<compile_context>
chip_gen: v7x
topology: tpu7x:2x2x1
jax: 0.10.0
libtpu: 0.0.40
codegen_flags: <defaults>
</compile_context>

<pallas_src>
import functools
import math

import jax
import jax.numpy as jnp
from jax.experimental import pallas as pl
from jax.experimental.pallas import tpu as pltpu


COMPUTE_DTYPE = jnp.bfloat16              # MXU-native operand dtype
MIN_PALLAS_N = 128                        # below this lane width, masked vst dominates -> XLA
MIN_PALLAS_M = 256                        # below this row count, launch overhead dominates -> XLA
WEIGHT_RESIDENT_BYTES = 8 * 1024 * 1024   # keep the whole (K,N) weight resident if it fits
ATTN_SCORE_BUDGET = 8 * 1024 * 1024       # live per-step f32 score/prob budget (q tiling)


def _vmem_limit_bytes():
    """Generation-aware scoped-VMEM budget: ~3/4 of physical, capped at 96 MiB.
    (v5e/v6e 128 MiB -> 96 MiB; v7x 64 MiB -> 48 MiB.)"""
    cap = 128 * 1024 * 1024
    try:
        info_cap = int(pltpu.get_tpu_info().vmem_capacity_bytes)
        if info_cap > 0:
            cap = info_cap
    except Exception:
        pass
    return min((cap * 3) // 4, 96 * 1024 * 1024)


VMEM_LIMIT_BYTES = _vmem_limit_bytes()


# ------------------------------ tiling helpers -------------------------------

def _round_up(x, m):
    return ((x + m - 1) // m) * m


def _snap_to_divisor(m, t):
    """Prefer an exact multiple-of-8 divisor of m in [t//2, t] (avoids padding)."""
    d = max(8, (t // 8) * 8)
    lo = max(8, t // 2)
    while d >= lo:
        if m % d == 0:
            return d
        d -= 8
    return t


def _row_tile(m, bytes_per_row, reserved_bytes=0, cap=2048):
    """Multiple-of-8 row tile sized so the double-buffered row slabs (plus any
    resident weight block) stay under ~60% of the scoped-VMEM budget."""
    budget = int(VMEM_LIMIT_BYTES * 0.6) - reserved_bytes
    t = max(8, budget // max(bytes_per_row, 1))
    t = min(cap, t, _round_up(m, 8))
    t = max(8, (t // 8) * 8)
    if m % t != 0:
        t = _snap_to_divisor(m, t)
    return t


def _col_tile(n, cap=512):
    """128-multiple divisor of n (only used when the weight cannot stay resident)."""
    if n % 128 != 0 or n <= cap:
        return n
    t = (cap // 128) * 128
    while t >= 128:
        if n % t == 0:
            return t
        t -= 128
    return n


# ------------------------------- Pallas kernels -------------------------------

def _gelu_tanh(y):
    # tanh approximation of GELU (EUP-friendly).
    return 0.5 * y * (1.0 + jnp.tanh(0.7978845608028654 * (y + 0.044715 * y * y * y)))


def _linear_kernel(x_ref, w_ref, b_ref, o_ref, *, act):
    # bf16 operands on the MXU, f32 accumulation + bias + activation.
    y = jnp.dot(x_ref[...], w_ref[...], preferred_element_type=jnp.float32)
    y = y + b_ref[...].astype(jnp.float32)
    if act == "gelu":
        y = _gelu_tanh(y)
    o_ref[...] = y.astype(o_ref.dtype)


def _layernorm_kernel(*refs, eps, act, has_residual):
    # Optionally fuses the residual add (x + residual) before the normalization.
    if has_residual:
        x_ref, r_ref, g_ref, b_ref, o_ref = refs
        x = x_ref[...].astype(jnp.float32) + r_ref[...].astype(jnp.float32)
    else:
        x_ref, g_ref, b_ref, o_ref = refs
        x = x_ref[...].astype(jnp.float32)
    mu = jnp.mean(x, axis=-1, keepdims=True)
    var = jnp.mean((x - mu) * (x - mu), axis=-1, keepdims=True)
    y = (x - mu) * jax.lax.rsqrt(var + eps) * g_ref[...] + b_ref[...]
    if act == "gelu":
        y = _gelu_tanh(y)
    o_ref[...] = y.astype(o_ref.dtype)


def _embed_ln_kernel(x_ref, pos_ref, tok_ref, g_ref, b_ref, o_ref, *, eps):
    # LN(inputs_embeds + position_emb + token_type(0) emb), all adds in f32,
    # fused into one pass over the activation slab.
    x = (x_ref[...].astype(jnp.float32)
         + pos_ref[...].astype(jnp.float32)
         + tok_ref[...].astype(jnp.float32))
    mu = jnp.mean(x, axis=-1, keepdims=True)
    var = jnp.mean((x - mu) * (x - mu), axis=-1, keepdims=True)
    y = (x - mu) * jax.lax.rsqrt(var + eps) * g_ref[...] + b_ref[...]
    o_ref[...] = y.astype(o_ref.dtype)


def _attn_block_kernel(q_ref, k_ref, v_ref, bias_ref, o_ref, *,
                       heads_per_block, head_dim):
    """One (batch, head-block, query-tile) grid step.

    Head blocks are 128-lane aligned (heads_per_block * head_dim % 128 == 0):
    q/k/v blocks are lane-dense DMAs straight out of the fused qkv slab, the
    output store is lane-dense, and only `heads_per_block` (TQ,S) f32
    score/prob intermediates are ever live.  Softmax scale is pre-folded into
    the q projection weights.
    """
    TQ, W = q_ref.shape[1], q_ref.shape[2]
    S = k_ref.shape[1]
    q = q_ref[...].reshape(TQ, W)
    k = k_ref[...].reshape(S, W)
    v = v_ref[...].reshape(S, W)
    bias = bias_ref[...].reshape(1, S)

    outs = []
    for h in range(heads_per_block):           # small static unroll (usually 2)
        lo, hi = h * head_dim, (h + 1) * head_dim
        s = jnp.einsum("qd,kd->qk", q[:, lo:hi], k[:, lo:hi],
                       preferred_element_type=jnp.float32) + bias
        m = jnp.max(s, axis=-1, keepdims=True)
        p = jnp.exp(s - m)
        denom = jnp.sum(p, axis=-1, keepdims=True)
        probs = (p * pl.reciprocal(denom, approx=True)).astype(v.dtype)
        outs.append(jnp.dot(probs, v[:, lo:hi], preferred_element_type=jnp.float32))

    out = outs[0] if heads_per_block == 1 else jnp.concatenate(outs, axis=-1)
    o_ref[...] = out.reshape(1, TQ, W).astype(o_ref.dtype)


def _attn_all_heads_kernel(qkv_ref, bias_ref, o_ref, *, num_heads):
    """Fallback for head dims that cannot form 128-lane blocks (tiny models)."""
    _, S, D3 = qkv_ref.shape
    D = D3 // 3
    Dh = D // num_heads
    qkv = qkv_ref[...].reshape(S, D3)
    bias = bias_ref[...].reshape(1, S)
    heads = []
    for h in range(num_heads):
        q = qkv[:, h * Dh:(h + 1) * Dh]
        k = qkv[:, D + h * Dh:D + (h + 1) * Dh]
        v = qkv[:, 2 * D + h * Dh:2 * D + (h + 1) * Dh]
        s = jnp.einsum("qd,kd->qk", q, k, preferred_element_type=jnp.float32) + bias
        m = jnp.max(s, axis=-1, keepdims=True)
        p = jnp.exp(s - m)
        denom = jnp.sum(p, axis=-1, keepdims=True)
        probs = (p * pl.reciprocal(denom, approx=True)).astype(v.dtype)
        heads.append(jnp.dot(probs, v, preferred_element_type=jnp.float32))
    out = jnp.concatenate(heads, axis=-1)
    o_ref[...] = out.reshape(1, S, D).astype(o_ref.dtype)


# ------------------------------- kernel wrappers ------------------------------

def _linear_xla(x2d, w, b, act):
    y = jnp.dot(x2d.astype(jnp.float32), w.astype(jnp.float32)) + b
    if act == "gelu":
        y = _gelu_tanh(y)
    return y


def pallas_linear(x2d, w, b, act=None, out_dtype=None):
    """x2d: (M, K) bf16, w: (K, N) bf16, b: (N,) f32 -> (M, N) out_dtype."""
    M, K = x2d.shape
    N = w.shape[1]
    out_dtype = out_dtype or x2d.dtype

    # Tiny lane widths / row counts: masked stores + launch overhead lose to XLA.
    if N < MIN_PALLAS_N or M < MIN_PALLAS_M:
        return _linear_xla(x2d, w, b, act).astype(out_dtype)

    x_b = jnp.dtype(x2d.dtype).itemsize
    w_b = jnp.dtype(w.dtype).itemsize
    o_b = jnp.dtype(out_dtype).itemsize

    w_bytes = K * N * w_b
    TN = N if w_bytes <= WEIGHT_RESIDENT_BYTES else _col_tile(N)
    TM = _row_tile(M, bytes_per_row=2 * (K * x_b + TN * o_b),
                   reserved_bytes=2 * K * TN * w_b)

    Mp = _round_up(M, TM)
    xp = x2d if Mp == M else jnp.pad(x2d, ((0, Mp - M), (0, 0)))

    kernel = functools.partial(_linear_kernel, act=act)
    b2d = b.reshape(1, N)

    if TN == N:
        # Weight/bias block indices are constant -> streamed from HBM once and
        # kept resident for the whole grid (no per-row-tile re-fetch).
        y = pl.pallas_call(
            kernel,
            out_shape=jax.ShapeDtypeStruct((Mp, N), out_dtype),
            grid=(Mp // TM,),
            in_specs=[pl.BlockSpec((TM, K), lambda i: (i, 0)),
                      pl.BlockSpec((K, N), lambda i: (0, 0)),
                      pl.BlockSpec((1, N), lambda i: (0, 0))],
            out_specs=pl.BlockSpec((TM, N), lambda i: (i, 0)),
            compiler_params=pltpu.CompilerParams(
                dimension_semantics=("parallel",),
                vmem_limit_bytes=VMEM_LIMIT_BYTES),
        )(xp, w, b2d)
    else:
        # Wide weight: column tiles on the OUTER grid axis so each weight block
        # is fetched exactly once while the rows sweep underneath it.
        y = pl.pallas_call(
            kernel,
            out_shape=jax.ShapeDtypeStruct((Mp, N), out_dtype),
            grid=(N // TN, Mp // TM),
            in_specs=[pl.BlockSpec((TM, K), lambda j, i: (i, 0)),
                      pl.BlockSpec((K, TN), lambda j, i: (0, j)),
                      pl.BlockSpec((1, TN), lambda j, i: (0, j))],
            out_specs=pl.BlockSpec((TM, TN), lambda j, i: (i, j)),
            compiler_params=pltpu.CompilerParams(
                dimension_semantics=("parallel", "parallel"),
                vmem_limit_bytes=VMEM_LIMIT_BYTES),
        )(xp, w, b2d)

    return y if Mp == M else y[:M]


def _ln_xla(x, gamma, beta, eps, act, residual):
    x = x.astype(jnp.float32)
    if residual is not None:
        x = x + residual.astype(jnp.float32)
    mu = jnp.mean(x, axis=-1, keepdims=True)
    var = jnp.mean((x - mu) * (x - mu), axis=-1, keepdims=True)
    y = (x - mu) * jax.lax.rsqrt(var + eps) * gamma + beta
    if act == "gelu":
        y = _gelu_tanh(y)
    return y


def pallas_layernorm(x2d, gamma, beta, eps, act=None, residual=None, out_dtype=None):
    """LayerNorm over the last dim, optionally fused with a residual add."""
    M, D = x2d.shape
    out_dtype = out_dtype or x2d.dtype
    if D < MIN_PALLAS_N or M < MIN_PALLAS_M:
        return _ln_xla(x2d, gamma, beta, eps, act, residual).astype(out_dtype)

    has_res = residual is not None
    TM = _row_tile(M, bytes_per_row=2 * D * 4 * (3 + int(has_res)))
    Mp = _round_up(M, TM)
    xp = x2d if Mp == M else jnp.pad(x2d, ((0, Mp - M), (0, 0)))

    kernel = functools.partial(_layernorm_kernel, eps=eps, act=act,
                               has_residual=has_res)
    in_specs = [pl.BlockSpec((TM, D), lambda i: (i, 0))]
    args = [xp]
    if has_res:
        rp = residual if Mp == M else jnp.pad(residual, ((0, Mp - M), (0, 0)))
        in_specs.append(pl.BlockSpec((TM, D), lambda i: (i, 0)))
        args.append(rp)
    in_specs += [pl.BlockSpec((1, D), lambda i: (0, 0)),
                 pl.BlockSpec((1, D), lambda i: (0, 0))]
    args += [gamma.reshape(1, D), beta.reshape(1, D)]

    y = pl.pallas_call(
        kernel,
        out_shape=jax.ShapeDtypeStruct((Mp, D), out_dtype),
        grid=(Mp // TM,),
        in_specs=in_specs,
        out_specs=pl.BlockSpec((TM, D), lambda i: (i, 0)),
        compiler_params=pltpu.CompilerParams(
            dimension_semantics=("parallel",),
            vmem_limit_bytes=VMEM_LIMIT_BYTES),
    )(*args)
    return y if Mp == M else y[:M]


def pallas_embed_layernorm(proj_bsd, pos_emb, tok_emb0, gamma, beta, eps, out_dtype):
    """LN(projection + pos_emb[:S] + tok_emb[0]) fused into one slab pass."""
    B, S, D = proj_bsd.shape
    if D < MIN_PALLAS_N or B * S < MIN_PALLAS_M:
        x = (proj_bsd.astype(jnp.float32)
             + pos_emb[:S][None, :, :].astype(jnp.float32)
             + tok_emb0[None, None, :].astype(jnp.float32))
        y = _ln_xla(x.reshape(B * S, D), gamma, beta, eps, None, None)
        return y.astype(out_dtype).reshape(B, S, D)

    TS = _row_tile(S, bytes_per_row=2 * D * 4 * 3, cap=1024)
    if S % TS != 0:
        TS = S
    kernel = functools.partial(_embed_ln_kernel, eps=eps)
    return pl.pallas_call(
        kernel,
        out_shape=jax.ShapeDtypeStruct((B, S, D), out_dtype),
        grid=(B, S // TS),
        in_specs=[
            pl.BlockSpec((1, TS, D), lambda b, s: (b, s, 0)),
            pl.BlockSpec((TS, D), lambda b, s: (s, 0)),
            pl.BlockSpec((1, D), lambda b, s: (0, 0)),
            pl.BlockSpec((1, D), lambda b, s: (0, 0)),
            pl.BlockSpec((1, D), lambda b, s: (0, 0)),
        ],
        out_specs=pl.BlockSpec((1, TS, D), lambda b, s: (b, s, 0)),
        compiler_params=pltpu.CompilerParams(
            dimension_semantics=("parallel", "parallel"),
            vmem_limit_bytes=VMEM_LIMIT_BYTES),
    )(proj_bsd, pos_emb[:S], tok_emb0.reshape(1, D),
      gamma.reshape(1, D), beta.reshape(1, D))


def _heads_per_block(num_heads, head_dim):
    """Smallest head-block size whose lane width is a multiple of 128."""
    for hb in range(1, num_heads + 1):
        if num_heads % hb == 0 and (hb * head_dim) % 128 == 0:
            return hb
    return None


def _q_tile(s, heads_per_block):
    """Query tile keeping the live per-step (hb, TQ, S) f32 score/prob working
    set bounded (matters on v7x's 64 MiB VMEM at long sequence lengths)."""
    if s % 8 != 0:
        return s
    max_rows = max(8, ATTN_SCORE_BUDGET // (heads_per_block * s * 4 * 2))
    if s <= max_rows:
        return s
    t = (min(max_rows, s) // 8) * 8
    while t >= 8 and s % t != 0:
        t -= 8
    return t if t >= 8 else s


def pallas_attention(qkv, bias, num_heads, out_dtype):
    """qkv: (B, S, 3D) bf16 fused projections (scale pre-folded into q),
    bias: (B, 1, S) f32 additive key mask -> (B, S, D)."""
    B, S, D3 = qkv.shape
    D = D3 // 3
    Dh = D // num_heads
    hb = _heads_per_block(num_heads, Dh)

    if hb is None:
        # Tiny head dims (demo-scale models): all heads of one batch per step.
        kernel = functools.partial(_attn_all_heads_kernel, num_heads=num_heads)
        return pl.pallas_call(
            kernel,
            out_shape=jax.ShapeDtypeStruct((B, S, D), out_dtype),
            grid=(B,),
            in_specs=[pl.BlockSpec((1, S, D3), lambda b: (b, 0, 0)),
                      pl.BlockSpec((1, 1, S), lambda b: (b, 0, 0))],
            out_specs=pl.BlockSpec((1, S, D), lambda b: (b, 0, 0)),
            compiler_params=pltpu.CompilerParams(
                dimension_semantics=("parallel",),
                vmem_limit_bytes=VMEM_LIMIT_BYTES),
        )(qkv, bias)

    W = hb * Dh                  # 128-lane-aligned head-block width
    nblk = D // W
    TQ = _q_tile(S, hb)
    kernel = functools.partial(_attn_block_kernel, heads_per_block=hb, head_dim=Dh)
    # q/k/v blocks are read straight out of the fused qkv slab via three specs
    # over the same array; k/v stay resident across the inner query sweep.
    return pl.pallas_call(
        kernel,
        out_shape=jax.ShapeDtypeStruct((B, S, D), out_dtype),
        grid=(B, nblk, S // TQ),
        in_specs=[
            pl.BlockSpec((1, TQ, W), lambda b, h, s: (b, s, h)),
            pl.BlockSpec((1, S, W), lambda b, h, s: (b, 0, nblk + h)),
            pl.BlockSpec((1, S, W), lambda b, h, s: (b, 0, 2 * nblk + h)),
            pl.BlockSpec((1, 1, S), lambda b, h, s: (b, 0, 0)),
        ],
        out_specs=pl.BlockSpec((1, TQ, W), lambda b, h, s: (b, s, h)),
        compiler_params=pltpu.CompilerParams(
            dimension_semantics=("parallel", "parallel", "arbitrary"),
            vmem_limit_bytes=VMEM_LIMIT_BYTES),
    )(qkv, qkv, qkv, bias)


# ------------------------------- parameter init -------------------------------

def init_params(key, feature_dim, bert_input, num_layers, num_heads,
                intermediate, hidden_dim, num_classes, max_pos):
    keys = iter(jax.random.split(key, 8 * num_layers + 32))

    def wbf16(shape):
        # matmul weights stored bf16 (MXU-native, half the HBM/DMA bytes)
        return (jax.random.normal(next(keys), shape, jnp.float32) * 0.02
                ).astype(COMPUTE_DTYPE)

    def wf32(shape):
        return jax.random.normal(next(keys), shape, jnp.float32) * 0.02

    def zeros(shape):
        return jnp.zeros(shape, jnp.float32)

    def ones(shape):
        return jnp.ones(shape, jnp.float32)

    D, I, HID = bert_input, intermediate, hidden_dim
    MID = (D + HID) // 2
    Dh = D // num_heads
    scale = 1.0 / math.sqrt(Dh)

    params = {
        "proj_w": wbf16((feature_dim, D)), "proj_b": zeros((D,)),
        "pos_emb": wf32((max_pos, D)), "tok_emb": wf32((2, D)),
        "emb_ln_g": ones((D,)), "emb_ln_b": zeros((D,)),
        "layers": [],
        "c1_w": wbf16((D, MID)), "c1_b": zeros((MID,)),
        "c2_w": wbf16((MID, HID)), "c2_b": zeros((HID,)),
        "cln1_g": ones((HID,)), "cln1_b": zeros((HID,)),
        "c3_w": wbf16((HID, HID // 2)), "c3_b": zeros((HID // 2,)),
        "cln2_g": ones((HID // 2,)), "cln2_b": zeros((HID // 2,)),
        "c4_w": wbf16((HID // 2, num_classes)), "c4_b": zeros((num_classes,)),
    }
    for _ in range(num_layers):
        qkv_w = jax.random.normal(next(keys), (D, 3 * D), jnp.float32) * 0.02
        qkv_b = zeros((3 * D,))
        # Fold the 1/sqrt(Dh) softmax scale into the q projection (exact;
        # removes the in-kernel multiply and its bf16 re-quantization).
        qkv_w = qkv_w.at[:, :D].multiply(scale)
        qkv_b = qkv_b.at[:D].multiply(scale)
        params["layers"].append({
            "qkv_w": qkv_w.astype(COMPUTE_DTYPE), "qkv_b": qkv_b,   # fused [q|k|v]
            "o_w": wbf16((D, D)), "o_b": zeros((D,)),
            "ln1_g": ones((D,)), "ln1_b": zeros((D,)),
            "i_w": wbf16((D, I)), "i_b": zeros((I,)),
            "out_w": wbf16((I, D)), "out_b": zeros((D,)),
            "ln2_g": ones((D,)), "ln2_b": zeros((D,)),
        })
    return params


# ---------------------------------- forward -----------------------------------

def bookbert_forward(params, features, attention_mask, num_heads):
    B, S, F = features.shape
    D = params["proj_w"].shape[1]
    M = B * S
    cdt = COMPUTE_DTYPE

    # input projection (bf16 MXU path)
    x2d = features.reshape(M, F).astype(cdt)
    proj = pallas_linear(x2d, params["proj_w"], params["proj_b"], out_dtype=cdt)

    # BERT embeddings: inputs_embeds + pos emb + token-type(0) emb, fused with LN
    h = pallas_embed_layernorm(proj.reshape(B, S, D), params["pos_emb"],
                               params["tok_emb"][0], params["emb_ln_g"],
                               params["emb_ln_b"], eps=1e-12, out_dtype=cdt)
    h = h.reshape(M, D)

    # extended attention mask kept at (B, 1, S) — no per-head replication.
    # (all-masked rows give a uniform softmax, standard BERT behaviour)
    bias = ((1.0 - attention_mask.astype(jnp.float32)) * -1e9).reshape(B, 1, S)

    for layer in params["layers"]:
        # fused QKV projection: read h once, one matmul
        qkv = pallas_linear(h, layer["qkv_w"], layer["qkv_b"], out_dtype=cdt)
        ctx = pallas_attention(qkv.reshape(B, S, 3 * D), bias, num_heads,
                               out_dtype=cdt)
        attn_out = pallas_linear(ctx.reshape(M, D), layer["o_w"], layer["o_b"],
                                 out_dtype=cdt)
        # residual add fused into the LayerNorm kernel
        h = pallas_layernorm(attn_out, layer["ln1_g"], layer["ln1_b"], eps=1e-12,
                             residual=h, out_dtype=cdt)
        inter = pallas_linear(h, layer["i_w"], layer["i_b"], act="gelu",
                              out_dtype=cdt)
        ffn_out = pallas_linear(inter, layer["out_w"], layer["out_b"],
                                out_dtype=cdt)
        h = pallas_layernorm(ffn_out, layer["ln2_g"], layer["ln2_b"], eps=1e-12,
                             residual=h, out_dtype=cdt)

    # classifier head (dropout = identity in eval; sub-128-lane widths -> XLA)
    c = pallas_linear(h, params["c1_w"], params["c1_b"], out_dtype=cdt)
    c = pallas_linear(c, params["c2_w"], params["c2_b"], out_dtype=cdt)
    c = pallas_layernorm(c, params["cln1_g"], params["cln1_b"], eps=1e-5,
                         act="gelu", out_dtype=cdt)
    c = pallas_linear(c, params["c3_w"], params["c3_b"], out_dtype=cdt)
    c = pallas_layernorm(c, params["cln2_g"], params["cln2_b"], eps=1e-5,
                         act="gelu", out_dtype=cdt)
    logits = pallas_linear(c, params["c4_w"], params["c4_b"],
                           out_dtype=jnp.float32)

    return logits.reshape(B, S, -1)


# ------------------------------------ main -------------------------------------

if __name__ == "__main__":
    # Small configuration that still sits on the (8,128) hardware granularity so
    # the Pallas paths (linear, embed-LN, LN, head-block attention) are exercised.
    FEATURE_DIM = 128    # feature_dim
    BERT_INPUT = 128     # bert_input (hidden size)
    NUM_LAYERS = 2       # num_hidden_layers
    NUM_HEADS = 2        # num_attention_heads (head_dim 64 -> 128-lane head blocks)
    INTERMEDIATE = 4 * BERT_INPUT
    HIDDEN_DIM = 16      # classifier hidden_dim
    NUM_CLASSES = 4
    MAX_POS = 512
    B, S = 2, 128

    key = jax.random.PRNGKey(0)
    k_param, k_feat = jax.random.split(key)

    params = init_params(k_param, FEATURE_DIM, BERT_INPUT, NUM_LAYERS, NUM_HEADS,
                         INTERMEDIATE, HIDDEN_DIM, NUM_CLASSES, MAX_POS)

    features = jax.random.normal(k_feat, (B, S, FEATURE_DIM), jnp.float32)
    attention_mask = jnp.ones((B, S), jnp.float32).at[1, 96:].set(0.0)  # pad tail tokens

    fwd = jax.jit(functools.partial(bookbert_forward, num_heads=NUM_HEADS))
    logits = fwd(params, features, attention_mask)
    jax.block_until_ready(logits)

    assert logits.shape == (B, S, NUM_CLASSES)
    assert bool(jnp.all(jnp.isfinite(logits)))
    print("KERNEL_OK")
</pallas_src>

<mosaic_0001>
module attributes {stable_mosaic.version = 11 : i64} {
  func.func @_linear_kernel(%arg0: i32, %arg1: memref<256x128xbf16, #tpu.memory_space<vmem>>, %arg2: memref<128x128xbf16, #tpu.memory_space<vmem>>, %arg3: memref<1x128xf32, #tpu.memory_space<vmem>>, %arg4: memref<256x128xbf16, #tpu.memory_space<vmem>>) attributes {dimension_semantics = [#tpu.dimension_semantics<parallel>], iteration_bounds = array<i64: 1>, scalar_prefetch = 0 : i64, scratch_operands = 0 : i64, tpu.core_type = #tpu.core_type<tc>, window_params = [{transform_indices = @transform_0, window_bounds = array<i64: 256, 128>}, {pipeline_mode = #tpu.pipeline_mode<synchronous>, transform_indices = @transform_1, window_bounds = array<i64: 128, 128>}, {pipeline_mode = #tpu.pipeline_mode<synchronous>, transform_indices = @transform_2, window_bounds = array<i64: 1, 128>}, {transform_indices = @transform_3, window_bounds = array<i64: 256, 128>}]} {
    %c0 = arith.constant 0 : index
    %c0_0 = arith.constant 0 : index
    %0 = vector.load %arg1[%c0, %c0_0] : memref<256x128xbf16, #tpu.memory_space<vmem>>, vector<256x128xbf16>
    %c0_1 = arith.constant 0 : index
    %c0_2 = arith.constant 0 : index
    %1 = vector.load %arg2[%c0_1, %c0_2] : memref<128x128xbf16, #tpu.memory_space<vmem>>, vector<128x128xbf16>
    %cst = arith.constant dense<0.000000e+00> : vector<256x128xf32>
    %2 = tpu.matmul %0, %1, %cst {dimension_numbers = #tpu.dot_dimension_numbers<[1], [0], [0], [1], [0, 0, 1, 1], [], []>} : vector<256x128xbf16>, vector<128x128xbf16>, vector<256x128xf32> -> vector<256x128xf32>
    %c0_3 = arith.constant 0 : index
    %c0_4 = arith.constant 0 : index
    %3 = vector.load %arg3[%c0_3, %c0_4] : memref<1x128xf32, #tpu.memory_space<vmem>>, vector<1x128xf32>
    %4 = vector.broadcast %3 : vector<1x128xf32> to vector<256x128xf32>
    %5 = arith.addf %2, %4 : vector<256x128xf32>
    %6 = arith.truncf %5 : vector<256x128xf32> to vector<256x128xbf16>
    %c0_5 = arith.constant 0 : index
    %c0_6 = arith.constant 0 : index
    %7 = vector.load %arg4[%c0_5, %c0_6] : memref<256x128xbf16, #tpu.memory_space<vmem>>, vector<256x128xbf16>
    tpu.vector_store %arg4[%c0_5, %c0_6], %6 {strides = array<i32>} : memref<256x128xbf16, #tpu.memory_space<vmem>>, vector<256x128xbf16>,
    return
  }
  func.func @transform_0(%arg0: i32) -> (i32, i32) {
    %c0_i32 = arith.constant 0 : i32
    %c0_i32_0 = arith.constant 0 : i32
    return %arg0, %c0_i32 : i32, i32
  }
  func.func @transform_1(%arg0: i32) -> (i32, i32) {
    %c0_i32 = arith.constant 0 : i32
    %c0_i32_0 = arith.constant 0 : i32
    %c0_i32_1 = arith.constant 0 : i32
    return %c0_i32, %c0_i32_0 : i32, i32
  }
  func.func @transform_2(%arg0: i32) -> (i32, i32) {
    %c0_i32 = arith.constant 0 : i32
    %c0_i32_0 = arith.constant 0 : i32
    %c0_i32_1 = arith.constant 0 : i32
    return %c0_i32, %c0_i32_0 : i32, i32
  }
  func.func @transform_3(%arg0: i32) -> (i32, i32) {
    %c0_i32 = arith.constant 0 : i32
    %c0_i32_0 = arith.constant 0 : i32
    return %arg0, %c0_i32 : i32, i32
  }
}

module attributes {stable_mosaic.version = 11 : i64} {
  func.func @_linear_kernel(%arg0: i32, %arg1: memref<256x128xbf16, #tpu.memory_space<vmem>>, %arg2: memref<128x384xbf16, #tpu.memory_space<vmem>>, %arg3: memref<1x384xf32, #tpu.memory_space<vmem>>, %arg4: memref<256x384xbf16, #tpu.memory_space<vmem>>) attributes {dimension_semantics = [#tpu.dimension_semantics<parallel>], iteration_bounds = array<i64: 1>, scalar_prefetch = 0 : i64, scratch_operands = 0 : i64, tpu.core_type = #tpu.core_type<tc>, window_params = [{transform_indices = @transform_0, window_bounds = array<i64: 256, 128>}, {pipeline_mode = #tpu.pipeline_mode<synchronous>, transform_indices = @transform_1, window_bounds = array<i64: 128, 384>}, {pipeline_mode = #tpu.pipeline_mode<synchronous>, transform_indices = @transform_2, window_bounds = array<i64: 1, 384>}, {transform_indices = @transform_3, window_bounds = array<i64: 256, 384>}]} {
    %c0 = arith.constant 0 : index
    %c0_0 = arith.constant 0 : index
    %0 = vector.load %arg1[%c0, %c0_0] : memref<256x128xbf16, #tpu.memory_space<vmem>>, vector<256x128xbf16>
    %c0_1 = arith.constant 0 : index
    %c0_2 = arith.constant 0 : index
    %1 = vector.load %arg2[%c0_1, %c0_2] : memref<128x384xbf16, #tpu.memory_space<vmem>>, vector<128x384xbf16>
    %cst = arith.constant dense<0.000000e+00> : vector<256x384xf32>
    %2 = tpu.matmul %0, %1, %cst {dimension_numbers = #tpu.dot_dimension_numbers<[1], [0], [0], [1], [0, 0, 1, 1], [], []>} : vector<256x128xbf16>, vector<128x384xbf16>, vector<256x384xf32> -> vector<256x384xf32>
    %c0_3 = arith.constant 0 : index
    %c0_4 = arith.constant 0 : index
    %3 = vector.load %arg3[%c0_3, %c0_4] : memref<1x384xf32, #tpu.memory_space<vmem>>, vector<1x384xf32>
    %4 = vector.broadcast %3 : vector<1x384xf32> to vector<256x384xf32>
    %5 = arith.addf %2, %4 : vector<256x384xf32>
    %6 = arith.truncf %5 : vector<256x384xf32> to vector<256x384xbf16>
    %c0_5 = arith.constant 0 : index
    %c0_6 = arith.constant 0 : index
    %7 = vector.load %arg4[%c0_5, %c0_6] : memref<256x384xbf16, #tpu.memory_space<vmem>>, vector<256x384xbf16>
    tpu.vector_store %arg4[%c0_5, %c0_6], %6 {strides = array<i32>} : memref<256x384xbf16, #tpu.memory_space<vmem>>, vector<256x384xbf16>,
    return
  }
  func.func @transform_0(%arg0: i32) -> (i32, i32) {
    %c0_i32 = arith.constant 0 : i32
    %c0_i32_0 = arith.constant 0 : i32
    return %arg0, %c0_i32 : i32, i32
  }
  func.func @transform_1(%arg0: i32) -> (i32, i32) {
    %c0_i32 = arith.constant 0 : i32
    %c0_i32_0 = arith.constant 0 : i32
    %c0_i32_1 = arith.constant 0 : i32
    return %c0_i32, %c0_i32_0 : i32, i32
  }
  func.func @transform_2(%arg0: i32) -> (i32, i32) {
    %c0_i32 = arith.constant 0 : i32
    %c0_i32_0 = arith.constant 0 : i32
    %c0_i32_1 = arith.constant 0 : i32
    return %c0_i32, %c0_i32_0 : i32, i32
  }
  func.func @transform_3(%arg0: i32) -> (i32, i32) {
    %c0_i32 = arith.constant 0 : i32
    %c0_i32_0 = arith.constant 0 : i32
    return %arg0, %c0_i32 : i32, i32
  }
}

module attributes {stable_mosaic.version = 11 : i64} {
  func.func @_attn_block_kernel(%arg0: i32, %arg1: i32, %arg2: i32, %arg3: memref<1x128x128xbf16, #tpu.memory_space<vmem>>, %arg4: memref<1x128x128xbf16, #tpu.memory_space<vmem>>, %arg5: memref<1x128x128xbf16, #tpu.memory_space<vmem>>, %arg6: memref<1x1x128xf32, #tpu.memory_space<vmem>>, %arg7: memref<1x128x128xbf16, #tpu.memory_space<vmem>>) attributes {dimension_semantics = [#tpu.dimension_semantics<parallel>, #tpu.dimension_semantics<parallel>, #tpu.dimension_semantics<arbitrary>], iteration_bounds = array<i64: 2, 1, 1>, scalar_prefetch = 0 : i64, scratch_operands = 0 : i64, tpu.core_type = #tpu.core_type<tc>, window_params = [{transform_indices = @transform_0, window_bounds = array<i64: 1, 128, 128>}, {transform_indices = @transform_1, window_bounds = array<i64: 1, 128, 128>}, {transform_indices = @transform_2, window_bounds = array<i64: 1, 128, 128>}, {transform_indices = @transform_3, window_bounds = array<i64: 1, 1, 128>}, {transform_indices = @transform_4, window_bounds = array<i64: 1, 128, 128>}]} {
    %c0 = arith.constant 0 : index
    %c0_0 = arith.constant 0 : index
    %c0_1 = arith.constant 0 : index
    %0 = vector.load %arg3[%c0, %c0_0, %c0_1] : memref<1x128x128xbf16, #tpu.memory_space<vmem>>, vector<1x128x128xbf16>
    %1 = vector.shape_cast %0 : vector<1x128x128xbf16> to vector<128x128xbf16>
    %c0_2 = arith.constant 0 : index
    %c0_3 = arith.constant 0 : index
    %c0_4 = arith.constant 0 : index
    %2 = vector.load %arg4[%c0_2, %c0_3, %c0_4] : memref<1x128x128xbf16, #tpu.memory_space<vmem>>, vector<1x128x128xbf16>
    %3 = vector.shape_cast %2 : vector<1x128x128xbf16> to vector<128x128xbf16>
    %c0_5 = arith.constant 0 : index
    %c0_6 = arith.constant 0 : index
    %c0_7 = arith.constant 0 : index
    %4 = vector.load %arg5[%c0_5, %c0_6, %c0_7] : memref<1x128x128xbf16, #tpu.memory_space<vmem>>, vector<1x128x128xbf16>
    %5 = vector.shape_cast %4 : vector<1x128x128xbf16> to vector<128x128xbf16>
    %c0_8 = arith.constant 0 : index
    %c0_9 = arith.constant 0 : index
    %c0_10 = arith.constant 0 : index
    %6 = vector.load %arg6[%c0_8, %c0_9, %c0_10] : memref<1x1x128xf32, #tpu.memory_space<vmem>>, vector<1x1x128xf32>
    %7 = vector.shape_cast %6 : vector<1x1x128xf32> to vector<1x128xf32>
    %8 = vector.extract_strided_slice %1 {offsets = [0, 0], sizes = [128, 64], strides = [1, 1]} : vector<128x128xbf16> to vector<128x64xbf16>
    %9 = vector.extract_strided_slice %3 {offsets = [0, 0], sizes = [128, 64], strides = [1, 1]} : vector<128x128xbf16> to vector<128x64xbf16>
    "tpu.trace_start"() <{level = 10 : i32, message = "qd,kd->qk"}> : () -> ()
    %cst = arith.constant dense<0.000000e+00> : vector<128x128xf32>
    %10 = tpu.matmul %8, %9, %cst {dimension_numbers = #tpu.dot_dimension_numbers<[1], [1], [0], [0], [0, 0, 1, 0], [], []>} : vector<128x64xbf16>, vector<128x64xbf16>, vector<128x128xf32> -> vector<128x128xf32>
    "tpu.trace_stop"() : () -> ()
    %11 = vector.broadcast %7 : vector<1x128xf32> to vector<128x128xf32>
    %12 = arith.addf %10, %11 : vector<128x128xf32>
    %cst_11 = arith.constant dense<0xFF800000> : vector<128xf32>
    %13 = vector.multi_reduction <maximumf>, %12, %cst_11 [1] : vector<128x128xf32> to vector<128xf32>
    %14 = vector.shape_cast %13 : vector<128xf32> to vector<128x1xf32>
    %15 = vector.broadcast %14 : vector<128x1xf32> to vector<128x128xf32>
    %16 = arith.subf %12, %15 : vector<128x128xf32>
    %17 = math.exp %16 : vector<128x128xf32>
    %cst_12 = arith.constant dense<0.000000e+00> : vector<128xf32>
    %18 = vector.multi_reduction <add>, %17, %cst_12 [1] : vector<128x128xf32> to vector<128xf32>
    %19 = vector.shape_cast %18 : vector<128xf32> to vector<128x1xf32>
    %20 = tpu.reciprocal %19 {approx = true} : vector<128x1xf32> -> vector<128x1xf32>
    %21 = vector.broadcast %20 : vector<128x1xf32> to vector<128x128xf32>
    %22 = arith.mulf %17, %21 : vector<128x128xf32>
    %23 = arith.truncf %22 : vector<128x128xf32> to vector<128x128xbf16>
    %24 = vector.extract_strided_slice %5 {offsets = [0, 0], sizes = [128, 64], strides = [1, 1]} : vector<128x128xbf16> to vector<128x64xbf16>
    %cst_13 = arith.constant dense<0.000000e+00> : vector<128x64xf32>
    %25 = tpu.matmul %23, %24, %cst_13 {dimension_numbers = #tpu.dot_dimension_numbers<[1], [0], [0], [1], [0, 0, 1, 1], [], []>} : vector<128x128xbf16>, vector<128x64xbf16>, vector<128x64xf32> -> vector<128x64xf32>
    %26 = vector.extract_strided_slice %1 {offsets = [0, 64], sizes = [128, 64], strides = [1, 1]} : vector<128x128xbf16> to vector<128x64xbf16>
    %27 = vector.extract_strided_slice %3 {offsets = [0, 64], sizes = [128, 64], strides = [1, 1]} : vector<128x128xbf16> to vector<128x64xbf16>
    "tpu.trace_start"() <{level = 10 : i32, message = "qd,kd->qk"}> : () -> ()
    %cst_14 = arith.constant dense<0.000000e+00> : vector<128x128xf32>
    %28 = tpu.matmul %26, %27, %cst_14 {dimension_numbers = #tpu.dot_dimension_numbers<[1], [1], [0], [0], [0, 0, 1, 0], [], []>} : vector<128x64xbf16>, vector<128x64xbf16>, vector<128x128xf32> -> vector<128x128xf32>
    "tpu.trace_stop"() : () -> ()
    %29 = vector.broadcast %7 : vector<1x128xf32> to vector<128x128xf32>
    %30 = arith.addf %28, %29 : vector<128x128xf32>
    %cst_15 = arith.constant dense<0xFF800000> : vector<128xf32>
    %31 = vector.multi_reduction <maximumf>, %30, %cst_15 [1] : vector<128x128xf32> to vector<128xf32>
    %32 = vector.shape_cast %31 : vector<128xf32> to vector<128x1xf32>
    %33 = vector.broadcast %32 : vector<128x1xf32> to vector<128x128xf32>
    %34 = arith.subf %30, %33 : vector<128x128xf32>
    %35 = math.exp %34 : vector<128x128xf32>
    %cst_16 = arith.constant dense<0.000000e+00> : vector<128xf32>
    %36 = vector.multi_reduction <add>, %35, %cst_16 [1] : vector<128x128xf32> to vector<128xf32>
    %37 = vector.shape_cast %36 : vector<128xf32> to vector<128x1xf32>
    %38 = tpu.reciprocal %37 {approx = true} : vector<128x1xf32> -> vector<128x1xf32>
    %39 = vector.broadcast %38 : vector<128x1xf32> to vector<128x128xf32>
    %40 = arith.mulf %35, %39 : vector<128x128xf32>
    %41 = arith.truncf %40 : vector<128x128xf32> to vector<128x128xbf16>
    %42 = vector.extract_strided_slice %5 {offsets = [0, 64], sizes = [128, 64], strides = [1, 1]} : vector<128x128xbf16> to vector<128x64xbf16>
    %cst_17 = arith.constant dense<0.000000e+00> : vector<128x64xf32>
    %43 = tpu.matmul %41, %42, %cst_17 {dimension_numbers = #tpu.dot_dimension_numbers<[1], [0], [0], [1], [0, 0, 1, 1], [], []>} : vector<128x128xbf16>, vector<128x64xbf16>, vector<128x64xf32> -> vector<128x64xf32>
    %44 = tpu.concatenate %25, %43 in 1 : vector<128x64xf32>, vector<128x64xf32> -> vector<128x128xf32>
    %45 = vector.shape_cast %44 : vector<128x128xf32> to vector<1x128x128xf32>
    %46 = arith.truncf %45 : vector<1x128x128xf32> to vector<1x128x128xbf16>
    %c0_18 = arith.constant 0 : index
    %c0_19 = arith.constant 0 : index
    %c0_20 = arith.constant 0 : index
    %47 = vector.load %arg7[%c0_18, %c0_19, %c0_20] : memref<1x128x128xbf16, #tpu.memory_space<vmem>>, vector<1x128x128xbf16>
    tpu.vector_store %arg7[%c0_18, %c0_19, %c0_20], %46 {strides = array<i32>} : memref<1x128x128xbf16, #tpu.memory_space<vmem>>, vector<1x128x128xbf16>,
    return
  }
  func.func @transform_0(%arg0: i32, %arg1: i32, %arg2: i32) -> (i32, i32, i32) {
    %c0_i32 = arith.constant 0 : i32
    return %arg0, %arg2, %arg1 : i32, i32, i32
  }
  func.func @transform_1(%arg0: i32, %arg1: i32, %arg2: i32) -> (i32, i32, i32) {
    %c1_i32 = arith.constant 1 : i32
    %0 = arith.addi %c1_i32, %arg1 : i32
    %c0_i32 = arith.constant 0 : i32
    %c0_i32_0 = arith.constant 0 : i32
    return %arg0, %c0_i32, %0 : i32, i32, i32
  }
  func.func @transform_2(%arg0: i32, %arg1: i32, %arg2: i32) -> (i32, i32, i32) {
    %c2_i32 = arith.constant 2 : i32
    %0 = arith.addi %c2_i32, %arg1 : i32
    %c0_i32 = arith.constant 0 : i32
    %c0_i32_0 = arith.constant 0 : i32
    return %arg0, %c0_i32, %0 : i32, i32, i32
  }
  func.func @transform_3(%arg0: i32, %arg1: i32, %arg2: i32) -> (i32, i32, i32) {
    %c0_i32 = arith.constant 0 : i32
    %c0_i32_0 = arith.constant 0 : i32
    %c0_i32_1 = arith.constant 0 : i32
    return %arg0, %c0_i32, %c0_i32_0 : i32, i32, i32
  }
  func.func @transform_4(%arg0: i32, %arg1: i32, %arg2: i32) -> (i32, i32, i32) {
    %c0_i32 = arith.constant 0 : i32
    return %arg0, %arg2, %arg1 : i32, i32, i32
  }
}

module attributes {stable_mosaic.version = 11 : i64} {
  func.func @_embed_ln_kernel(%arg0: i32, %arg1: i32, %arg2: memref<1x128x128xbf16, #tpu.memory_space<vmem>>, %arg3: memref<128x128xf32, #tpu.memory_space<vmem>>, %arg4: memref<1x128xf32, #tpu.memory_space<vmem>>, %arg5: memref<1x128xf32, #tpu.memory_space<vmem>>, %arg6: memref<1x128xf32, #tpu.memory_space<vmem>>, %arg7: memref<1x128x128xbf16, #tpu.memory_space<vmem>>) attributes {dimension_semantics = [#tpu.dimension_semantics<parallel>, #tpu.dimension_semantics<parallel>], iteration_bounds = array<i64: 2, 1>, scalar_prefetch = 0 : i64, scratch_operands = 0 : i64, tpu.core_type = #tpu.core_type<tc>, window_params = [{transform_indices = @transform_0, window_bounds = array<i64: 1, 128, 128>}, {transform_indices = @transform_1, window_bounds = array<i64: 128, 128>}, {pipeline_mode = #tpu.pipeline_mode<synchronous>, transform_indices = @transform_2, window_bounds = array<i64: 1, 128>}, {pipeline_mode = #tpu.pipeline_mode<synchronous>, transform_indices = @transform_3, window_bounds = array<i64: 1, 128>}, {pipeline_mode = #tpu.pipeline_mode<synchronous>, transform_indices = @transform_4, window_bounds = array<i64: 1, 128>}, {transform_indices = @transform_5, window_bounds = array<i64: 1, 128, 128>}]} {
    %c0 = arith.constant 0 : index
    %c0_0 = arith.constant 0 : index
    %c0_1 = arith.constant 0 : index
    %0 = vector.load %arg2[%c0, %c0_0, %c0_1] : memref<1x128x128xbf16, #tpu.memory_space<vmem>>, vector<1x128x128xbf16>
    %1 = arith.extf %0 : vector<1x128x128xbf16> to vector<1x128x128xf32>
    %c0_2 = arith.constant 0 : index
    %c0_3 = arith.constant 0 : index
    %2 = vector.load %arg3[%c0_2, %c0_3] : memref<128x128xf32, #tpu.memory_space<vmem>>, vector<128x128xf32>
    %3 = vector.shape_cast %2 : vector<128x128xf32> to vector<1x128x128xf32>
    %4 = arith.addf %1, %3 : vector<1x128x128xf32>
    %c0_4 = arith.constant 0 : index
    %c0_5 = arith.constant 0 : index
    %5 = vector.load %arg4[%c0_4, %c0_5] : memref<1x128xf32, #tpu.memory_space<vmem>>, vector<1x128xf32>
    %6 = vector.shape_cast %5 : vector<1x128xf32> to vector<1x1x128xf32>
    %7 = vector.broadcast %6 : vector<1x1x128xf32> to vector<1x128x128xf32>
    %8 = arith.addf %4, %7 : vector<1x128x128xf32>
    %cst = arith.constant dense<0.000000e+00> : vector<1x128xf32>
    %9 = vector.multi_reduction <add>, %8, %cst [2] : vector<1x128x128xf32> to vector<1x128xf32>
    %10 = vector.shape_cast %9 : vector<1x128xf32> to vector<1x128x1xf32>
    %cst_6 = arith.constant 1.280000e+02 : f32
    %11 = vector.broadcast %cst_6 : f32 to vector<1x128x1xf32>
    %12 = arith.divf %10, %11 : vector<1x128x1xf32>
    %13 = vector.broadcast %12 : vector<1x128x1xf32> to vector<1x128x128xf32>
    %14 = arith.subf %8, %13 : vector<1x128x128xf32>
    %15 = vector.broadcast %12 : vector<1x128x1xf32> to vector<1x128x128xf32>
    %16 = arith.subf %8, %15 : vector<1x128x128xf32>
    %17 = arith.mulf %14, %16 : vector<1x128x128xf32>
    %cst_7 = arith.constant dense<0.000000e+00> : vector<1x128xf32>
    %18 = vector.multi_reduction <add>, %17, %cst_7 [2] : vector<1x128x128xf32> to vector<1x128xf32>
    %19 = vector.shape_cast %18 : vector<1x128xf32> to vector<1x128x1xf32>
    %cst_8 = arith.constant 1.280000e+02 : f32
    %20 = vector.broadcast %cst_8 : f32 to vector<1x128x1xf32>
    %21 = arith.divf %19, %20 : vector<1x128x1xf32>
    %22 = vector.broadcast %12 : vector<1x128x1xf32> to vector<1x128x128xf32>
    %23 = arith.subf %8, %22 : vector<1x128x128xf32>
    %cst_9 = arith.constant 9.99999996E-13 : f32
    %24 = vector.broadcast %cst_9 : f32 to vector<1x128x1xf32>
    %25 = arith.addf %21, %24 : vector<1x128x1xf32>
    %26 = math.rsqrt %25 : vector<1x128x1xf32>
    %27 = vector.broadcast %26 : vector<1x128x1xf32> to vector<1x128x128xf32>
    %28 = arith.mulf %23, %27 : vector<1x128x128xf32>
    %c0_10 = arith.constant 0 : index
    %c0_11 = arith.constant 0 : index
    %29 = vector.load %arg5[%c0_10, %c0_11] : memref<1x128xf32, #tpu.memory_space<vmem>>, vector<1x128xf32>
    %30 = vector.shape_cast %29 : vector<1x128xf32> to vector<1x1x128xf32>
    %31 = vector.broadcast %30 : vector<1x1x128xf32> to vector<1x128x128xf32>
    %32 = arith.mulf %28, %31 : vector<1x128x128xf32>
    %c0_12 = arith.constant 0 : index
    %c0_13 = arith.constant 0 : index
    %33 = vector.load %arg6[%c0_12, %c0_13] : memref<1x128xf32, #tpu.memory_space<vmem>>, vector<1x128xf32>
    %34 = vector.shape_cast %33 : vector<1x128xf32> to vector<1x1x128xf32>
    %35 = vector.broadcast %34 : vector<1x1x128xf32> to vector<1x128x128xf32>
    %36 = arith.addf %32, %35 : vector<1x128x128xf32>
    %37 = arith.truncf %36 : vector<1x128x128xf32> to vector<1x128x128xbf16>
    %c0_14 = arith.constant 0 : index
    %c0_15 = arith.constant 0 : index
    %c0_16 = arith.constant 0 : index
    %38 = vector.load %arg7[%c0_14, %c0_15, %c0_16] : memref<1x128x128xbf16, #tpu.memory_space<vmem>>, vector<1x128x128xbf16>
    tpu.vector_store %arg7[%c0_14, %c0_15, %c0_16], %37 {strides = array<i32>} : memref<1x128x128xbf16, #tpu.memory_space<vmem>>, vector<1x128x128xbf16>,
    return
  }
  func.func @transform_0(%arg0: i32, %arg1: i32) -> (i32, i32, i32) {
    %c0_i32 = arith.constant 0 : i32
    %c0_i32_0 = arith.constant 0 : i32
    return %arg0, %arg1, %c0_i32 : i32, i32, i32
  }
  func.func @transform_1(%arg0: i32, %arg1: i32) -> (i32, i32) {
    %c0_i32 = arith.constant 0 : i32
    %c0_i32_0 = arith.constant 0 : i32
    return %arg1, %c0_i32 : i32, i32
  }
  func.func @transform_2(%arg0: i32, %arg1: i32) -> (i32, i32) {
    %c0_i32 = arith.constant 0 : i32
    %c0_i32_0 = arith.constant 0 : i32
    %c0_i32_1 = arith.constant 0 : i32
    return %c0_i32, %c0_i32_0 : i32, i32
  }
  func.func @transform_3(%arg0: i32, %arg1: i32) -> (i32, i32) {
    %c0_i32 = arith.constant 0 : i32
    %c0_i32_0 = arith.constant 0 : i32
    %c0_i32_1 = arith.constant 0 : i32
    return %c0_i32, %c0_i32_0 : i32, i32
  }
  func.func @transform_4(%arg0: i32, %arg1: i32) -> (i32, i32) {
    %c0_i32 = arith.constant 0 : i32
    %c0_i32_0 = arith.constant 0 : i32
    %c0_i32_1 = arith.constant 0 : i32
    return %c0_i32, %c0_i32_0 : i32, i32
  }
  func.func @transform_5(%arg0: i32, %arg1: i32) -> (i32, i32, i32) {
    %c0_i32 = arith.constant 0 : i32
    %c0_i32_0 = arith.constant 0 : i32
    return %arg0, %arg1, %c0_i32 : i32, i32, i32
  }
}

module attributes {stable_mosaic.version = 11 : i64} {
  func.func @_layernorm_kernel(%arg0: i32, %arg1: memref<256x128xbf16, #tpu.memory_space<vmem>>, %arg2: memref<256x128xbf16, #tpu.memory_space<vmem>>, %arg3: memref<1x128xf32, #tpu.memory_space<vmem>>, %arg4: memref<1x128xf32, #tpu.memory_space<vmem>>, %arg5: memref<256x128xbf16, #tpu.memory_space<vmem>>) attributes {dimension_semantics = [#tpu.dimension_semantics<parallel>], iteration_bounds = array<i64: 1>, scalar_prefetch = 0 : i64, scratch_operands = 0 : i64, tpu.core_type = #tpu.core_type<tc>, window_params = [{transform_indices = @transform_0, window_bounds = array<i64: 256, 128>}, {transform_indices = @transform_1, window_bounds = array<i64: 256, 128>}, {pipeline_mode = #tpu.pipeline_mode<synchronous>, transform_indices = @transform_2, window_bounds = array<i64: 1, 128>}, {pipeline_mode = #tpu.pipeline_mode<synchronous>, transform_indices = @transform_3, window_bounds = array<i64: 1, 128>}, {transform_indices = @transform_4, window_bounds = array<i64: 256, 128>}]} {
    %c0 = arith.constant 0 : index
    %c0_0 = arith.constant 0 : index
    %0 = vector.load %arg1[%c0, %c0_0] : memref<256x128xbf16, #tpu.memory_space<vmem>>, vector<256x128xbf16>
    %1 = arith.extf %0 : vector<256x128xbf16> to vector<256x128xf32>
    %c0_1 = arith.constant 0 : index
    %c0_2 = arith.constant 0 : index
    %2 = vector.load %arg2[%c0_1, %c0_2] : memref<256x128xbf16, #tpu.memory_space<vmem>>, vector<256x128xbf16>
    %3 = arith.extf %2 : vector<256x128xbf16> to vector<256x128xf32>
    %4 = arith.addf %1, %3 : vector<256x128xf32>
    %cst = arith.constant dense<0.000000e+00> : vector<256xf32>
    %5 = vector.multi_reduction <add>, %4, %cst [1] : vector<256x128xf32> to vector<256xf32>
    %6 = vector.shape_cast %5 : vector<256xf32> to vector<256x1xf32>
    %cst_3 = arith.constant 1.280000e+02 : f32
    %7 = vector.broadcast %cst_3 : f32 to vector<256x1xf32>
    %8 = arith.divf %6, %7 : vector<256x1xf32>
    %9 = vector.broadcast %8 : vector<256x1xf32> to vector<256x128xf32>
    %10 = arith.subf %4, %9 : vector<256x128xf32>
    %11 = vector.broadcast %8 : vector<256x1xf32> to vector<256x128xf32>
    %12 = arith.subf %4, %11 : vector<256x128xf32>
    %13 = arith.mulf %10, %12 : vector<256x128xf32>
    %cst_4 = arith.constant dense<0.000000e+00> : vector<256xf32>
    %14 = vector.multi_reduction <add>, %13, %cst_4 [1] : vector<256x128xf32> to vector<256xf32>
    %15 = vector.shape_cast %14 : vector<256xf32> to vector<256x1xf32>
    %cst_5 = arith.constant 1.280000e+02 : f32
    %16 = vector.broadcast %cst_5 : f32 to vector<256x1xf32>
    %17 = arith.divf %15, %16 : vector<256x1xf32>
    %18 = vector.broadcast %8 : vector<256x1xf32> to vector<256x128xf32>
    %19 = arith.subf %4, %18 : vector<256x128xf32>
    %cst_6 = arith.constant 9.99999996E-13 : f32
    %20 = vector.broadcast %cst_6 : f32 to vector<256x1xf32>
    %21 = arith.addf %17, %20 : vector<256x1xf32>
    %22 = math.rsqrt %21 : vector<256x1xf32>
    %23 = vector.broadcast %22 : vector<256x1xf32> to vector<256x128xf32>
    %24 = arith.mulf %19, %23 : vector<256x128xf32>
    %c0_7 = arith.constant 0 : index
    %c0_8 = arith.constant 0 : index
    %25 = vector.load %arg3[%c0_7, %c0_8] : memref<1x128xf32, #tpu.memory_space<vmem>>, vector<1x128xf32>
    %26 = vector.broadcast %25 : vector<1x128xf32> to vector<256x128xf32>
    %27 = arith.mulf %24, %26 : vector<256x128xf32>
    %c0_9 = arith.constant 0 : index
    %c0_10 = arith.constant 0 : index
    %28 = vector.load %arg4[%c0_9, %c0_10] : memref<1x128xf32, #tpu.memory_space<vmem>>, vector<1x128xf32>
    %29 = vector.broadcast %28 : vector<1x128xf32> to vector<256x128xf32>
    %30 = arith.addf %27, %29 : vector<256x128xf32>
    %31 = arith.truncf %30 : vector<256x128xf32> to vector<256x128xbf16>
    %c0_11 = arith.constant 0 : index
    %c0_12 = arith.constant 0 : index
    %32 = vector.load %arg5[%c0_11, %c0_12] : memref<256x128xbf16, #tpu.memory_space<vmem>>, vector<256x128xbf16>
    tpu.vector_store %arg5[%c0_11, %c0_12], %31 {strides = array<i32>} : memref<256x128xbf16, #tpu.memory_space<vmem>>, vector<256x128xbf16>,
    return
  }
  func.func @transform_0(%arg0: i32) -> (i32, i32) {
    %c0_i32 = arith.constant 0 : i32
    %c0_i32_0 = arith.constant 0 : i32
    return %arg0, %c0_i32 : i32, i32
  }
  func.func @transform_1(%arg0: i32) -> (i32, i32) {
    %c0_i32 = arith.constant 0 : i32
    %c0_i32_0 = arith.constant 0 : i32
    return %arg0, %c0_i32 : i32, i32
  }
  func.func @transform_2(%arg0: i32) -> (i32, i32) {
    %c0_i32 = arith.constant 0 : i32
    %c0_i32_0 = arith.constant 0 : i32
    %c0_i32_1 = arith.constant 0 : i32
    return %c0_i32, %c0_i32_0 : i32, i32
  }
  func.func @transform_3(%arg0: i32) -> (i32, i32) {
    %c0_i32 = arith.constant 0 : i32
    %c0_i32_0 = arith.constant 0 : i32
    %c0_i32_1 = arith.constant 0 : i32
    return %c0_i32, %c0_i32_0 : i32, i32
  }
  func.func @transform_4(%arg0: i32) -> (i32, i32) {
    %c0_i32 = arith.constant 0 : i32
    %c0_i32_0 = arith.constant 0 : i32
    return %arg0, %c0_i32 : i32, i32
  }
}

module attributes {stable_mosaic.version = 11 : i64} {
  func.func @_linear_kernel(%arg0: i32, %arg1: memref<256x128xbf16, #tpu.memory_space<vmem>>, %arg2: memref<128x512xbf16, #tpu.memory_space<vmem>>, %arg3: memref<1x512xf32, #tpu.memory_space<vmem>>, %arg4: memref<256x512xbf16, #tpu.memory_space<vmem>>) attributes {dimension_semantics = [#tpu.dimension_semantics<parallel>], iteration_bounds = array<i64: 1>, scalar_prefetch = 0 : i64, scratch_operands = 0 : i64, tpu.core_type = #tpu.core_type<tc>, window_params = [{transform_indices = @transform_0, window_bounds = array<i64: 256, 128>}, {pipeline_mode = #tpu.pipeline_mode<synchronous>, transform_indices = @transform_1, window_bounds = array<i64: 128, 512>}, {pipeline_mode = #tpu.pipeline_mode<synchronous>, transform_indices = @transform_2, window_bounds = array<i64: 1, 512>}, {transform_indices = @transform_3, window_bounds = array<i64: 256, 512>}]} {
    %c0 = arith.constant 0 : index
    %c0_0 = arith.constant 0 : index
    %0 = vector.load %arg1[%c0, %c0_0] : memref<256x128xbf16, #tpu.memory_space<vmem>>, vector<256x128xbf16>
    %c0_1 = arith.constant 0 : index
    %c0_2 = arith.constant 0 : index
    %1 = vector.load %arg2[%c0_1, %c0_2] : memref<128x512xbf16, #tpu.memory_space<vmem>>, vector<128x512xbf16>
    %cst = arith.constant dense<0.000000e+00> : vector<256x512xf32>
    %2 = tpu.matmul %0, %1, %cst {dimension_numbers = #tpu.dot_dimension_numbers<[1], [0], [0], [1], [0, 0, 1, 1], [], []>} : vector<256x128xbf16>, vector<128x512xbf16>, vector<256x512xf32> -> vector<256x512xf32>
    %c0_3 = arith.constant 0 : index
    %c0_4 = arith.constant 0 : index
    %3 = vector.load %arg3[%c0_3, %c0_4] : memref<1x512xf32, #tpu.memory_space<vmem>>, vector<1x512xf32>
    %4 = vector.broadcast %3 : vector<1x512xf32> to vector<256x512xf32>
    %5 = arith.addf %2, %4 : vector<256x512xf32>
    %cst_5 = arith.constant 5.000000e-01 : f32
    %6 = vector.broadcast %cst_5 : f32 to vector<256x512xf32>
    %7 = arith.mulf %6, %5 : vector<256x512xf32>
    %cst_6 = arith.constant 4.471500e-02 : f32
    %8 = vector.broadcast %cst_6 : f32 to vector<256x512xf32>
    %9 = arith.mulf %8, %5 : vector<256x512xf32>
    %10 = arith.mulf %9, %5 : vector<256x512xf32>
    %11 = arith.mulf %10, %5 : vector<256x512xf32>
    %12 = arith.addf %5, %11 : vector<256x512xf32>
    %cst_7 = arith.constant 0.797884583 : f32
    %13 = vector.broadcast %cst_7 : f32 to vector<256x512xf32>
    %14 = arith.mulf %13, %12 : vector<256x512xf32>
    %15 = math.tanh %14 : vector<256x512xf32>
    %cst_8 = arith.constant 1.000000e+00 : f32
    %16 = vector.broadcast %cst_8 : f32 to vector<256x512xf32>
    %17 = arith.addf %16, %15 : vector<256x512xf32>
    %18 = arith.mulf %7, %17 : vector<256x512xf32>
    %19 = arith.truncf %18 : vector<256x512xf32> to vector<256x512xbf16>
    %c0_9 = arith.constant 0 : index
    %c0_10 = arith.constant 0 : index
    %20 = vector.load %arg4[%c0_9, %c0_10] : memref<256x512xbf16, #tpu.memory_space<vmem>>, vector<256x512xbf16>
    tpu.vector_store %arg4[%c0_9, %c0_10], %19 {strides = array<i32>} : memref<256x512xbf16, #tpu.memory_space<vmem>>, vector<256x512xbf16>,
    return
  }
  func.func @transform_0(%arg0: i32) -> (i32, i32) {
    %c0_i32 = arith.constant 0 : i32
    %c0_i32_0 = arith.constant 0 : i32
    return %arg0, %c0_i32 : i32, i32
  }
  func.func @transform_1(%arg0: i32) -> (i32, i32) {
    %c0_i32 = arith.constant 0 : i32
    %c0_i32_0 = arith.constant 0 : i32
    %c0_i32_1 = arith.constant 0 : i32
    return %c0_i32, %c0_i32_0 : i32, i32
  }
  func.func @transform_2(%arg0: i32) -> (i32, i32) {
    %c0_i32 = arith.constant 0 : i32
    %c0_i32_0 = arith.constant 0 : i32
    %c0_i32_1 = arith.constant 0 : i32
    return %c0_i32, %c0_i32_0 : i32, i32
  }
  func.func @transform_3(%arg0: i32) -> (i32, i32) {
    %c0_i32 = arith.constant 0 : i32
    %c0_i32_0 = arith.constant 0 : i32
    return %arg0, %c0_i32 : i32, i32
  }
}

module attributes {stable_mosaic.version = 11 : i64} {
  func.func @_layernorm_kernel(%arg0: i32, %arg1: memref<256x128xbf16, #tpu.memory_space<vmem>>, %arg2: memref<256x128xbf16, #tpu.memory_space<vmem>>, %arg3: memref<1x128xf32, #tpu.memory_space<vmem>>, %arg4: memref<1x128xf32, #tpu.memory_space<vmem>>, %arg5: memref<256x128xbf16, #tpu.memory_space<vmem>>) attributes {dimension_semantics = [#tpu.dimension_semantics<parallel>], iteration_bounds = array<i64: 1>, scalar_prefetch = 0 : i64, scratch_operands = 0 : i64, tpu.core_type = #tpu.core_type<tc>, window_params = [{transform_indices = @transform_0, window_bounds = array<i64: 256, 128>}, {transform_indices = @transform_1, window_bounds = array<i64: 256, 128>}, {pipeline_mode = #tpu.pipeline_mode<synchronous>, transform_indices = @transform_2, window_bounds = array<i64: 1, 128>}, {pipeline_mode = #tpu.pipeline_mode<synchronous>, transform_indices = @transform_3, window_bounds = array<i64: 1, 128>}, {transform_indices = @transform_4, window_bounds = array<i64: 256, 128>}]} {
    %c0 = arith.constant 0 : index
    %c0_0 = arith.constant 0 : index
    %0 = vector.load %arg1[%c0, %c0_0] : memref<256x128xbf16, #tpu.memory_space<vmem>>, vector<256x128xbf16>
    %1 = arith.extf %0 : vector<256x128xbf16> to vector<256x128xf32>
    %c0_1 = arith.constant 0 : index
    %c0_2 = arith.constant 0 : index
    %2 = vector.load %arg2[%c0_1, %c0_2] : memref<256x128xbf16, #tpu.memory_space<vmem>>, vector<256x128xbf16>
    %3 = arith.extf %2 : vector<256x128xbf16> to vector<256x128xf32>
    %4 = arith.addf %1, %3 : vector<256x128xf32>
    %cst = arith.constant dense<0.000000e+00> : vector<256xf32>
    %5 = vector.multi_reduction <add>, %4, %cst [1] : vector<256x128xf32> to vector<256xf32>
    %6 = vector.shape_cast %5 : vector<256xf32> to vector<256x1xf32>
    %cst_3 = arith.constant 1.280000e+02 : f32
    %7 = vector.broadcast %cst_3 : f32 to vector<256x1xf32>
    %8 = arith.divf %6, %7 : vector<256x1xf32>
    %9 = vector.broadcast %8 : vector<256x1xf32> to vector<256x128xf32>
    %10 = arith.subf %4, %9 : vector<256x128xf32>
    %11 = vector.broadcast %8 : vector<256x1xf32> to vector<256x128xf32>
    %12 = arith.subf %4, %11 : vector<256x128xf32>
    %13 = arith.mulf %10, %12 : vector<256x128xf32>
    %cst_4 = arith.constant dense<0.000000e+00> : vector<256xf32>
    %14 = vector.multi_reduction <add>, %13, %cst_4 [1] : vector<256x128xf32> to vector<256xf32>
    %15 = vector.shape_cast %14 : vector<256xf32> to vector<256x1xf32>
    %cst_5 = arith.constant 1.280000e+02 : f32
    %16 = vector.broadcast %cst_5 : f32 to vector<256x1xf32>
    %17 = arith.divf %15, %16 : vector<256x1xf32>
    %18 = vector.broadcast %8 : vector<256x1xf32> to vector<256x128xf32>
    %19 = arith.subf %4, %18 : vector<256x128xf32>
    %cst_6 = arith.constant 9.99999996E-13 : f32
    %20 = vector.broadcast %cst_6 : f32 to vector<256x1xf32>
    %21 = arith.addf %17, %20 : vector<256x1xf32>
    %22 = math.rsqrt %21 : vector<256x1xf32>
    %23 = vector.broadcast %22 : vector<256x1xf32> to vector<256x128xf32>
    %24 = arith.mulf %19, %23 : vector<256x128xf32>
    %c0_7 = arith.constant 0 : index
    %c0_8 = arith.constant 0 : index
    %25 = vector.load %arg3[%c0_7, %c0_8] : memref<1x128xf32, #tpu.memory_space<vmem>>, vector<1x128xf32>
    %26 = vector.broadcast %25 : vector<1x128xf32> to vector<256x128xf32>
    %27 = arith.mulf %24, %26 : vector<256x128xf32>
    %c0_9 = arith.constant 0 : index
    %c0_10 = arith.constant 0 : index
    %28 = vector.load %arg4[%c0_9, %c0_10] : memref<1x128xf32, #tpu.memory_space<vmem>>, vector<1x128xf32>
    %29 = vector.broadcast %28 : vector<1x128xf32> to vector<256x128xf32>
    %30 = arith.addf %27, %29 : vector<256x128xf32>
    %31 = arith.truncf %30 : vector<256x128xf32> to vector<256x128xbf16>
    %c0_11 = arith.constant 0 : index
    %c0_12 = arith.constant 0 : index
    %32 = vector.load %arg5[%c0_11, %c0_12] : memref<256x128xbf16, #tpu.memory_space<vmem>>, vector<256x128xbf16>
    tpu.vector_store %arg5[%c0_11, %c0_12], %31 {strides = array<i32>} : memref<256x128xbf16, #tpu.memory_space<vmem>>, vector<256x128xbf16>,
    return
  }
  func.func @transform_0(%arg0: i32) -> (i32, i32) {
    %c0_i32 = arith.constant 0 : i32
    %c0_i32_0 = arith.constant 0 : i32
    return %arg0, %c0_i32 : i32, i32
  }
  func.func @transform_1(%arg0: i32) -> (i32, i32) {
    %c0_i32 = arith.constant 0 : i32
    %c0_i32_0 = arith.constant 0 : i32
    return %arg0, %c0_i32 : i32, i32
  }
  func.func @transform_2(%arg0: i32) -> (i32, i32) {
    %c0_i32 = arith.constant 0 : i32
    %c0_i32_0 = arith.constant 0 : i32
    %c0_i32_1 = arith.constant 0 : i32
    return %c0_i32, %c0_i32_0 : i32, i32
  }
  func.func @transform_3(%arg0: i32) -> (i32, i32) {
    %c0_i32 = arith.constant 0 : i32
    %c0_i32_0 = arith.constant 0 : i32
    %c0_i32_1 = arith.constant 0 : i32
    return %c0_i32, %c0_i32_0 : i32, i32
  }
  func.func @transform_4(%arg0: i32) -> (i32, i32) {
    %c0_i32 = arith.constant 0 : i32
    %c0_i32_0 = arith.constant 0 : i32
    return %arg0, %c0_i32 : i32, i32
  }
}

module attributes {stable_mosaic.version = 11 : i64} {
  func.func @_linear_kernel(%arg0: i32, %arg1: memref<256x512xbf16, #tpu.memory_space<vmem>>, %arg2: memref<512x128xbf16, #tpu.memory_space<vmem>>, %arg3: memref<1x128xf32, #tpu.memory_space<vmem>>, %arg4: memref<256x128xbf16, #tpu.memory_space<vmem>>) attributes {dimension_semantics = [#tpu.dimension_semantics<parallel>], iteration_bounds = array<i64: 1>, scalar_prefetch = 0 : i64, scratch_operands = 0 : i64, tpu.core_type = #tpu.core_type<tc>, window_params = [{transform_indices = @transform_0, window_bounds = array<i64: 256, 512>}, {pipeline_mode = #tpu.pipeline_mode<synchronous>, transform_indices = @transform_1, window_bounds = array<i64: 512, 128>}, {pipeline_mode = #tpu.pipeline_mode<synchronous>, transform_indices = @transform_2, window_bounds = array<i64: 1, 128>}, {transform_indices = @transform_3, window_bounds = array<i64: 256, 128>}]} {
    %c0 = arith.constant 0 : index
    %c0_0 = arith.constant 0 : index
    %0 = vector.load %arg1[%c0, %c0_0] : memref<256x512xbf16, #tpu.memory_space<vmem>>, vector<256x512xbf16>
    %c0_1 = arith.constant 0 : index
    %c0_2 = arith.constant 0 : index
    %1 = vector.load %arg2[%c0_1, %c0_2] : memref<512x128xbf16, #tpu.memory_space<vmem>>, vector<512x128xbf16>
    %cst = arith.constant dense<0.000000e+00> : vector<256x128xf32>
    %2 = tpu.matmul %0, %1, %cst {dimension_numbers = #tpu.dot_dimension_numbers<[1], [0], [0], [1], [0, 0, 1, 1], [], []>} : vector<256x512xbf16>, vector<512x128xbf16>, vector<256x128xf32> -> vector<256x128xf32>
    %c0_3 = arith.constant 0 : index
    %c0_4 = arith.constant 0 : index
    %3 = vector.load %arg3[%c0_3, %c0_4] : memref<1x128xf32, #tpu.memory_space<vmem>>, vector<1x128xf32>
    %4 = vector.broadcast %3 : vector<1x128xf32> to vector<256x128xf32>
    %5 = arith.addf %2, %4 : vector<256x128xf32>
    %6 = arith.truncf %5 : vector<256x128xf32> to vector<256x128xbf16>
    %c0_5 = arith.constant 0 : index
    %c0_6 = arith.constant 0 : index
    %7 = vector.load %arg4[%c0_5, %c0_6] : memref<256x128xbf16, #tpu.memory_space<vmem>>, vector<256x128xbf16>
    tpu.vector_store %arg4[%c0_5, %c0_6], %6 {strides = array<i32>} : memref<256x128xbf16, #tpu.memory_space<vmem>>, vector<256x128xbf16>,
    return
  }
  func.func @transform_0(%arg0: i32) -> (i32, i32) {
    %c0_i32 = arith.constant 0 : i32
    %c0_i32_0 = arith.constant 0 : i32
    return %arg0, %c0_i32 : i32, i32
  }
  func.func @transform_1(%arg0: i32) -> (i32, i32) {
    %c0_i32 = arith.constant 0 : i32
    %c0_i32_0 = arith.constant 0 : i32
    %c0_i32_1 = arith.constant 0 : i32
    return %c0_i32, %c0_i32_0 : i32, i32
  }
  func.func @transform_2(%arg0: i32) -> (i32, i32) {
    %c0_i32 = arith.constant 0 : i32
    %c0_i32_0 = arith.constant 0 : i32
    %c0_i32_1 = arith.constant 0 : i32
    return %c0_i32, %c0_i32_0 : i32, i32
  }
  func.func @transform_3(%arg0: i32) -> (i32, i32) {
    %c0_i32 = arith.constant 0 : i32
    %c0_i32_0 = arith.constant 0 : i32
    return %arg0, %c0_i32 : i32, i32
  }
}

</mosaic_0001>

<bundles_post_ra>
// kernel: bookbert_forward.16
= control target key start
LH: loop header
LB: loop body
LE: loop exit
PB: predicated region body
PF: predicated region fallthrough
CT: control target
= control target key end

     0   :  { %8 = vsyncpa [#allocation3], 0  ;;  %s1113_s0 = inlined_call_operand.hbm [shape: bf16[256,128], index: 0, kind: input, shape index: {}]   ;;  %s1114_s1 = inlined_call_operand.hbm [shape: bf16[128,128], index: 1, kind: input, shape index: {}]   ;;  %s1115_s2 = inlined_call_operand.hbm [shape: f32[1,128], index: 2, kind: input, shape index: {}]   ;;  %s1116_s3 = inlined_call_operand.hbm [shape: bf16[256,128], index: 3, kind: output, shape index: {}]  }
   0x1   :  { %9 = vsyncpa [#allocation6], 0 }
   0x2   :  { %10 = vsyncpa [#allocation4], 0  ;;  %s989_s12 = smov [#allocation5]   ;;  %s990_s14 = smov [#allocation2]  }
   0x3   :  { %s28_s13 = sshll.u32 %s989_s12, 4  ;;  %s16_s15 = sshll.u32 %s990_s14, 4  ;;  %s29_s13 = int_to_ptr.vmem [resolvable:$true] %s28_s13  ;;  %s1015_s15 = int_to_ptr.vmem [resolvable:$true] %s16_s15 }
   0x4   :  { %s895_s18 = scalar_lea.hbm %s1114_s1, 1024 }
   0x5   :  { %p896_p0 = scmp.ne.s32.totalorder %s1114_s1, %s895_s18  ;;  %p899_p1 = scmp.lt.u32.totalorder %s895_s18, %s1114_s1 }
   0x7   :  { %p901_p2 = pnand %p899_p1, %p896_p0 }
   0x9   :  { %904 = shalt.err (!%p901_p2)
}
   0xa   :  { %s905_s23 = scalar_lea.vmem %s29_s13, 1024  ;;  %p910_p4 = scmp.lt.s32.totalorder %s29_s13, %s29_s13 }
   0xb   :  { %p906_p3 = scmp.ne.s32.totalorder %s29_s13, %s905_s23  ;;  %p911_p5 = scmp.lt.s32.totalorder %s905_s23, %s905_s23 }
   0xd   :  { %p912_p6 = por %p911_p5, %p910_p4 }
   0xf   :  { %p913_p7 = pnand %p912_p6, %p906_p3 }
  0x11   :  { %916 = shalt.err (!%p913_p7)
}
  0x12   :  { %s991_s24 = smov 64   ;;  %s992_s25 = smov 4  }
  0x13   :  { %34 = dma.hbm_to_vmem [thread:$0]  %s1114_s1, 1024, %s29_s13, [#allocation6], %s991_s24, %s991_s24, %s992_s25  }
  0x14   :  { %s917_s30 = scalar_lea.hbm %s1113_s0, 2048 }
  0x15   :  { %p918_p8 = scmp.ne.s32.totalorder %s1113_s0, %s917_s30  ;;  %p921_p9 = scmp.lt.u32.totalorder %s917_s30, %s1113_s0 }
  0x17   :  { %p923_p10 = pnand %p921_p9, %p918_p8 }
  0x19   :  { %926 = shalt.err (!%p923_p10)
}
  0x1a   :  { %s927_s8 = scalar_lea.vmem %s1015_s15, 2048  ;;  %p932_p12 = scmp.lt.s32.totalorder %s1015_s15, %s1015_s15 }
  0x1b   :  { %p928_p11 = scmp.ne.s32.totalorder %s1015_s15, %s927_s8  ;;  %p933_p13 = scmp.lt.s32.totalorder %s927_s8, %s927_s8 }
  0x1d   :  { %p934_p0 = por %p933_p13, %p932_p12 }
  0x1f   :  { %p935_p1 = pnand %p934_p0, %p928_p11 }
  0x21   :  { %938 = shalt.err (!%p935_p1)
}
  0x22   :  { %22 = dma.hbm_to_vmem [thread:$0]  %s1113_s0, 2048, %s1015_s15, [#allocation3], %s991_s24, %s991_s24, %s992_s25  }
  0x23   :  { %s993_s10 = smov [#allocation7]   ;;  %s939_s14 = scalar_lea.hbm %s1115_s2, 16 }
  0x24   :  { %s41_s11 = sshll.u32 %s993_s10, 4  ;;  %p940_p2 = scmp.ne.s32.totalorder %s1115_s2, %s939_s14  ;;  %s42_s11 = int_to_ptr.vmem [resolvable:$true] %s41_s11 }
  0x25   :  { %p943_p3 = scmp.lt.u32.totalorder %s939_s14, %s1115_s2 }
  0x27   :  { %p945_p4 = pnand %p943_p3, %p940_p2 }
  0x29   :  { %948 = shalt.err (!%p945_p4)
}
  0x2a   :  { %s949_s20 = scalar_lea.vmem %s42_s11, 16  ;;  %s953_s0 = scalar_lea.vmem %s42_s11, 32 }
  0x2b   :  { %p950_p5 = scmp.ne.s32.totalorder %s42_s11, %s949_s20  ;;  %p954_p6 = scmp.lt.s32.totalorder %s42_s11, %s42_s11 }
  0x2c   :  { %p955_p7 = scmp.lt.s32.totalorder %s953_s0, %s949_s20 }
  0x2e   :  { %p956_p8 = por %p955_p7, %p954_p6 }
  0x30   :  { %p957_p9 = pnand %p956_p8, %p950_p5 }
  0x32   :  { %960 = shalt.err (!%p957_p9)
}
  0x33   :  { %44 = dma.hbm_to_vmem [thread:$0]  %s1115_s2, 16, %s42_s11, [#allocation6]  }
  0x34   :  { %983 = dma.done.wait [#allocation3], 2048  }
  0x35   :  { %984 = vsyncadd [#allocation3], 4294965248 }
  0x36   :  { %985 = dma.done.wait [#allocation6], 1040  }
  0x37   :  { %986 = vsyncadd [#allocation6], 4294966256  ;;  %v871_v0 = vld [vmem:[#allocation5] sm:$0xff]   ;;  %v872_v1 = vld [vmem:[#allocation5 + $0x8] sm:$0xff]   ;;  %s994_s2 = smov [#allocation8]  }
  0x38   :  { %801 = vmatprep.subr.bf16.mxu0 %v871_v0  ;;  %849 = vmatprep.subr.bf16.mxu1 %v871_v0  ;;  %v873_v2 = vld [vmem:[#allocation5 + $0x10] sm:$0xff]   ;;  %v874_v3 = vld [vmem:[#allocation5 + $0x18] sm:$0xff]   ;;  %v879_v4 = vld [vmem:[#allocation2] sm:$0xff]   ;;  %s580_s22 = sshll.u32 %s994_s2, 4  ;;  %s581_s22 = int_to_ptr.vmem [resolvable:$true] %s580_s22 }
  0x39   :  { %802 = vmatpush3.bf16.msra.mxu0 %v871_v0  ;;  %857 = vmatpush3.bf16.msra.mxu1 %v871_v0  ;;  %v880_v5 = vld [vmem:[#allocation2 + $0x40] sm:$0xff]   ;;  %v876_v7 = vld [vmem:[#allocation5 + $0x28] sm:$0xff]   ;;  %v877_v8 = vld [vmem:[#allocation5 + $0x30] sm:$0xff]   ;;  %s961_s23 = scalar_lea.vmem %s581_s22, 2048  ;;  %p966_p11 = scmp.lt.s32.totalorder %s581_s22, %s581_s22 }
  0x3a   :  { %803 = vmatprep.subr.bf16.mxu0 %v872_v1  ;;  %850 = vmatprep.subr.bf16.mxu1 %v872_v1  ;;  %v875_v6 = vld [vmem:[#allocation5 + $0x20] sm:$0xff]   ;;  %v878_v9 = vld [vmem:[#allocation5 + $0x38] sm:$0xff]   ;;  %v881_v10 = vld [vmem:[#allocation2 + $0x8] sm:$0xff]   ;;  %p962_p10 = scmp.ne.s32.totalorder %s581_s22, %s961_s23  ;;  %p967_p12 = scmp.lt.s32.totalorder %s961_s23, %s961_s23 }
  0x3b   :  { %817 = vmatprep.mubr.bf16.mxu0 %v879_v4  ;;  %833 = vmatprep.mubr.bf16.mxu1 %v880_v5  ;;  %v882_v11 = vld [vmem:[#allocation2 + $0x48] sm:$0xff]   ;;  %v883_v12 = vld [vmem:[#allocation2 + $0x10] sm:$0xff]   ;;  %v885_v14 = vld [vmem:[#allocation2 + $0x18] sm:$0xff]  }
  0x3c   :  { %v884_v13 = vld [vmem:[#allocation2 + $0x50] sm:$0xff]   ;;  %v886_v15 = vld [vmem:[#allocation2 + $0x58] sm:$0xff]   ;;  %v887_v16 = vld [vmem:[#allocation2 + $0x20] sm:$0xff]   ;;  %p968_p13 = por %p967_p12, %p966_p11 }
  0x3d   :  { %804 = vmatpush3.bf16.msra.mxu0 %v872_v1  ;;  %858 = vmatpush3.bf16.msra.mxu1 %v872_v1  ;;  %v888_v17 = vld [vmem:[#allocation2 + $0x60] sm:$0xff]   ;;  %v889_v18 = vld [vmem:[#allocation2 + $0x28] sm:$0xff]   ;;  %v891_v20 = vld [vmem:[#allocation2 + $0x30] sm:$0xff]  }
  0x3e   :  { %805 = vmatprep.subr.bf16.mxu0 %v873_v2  ;;  %851 = vmatprep.subr.bf16.mxu1 %v873_v2  ;;  %v890_v19 = vld [vmem:[#allocation2 + $0x68] sm:$0xff]   ;;  %v892_v21 = vld [vmem:[#allocation2 + $0x70] sm:$0xff]   ;;  %v893_v22 = vld [vmem:[#allocation2 + $0x38] sm:$0xff]   ;;  %p969_p0 = pnand %p968_p13, %p962_p10 }
  0x3f   :  { %v894_v23 = vld [vmem:[#allocation2 + $0x78] sm:$0xff]   ;;  %v1064_v25 = vld [vmem:[#allocation7] ss:$0 sm:$0xff] }
  0x41   :  { %806 = vmatpush3.bf16.msra.mxu0 %v873_v2  ;;  %859 = vmatpush3.bf16.msra.mxu1 %v873_v2 }
  0x42   :  { %807 = vmatprep.subr.bf16.mxu0 %v874_v3  ;;  %852 = vmatprep.subr.bf16.mxu1 %v874_v3 }
  0x45   :  { %808 = vmatpush3.bf16.msra.mxu0 %v874_v3  ;;  %860 = vmatpush3.bf16.msra.mxu1 %v874_v3 }
  0x46   :  { %809 = vmatprep.subr.bf16.mxu0 %v875_v6  ;;  %853 = vmatprep.subr.bf16.mxu1 %v875_v6 }
  0x49   :  { %810 = vmatpush3.bf16.msra.mxu0 %v875_v6  ;;  %861 = vmatpush3.bf16.msra.mxu1 %v875_v6 }
  0x4a   :  { %811 = vmatprep.subr.bf16.mxu0 %v876_v7  ;;  %854 = vmatprep.subr.bf16.mxu1 %v876_v7 }
  0x4d   :  { %812 = vmatpush3.bf16.msra.mxu0 %v876_v7  ;;  %862 = vmatpush3.bf16.msra.mxu1 %v876_v7 }
  0x4e   :  { %813 = vmatprep.subr.bf16.mxu0 %v877_v8  ;;  %855 = vmatprep.subr.bf16.mxu1 %v877_v8 }
  0x51   :  { %814 = vmatpush3.bf16.msra.mxu0 %v877_v8  ;;  %863 = vmatpush3.bf16.msra.mxu1 %v877_v8 }
  0x52   :  { %815 = vmatprep.subr.bf16.mxu0 %v878_v9  ;;  %856 = vmatprep.subr.bf16.mxu1 %v878_v9 }
  0x55   :  { %816 = vmatpush3.bf16.msra.mxu0 %v878_v9  ;;  %864 = vmatpush3.bf16.msra.mxu1 %v878_v9 }
  0x58   :  { %818 = vmatmul.mubr.bf16.vlgmr.msra.gmra.mrb[0].mxu0 %v881_v10  ;;  %834 = vmatmul.mubr.bf16.vlgmr.msra.gmra.mrb[0].mxu1 %v882_v11 }
  0x59   :  { %821 = vmatprep.mubr.bf16.mxu0 %v883_v12  ;;  %837 = vmatprep.mubr.bf16.mxu1 %v884_v13 }
  0x60   :  { %822 = vmatmul.mubr.bf16.gmra.mrb[4].mxu0 %v885_v14  ;;  %838 = vmatmul.mubr.bf16.gmra.mrb[4].mxu1 %v886_v15 }
  0x61   :  { %825 = vmatprep.mubr.bf16.mxu0 %v887_v16  ;;  %841 = vmatprep.mubr.bf16.mxu1 %v888_v17 }
  0x68   :  { %826 = vmatmul.mubr.bf16.gmra.mrb[8].mxu0 %v889_v18  ;;  %842 = vmatmul.mubr.bf16.gmra.mrb[8].mxu1 %v890_v19 }
  0x69   :  { %829 = vmatprep.mubr.bf16.mxu0 %v891_v20  ;;  %845 = vmatprep.mubr.bf16.mxu1 %v892_v21 }
  0x70   :  { %830 = vmatmul.mubr.bf16.gmra.mrb[12].mxu0 %v893_v22  ;;  %846 = vmatmul.mubr.bf16.gmra.mrb[12].mxu1 %v894_v23 }
 0x12b   :  { %v819_v24 = vpop.f32.mrb[0].mxu0  ;;  %v835_v26 = vpop.f32.mrb[0].mxu1 }
 0x12c   :  { %v288_v27 = vpop.f32.mrb[1].mxu0  ;;  %v352_v28 = vpop.f32.mrb[1].mxu1  ;;  %v297_v31 = vadd.f32 %v819_v24, %v1064_v25  ;;  %v361_v32 = vadd.f32 %v835_v26, %v1064_v25 }
 0x12d   :  { %v820_v29 = vpop.f32.mrb[2].mxu0  ;;  %v836_v30 = vpop.f32.mrb[2].mxu1  ;;  %v289_v37 = vadd.f32 %v1064_v25, %v288_v27  ;;  %v353_v38 = vadd.f32 %v1064_v25, %v352_v28 }
 0x12e   :  { %v300_v33 = vadd.f32 %v820_v29, %v1064_v25  ;;  %v364_v34 = vadd.f32 %v836_v30, %v1064_v25  ;;  %v291_v35 = vpop.f32.mrb[3].mxu0  ;;  %v355_v36 = vpop.f32.mrb[3].mxu1 }
 0x12f   :  { %v292_v39 = vadd.f32 %v1064_v25, %v291_v35  ;;  %v356_v40 = vadd.f32 %v1064_v25, %v355_v36 }
 0x130   :  { %v690_v41 = vpack.c.bf16 %v300_v33, %v297_v31  ;;  %v730_v42 = vpack.c.bf16 %v364_v34, %v361_v32 }
 0x131   :  { %v685_v43 = vpack.c.bf16 %v292_v39, %v289_v37  ;;  %v725_v44 = vpack.c.bf16 %v356_v40, %v353_v38 }
 0x132   :  { %762 = vst [vmem:[#allocation8 + $0x8] sm:$0xff] %v690_v41   ;;  %770 = vst [vmem:[#allocation8 + $0x48] sm:$0xff] %v730_v42  }
 0x133   :  { %686 = vst [vmem:[#allocation8] sm:$0xff] %v685_v43   ;;  %769 = vst [vmem:[#allocation8 + $0x40] sm:$0xff] %v725_v44   ;;  %v823_v45 = vpop.f32.mrb[4].mxu0  ;;  %v839_v46 = vpop.f32.mrb[4].mxu1 }
 0x134   :  { %v304_v47 = vpop.f32.mrb[5].mxu0  ;;  %v368_v48 = vpop.f32.mrb[5].mxu1  ;;  %v313_v51 = vadd.f32 %v823_v45, %v1064_v25  ;;  %v377_v52 = vadd.f32 %v839_v46, %v1064_v25 }
 0x135   :  { %v824_v49 = vpop.f32.mrb[6].mxu0  ;;  %v840_v50 = vpop.f32.mrb[6].mxu1  ;;  %v305_v57 = vadd.f32 %v1064_v25, %v304_v47  ;;  %v369_v58 = vadd.f32 %v1064_v25, %v368_v48 }
 0x136   :  { %v316_v53 = vadd.f32 %v824_v49, %v1064_v25  ;;  %v380_v54 = vadd.f32 %v840_v50, %v1064_v25  ;;  %v307_v55 = vpop.f32.mrb[7].mxu0  ;;  %v371_v56 = vpop.f32.mrb[7].mxu1 }
 0x137   :  { %v308_v59 = vadd.f32 %v1064_v25, %v307_v55  ;;  %v372_v60 = vadd.f32 %v1064_v25, %v371_v56 }
 0x138   :  { %v700_v61 = vpack.c.bf16 %v316_v53, %v313_v51  ;;  %v740_v62 = vpack.c.bf16 %v380_v54, %v377_v52 }
 0x139   :  { %v695_v63 = vpack.c.bf16 %v308_v59, %v305_v57  ;;  %v735_v0 = vpack.c.bf16 %v372_v60, %v369_v58 }
 0x13a   :  { %764 = vst [vmem:[#allocation8 + $0x18] sm:$0xff] %v700_v61   ;;  %772 = vst [vmem:[#allocation8 + $0x58] sm:$0xff] %v740_v62  }
 0x13b   :  { %763 = vst [vmem:[#allocation8 + $0x10] sm:$0xff] %v695_v63   ;;  %771 = vst [vmem:[#allocation8 + $0x50] sm:$0xff] %v735_v0   ;;  %v827_v1 = vpop.f32.mrb[8].mxu0  ;;  %v843_v2 = vpop.f32.mrb[8].mxu1 }
 0x13c   :  { %v320_v3 = vpop.f32.mrb[9].mxu0  ;;  %v384_v4 = vpop.f32.mrb[9].mxu1  ;;  %v329_v7 = vadd.f32 %v827_v1, %v1064_v25  ;;  %v393_v8 = vadd.f32 %v843_v2, %v1064_v25 }
 0x13d   :  { %v828_v5 = vpop.f32.mrb[10].mxu0  ;;  %v844_v6 = vpop.f32.mrb[10].mxu1  ;;  %v321_v13 = vadd.f32 %v1064_v25, %v320_v3  ;;  %v385_v14 = vadd.f32 %v1064_v25, %v384_v4 }
 0x13e   :  { %v332_v9 = vadd.f32 %v828_v5, %v1064_v25  ;;  %v396_v10 = vadd.f32 %v844_v6, %v1064_v25  ;;  %v323_v11 = vpop.f32.mrb[11].mxu0  ;;  %v387_v12 = vpop.f32.mrb[11].mxu1 }
 0x13f   :  { %v324_v15 = vadd.f32 %v1064_v25, %v323_v11  ;;  %v388_v16 = vadd.f32 %v1064_v25, %v387_v12 }
 0x140   :  { %v710_v17 = vpack.c.bf16 %v332_v9, %v329_v7  ;;  %v750_v18 = vpack.c.bf16 %v396_v10, %v393_v8 }
 0x141   :  { %v705_v19 = vpack.c.bf16 %v324_v15, %v321_v13  ;;  %v745_v20 = vpack.c.bf16 %v388_v16, %v385_v14 }
 0x142   :  { %766 = vst [vmem:[#allocation8 + $0x28] sm:$0xff] %v710_v17   ;;  %774 = vst [vmem:[#allocation8 + $0x68] sm:$0xff] %v750_v18  }
 0x143   :  { %765 = vst [vmem:[#allocation8 + $0x20] sm:$0xff] %v705_v19   ;;  %773 = vst [vmem:[#allocation8 + $0x60] sm:$0xff] %v745_v20   ;;  %v831_v21 = vpop.f32.mrb[12].mxu0  ;;  %v847_v22 = vpop.f32.mrb[12].mxu1 }
 0x144   :  { %v336_v23 = vpop.f32.mrb[13].mxu0  ;;  %v400_v24 = vpop.f32.mrb[13].mxu1  ;;  %v345_v28 = vadd.f32 %v831_v21, %v1064_v25  ;;  %v409_v29 = vadd.f32 %v847_v22, %v1064_v25 }
 0x145   :  { %v832_v26 = vpop.f32.mrb[14].mxu0  ;;  %v848_v27 = vpop.f32.mrb[14].mxu1  ;;  %v337_v34 = vadd.f32 %v1064_v25, %v336_v23  ;;  %v401_v35 = vadd.f32 %v1064_v25, %v400_v24 }
 0x146   :  { %v348_v30 = vadd.f32 %v832_v26, %v1064_v25  ;;  %v412_v31 = vadd.f32 %v848_v27, %v1064_v25  ;;  %v339_v32 = vpop.f32.mrb[15].mxu0  ;;  %v403_v33 = vpop.f32.mrb[15].mxu1 }
 0x147   :  { %v340_v36 = vadd.f32 %v1064_v25, %v339_v32  ;;  %v404_v37 = vadd.f32 %v1064_v25, %v403_v33 }
 0x148   :  { %v720_v38 = vpack.c.bf16 %v348_v30, %v345_v28  ;;  %v760_v39 = vpack.c.bf16 %v412_v31, %v409_v29 }
 0x149   :  { %v715_v40 = vpack.c.bf16 %v340_v36, %v337_v34  ;;  %v755_v41 = vpack.c.bf16 %v404_v37, %v401_v35 }
 0x14a   :  { %768 = vst [vmem:[#allocation8 + $0x38] sm:$0xff] %v720_v38   ;;  %776 = vst [vmem:[#allocation8 + $0x78] sm:$0xff] %v760_v39  }
 0x14b   :  { %767 = vst [vmem:[#allocation8 + $0x30] sm:$0xff] %v715_v40   ;;  %775 = vst [vmem:[#allocation8 + $0x70] sm:$0xff] %v755_v41  }
 0x14c   :  { %972 = shalt.err (!%p969_p0)
}
 0x14d   :  { %s973_s28 = scalar_lea.hbm %s1116_s3, 2048 }
 0x14e   :  { %p974_p1 = scmp.ne.s32.totalorder %s1116_s3, %s973_s28  ;;  %p977_p2 = scmp.lt.u32.totalorder %s973_s28, %s1116_s3 }
 0x150   :  { %p979_p3 = pnand %p977_p2, %p974_p1 }
 0x152   :  { %982 = shalt.err (!%p979_p3)
}
 0x153   :  { %586 = dma.vmem_to_hbm [thread:$0]  %s581_s22, 2048, %s1116_s3, [#allocation4], %s991_s24, %s991_s24, %s992_s25  }
 0x154   :  { %987 = dma.done.wait [#allocation4], 2048  }
 0x155   :  { %988 = vsyncadd [#allocation4], 4294965248 }
 0x156   :  { %590 = vsyncpa [#allocation3], 1 }
 0x157   :  { %591 = vsyncpa [#allocation6], 1 }
 0x158   :  { %592 = vsyncpa [#allocation4], 1 }

// kernel: bookbert_forward.17
= control target key start
LH: loop header
LB: loop body
LE: loop exit
PB: predicated region body
PF: predicated region fallthrough
CT: control target
= control target key end

     0   :  { %10 = vsyncpa [#allocation3], 0  ;;  %s1942_s0 = inlined_call_operand.hbm [shape: bf16[2,128,128], index: 0, kind: input, shape index: {}]   ;;  %s1943_s1 = inlined_call_operand.hbm [shape: f32[128,128], index: 1, kind: input, shape index: {}]   ;;  %s1944_s2 = inlined_call_operand.hbm [shape: f32[1,128], index: 2, kind: input, shape index: {}]   ;;  %s1945_s3 = inlined_call_operand.hbm [shape: f32[1,128], index: 3, kind: input, shape index: {}]   ;;  %s1946_s4 = inlined_call_operand.hbm [shape: f32[1,128], index: 4, kind: input, shape index: {}]   ;;  %s1947_s5 = inlined_call_operand.hbm [shape: bf16[2,128,128], index: 5, kind: output, shape index: {}]  }
   0x1   :  { %12 = vsyncpa [#allocation3 + $0x1], 0 }
   0x2   :  { %13 = vsyncpa [#allocation6], 0 }
   0x3   :  { %14 = vsyncpa [#allocation9], 0 }
   0x4   :  { %15 = vsyncpa [#allocation4], 0 }
   0x5   :  { %17 = vsyncpa [#allocation4 + $0x1], 0  ;;  %s1420_s18 = smov 0   ;;  %s1422_s19 = smov 0  }
   0x6   :  { %s1424_s20 = smov 0   ;;  %s1426_s21 = smov 0  }
   0x7   :  { %s1428_s22 = smov 0   ;;  %s1430_s23 = smov 0  }
   0x8 LB: > { %1954 = sst [smem:[#allocation16_spill]] %s1356_s18  ;;  %s857_s24 = sadd.s32 4294967295, %s1376_s23   ;;  %s1376_s23 = sphi %s1430_s23, %s23_s23   ;;  %s1372_s22 = sphi %s1428_s22, %s1977_s22   ;;  %s1368_s21 = sphi %s1426_s21, %s1976_s21   ;;  %s1364_s20 = sphi %s1424_s20, %s1975_s20   ;;  %s1360_s19 = sphi %s1422_s19, %s1974_s19   ;;  %s1356_s18 = sphi %s1420_s18, %s1973_s18  }
   0x9   : > { %s858_s25 = sadd.s32 4294967294, %s1376_s23   ;;  %p57_p0 = scmp.ne.s32.totalorder %s1360_s19, %s1356_s18 }
   0xa   : > { %p1454_p1 = scmp.eq.s32.totalorder %s857_s24, 0  ;;  %p1458_p2 = scmp.eq.s32.totalorder %s857_s24, 1 }
   0xb   : > { %p178_p3 = scmp.eq.s32.totalorder %s858_s25, 1  ;;  %p859_p5 = scmp.ge.s32.totalorder %s1376_s23, 1 }
   0xc   : > { %s1955_s26 = scalar_select %p1454_p1, 1, 0 }
   0xd   : > { %s1956_s27 = scalar_select %p1458_p2, 1, 0 }
   0xe   : > { %p1464_p4 = por %p1454_p1, %p57_p0  ;;  %p1469_p6 = por %p178_p3, %p57_p0 }
   0xf   : > { %p185_p7 = scmp.lt.s32.totalorder %s1376_s23, 3  ;;  %s1378_s6 = smov [#allocation5]  }
  0x10   : > { %s1957_s28 = scalar_select %p1464_p4, 1, 0 }
  0x11   : > { %s1958_s29 = scalar_select %p1469_p6, 1, 0 }
  0x12   : > { %p1474_p8 = pnand %p859_p5, %p185_p7  ;;  %s200_s7 = sshll.u32 %s1378_s6, 4  ;;  %s1478_s7 = int_to_ptr.vmem [resolvable:$true] %s200_s7 }
  0x13   : > { %1959 = sst [smem:[#allocation17_spill]] %s1958_s29  ;;  %s1379_s9 = smov [#allocation8]  }
  0x14   : > { %s1960_s30 = scalar_select %p1474_p8, 1, 0 }
  0x15   : > { %p1023_p9 = pneg %p1474_p8  ;;  %s225_s10 = sshll.u32 %s1379_s9, 4  ;;  %s1489_s10 = int_to_ptr.vmem [resolvable:$true] %s225_s10 }
  0x16   : > { %s1380_s11 = smov [#allocation7]   ;;  %s1144_s15 = scalar_lea.hbm %s1943_s1, 2048 }
  0x17   : > { %p1485_p11 = pnand %p1023_p9, %p1454_p1  ;;  %s1491_s12 = sshll.u32 %s1380_s11, 4  ;;  %s215_s12 = int_to_ptr.vmem [resolvable:$true] %s1491_s12 }
  0x18   : > { %p1145_p12 = scmp.ne.s32.totalorder %s1943_s1, %s1144_s15  ;;  %p1151_p5 = scmp.lt.u32.totalorder %s1144_s15, %s1943_s1 }
  0x19   : > { %p1501_p13 = pneg %p1485_p11 }
  0x1b   : > { %p1147_p0 = pnand %p1501_p13, %p1145_p12 }
  0x1d   : > { %p1148_p3 = pneg %p1147_p0 }
  0x1f   : > { %p1153_p7 = pnand %p1151_p5, %p1148_p3 }
  0x21   : > { %1156 = shalt.err (!%p1153_p7)
}
  0x22   : > { %s1157_s9 = scalar_lea.vmem %s1478_s7, 2048  ;;  %p1165_p1 = scmp.lt.s32.totalorder %s1478_s7, %s1478_s7 }
  0x23   : > { %p1158_p9 = scmp.ne.s32.totalorder %s1478_s7, %s1157_s9  ;;  %p1166_p4 = scmp.lt.s32.totalorder %s1157_s9, %s1157_s9 }
  0x25   : > { %p1160_p10 = pnand %p1158_p9, %p1501_p13  ;;  %p1167_p12 = por %p1166_p4, %p1165_p1 }
  0x27   : > { %p1161_p6 = pneg %p1160_p10 }
  0x29   : > { %p1168_p0 = pnand %p1167_p12, %p1161_p6 }
  0x2b   : > { %1171 = shalt.err (!%p1168_p0)
}
  0x2c   : > { %s1381_s11 = smov 128   ;;  %s1382_s13 = smov 8  }
  0x2d   : > { %1026 = dma.hbm_to_vmem [thread:$0]  (!%p1485_p11), %s1943_s1, 2048, %s1478_s7, [#allocation6], %s1381_s11, %s1381_s11, %s1382_s13  }
  0x2e   : > { %s1172_s25 = scalar_lea.hbm %s1945_s3, 16 }
  0x2f   : > { %p1173_p1 = scmp.ne.s32.totalorder %s1945_s3, %s1172_s25  ;;  %p1179_p10 = scmp.lt.u32.totalorder %s1172_s25, %s1945_s3 }
  0x31   : > { %p1175_p4 = pnand %p1173_p1, %p1501_p13 }
  0x33   : > { %p1176_p6 = pneg %p1175_p4 }
  0x35   : > { %p1181_p3 = pnand %p1179_p10, %p1176_p6 }
  0x37   : > { %1184 = shalt.err (!%p1181_p3)
}
  0x38   : > { %s1185_s7 = scalar_lea.vmem %s1489_s10, 16  ;;  %s1192_s29 = scalar_lea.vmem %s1489_s10, 32 }
  0x39   : > { %p1186_p5 = scmp.ne.s32.totalorder %s1489_s10, %s1185_s7  ;;  %p1193_p12 = scmp.lt.s32.totalorder %s1489_s10, %s1489_s10 }
  0x3a   : > { %p1194_p0 = scmp.lt.s32.totalorder %s1192_s29, %s1185_s7 }
  0x3b   : > { %p1188_p7 = pnand %p1186_p5, %p1501_p13 }
  0x3c   : > { %p1195_p1 = por %p1194_p0, %p1193_p12 }
  0x3d   : > { %p1189_p9 = pneg %p1188_p7 }
  0x3f   : > { %p1196_p4 = pnand %p1195_p1, %p1189_p9 }
  0x41   : > { %1199 = shalt.err (!%p1196_p4)
}
  0x42   : > { %1032 = dma.hbm_to_vmem [thread:$0]  (!%p1485_p11), %s1945_s3, 16, %s1489_s10, [#allocation9]  }
  0x43   : > { %s1200_s15 = scalar_lea.hbm %s1944_s2, 16 }
  0x44   : > { %p1201_p6 = scmp.ne.s32.totalorder %s1944_s2, %s1200_s15  ;;  %p1207_p5 = scmp.lt.u32.totalorder %s1200_s15, %s1944_s2 }
  0x46   : > { %p1203_p10 = pnand %p1201_p6, %p1501_p13 }
  0x48   : > { %p1204_p3 = pneg %p1203_p10 }
  0x4a   : > { %p1209_p7 = pnand %p1207_p5, %p1204_p3 }
  0x4c   : > { %1212 = shalt.err (!%p1209_p7)
}
  0x4d   : > { %s1213_s9 = scalar_lea.vmem %s215_s12, 16  ;;  %s1220_s10 = scalar_lea.vmem %s215_s12, 32 }
  0x4e   : > { %p1214_p9 = scmp.ne.s32.totalorder %s215_s12, %s1213_s9  ;;  %p1221_p1 = scmp.lt.s32.totalorder %s215_s12, %s215_s12 }
  0x4f   : > { %p1222_p4 = scmp.lt.s32.totalorder %s1220_s10, %s1213_s9 }
  0x50   : > { %p1216_p12 = pnand %p1214_p9, %p1501_p13 }
  0x51   : > { %p1223_p8 = por %p1222_p4, %p1221_p1 }
  0x52   : > { %p1217_p0 = pneg %p1216_p12 }
  0x54   : > { %p1224_p2 = pnand %p1223_p8, %p1217_p0 }
  0x56   : > { %1227 = shalt.err (!%p1224_p2)
}
  0x57   : > { %1029 = dma.hbm_to_vmem [thread:$0]  (!%p1485_p11), %s1944_s2, 16, %s215_s12, [#allocation6]  }
  0x58   : > { %s1383_s18 = smov [#allocation10]   ;;  %s1228_s15 = scalar_lea.hbm %s1946_s4, 16 }
  0x59   : > { %s236_s11 = sshll.u32 %s1383_s18, 4  ;;  %p1229_p6 = scmp.ne.s32.totalorder %s1946_s4, %s1228_s15  ;;  %s237_s11 = int_to_ptr.vmem [resolvable:$true] %s236_s11 }
  0x5a   : > { %p1235_p10 = scmp.lt.u32.totalorder %s1228_s15, %s1946_s4 }
  0x5b   : > { %p1231_p2 = pnand %p1229_p6, %p1501_p13 }
  0x5d   : > { %p1232_p8 = pneg %p1231_p2 }
  0x5f   : > { %p1237_p3 = pnand %p1235_p10, %p1232_p8 }
  0x61   : > { %1240 = shalt.err (!%p1237_p3)
}
  0x62   : > { %s1241_s12 = scalar_lea.vmem %s237_s11, 16  ;;  %s1248_s9 = scalar_lea.vmem %s237_s11, 32 }
  0x63   : > { %p1242_p5 = scmp.ne.s32.totalorder %s237_s11, %s1241_s12  ;;  %p1249_p12 = scmp.lt.s32.totalorder %s237_s11, %s237_s11 }
  0x64   : > { %p1250_p0 = scmp.lt.s32.totalorder %s1248_s9, %s1241_s12 }
  0x65   : > { %p1244_p7 = pnand %p1242_p5, %p1501_p13 }
  0x66   : > { %p1251_p1 = por %p1250_p0, %p1249_p12 }
  0x67   : > { %p1245_p9 = pneg %p1244_p7 }
  0x69   : > { %p1252_p4 = pnand %p1251_p1, %p1245_p9 }
  0x6b   : > { %1255 = shalt.err (!%p1252_p4)
}
  0x6c   : > { %1035 = dma.hbm_to_vmem [thread:$0]  (!%p1485_p11), %s1946_s4, 16, %s237_s11, [#allocation9]  }
  0x6d   : > { %s35_s24 = sadd.s32 1, %s1372_s22  ;;  %s44_s29 = sadd.s32 1, %s1364_s20 }
  0x6e   : > { %p37_p13 = scmp.ge.s32.totalorder %s35_s24, 2  ;;  %p51_p6 = scmp.ne.s32.totalorder %s1364_s20, %s1360_s19 }
  0x6f   : > { %p52_p2 = scmp.eq.s32.totalorder %s1376_s23, 0  ;;  %p1048_p8 = scmp.lt.s32.totalorder %s1376_s23, 2 }
  0x70   : > { %s1979_s24 = smov (%p37_p13, %s35_s24), 0  ;;  %p1963_p3 = scmp.ne.s32.totalorder %s1956_s27, 0 }
  0x71   : > { %p53_p10 = por %p52_p2, %p51_p6  ;;  %s39_s18 = ssub.s32 %s1372_s22, %s1979_s24 }
  0x72   : > { %p1593_p5 = por %p1963_p3, %p51_p6  ;;  %s247_s13 = sand.u32 1, %s1364_s20  }
  0x73   : > { %p42_p7 = scmp.eq.s32.totalorder %s39_s18, 0  ;;  %s865_s11 = sshll.u32 %s247_s13, 6 }
  0x74   : > { %s899_s14 = sshll.u32 %s1372_s22, 10  ;;  %s251_s27 = scalar_lea.vmem [#allocation2], %s865_s11 }
  0x75   : > { %s1602_s15 = scalar_select %p42_p7, %s1364_s20, %s44_s29  }
  0x76   : > { %s1607_s25 = scalar_lea.hbm %s1942_s0, %s899_s14  ;;  %s260_s6 = sshll.u32 %s251_s27, 4  ;;  %s1615_s6 = int_to_ptr.vmem [resolvable:$true] %s260_s6 }
  0x77   : > { %p1611_p11 = pnand %p1048_p8, %p53_p10  ;;  %s1617_s9 = scalar_lea.sflag [#allocation3], %s247_s13 }
  0x78   : > { %s1256_s10 = scalar_lea.hbm %s1607_s25, 1024  ;;  %s1261_s18 = scalar_lea.hbm %s1942_s0, 2048 }
  0x79   : > { %p1257_p9 = scmp.ne.s32.totalorder %s1607_s25, %s1256_s10  ;;  %p1258_p12 = pneg %p1611_p11 }
  0x7a   : > { %p1262_p4 = scmp.lt.u32.totalorder %s1607_s25, %s1942_s0  ;;  %p1263_p13 = scmp.lt.u32.totalorder %s1261_s18, %s1256_s10 }
  0x7b   : > { %p1259_p0 = pnand %p1258_p12, %p1257_p9  ;;  %p1265_p2 = scmp.lt.u32.totalorder %s1256_s10, %s1607_s25 }
  0x7c   : > { %p1264_p6 = por %p1263_p13, %p1262_p4 }
  0x7d   : > { %p1260_p1 = pneg %p1259_p0 }
  0x7e   : > { %p1266_p8 = por %p1265_p2, %p1264_p6 }
  0x80   : > { %p1267_p10 = pnand %p1266_p8, %p1260_p1 }
  0x82   : > { %1270 = shalt.err (!%p1267_p10)
}
  0x83   : > { %s1271_s13 = scalar_lea.vmem %s1615_s6, 1024  ;;  %s1384_s16 = smov [#allocation2]  }
  0x84   : > { %p1272_p3 = scmp.ne.s32.totalorder %s1615_s6, %s1271_s13  ;;  %s1276_s17 = sshll.u32 %s1384_s16, 4  ;;  %s1277_s17 = int_to_ptr.vmem [resolvable:$false] %s1276_s17 }
  0x85   : > { %s1278_s27 = scalar_lea.vmem %s1277_s17, 2048  ;;  %p1279_p0 = scmp.lt.s32.totalorder %s1615_s6, %s1277_s17 }
  0x86   : > { %p1274_p7 = pnand %p1272_p3, %p1258_p12  ;;  %p1280_p4 = scmp.lt.s32.totalorder %s1278_s27, %s1271_s13 }
  0x88   : > { %p1275_p9 = pneg %p1274_p7  ;;  %p1281_p13 = por %p1280_p4, %p1279_p0 }
  0x8a   : > { %p1282_p6 = pnand %p1281_p13, %p1275_p9 }
  0x8c   : > { %1285 = shalt.err (!%p1282_p6)
}
  0x8d   : > { %s1385_s10 = smov 64   ;;  %s1386_s7 = smov 4  }
  0x8e   : > { %1039 = dma.hbm_to_vmem [thread:$0]  (!%p1611_p11), %s1607_s25, 1024, %s1615_s6, %s1617_s9, %s1385_s10, %s1385_s10, %s1386_s7  }
  0x8f   : > { %p1966_p12 = scmp.ne.s32.totalorder %s1960_s30, 0 }
  0x90   : > { %s1648_s29 = sand.u32 (!%p1966_p12), 1, %s1360_s19   ;;  %p1967_p1 = scmp.ne.s32.totalorder (!%p1966_p12), %s1957_s28, 0 }
  0x91   : > { %272 = sbr.rel (%p1966_p12) target bundleno = 525 (0x20d), region = 40  ;;  %s869_s18 = sshll.u32 (!%p1966_p12), %s1648_s29, 6 }
  0x92   : > { %s275_s11 = scalar_lea.sflag (!%p1966_p12), [#allocation3], %s1648_s29  ;;  %s1654_s14 = scalar_lea.vmem (!%p1966_p12), [#allocation2], %s869_s18 }
  0x98   : > { %1339 = dma.done.wait (%p1967_p1), %s275_s11, 1024  }
  0x99   : > { %1341 = vsyncadd (%p1967_p1), %s275_s11, 4294966272  ;;  %p1968_p11 = scmp.ne.s32.totalorder %s1955_s26, 0 }
  0x9b   : > { %1343 = dma.done.wait (%p1968_p11), [#allocation6], 2064  }
  0x9c   : > { %1345 = vsyncadd (%p1968_p11), [#allocation6], 4294965232 }
  0x9d   : > { %1347 = dma.done.wait (%p1968_p11), [#allocation9], 32  }
  0x9e   : > { %1349 = vsyncadd (%p1968_p11), [#allocation9], 4294967264  ;;  %v918_v0 = vld [vmem:[%s1654_s14] sm:$0xff]   ;;  %v989_v3 = vld [vmem:[%s1654_s14 + $0x8] sm:$0xff]   ;;  %s1840_s26 = scalar_lea.vmem [#allocation11], %s869_s18  ;;  %s916_s28 = sshll.u32 %s1368_s21, 10 }
  0x9f   : > { %v356_v1 = vld [vmem:[#allocation5] sm:$0xff]  ;;  %v919_v2 = vunpack.c.l.bf16 %v918_v0  ;;  %v358_v4 = vld [vmem:[#allocation5 + $0x10] sm:$0xff]  ;;  %v920_v5 = vunpack.c.h.bf16 %v918_v0  ;;  %v357_v6 = vld [vmem:[#allocation5 + $0x8] sm:$0xff]  ;;  %v923_v8 = vunpack.c.l.bf16 %v989_v3  ;;  %v924_v9 = vunpack.c.h.bf16 %v989_v3  ;;  %s730_s30 = sshll.u32 %s1840_s26, 4  ;;  %s1890_s12 = scalar_lea.hbm %s1947_s5, %s916_s28  ;;  %s1892_s30 = int_to_ptr.vmem [resolvable:$true] %s730_s30 }
  0xa0   : > { %v1670_v7 = vld [vmem:[#allocation7] ss:$0 sm:$0xff]  ;;  %v359_v10 = vld [vmem:[#allocation5 + $0x18] sm:$0xff]  ;;  %v990_v11 = vld [vmem:[%s1654_s14 + $0x10] sm:$0xff]   ;;  %s715_s9 = scalar_lea.sflag [#allocation4], %s1648_s29  ;;  %s1286_s21 = scalar_lea.vmem %s1892_s30, 1024 }
  0xa1   : > { %v372_v12 = vadd.f32 %v919_v2, %v356_v1  ;;  %v373_v13 = vadd.f32 %v920_v5, %v357_v6  ;;  %v927_v14 = vunpack.c.l.bf16 %v990_v11  ;;  %v374_v15 = vadd.f32 %v923_v8, %v358_v4  ;;  %v360_v17 = vld [vmem:[#allocation5 + $0x20] sm:$0xff]  ;;  %v991_v19 = vld [vmem:[%s1654_s14 + $0x18] sm:$0xff]   ;;  %v361_v21 = vld [vmem:[#allocation5 + $0x28] sm:$0xff]  ;;  %p1287_p2 = scmp.ne.s32.totalorder %s1892_s30, %s1286_s21  ;;  %s1387_s13 = smov [#allocation11]  }
  0xa2   : > { %v375_v16 = vadd.f32 %v924_v9, %v359_v10  ;;  %v928_v18 = vunpack.c.h.bf16 %v990_v11  ;;  %v931_v25 = vunpack.c.l.bf16 %v991_v19  ;;  %v362_v28 = vld [vmem:[#allocation5 + $0x30] sm:$0xff]  ;;  %v932_v29 = vunpack.c.h.bf16 %v991_v19  ;;  %v992_v30 = vld [vmem:[%s1654_s14 + $0x20] sm:$0xff]   ;;  %v363_v31 = vld [vmem:[#allocation5 + $0x38] sm:$0xff]  ;;  %s1290_s16 = sshll.u32 %s1387_s13, 4  ;;  %s1291_s16 = int_to_ptr.vmem [resolvable:$false] %s1290_s16 }
  0xa3   : > { %v1675_v20 = vadd.f32 %v1670_v7, %v372_v12  ;;  %v1678_v22 = vadd.f32 %v1670_v7, %v374_v15  ;;  %v1682_v23 = vadd.f32 %v1670_v7, %v373_v13  ;;  %v376_v24 = vadd.f32 %v927_v14, %v360_v17  ;;  %v364_v37 = vld [vmem:[#allocation5 + $0x40] sm:$0xff]  ;;  %v993_v39 = vld [vmem:[%s1654_s14 + $0x28] sm:$0xff]   ;;  %v366_v46 = vld [vmem:[#allocation5 + $0x50] sm:$0xff]  ;;  %p1288_p8 = pnand %p1287_p2, %p1593_p5  ;;  %s1292_s17 = scalar_lea.vmem %s1291_s16, 2048 }
  0xa4   : > { %v1686_v26 = vadd.f32 %v1670_v7, %v375_v16  ;;  %v377_v27 = vadd.f32 %v928_v18, %v361_v21  ;;  %v378_v33 = vadd.f32 %v931_v25, %v362_v28  ;;  %v935_v34 = vunpack.c.l.bf16 %v992_v30  ;;  %v365_v40 = vld [vmem:[#allocation5 + $0x48] sm:$0xff]  ;;  %v994_v48 = vld [vmem:[%s1654_s14 + $0x30] sm:$0xff]   ;;  %v367_v49 = vld [vmem:[#allocation5 + $0x58] sm:$0xff]  ;;  %p1293_p3 = scmp.lt.s32.totalorder %s1892_s30, %s1291_s16  ;;  %p1294_p7 = scmp.lt.s32.totalorder %s1292_s17, %s1286_s21 }
  0xa5   : > { %411 = vadd.xlane.f32.xlu0 %v1675_v20  ;;  %415 = vadd.xlane.f32.xlu1 %v1678_v22  ;;  %v1691_v32 = vadd.f32 %v1670_v7, %v376_v24  ;;  %v379_v36 = vadd.f32 %v932_v29, %v363_v31  ;;  %v936_v38 = vunpack.c.h.bf16 %v992_v30  ;;  %v939_v43 = vunpack.c.l.bf16 %v993_v39  ;;  %v368_v55 = vld [vmem:[#allocation5 + $0x60] sm:$0xff]  ;;  %v995_v57 = vld [vmem:[%s1654_s14 + $0x38] sm:$0xff]   ;;  %v369_v58 = vld [vmem:[#allocation5 + $0x68] sm:$0xff]  ;;  %p1289_p10 = pneg %p1288_p8 }
  0xa6   : > { %v1695_v35 = vadd.f32 %v1670_v7, %v377_v27  ;;  %v1700_v41 = vadd.f32 %v1670_v7, %v378_v33  ;;  %v380_v42 = vadd.f32 %v935_v34, %v364_v37  ;;  %v940_v47 = vunpack.c.h.bf16 %v993_v39  ;;  %v370_v0 = vld [vmem:[#allocation5 + $0x70] sm:$0xff]  ;;  %v371_v2 = vld [vmem:[#allocation5 + $0x78] sm:$0xff]  ;;  %p1295_p9 = por %p1294_p7, %p1293_p3 }
  0xa7   : > { %v1704_v44 = vadd.f32 %v1670_v7, %v379_v36  ;;  %v381_v45 = vadd.f32 %v936_v38, %v365_v40  ;;  %v382_v51 = vadd.f32 %v939_v43, %v366_v46  ;;  %v943_v52 = vunpack.c.l.bf16 %v994_v48 }
  0xa8   : > { %v1709_v50 = vadd.f32 %v1670_v7, %v380_v42  ;;  %v383_v54 = vadd.f32 %v940_v47, %v367_v49  ;;  %v944_v56 = vunpack.c.h.bf16 %v994_v48  ;;  %v947_v61 = vunpack.c.l.bf16 %v995_v57  ;;  %p1296_p0 = pnand %p1295_p9, %p1289_p10 }
  0xa9   : > { %413 = vadd.xlane.f32.xlu0 %v1682_v23  ;;  %417 = vadd.xlane.f32.xlu1 %v1686_v26  ;;  %v1713_v53 = vadd.f32 %v1670_v7, %v381_v45  ;;  %v1718_v59 = vadd.f32 %v1670_v7, %v382_v51  ;;  %v384_v60 = vadd.f32 %v943_v52, %v368_v55  ;;  %v948_v1 = vunpack.c.h.bf16 %v995_v57 }
  0xaa   : > { %v1722_v62 = vadd.f32 %v1670_v7, %v383_v54  ;;  %v385_v63 = vadd.f32 %v944_v56, %v369_v58  ;;  %v386_v4 = vadd.f32 %v947_v61, %v370_v0 }
  0xab   : > { %v1726_v3 = vadd.f32 %v1670_v7, %v384_v60  ;;  %v387_v6 = vadd.f32 %v948_v1, %v371_v2 }
  0xac   : > { %v1730_v5 = vadd.f32 %v1670_v7, %v385_v63  ;;  %v1734_v8 = vadd.f32 %v1670_v7, %v386_v4 }
  0xad   : > { %419 = vadd.xlane.f32.xlu0 %v1691_v32  ;;  %421 = vadd.xlane.f32.xlu1 %v1695_v35  ;;  %v1738_v9 = vadd.f32 %v1670_v7, %v387_v6 }
  0xb1   : > { %423 = vadd.xlane.f32.xlu0 %v1700_v41  ;;  %425 = vadd.xlane.f32.xlu1 %v1704_v44 }
  0xb5   : > { %427 = vadd.xlane.f32.xlu0 %v1709_v50  ;;  %429 = vadd.xlane.f32.xlu1 %v1713_v53 }
  0xb9   : > { %431 = vadd.xlane.f32.xlu0 %v1718_v59  ;;  %433 = vadd.xlane.f32.xlu1 %v1722_v62 }
  0xbd   : > { %435 = vadd.xlane.f32.xlu0 %v1726_v3  ;;  %437 = vadd.xlane.f32.xlu1 %v1730_v5 }
  0xc1   : > { %439 = vadd.xlane.f32.xlu0 %v1734_v8  ;;  %441 = vadd.xlane.f32.xlu1 %v1738_v9 }
 0x132   : > { %v412_v10 = vpop.xlane.xlu0 %411  ;;  %v416_v12 = vpop.xlane.xlu1 %415 }
 0x133   : > { %v444_v11 = vmul.f32 0.0078125, %v412_v10  ;;  %v446_v13 = vmul.f32 0.0078125, %v416_v12 }
 0x135   : > { %v1743_v14 = vsub.f32 %v1675_v20, %v444_v11  ;;  %v1746_v15 = vsub.f32 %v1678_v22, %v446_v13 }
 0x136   : > { %v414_v16 = vpop.xlane.xlu0 %413  ;;  %v418_v18 = vpop.xlane.xlu1 %417 }
 0x137   : > { %v445_v17 = vmul.f32 0.0078125, %v414_v16  ;;  %v476_v7 = vmul.f32 %v1743_v14, %v1743_v14  ;;  %v447_v19 = vmul.f32 0.0078125, %v418_v18  ;;  %v478_v24 = vmul.f32 %v1746_v15, %v1746_v15 }
 0x139   : > { %v1751_v21 = vsub.f32 %v1682_v23, %v445_v17  ;;  %492 = vadd.xlane.f32.xlu0 %v476_v7  ;;  %v1756_v20 = vsub.f32 %v1686_v26, %v447_v19 }
 0x13a   : > { %v420_v25 = vpop.xlane.xlu0 %419  ;;  %v422_v28 = vpop.xlane.xlu1 %421 }
 0x13b   : > { %v448_v22 = vmul.f32 0.0078125, %v420_v25  ;;  %v477_v27 = vmul.f32 %v1751_v21, %v1751_v21  ;;  %v449_v29 = vmul.f32 0.0078125, %v422_v28  ;;  %v479_v23 = vmul.f32 %v1756_v20, %v1756_v20 }
 0x13d   : > { %v1761_v30 = vsub.f32 %v1691_v32, %v448_v22  ;;  %496 = vadd.xlane.f32.xlu0 %v478_v24  ;;  %494 = vadd.xlane.f32.xlu1 %v477_v27  ;;  %v1766_v31 = vsub.f32 %v1695_v35, %v449_v29 }
 0x13e   : > { %v424_v26 = vpop.xlane.xlu0 %423  ;;  %v426_v36 = vpop.xlane.xlu1 %425 }
 0x13f   : > { %v450_v33 = vmul.f32 0.0078125, %v424_v26  ;;  %v480_v34 = vmul.f32 %v1761_v30, %v1761_v30  ;;  %v451_v37 = vmul.f32 0.0078125, %v426_v36  ;;  %v481_v32 = vmul.f32 %v1766_v31, %v1766_v31 }
 0x141   : > { %v1771_v38 = vsub.f32 %v1700_v41, %v450_v33  ;;  %498 = vadd.xlane.f32.xlu1 %v479_v23  ;;  %500 = vadd.xlane.f32.xlu0 %v480_v34  ;;  %v1776_v39 = vsub.f32 %v1704_v44, %v451_v37 }
 0x142   : > { %v428_v35 = vpop.xlane.xlu0 %427  ;;  %v430_v43 = vpop.xlane.xlu1 %429 }
 0x143   : > { %v452_v40 = vmul.f32 0.0078125, %v428_v35  ;;  %v482_v42 = vmul.f32 %v1771_v38, %v1771_v38  ;;  %v453_v45 = vmul.f32 0.0078125, %v430_v43  ;;  %v483_v41 = vmul.f32 %v1776_v39, %v1776_v39  ;;  %v1823_v43 = vld [vmem:[#allocation8] ss:$0 sm:$0xff] }
 0x145   : > { %v1781_v46 = vsub.f32 %v1709_v50, %v452_v40  ;;  %502 = vadd.xlane.f32.xlu1 %v481_v32  ;;  %504 = vadd.xlane.f32.xlu0 %v482_v42  ;;  %v1786_v47 = vsub.f32 %v1713_v53, %v453_v45 }
 0x146   : > { %v432_v44 = vpop.xlane.xlu0 %431  ;;  %v434_v51 = vpop.xlane.xlu1 %433 }
 0x147   : > { %v454_v48 = vmul.f32 0.0078125, %v432_v44  ;;  %v484_v49 = vmul.f32 %v1781_v46, %v1781_v46  ;;  %v455_v52 = vmul.f32 0.0078125, %v434_v51  ;;  %v485_v50 = vmul.f32 %v1786_v47, %v1786_v47 }
 0x149   : > { %v1791_v54 = vsub.f32 %v1718_v59, %v454_v48  ;;  %506 = vadd.xlane.f32.xlu1 %v483_v41  ;;  %508 = vadd.xlane.f32.xlu0 %v484_v49  ;;  %v1796_v55 = vsub.f32 %v1722_v62, %v455_v52 }
 0x14a   : > { %v436_v53 = vpop.xlane.xlu0 %435  ;;  %v438_v58 = vpop.xlane.xlu1 %437 }
 0x14b   : > { %v456_v56 = vmul.f32 0.0078125, %v436_v53  ;;  %v486_v57 = vmul.f32 %v1791_v54, %v1791_v54  ;;  %v457_v60 = vmul.f32 0.0078125, %v438_v58  ;;  %v487_v59 = vmul.f32 %v1796_v55, %v1796_v55 }
 0x14d   : > { %v1801_v61 = vsub.f32 %v1726_v3, %v456_v56  ;;  %510 = vadd.xlane.f32.xlu1 %v485_v50  ;;  %512 = vadd.xlane.f32.xlu0 %v486_v57  ;;  %v1806_v63 = vsub.f32 %v1730_v5, %v457_v60  ;;  %v1827_v57 = vld [vmem:[#allocation10] ss:$0 sm:$0xff] }
 0x14e   : > { %v440_v62 = vpop.xlane.xlu0 %439  ;;  %v442_v2 = vpop.xlane.xlu1 %441 }
 0x14f   : > { %v458_v0 = vmul.f32 0.0078125, %v440_v62  ;;  %v488_v1 = vmul.f32 %v1801_v61, %v1801_v61  ;;  %v459_v4 = vmul.f32 0.0078125, %v442_v2  ;;  %v489_v3 = vmul.f32 %v1806_v63, %v1806_v63 }
 0x151   : > { %v1811_v6 = vsub.f32 %v1734_v8, %v458_v0  ;;  %514 = vadd.xlane.f32.xlu1 %v487_v59  ;;  %516 = vadd.xlane.f32.xlu0 %v488_v1  ;;  %v1816_v10 = vsub.f32 %v1738_v9, %v459_v4 }
 0x153   : > { %v490_v5 = vmul.f32 %v1811_v6, %v1811_v6  ;;  %v491_v11 = vmul.f32 %v1816_v10, %v1816_v10 }
 0x155   : > { %518 = vadd.xlane.f32.xlu1 %v489_v3  ;;  %520 = vadd.xlane.f32.xlu0 %v490_v5 }
 0x159   : > { %522 = vadd.xlane.f32.xlu1 %v491_v11 }
 0x1c6   : > { %v493_v12 = vpop.xlane.xlu0 %492 }
 0x1c7   : > { %v524_v8 = vmul.f32 0.0078125, %v493_v12 }
 0x1c9   : > { %v540_v13 = vadd.f32 1e-12, %v524_v8 }
 0x1ca   : > { %v495_v16 = vpop.xlane.xlu1 %494  ;;  %v497_v17 = vpop.xlane.xlu0 %496 }
 0x1cb   : > { %1112 = vrsqrt.f32 %v540_v13  ;;  %v525_v7 = vmul.f32 0.0078125, %v495_v16  ;;  %v526_v18 = vmul.f32 0.0078125, %v497_v17 }
 0x1cd   : > { %v541_v19 = vadd.f32 1e-12, %v525_v7  ;;  %v542_v9 = vadd.f32 1e-12, %v526_v18 }
 0x1ce   : > { %v499_v24 = vpop.xlane.xlu1 %498  ;;  %v501_v25 = vpop.xlane.xlu0 %500 }
 0x1cf   : > { %1114 = vrsqrt.f32 %v541_v19  ;;  %v527_v22 = vmul.f32 0.0078125, %v499_v24  ;;  %v528_v27 = vmul.f32 0.0078125, %v501_v25 }
 0x1d0   : > { %1116 = vrsqrt.f32 %v542_v9 }
 0x1d1   : > { %v543_v28 = vadd.f32 1e-12, %v527_v22  ;;  %v544_v29 = vadd.f32 1e-12, %v528_v27 }
 0x1d2   : > { %v503_v23 = vpop.xlane.xlu1 %502  ;;  %v505_v26 = vpop.xlane.xlu0 %504 }
 0x1d3   : > { %1118 = vrsqrt.f32 %v543_v28  ;;  %v529_v33 = vmul.f32 0.0078125, %v503_v23  ;;  %v530_v34 = vmul.f32 0.0078125, %v505_v26 }
 0x1d4   : > { %1120 = vrsqrt.f32 %v544_v29 }
 0x1d5   : > { %v1113_v36 = vpop.eup %1112  ;;  %v545_v37 = vadd.f32 1e-12, %v529_v33  ;;  %v546_v32 = vadd.f32 1e-12, %v530_v34 }
 0x1d6   : > { %v572_v35 = vmul.f32 %v1113_v36, %v1743_v14  ;;  %v507_v40 = vpop.xlane.xlu1 %506  ;;  %v509_v42 = vpop.xlane.xlu0 %508 }
 0x1d7   : > { %1122 = vrsqrt.f32 %v545_v37  ;;  %v531_v45 = vmul.f32 0.0078125, %v507_v40  ;;  %v532_v41 = vmul.f32 0.0078125, %v509_v42 }
 0x1d8   : > { %1124 = vrsqrt.f32 %v546_v32  ;;  %v595_v52 = vmul.f32 %v1823_v43, %v572_v35 }
 0x1d9   : > { %v1115_v44 = vpop.eup %1114  ;;  %v547_v48 = vadd.f32 1e-12, %v531_v45  ;;  %v548_v49 = vadd.f32 1e-12, %v532_v41 }
 0x1da   : > { %v1117_v51 = vpop.eup %1116  ;;  %v573_v50 = vmul.f32 %v1115_v44, %v1751_v21  ;;  %v511_v53 = vpop.xlane.xlu1 %510  ;;  %v618_v4 = vadd.f32 %v1827_v57, %v595_v52 }
 0x1db   : > { %v513_v56 = vpop.xlane.xlu0 %512  ;;  %v574_v14 = vmul.f32 %v1117_v51, %v1746_v15  ;;  %1126 = vrsqrt.f32 %v547_v48  ;;  %v533_v58 = vmul.f32 0.0078125, %v511_v53 }
 0x1dc   : > { %v534_v60 = vmul.f32 0.0078125, %v513_v56  ;;  %v596_v59 = vmul.f32 %v1823_v43, %v573_v50  ;;  %1128 = vrsqrt.f32 %v548_v49 }
 0x1dd   : > { %v1119_v62 = vpop.eup %1118  ;;  %v549_v0 = vadd.f32 1e-12, %v533_v58  ;;  %v597_v3 = vmul.f32 %v1823_v43, %v574_v14 }
 0x1de   : > { %v550_v1 = vadd.f32 1e-12, %v534_v60  ;;  %v1121_v2 = vpop.eup %1120  ;;  %v619_v21 = vadd.f32 %v1827_v57, %v596_v59  ;;  %v575_v5 = vmul.f32 %v1119_v62, %v1756_v20  ;;  %v515_v15 = vpop.xlane.xlu1 %514 }
 0x1df   : > { %v517_v11 = vpop.xlane.xlu0 %516  ;;  %v576_v12 = vmul.f32 %v1121_v2, %v1761_v30  ;;  %1130 = vrsqrt.f32 %v549_v0  ;;  %v535_v8 = vmul.f32 0.0078125, %v515_v15  ;;  %v620_v20 = vadd.f32 %v1827_v57, %v597_v3 }
 0x1e0   : > { %v952_v13 = vpack.c.bf16 %v619_v21, %v618_v4  ;;  %v598_v16 = vmul.f32 %v1823_v43, %v575_v5  ;;  %1132 = vrsqrt.f32 %v550_v1  ;;  %v536_v17 = vmul.f32 0.0078125, %v517_v11 }
 0x1e1   : > { %v1123_v7 = vpop.eup %1122  ;;  %v599_v18 = vmul.f32 %v1823_v43, %v576_v12  ;;  %v551_v19 = vadd.f32 1e-12, %v535_v8 }
 0x1e2   : > { %v1125_v9 = vpop.eup %1124  ;;  %953 = vst [vmem:[%s1840_s26] sm:$0xff] %v952_v13   ;;  %v621_v30 = vadd.f32 %v1827_v57, %v598_v16  ;;  %v577_v24 = vmul.f32 %v1123_v7, %v1766_v31  ;;  %v552_v25 = vadd.f32 1e-12, %v536_v17  ;;  %v519_v22 = vpop.xlane.xlu1 %518 }
 0x1e3   : > { %v521_v27 = vpop.xlane.xlu0 %520  ;;  %v578_v28 = vmul.f32 %v1125_v9, %v1771_v38  ;;  %1134 = vrsqrt.f32 %v551_v19  ;;  %v537_v29 = vmul.f32 0.0078125, %v519_v22  ;;  %v622_v36 = vadd.f32 %v1827_v57, %v599_v18 }
 0x1e4   : > { %v957_v23 = vpack.c.bf16 %v621_v30, %v620_v20  ;;  %v600_v26 = vmul.f32 %v1823_v43, %v577_v24  ;;  %1136 = vrsqrt.f32 %v552_v25  ;;  %v538_v33 = vmul.f32 0.0078125, %v521_v27 }
 0x1e5   : > { %v1127_v34 = vpop.eup %1126  ;;  %v553_v37 = vadd.f32 1e-12, %v537_v29  ;;  %v601_v35 = vmul.f32 %v1823_v43, %v578_v28 }
 0x1e6   : > { %v1129_v32 = vpop.eup %1128  ;;  %996 = vst [vmem:[%s1840_s26 + $0x8] sm:$0xff] %v957_v23   ;;  %v623_v31 = vadd.f32 %v1827_v57, %v600_v26  ;;  %v579_v38 = vmul.f32 %v1127_v34, %v1776_v39  ;;  %v554_v40 = vadd.f32 1e-12, %v538_v33  ;;  %v523_v42 = vpop.xlane.xlu1 %522 }
 0x1e7   : > { %v580_v45 = vmul.f32 %v1129_v32, %v1781_v46  ;;  %1138 = vrsqrt.f32 %v553_v37  ;;  %v539_v41 = vmul.f32 0.0078125, %v523_v42  ;;  %v624_v50 = vadd.f32 %v1827_v57, %v601_v35 }
 0x1e8   : > { %v962_v44 = vpack.c.bf16 %v623_v31, %v622_v36  ;;  %v602_v48 = vmul.f32 %v1823_v43, %v579_v38  ;;  %1140 = vrsqrt.f32 %v554_v40 }
 0x1e9   : > { %v1131_v49 = vpop.eup %1130  ;;  %v555_v51 = vadd.f32 1e-12, %v539_v41  ;;  %v603_v39 = vmul.f32 %v1823_v43, %v580_v45 }
 0x1ea   : > { %v1133_v52 = vpop.eup %1132  ;;  %997 = vst [vmem:[%s1840_s26 + $0x10] sm:$0xff] %v962_v44   ;;  %v625_v53 = vadd.f32 %v1827_v57, %v602_v48  ;;  %v581_v56 = vmul.f32 %v1131_v49, %v1786_v47 }
 0x1eb   : > { %v582_v46 = vmul.f32 %v1133_v52, %v1791_v54  ;;  %1142 = vrsqrt.f32 %v555_v51  ;;  %v626_v62 = vadd.f32 %v1827_v57, %v603_v39 }
 0x1ec   : > { %v967_v14 = vpack.c.bf16 %v625_v53, %v624_v50  ;;  %v604_v58 = vmul.f32 %v1823_v43, %v581_v56 }
 0x1ed   : > { %v1135_v60 = vpop.eup %1134  ;;  %v605_v1 = vmul.f32 %v1823_v43, %v582_v46 }
 0x1ee   : > { %v1137_v59 = vpop.eup %1136  ;;  %998 = vst [vmem:[%s1840_s26 + $0x18] sm:$0xff] %v967_v14   ;;  %v627_v0 = vadd.f32 %v1827_v57, %v604_v58  ;;  %v583_v2 = vmul.f32 %v1135_v60, %v1796_v55 }
 0x1ef   : > { %v584_v47 = vmul.f32 %v1137_v59, %v1801_v61  ;;  %v628_v5 = vadd.f32 %v1827_v57, %v605_v1 }
 0x1f0   : > { %v972_v54 = vpack.c.bf16 %v627_v0, %v626_v62  ;;  %v606_v4 = vmul.f32 %v1823_v43, %v583_v2 }
 0x1f1   : > { %v1139_v21 = vpop.eup %1138  ;;  %v607_v11 = vmul.f32 %v1823_v43, %v584_v47 }
 0x1f2   : > { %v1141_v3 = vpop.eup %1140  ;;  %999 = vst [vmem:[%s1840_s26 + $0x20] sm:$0xff] %v972_v54   ;;  %v629_v15 = vadd.f32 %v1827_v57, %v606_v4  ;;  %v585_v12 = vmul.f32 %v1139_v21, %v1806_v63 }
 0x1f3   : > { %v586_v55 = vmul.f32 %v1141_v3, %v1811_v6  ;;  %v630_v16 = vadd.f32 %v1827_v57, %v607_v11 }
 0x1f4   : > { %v977_v61 = vpack.c.bf16 %v629_v15, %v628_v5  ;;  %v608_v8 = vmul.f32 %v1823_v43, %v585_v12 }
 0x1f5   : > { %v1143_v13 = vpop.eup %1142  ;;  %v609_v7 = vmul.f32 %v1823_v43, %v586_v55 }
 0x1f6   : > { %1000 = vst [vmem:[%s1840_s26 + $0x28] sm:$0xff] %v977_v61   ;;  %v631_v17 = vadd.f32 %v1827_v57, %v608_v8  ;;  %v587_v18 = vmul.f32 %v1143_v13, %v1816_v10 }
 0x1f7   : > { %v632_v6 = vadd.f32 %v1827_v57, %v609_v7 }
 0x1f8   : > { %v982_v19 = vpack.c.bf16 %v631_v17, %v630_v16  ;;  %v610_v63 = vmul.f32 %v1823_v43, %v587_v18 }
 0x1fa   : > { %1001 = vst [vmem:[%s1840_s26 + $0x30] sm:$0xff] %v982_v19   ;;  %v633_v9 = vadd.f32 %v1827_v57, %v610_v63 }
 0x1fc   : > { %v987_v10 = vpack.c.bf16 %v633_v9, %v632_v6 }
 0x1fe   : > { %1002 = vst [vmem:[%s1840_s26 + $0x38] sm:$0xff] %v987_v10  }
 0x1ff   : > { %1299 = shalt.err (!%p1296_p0)
}
 0x200   : > { %s1300_s27 = scalar_lea.hbm %s1890_s12, 1024  ;;  %s1304_s18 = scalar_lea.hbm %s1947_s5, 2048 }
 0x201   : > { %p1301_p4 = scmp.ne.s32.totalorder %s1890_s12, %s1300_s27  ;;  %p1305_p12 = scmp.lt.u32.totalorder %s1890_s12, %s1947_s5 }
 0x202   : > { %p1306_p1 = scmp.lt.u32.totalorder %s1304_s18, %s1300_s27  ;;  %p1308_p2 = scmp.lt.u32.totalorder %s1300_s27, %s1890_s12 }
 0x203   : > { %p1302_p13 = pnand %p1301_p4, %p1593_p5 }
 0x204   : > { %p1307_p11 = por %p1306_p1, %p1305_p12 }
 0x205   : > { %p1303_p6 = pneg %p1302_p13 }
 0x206   : > { %p1309_p8 = por %p1308_p2, %p1307_p11 }
 0x208   : > { %p1310_p10 = pnand %p1309_p8, %p1303_p6 }
 0x20a   : > { %1313 = shalt.err (!%p1310_p10)
}
 0x20b   : > { %s1388_s26 = smov 64   ;;  %s1389_s28 = smov 4  }
 0x20c   : > { %1021 = dma.vmem_to_hbm [thread:$0]  (%p1593_p5), %s1892_s30, 1024, %s1890_s12, %s715_s9, %s1388_s26, %s1388_s26, %s1389_s28  }
 0x20d PF: > { %s1969_s25 = sld [smem:[#allocation16_spill]]  ;;  %s1970_s6 = sld [smem:[#allocation17_spill]] }
 0x20e   : > { %p1972_p7 = scmp.ge.s32.totalorder %s1376_s23, 2 }
 0x213   : > { %s745_s21 = sand.u32 1, %s1969_s25   ;;  %p1971_p3 = scmp.ne.s32.totalorder %s1970_s6, 0 }
 0x214   : > { %s746_s13 = scalar_lea.sflag [#allocation4], %s745_s21 }
 0x215   : > { %p1041_p9 = pnand %p1972_p7, %p1971_p3 }
 0x217   : > { %1351 = dma.done.wait (!%p1041_p9), %s746_s13, 1024  }
 0x218   : > { %1353 = vsyncadd (!%p1041_p9), %s746_s13, 4294966272  ;;  %s23_s23 = sadd.s32 1, %s1376_s23   ;;  %s1973_s18 = smov %s1360_s19 }
 0x219   : > { %p20_p0 = scmp.ge.s32.totalorder %s23_s23, 4   ;;  %s1974_s19 = smov %s1364_s20 }
 0x21a   : > { %s1975_s20 = smov %s1602_s15  ;;  %s1976_s21 = smov %s1372_s22 }
 0x21b   : > { %s1977_s22 = smov %s1979_s24  ;;  %22 = sbr.rel (!%p20_p0) target bundleno = 8 (0x8), region = 102 }
 0x222   :  { %751 = vsyncpa [#allocation3], 1 }
 0x223   :  { %753 = vsyncpa [#allocation3 + $0x1], 1 }
 0x224   :  { %754 = vsyncpa [#allocation6], 1 }
 0x225   :  { %755 = vsyncpa [#allocation9], 1 }
 0x226   :  { %756 = vsyncpa [#allocation4], 1 }
 0x227   :  { %758 = vsyncpa [#allocation4 + $0x1], 1 }

// kernel: bookbert_forward.18
= control target key start
LH: loop header
LB: loop body
LE: loop exit
PB: predicated region body
PF: predicated region fallthrough
CT: control target
= control target key end

     0   :  { %8 = vsyncpa [#allocation3], 0  ;;  %s1742_s0 = inlined_call_operand.hbm [shape: bf16[256,128], index: 0, kind: input, shape index: {}]   ;;  %s1743_s1 = inlined_call_operand.hbm [shape: bf16[128,384], index: 1, kind: input, shape index: {}]   ;;  %s1744_s2 = inlined_call_operand.hbm [shape: f32[1,384], index: 2, kind: input, shape index: {}]   ;;  %s1745_s3 = inlined_call_operand.hbm [shape: bf16[256,384], index: 3, kind: output, shape index: {}]  }
   0x1   :  { %9 = vsyncpa [#allocation6], 0 }
   0x2   :  { %10 = vsyncpa [#allocation4], 0  ;;  %s1523_s12 = smov [#allocation5]   ;;  %s1429_s16 = scalar_lea.hbm %s1743_s1, 3072 }
   0x3   :  { %s28_s13 = sshll.u32 %s1523_s12, 4  ;;  %p1430_p0 = scmp.ne.s32.totalorder %s1743_s1, %s1429_s16  ;;  %s29_s13 = int_to_ptr.vmem [resolvable:$true] %s28_s13 }
   0x4   :  { %p1433_p1 = scmp.lt.u32.totalorder %s1429_s16, %s1743_s1 }
   0x6   :  { %p1435_p2 = pnand %p1433_p1, %p1430_p0 }
   0x8   :  { %1438 = shalt.err (!%p1435_p2)
}
   0x9   :  { %s1439_s21 = scalar_lea.vmem %s29_s13, 3072  ;;  %p1444_p4 = scmp.lt.s32.totalorder %s29_s13, %s29_s13 }
   0xa   :  { %p1440_p3 = scmp.ne.s32.totalorder %s29_s13, %s1439_s21  ;;  %p1445_p5 = scmp.lt.s32.totalorder %s1439_s21, %s1439_s21 }
   0xc   :  { %p1446_p6 = por %p1445_p5, %p1444_p4 }
   0xe   :  { %p1447_p7 = pnand %p1446_p6, %p1440_p3 }
  0x10   :  { %1450 = shalt.err (!%p1447_p7)
}
  0x11   :  { %s1524_s22 = smov 192   ;;  %s1525_s23 = smov 12  }
  0x12   :  { %34 = dma.hbm_to_vmem [thread:$0]  %s1743_s1, 3072, %s29_s13, [#allocation6], %s1524_s22, %s1524_s22, %s1525_s23  }
  0x13   :  { %s1526_s26 = smov [#allocation2]   ;;  %s1451_s30 = scalar_lea.hbm %s1742_s0, 2048 }
  0x14   :  { %s16_s27 = sshll.u32 %s1526_s26, 4  ;;  %p1452_p8 = scmp.ne.s32.totalorder %s1742_s0, %s1451_s30  ;;  %s17_s27 = int_to_ptr.vmem [resolvable:$true] %s16_s27 }
  0x15   :  { %p1455_p9 = scmp.lt.u32.totalorder %s1451_s30, %s1742_s0 }
  0x17   :  { %p1457_p10 = pnand %p1455_p9, %p1452_p8 }
  0x19   :  { %1460 = shalt.err (!%p1457_p10)
}
  0x1a   :  { %s1461_s8 = scalar_lea.vmem %s17_s27, 2048  ;;  %p1466_p12 = scmp.lt.s32.totalorder %s17_s27, %s17_s27 }
  0x1b   :  { %p1462_p11 = scmp.ne.s32.totalorder %s17_s27, %s1461_s8  ;;  %p1467_p13 = scmp.lt.s32.totalorder %s1461_s8, %s1461_s8 }
  0x1d   :  { %p1468_p0 = por %p1467_p13, %p1466_p12 }
  0x1f   :  { %p1469_p1 = pnand %p1468_p0, %p1462_p11 }
  0x21   :  { %1472 = shalt.err (!%p1469_p1)
}
  0x22   :  { %s1527_s1 = smov 64   ;;  %s1528_s9 = smov 4  }
  0x23   :  { %22 = dma.hbm_to_vmem [thread:$0]  %s1742_s0, 2048, %s17_s27, [#allocation3], %s1527_s1, %s1527_s1, %s1528_s9  }
  0x24   :  { %s1529_s12 = smov [#allocation7]   ;;  %s1473_s16 = scalar_lea.hbm %s1744_s2, 48 }
  0x25   :  { %s41_s13 = sshll.u32 %s1529_s12, 4  ;;  %p1474_p2 = scmp.ne.s32.totalorder %s1744_s2, %s1473_s16  ;;  %s42_s13 = int_to_ptr.vmem [resolvable:$true] %s41_s13 }
  0x26   :  { %p1477_p3 = scmp.lt.u32.totalorder %s1473_s16, %s1744_s2 }
  0x28   :  { %p1479_p4 = pnand %p1477_p3, %p1474_p2 }
  0x2a   :  { %1482 = shalt.err (!%p1479_p4)
}
  0x2b   :  { %s1483_s21 = scalar_lea.vmem %s42_s13, 48  ;;  %s1487_s0 = scalar_lea.vmem %s42_s13, 64 }
  0x2c   :  { %p1484_p5 = scmp.ne.s32.totalorder %s42_s13, %s1483_s21  ;;  %p1488_p6 = scmp.lt.s32.totalorder %s42_s13, %s42_s13 }
  0x2d   :  { %p1489_p7 = scmp.lt.s32.totalorder %s1487_s0, %s1483_s21 }
  0x2f   :  { %p1490_p8 = por %p1489_p7, %p1488_p6 }
  0x31   :  { %p1491_p9 = pnand %p1490_p8, %p1484_p5 }
  0x33   :  { %1494 = shalt.err (!%p1491_p9)
}
  0x34   :  { %44 = dma.hbm_to_vmem [thread:$0]  %s1744_s2, 48, %s42_s13, [#allocation6]  }
  0x35   :  { %1517 = dma.done.wait [#allocation3], 2048  }
  0x36   :  { %1518 = vsyncadd [#allocation3], 4294965248 }
  0x37   :  { %1519 = dma.done.wait [#allocation6], 3120  }
  0x38   :  { %1520 = vsyncadd [#allocation6], 4294964176  ;;  %v1530_v0 = vmov 0   ;;  %v1381_v1 = vld [vmem:[#allocation5 + $0x4] ss:$12 sps:$4 sm:$0xff]   ;;  %v1409_v22 = vld [vmem:[#allocation2 + $0x8] sm:$0xff]   ;;  %v121_v41 = vlaneseq }
  0x39   :  { %392 = vmatprep.mubr.bf16.mxu0 %v1530_v0  ;;  %512 = vmatprep.mubr.bf16.mxu1 %v1530_v0  ;;  %v1383_v2 = vld [vmem:[#allocation5] ss:$12 sps:$4 sm:$0xff]   ;;  %v1384_v3 = vld [vmem:[#allocation5 + $0x1c] ss:$12 sps:$4 sm:$0xff]   ;;  %v1386_v4 = vld [vmem:[#allocation5 + $0x18] ss:$12 sps:$4 sm:$0xff]  }
  0x3a   :  { %360 = vmatprep.subr.bf16.mxu0 %v1381_v1  ;;  %1356 = vmatprep.subr.bf16.mxu1 %v1381_v1  ;;  %v1387_v5 = vld [vmem:[#allocation5 + $0x34] ss:$12 sps:$4 sm:$0xff]   ;;  %v1389_v6 = vld [vmem:[#allocation5 + $0x30] ss:$12 sps:$4 sm:$0xff]   ;;  %v1390_v7 = vld [vmem:[#allocation5 + $0x4c] ss:$12 sps:$4 sm:$0xff]  }
  0x3b   :  { %361 = vmatpush1.bf16.msra.mxu0 %v1383_v2  ;;  %1364 = vmatpush1.bf16.msra.mxu1 %v1383_v2  ;;  %v1392_v8 = vld [vmem:[#allocation5 + $0x48] ss:$12 sps:$4 sm:$0xff]   ;;  %v1393_v9 = vld [vmem:[#allocation5 + $0x64] ss:$12 sps:$4 sm:$0xff]   ;;  %v1395_v10 = vld [vmem:[#allocation5 + $0x60] ss:$12 sps:$4 sm:$0xff]  }
  0x3c   :  { %362 = vmatprep.subr.bf16.mxu0 %v1384_v3  ;;  %1357 = vmatprep.subr.bf16.mxu1 %v1384_v3  ;;  %v1396_v11 = vld [vmem:[#allocation5 + $0x7c] ss:$12 sps:$4 sm:$0xff]   ;;  %v1398_v12 = vld [vmem:[#allocation5 + $0x78] ss:$12 sps:$4 sm:$0xff]   ;;  %v1399_v13 = vld [vmem:[#allocation5 + $0x94] ss:$12 sps:$4 sm:$0xff]  }
  0x3d   :  { %v1401_v14 = vld [vmem:[#allocation5 + $0x90] ss:$12 sps:$4 sm:$0xff]   ;;  %v1402_v15 = vld [vmem:[#allocation5 + $0xac] ss:$12 sps:$4 sm:$0xff]   ;;  %v1404_v16 = vld [vmem:[#allocation5 + $0xa8] ss:$12 sps:$4 sm:$0xff]  }
  0x3e   :  { %v1407_v17 = vld [vmem:[#allocation5 + $0x8] ss:$12 sps:$4 sm:$0xff]   ;;  %v1405_v18 = vld [vmem:[#allocation2] sm:$0xff]   ;;  %v1412_v24 = vld [vmem:[#allocation5 + $0x50] ss:$12 sps:$4 sm:$0xff]   ;;  %v1615_v42 = vshrl.u32 %v121_v41, 7 }
  0x3f   :  { %363 = vmatpush1.bf16.msra.mxu0 %v1386_v4  ;;  %1365 = vmatpush1.bf16.msra.mxu1 %v1386_v4  ;;  %v1593_v19 = vld [vmem:[#allocation2 + $0x60] sm:$0xff]   ;;  %v1598_v23 = vld [vmem:[#allocation2 + $0x68] sm:$0xff]   ;;  %v1413_v26 = vld [vmem:[#allocation2 + $0x10] sm:$0xff]   ;;  %s1531_s2 = smov [#allocation8]  }
  0x40   :  { %364 = vmatprep.subr.bf16.mxu0 %v1387_v5  ;;  %1358 = vmatprep.subr.bf16.mxu1 %v1387_v5  ;;  %v1408_v20 = vld [vmem:[#allocation5 + $0x20] ss:$12 sps:$4 sm:$0xff]   ;;  %v1411_v21 = vld [vmem:[#allocation5 + $0x38] ss:$12 sps:$4 sm:$0xff]   ;;  %v1415_v25 = vld [vmem:[#allocation5 + $0x68] ss:$12 sps:$4 sm:$0xff]  }
  0x41   :  { %v1414_v27 = vld [vmem:[#allocation2 + $0x70] sm:$0xff]   ;;  %v1416_v28 = vld [vmem:[#allocation5 + $0x80] ss:$12 sps:$4 sm:$0xff]   ;;  %v1419_v29 = vld [vmem:[#allocation5 + $0x98] ss:$12 sps:$4 sm:$0xff]   ;;  %v123_v43 = vsub.s32 0, %v1615_v42 }
  0x42   :  { %v1417_v30 = vld [vmem:[#allocation2 + $0x18] sm:$0xff]   ;;  %v1421_v33 = vld [vmem:[#allocation2 + $0x20] sm:$0xff]   ;;  %v1422_v34 = vld [vmem:[#allocation2 + $0x28] sm:$0xff]   ;;  %v127_v45 = vsub.s32 1, %v1615_v42  ;;  %s1103_s26 = sshll.u32 %s1531_s2, 4  ;;  %s1104_s26 = int_to_ptr.vmem [resolvable:$true] %s1103_s26 }
  0x43   :  { %365 = vmatpush1.bf16.msra.mxu0 %v1389_v6  ;;  %1366 = vmatpush1.bf16.msra.mxu1 %v1389_v6  ;;  %v1418_v31 = vld [vmem:[#allocation2 + $0x78] sm:$0xff]   ;;  %v1423_v35 = vld [vmem:[#allocation2 + $0x30] sm:$0xff]   ;;  %v1425_v37 = vld [vmem:[#allocation2 + $0x40] sm:$0xff]   ;;  %s1495_s27 = scalar_lea.vmem %s1104_s26, 6144  ;;  %p1500_p11 = scmp.lt.s32.totalorder %s1104_s26, %s1104_s26 }
  0x44   :  { %366 = vmatprep.subr.bf16.mxu0 %v1390_v7  ;;  %1359 = vmatprep.subr.bf16.mxu1 %v1390_v7  ;;  %v1420_v32 = vld [vmem:[#allocation5 + $0xb0] ss:$12 sps:$4 sm:$0xff]   ;;  %v1426_v38 = vld [vmem:[#allocation2 + $0x48] sm:$0xff]   ;;  %v1618_v44 = vld [vmem:[#allocation7] sm:$0x7]  ;;  %p1496_p10 = scmp.ne.s32.totalorder %s1104_s26, %s1495_s27  ;;  %p1501_p12 = scmp.lt.s32.totalorder %s1495_s27, %s1495_s27 }
  0x45   :  { %v1424_v36 = vld [vmem:[#allocation2 + $0x38] sm:$0xff]   ;;  %v1427_v39 = vld [vmem:[#allocation2 + $0x50] sm:$0xff]   ;;  %v1622_v46 = vrot.slane %v1618_v44, %v123_v43  ;;  %v1625_v47 = vrot.slane %v1618_v44, %v127_v45 }
  0x46   :  { %v1428_v40 = vld [vmem:[#allocation2 + $0x58] sm:$0xff]   ;;  %p1502_p13 = por %p1501_p12, %p1500_p11 }
  0x47   :  { %367 = vmatpush1.bf16.msra.mxu0 %v1392_v8  ;;  %1367 = vmatpush1.bf16.msra.mxu1 %v1392_v8 }
  0x48   :  { %368 = vmatprep.subr.bf16.mxu0 %v1393_v9  ;;  %1360 = vmatprep.subr.bf16.mxu1 %v1393_v9  ;;  %p1503_p0 = pnand %p1502_p13, %p1496_p10 }
  0x4b   :  { %369 = vmatpush1.bf16.msra.mxu0 %v1395_v10  ;;  %1368 = vmatpush1.bf16.msra.mxu1 %v1395_v10 }
  0x4c   :  { %370 = vmatprep.subr.bf16.mxu0 %v1396_v11  ;;  %1361 = vmatprep.subr.bf16.mxu1 %v1396_v11 }
  0x4f   :  { %371 = vmatpush1.bf16.msra.mxu0 %v1398_v12  ;;  %1369 = vmatpush1.bf16.msra.mxu1 %v1398_v12 }
  0x50   :  { %372 = vmatprep.subr.bf16.mxu0 %v1399_v13  ;;  %1362 = vmatprep.subr.bf16.mxu1 %v1399_v13 }
  0x53   :  { %373 = vmatpush1.bf16.msra.mxu0 %v1401_v14  ;;  %1370 = vmatpush1.bf16.msra.mxu1 %v1401_v14 }
  0x54   :  { %374 = vmatprep.subr.bf16.mxu0 %v1402_v15  ;;  %1363 = vmatprep.subr.bf16.mxu1 %v1402_v15 }
  0x57   :  { %375 = vmatpush1.bf16.msra.mxu0 %v1404_v16  ;;  %1371 = vmatpush1.bf16.msra.mxu1 %v1404_v16 }
  0x58   :  { %1308 = vmatprep.subr.bf16.mxu1 %v1407_v17 }
  0x5a   :  { %393 = vmatmul.mubr.bf16.vlgmr.msra.gmra.mrb[0].mxu0 %v1405_v18  ;;  %513 = vmatmul.mubr.bf16.vlgmr.msra.gmra.mrb[0].mxu1 %v1593_v19 }
  0x5b   :  { %1309 = vmatpush3.bf16.msra.mxu1 %v1407_v17  ;;  %402 = vmatprep.mubr.bf16.mxu0 %v1530_v0 }
  0x5c   :  { %1310 = vmatprep.subr.bf16.mxu1 %v1408_v20  ;;  %522 = vmatprep.mubr.bf16.mxu1 %v1530_v0 }
  0x5f   :  { %1311 = vmatpush3.bf16.msra.mxu1 %v1408_v20 }
  0x60   :  { %1312 = vmatprep.subr.bf16.mxu1 %v1411_v21 }
  0x62   :  { %403 = vmatmul.mubr.bf16.gmra.mrb[4].mxu0 %v1409_v22  ;;  %523 = vmatmul.mubr.bf16.gmra.mrb[4].mxu1 %v1598_v23 }
  0x63   :  { %1313 = vmatpush3.bf16.msra.mxu1 %v1411_v21  ;;  %412 = vmatprep.mubr.bf16.mxu0 %v1530_v0 }
  0x64   :  { %1314 = vmatprep.subr.bf16.mxu1 %v1412_v24  ;;  %532 = vmatprep.mubr.bf16.mxu1 %v1530_v0 }
  0x67   :  { %1315 = vmatpush3.bf16.msra.mxu1 %v1412_v24 }
  0x68   :  { %1316 = vmatprep.subr.bf16.mxu1 %v1415_v25 }
  0x6a   :  { %413 = vmatmul.mubr.bf16.gmra.mrb[8].mxu0 %v1413_v26  ;;  %533 = vmatmul.mubr.bf16.gmra.mrb[8].mxu1 %v1414_v27 }
  0x6b   :  { %1317 = vmatpush3.bf16.msra.mxu1 %v1415_v25  ;;  %422 = vmatprep.mubr.bf16.mxu0 %v1530_v0 }
  0x6c   :  { %1318 = vmatprep.subr.bf16.mxu1 %v1416_v28  ;;  %542 = vmatprep.mubr.bf16.mxu1 %v1530_v0 }
  0x6f   :  { %1319 = vmatpush3.bf16.msra.mxu1 %v1416_v28 }
  0x70   :  { %1320 = vmatprep.subr.bf16.mxu1 %v1419_v29 }
  0x72   :  { %423 = vmatmul.mubr.bf16.gmra.mrb[12].mxu0 %v1417_v30  ;;  %543 = vmatmul.mubr.bf16.gmra.mrb[12].mxu1 %v1418_v31 }
  0x73   :  { %1321 = vmatpush3.bf16.msra.mxu1 %v1419_v29  ;;  %432 = vmatprep.mubr.bf16.mxu0 %v1530_v0 }
  0x74   :  { %1322 = vmatprep.subr.bf16.mxu1 %v1420_v32  ;;  %1324 = vmatprep.mubr.bf16.mxu1 %v1405_v18 }
  0x77   :  { %1323 = vmatpush3.bf16.msra.mxu1 %v1420_v32 }
  0x7a   :  { %433 = vmatmul.mubr.bf16.gmra.mrb[16].mxu0 %v1421_v33  ;;  %1325 = vmatmul.mubr.bf16.vlgmr.msra.gmra.mrb[16].mxu1 %v1409_v22 }
  0x7b   :  { %442 = vmatprep.mubr.bf16.mxu0 %v1530_v0  ;;  %1328 = vmatprep.mubr.bf16.mxu1 %v1413_v26 }
  0x82   :  { %443 = vmatmul.mubr.bf16.gmra.mrb[20].mxu0 %v1422_v34  ;;  %1329 = vmatmul.mubr.bf16.gmra.mrb[20].mxu1 %v1417_v30 }
  0x83   :  { %452 = vmatprep.mubr.bf16.mxu0 %v1530_v0  ;;  %1332 = vmatprep.mubr.bf16.mxu1 %v1421_v33 }
  0x8a   :  { %453 = vmatmul.mubr.bf16.gmra.mrb[24].mxu0 %v1423_v35  ;;  %1333 = vmatmul.mubr.bf16.gmra.mrb[24].mxu1 %v1422_v34 }
  0x8b   :  { %462 = vmatprep.mubr.bf16.mxu0 %v1530_v0  ;;  %1336 = vmatprep.mubr.bf16.mxu1 %v1423_v35 }
  0x92   :  { %463 = vmatmul.mubr.bf16.gmra.mrb[28].mxu0 %v1424_v36  ;;  %1337 = vmatmul.mubr.bf16.gmra.mrb[28].mxu1 %v1424_v36 }
  0x93   :  { %472 = vmatprep.mubr.bf16.mxu0 %v1530_v0  ;;  %1340 = vmatprep.mubr.bf16.mxu1 %v1425_v37 }
  0x9a   :  { %473 = vmatmul.mubr.bf16.gmra.mrb[32].mxu0 %v1425_v37  ;;  %1341 = vmatmul.mubr.bf16.gmra.mrb[32].mxu1 %v1426_v38 }
  0x9b   :  { %482 = vmatprep.mubr.bf16.mxu0 %v1530_v0  ;;  %1344 = vmatprep.mubr.bf16.mxu1 %v1427_v39 }
  0xa2   :  { %483 = vmatmul.mubr.bf16.gmra.mrb[36].mxu0 %v1426_v38  ;;  %1345 = vmatmul.mubr.bf16.gmra.mrb[36].mxu1 %v1428_v40 }
  0xa3   :  { %492 = vmatprep.mubr.bf16.mxu0 %v1530_v0  ;;  %1348 = vmatprep.mubr.bf16.mxu1 %v1593_v19 }
  0xaa   :  { %493 = vmatmul.mubr.bf16.gmra.mrb[40].mxu0 %v1427_v39  ;;  %1349 = vmatmul.mubr.bf16.gmra.mrb[40].mxu1 %v1598_v23 }
  0xab   :  { %502 = vmatprep.mubr.bf16.mxu0 %v1530_v0  ;;  %1352 = vmatprep.mubr.bf16.mxu1 %v1414_v27 }
  0xb2   :  { %503 = vmatmul.mubr.bf16.gmra.mrb[44].mxu0 %v1428_v40  ;;  %1353 = vmatmul.mubr.bf16.gmra.mrb[44].mxu1 %v1418_v31 }
 0x12d   :  { %v394_v48 = vpop.f32.mrb[0].mxu0  ;;  %v514_v49 = vpop.f32.mrb[0].mxu1 }
 0x12e   :  { %v395_v50 = vadd.f32 %v394_v48, %v1622_v46  ;;  %v515_v51 = vadd.f32 %v514_v49, %v1622_v46  ;;  %v396_v52 = vpop.f32.mrb[1].mxu0  ;;  %v516_v53 = vpop.f32.mrb[1].mxu1 }
 0x12f   :  { %v397_v54 = vadd.f32 %v396_v52, %v1625_v47  ;;  %v517_v55 = vadd.f32 %v516_v53, %v1625_v47  ;;  %v398_v56 = vpop.f32.mrb[2].mxu0  ;;  %v518_v57 = vpop.f32.mrb[2].mxu1 }
 0x130   :  { %v399_v58 = vadd.f32 %v398_v56, %v1622_v46  ;;  %v519_v59 = vadd.f32 %v518_v57, %v1622_v46  ;;  %v400_v60 = vpop.f32.mrb[3].mxu0  ;;  %v520_v61 = vpop.f32.mrb[3].mxu1 }
 0x131   :  { %v1220_v62 = vpack.c.bf16 %v397_v54, %v395_v50  ;;  %v1268_v63 = vpack.c.bf16 %v517_v55, %v515_v51  ;;  %v401_v0 = vadd.f32 %v400_v60, %v1625_v47  ;;  %v521_v1 = vadd.f32 %v520_v61, %v1625_v47 }
 0x132   :  { %v131_v54 = vsub.s32 2, %v1615_v42 }
 0x133   :  { %1034 = vst [vmem:[#allocation8] sm:$0xff] %v1220_v62  ;;  %1082 = vst [vmem:[#allocation8 + $0x120] sm:$0xff] %v1268_v63  ;;  %v1222_v2 = vpack.c.bf16 %v401_v0, %v399_v58  ;;  %v1270_v3 = vpack.c.bf16 %v521_v1, %v519_v59 }
 0x134   :  { %v1661_v42 = vrot.slane %v1618_v44, %v131_v54 }
 0x135   :  { %1036 = vst [vmem:[#allocation8 + $0xc] sm:$0xff] %v1222_v2  ;;  %1084 = vst [vmem:[#allocation8 + $0x12c] sm:$0xff] %v1270_v3  ;;  %v404_v4 = vpop.f32.mrb[4].mxu0  ;;  %v524_v5 = vpop.f32.mrb[4].mxu1 }
 0x136   :  { %v405_v6 = vadd.f32 %v404_v4, %v1622_v46  ;;  %v525_v7 = vadd.f32 %v524_v5, %v1622_v46  ;;  %v406_v8 = vpop.f32.mrb[5].mxu0  ;;  %v526_v9 = vpop.f32.mrb[5].mxu1 }
 0x137   :  { %v407_v10 = vadd.f32 %v406_v8, %v1625_v47  ;;  %v527_v11 = vadd.f32 %v526_v9, %v1625_v47  ;;  %v408_v12 = vpop.f32.mrb[6].mxu0  ;;  %v528_v13 = vpop.f32.mrb[6].mxu1 }
 0x138   :  { %v409_v14 = vadd.f32 %v408_v12, %v1622_v46  ;;  %v529_v15 = vadd.f32 %v528_v13, %v1622_v46  ;;  %v410_v16 = vpop.f32.mrb[7].mxu0  ;;  %v530_v17 = vpop.f32.mrb[7].mxu1 }
 0x139   :  { %v1224_v18 = vpack.c.bf16 %v407_v10, %v405_v6  ;;  %v1272_v19 = vpack.c.bf16 %v527_v11, %v525_v7  ;;  %v411_v20 = vadd.f32 %v410_v16, %v1625_v47  ;;  %v531_v21 = vadd.f32 %v530_v17, %v1625_v47 }
 0x13b   :  { %1038 = vst [vmem:[#allocation8 + $0x18] sm:$0xff] %v1224_v18  ;;  %1086 = vst [vmem:[#allocation8 + $0x138] sm:$0xff] %v1272_v19  ;;  %v1226_v22 = vpack.c.bf16 %v411_v20, %v409_v14  ;;  %v1274_v23 = vpack.c.bf16 %v531_v21, %v529_v15 }
 0x13d   :  { %1040 = vst [vmem:[#allocation8 + $0x24] sm:$0xff] %v1226_v22  ;;  %1088 = vst [vmem:[#allocation8 + $0x144] sm:$0xff] %v1274_v23  ;;  %v414_v24 = vpop.f32.mrb[8].mxu0  ;;  %v534_v25 = vpop.f32.mrb[8].mxu1 }
 0x13e   :  { %v415_v26 = vadd.f32 %v414_v24, %v1622_v46  ;;  %v535_v27 = vadd.f32 %v534_v25, %v1622_v46  ;;  %v416_v28 = vpop.f32.mrb[9].mxu0  ;;  %v536_v29 = vpop.f32.mrb[9].mxu1 }
 0x13f   :  { %v417_v30 = vadd.f32 %v416_v28, %v1625_v47  ;;  %v537_v31 = vadd.f32 %v536_v29, %v1625_v47  ;;  %v418_v32 = vpop.f32.mrb[10].mxu0  ;;  %v538_v33 = vpop.f32.mrb[10].mxu1 }
 0x140   :  { %v419_v34 = vadd.f32 %v418_v32, %v1622_v46  ;;  %v539_v35 = vadd.f32 %v538_v33, %v1622_v46  ;;  %v420_v36 = vpop.f32.mrb[11].mxu0  ;;  %v540_v37 = vpop.f32.mrb[11].mxu1 }
 0x141   :  { %v1228_v38 = vpack.c.bf16 %v417_v30, %v415_v26  ;;  %v1276_v39 = vpack.c.bf16 %v537_v31, %v535_v27  ;;  %v421_v40 = vadd.f32 %v420_v36, %v1625_v47  ;;  %v541_v41 = vadd.f32 %v540_v37, %v1625_v47 }
 0x143   :  { %1042 = vst [vmem:[#allocation8 + $0x30] sm:$0xff] %v1228_v38  ;;  %1090 = vst [vmem:[#allocation8 + $0x150] sm:$0xff] %v1276_v39  ;;  %v1230_v43 = vpack.c.bf16 %v421_v40, %v419_v34  ;;  %v1278_v45 = vpack.c.bf16 %v541_v41, %v539_v35 }
 0x145   :  { %1044 = vst [vmem:[#allocation8 + $0x3c] sm:$0xff] %v1230_v43  ;;  %1092 = vst [vmem:[#allocation8 + $0x15c] sm:$0xff] %v1278_v45  ;;  %v424_v48 = vpop.f32.mrb[12].mxu0  ;;  %v544_v49 = vpop.f32.mrb[12].mxu1 }
 0x146   :  { %v425_v50 = vadd.f32 %v424_v48, %v1622_v46  ;;  %v545_v51 = vadd.f32 %v544_v49, %v1622_v46  ;;  %v426_v52 = vpop.f32.mrb[13].mxu0  ;;  %v546_v53 = vpop.f32.mrb[13].mxu1 }
 0x147   :  { %v427_v55 = vadd.f32 %v426_v52, %v1625_v47  ;;  %v547_v56 = vadd.f32 %v546_v53, %v1625_v47  ;;  %v428_v57 = vpop.f32.mrb[14].mxu0  ;;  %v548_v58 = vpop.f32.mrb[14].mxu1 }
 0x148   :  { %v429_v59 = vadd.f32 %v428_v57, %v1622_v46  ;;  %v549_v60 = vadd.f32 %v548_v58, %v1622_v46  ;;  %v430_v61 = vpop.f32.mrb[15].mxu0  ;;  %v550_v62 = vpop.f32.mrb[15].mxu1 }
 0x149   :  { %v1232_v63 = vpack.c.bf16 %v427_v55, %v425_v50  ;;  %v1280_v0 = vpack.c.bf16 %v547_v56, %v545_v51  ;;  %v431_v1 = vadd.f32 %v430_v61, %v1625_v47  ;;  %v551_v2 = vadd.f32 %v550_v62, %v1625_v47 }
 0x14b   :  { %1046 = vst [vmem:[#allocation8 + $0x48] sm:$0xff] %v1232_v63  ;;  %1094 = vst [vmem:[#allocation8 + $0x168] sm:$0xff] %v1280_v0  ;;  %v1234_v3 = vpack.c.bf16 %v431_v1, %v429_v59  ;;  %v1282_v4 = vpack.c.bf16 %v551_v2, %v549_v60 }
 0x14d   :  { %1048 = vst [vmem:[#allocation8 + $0x54] sm:$0xff] %v1234_v3  ;;  %1096 = vst [vmem:[#allocation8 + $0x174] sm:$0xff] %v1282_v4  ;;  %v434_v5 = vpop.f32.mrb[16].mxu0  ;;  %v1326_v6 = vpop.f32.mrb[16].mxu1 }
 0x14e   :  { %v435_v7 = vadd.f32 %v434_v5, %v1622_v46  ;;  %v596_v8 = vadd.f32 %v1326_v6, %v1661_v42  ;;  %v436_v9 = vpop.f32.mrb[17].mxu0  ;;  %v587_v10 = vpop.f32.mrb[17].mxu1 }
 0x14f   :  { %v437_v11 = vadd.f32 %v436_v9, %v1625_v47  ;;  %v588_v12 = vadd.f32 %v587_v10, %v1661_v42  ;;  %v438_v44 = vpop.f32.mrb[18].mxu0  ;;  %v1327_v13 = vpop.f32.mrb[18].mxu1 }
 0x150   :  { %v1225_v14 = vpack.c.bf16 %v596_v8, %v596_v8  ;;  %v439_v15 = vadd.f32 %v438_v44, %v1622_v46  ;;  %v599_v16 = vadd.f32 %v1327_v13, %v1661_v42  ;;  %v440_v17 = vpop.f32.mrb[19].mxu0  ;;  %v590_v18 = vpop.f32.mrb[19].mxu1 }
 0x151   :  { %v1236_v19 = vpack.c.bf16 %v437_v11, %v435_v7  ;;  %v1221_v20 = vpack.c.bf16 %v588_v12, %v588_v12  ;;  %v441_v21 = vadd.f32 %v440_v17, %v1625_v47  ;;  %v591_v22 = vadd.f32 %v590_v18, %v1661_v42 }
 0x152   :  { %1039 = vst [vmem:[#allocation8 + $0x20] sm:$0xf] %v1225_v14  ;;  %v1227_v23 = vpack.c.bf16 %v599_v16, %v599_v16 }
 0x153   :  { %1050 = vst [vmem:[#allocation8 + $0x60] sm:$0xff] %v1236_v19  ;;  %1035 = vst [vmem:[#allocation8 + $0x8] sm:$0xf] %v1221_v20  ;;  %v1238_v24 = vpack.c.bf16 %v441_v21, %v439_v15  ;;  %v1223_v25 = vpack.c.bf16 %v591_v22, %v591_v22 }
 0x154   :  { %1041 = vst [vmem:[#allocation8 + $0x2c] sm:$0xf] %v1227_v23 }
 0x155   :  { %1052 = vst [vmem:[#allocation8 + $0x6c] sm:$0xff] %v1238_v24  ;;  %1037 = vst [vmem:[#allocation8 + $0x14] sm:$0xf] %v1223_v25  ;;  %v444_v26 = vpop.f32.mrb[20].mxu0  ;;  %v1330_v27 = vpop.f32.mrb[20].mxu1 }
 0x156   :  { %v445_v28 = vadd.f32 %v444_v26, %v1622_v46  ;;  %v612_v29 = vadd.f32 %v1330_v27, %v1661_v42  ;;  %v446_v30 = vpop.f32.mrb[21].mxu0  ;;  %v603_v31 = vpop.f32.mrb[21].mxu1 }
 0x157   :  { %v447_v32 = vadd.f32 %v446_v30, %v1625_v47  ;;  %v604_v33 = vadd.f32 %v603_v31, %v1661_v42  ;;  %v448_v34 = vpop.f32.mrb[22].mxu0  ;;  %v1331_v35 = vpop.f32.mrb[22].mxu1 }
 0x158   :  { %v1233_v36 = vpack.c.bf16 %v612_v29, %v612_v29  ;;  %v449_v37 = vadd.f32 %v448_v34, %v1622_v46  ;;  %v615_v38 = vadd.f32 %v1331_v35, %v1661_v42  ;;  %v450_v39 = vpop.f32.mrb[23].mxu0  ;;  %v606_v40 = vpop.f32.mrb[23].mxu1 }
 0x159   :  { %v1240_v41 = vpack.c.bf16 %v447_v32, %v445_v28  ;;  %v1229_v43 = vpack.c.bf16 %v604_v33, %v604_v33  ;;  %v451_v45 = vadd.f32 %v450_v39, %v1625_v47  ;;  %v607_v48 = vadd.f32 %v606_v40, %v1661_v42 }
 0x15a   :  { %1047 = vst [vmem:[#allocation8 + $0x50] sm:$0xf] %v1233_v36  ;;  %v1235_v49 = vpack.c.bf16 %v615_v38, %v615_v38 }
 0x15b   :  { %1054 = vst [vmem:[#allocation8 + $0x78] sm:$0xff] %v1240_v41  ;;  %1043 = vst [vmem:[#allocation8 + $0x38] sm:$0xf] %v1229_v43  ;;  %v1242_v50 = vpack.c.bf16 %v451_v45, %v449_v37  ;;  %v1231_v51 = vpack.c.bf16 %v607_v48, %v607_v48 }
 0x15c   :  { %1049 = vst [vmem:[#allocation8 + $0x5c] sm:$0xf] %v1235_v49 }
 0x15d   :  { %1056 = vst [vmem:[#allocation8 + $0x84] sm:$0xff] %v1242_v50  ;;  %1045 = vst [vmem:[#allocation8 + $0x44] sm:$0xf] %v1231_v51  ;;  %v454_v52 = vpop.f32.mrb[24].mxu0  ;;  %v1334_v53 = vpop.f32.mrb[24].mxu1 }
 0x15e   :  { %v455_v54 = vadd.f32 %v454_v52, %v1622_v46  ;;  %v628_v55 = vadd.f32 %v1334_v53, %v1661_v42  ;;  %v456_v56 = vpop.f32.mrb[25].mxu0  ;;  %v619_v57 = vpop.f32.mrb[25].mxu1 }
 0x15f   :  { %v457_v58 = vadd.f32 %v456_v56, %v1625_v47  ;;  %v620_v59 = vadd.f32 %v619_v57, %v1661_v42  ;;  %v458_v60 = vpop.f32.mrb[26].mxu0  ;;  %v1335_v61 = vpop.f32.mrb[26].mxu1 }
 0x160   :  { %v1241_v62 = vpack.c.bf16 %v628_v55, %v628_v55  ;;  %v459_v63 = vadd.f32 %v458_v60, %v1622_v46  ;;  %v631_v0 = vadd.f32 %v1335_v61, %v1661_v42  ;;  %v460_v1 = vpop.f32.mrb[27].mxu0  ;;  %v622_v2 = vpop.f32.mrb[27].mxu1 }
 0x161   :  { %v1244_v3 = vpack.c.bf16 %v457_v58, %v455_v54  ;;  %v1237_v4 = vpack.c.bf16 %v620_v59, %v620_v59  ;;  %v461_v5 = vadd.f32 %v460_v1, %v1625_v47  ;;  %v623_v6 = vadd.f32 %v622_v2, %v1661_v42 }
 0x162   :  { %1055 = vst [vmem:[#allocation8 + $0x80] sm:$0xf] %v1241_v62  ;;  %v1243_v7 = vpack.c.bf16 %v631_v0, %v631_v0 }
 0x163   :  { %1058 = vst [vmem:[#allocation8 + $0x90] sm:$0xff] %v1244_v3  ;;  %1051 = vst [vmem:[#allocation8 + $0x68] sm:$0xf] %v1237_v4  ;;  %v1246_v8 = vpack.c.bf16 %v461_v5, %v459_v63  ;;  %v1239_v9 = vpack.c.bf16 %v623_v6, %v623_v6 }
 0x164   :  { %1057 = vst [vmem:[#allocation8 + $0x8c] sm:$0xf] %v1243_v7 }
 0x165   :  { %1060 = vst [vmem:[#allocation8 + $0x9c] sm:$0xff] %v1246_v8  ;;  %1053 = vst [vmem:[#allocation8 + $0x74] sm:$0xf] %v1239_v9  ;;  %v464_v10 = vpop.f32.mrb[28].mxu0  ;;  %v1338_v11 = vpop.f32.mrb[28].mxu1 }
 0x166   :  { %v465_v12 = vadd.f32 %v464_v10, %v1622_v46  ;;  %v644_v44 = vadd.f32 %v1338_v11, %v1661_v42  ;;  %v466_v13 = vpop.f32.mrb[29].mxu0  ;;  %v635_v14 = vpop.f32.mrb[29].mxu1 }
 0x167   :  { %v467_v15 = vadd.f32 %v466_v13, %v1625_v47  ;;  %v636_v16 = vadd.f32 %v635_v14, %v1661_v42  ;;  %v468_v17 = vpop.f32.mrb[30].mxu0  ;;  %v1339_v18 = vpop.f32.mrb[30].mxu1 }
 0x168   :  { %v1249_v19 = vpack.c.bf16 %v644_v44, %v644_v44  ;;  %v469_v20 = vadd.f32 %v468_v17, %v1622_v46  ;;  %v647_v21 = vadd.f32 %v1339_v18, %v1661_v42  ;;  %v470_v22 = vpop.f32.mrb[31].mxu0  ;;  %v638_v23 = vpop.f32.mrb[31].mxu1 }
 0x169   :  { %v1248_v24 = vpack.c.bf16 %v467_v15, %v465_v12  ;;  %v1245_v25 = vpack.c.bf16 %v636_v16, %v636_v16  ;;  %v471_v26 = vadd.f32 %v470_v22, %v1625_v47  ;;  %v639_v27 = vadd.f32 %v638_v23, %v1661_v42 }
 0x16a   :  { %1063 = vst [vmem:[#allocation8 + $0xb0] sm:$0xf] %v1249_v19  ;;  %v1251_v28 = vpack.c.bf16 %v647_v21, %v647_v21 }
 0x16b   :  { %1062 = vst [vmem:[#allocation8 + $0xa8] sm:$0xff] %v1248_v24  ;;  %1059 = vst [vmem:[#allocation8 + $0x98] sm:$0xf] %v1245_v25  ;;  %v1250_v29 = vpack.c.bf16 %v471_v26, %v469_v20  ;;  %v1247_v30 = vpack.c.bf16 %v639_v27, %v639_v27 }
 0x16c   :  { %1065 = vst [vmem:[#allocation8 + $0xbc] sm:$0xf] %v1251_v28 }
 0x16d   :  { %1064 = vst [vmem:[#allocation8 + $0xb4] sm:$0xff] %v1250_v29  ;;  %1061 = vst [vmem:[#allocation8 + $0xa4] sm:$0xf] %v1247_v30  ;;  %v474_v31 = vpop.f32.mrb[32].mxu0  ;;  %v1342_v32 = vpop.f32.mrb[32].mxu1 }
 0x16e   :  { %v475_v33 = vadd.f32 %v474_v31, %v1622_v46  ;;  %v660_v34 = vadd.f32 %v1342_v32, %v1661_v42  ;;  %v476_v35 = vpop.f32.mrb[33].mxu0  ;;  %v651_v36 = vpop.f32.mrb[33].mxu1 }
 0x16f   :  { %v477_v37 = vadd.f32 %v476_v35, %v1625_v47  ;;  %v652_v38 = vadd.f32 %v651_v36, %v1661_v42  ;;  %v478_v39 = vpop.f32.mrb[34].mxu0  ;;  %v1343_v40 = vpop.f32.mrb[34].mxu1 }
 0x170   :  { %v1257_v41 = vpack.c.bf16 %v660_v34, %v660_v34  ;;  %v479_v43 = vadd.f32 %v478_v39, %v1622_v46  ;;  %v663_v45 = vadd.f32 %v1343_v40, %v1661_v42  ;;  %v480_v48 = vpop.f32.mrb[35].mxu0  ;;  %v654_v49 = vpop.f32.mrb[35].mxu1 }
 0x171   :  { %v1252_v50 = vpack.c.bf16 %v477_v37, %v475_v33  ;;  %v1253_v51 = vpack.c.bf16 %v652_v38, %v652_v38  ;;  %v481_v52 = vadd.f32 %v480_v48, %v1625_v47  ;;  %v655_v53 = vadd.f32 %v654_v49, %v1661_v42 }
 0x172   :  { %1071 = vst [vmem:[#allocation8 + $0xe0] sm:$0xf] %v1257_v41  ;;  %v1259_v54 = vpack.c.bf16 %v663_v45, %v663_v45 }
 0x173   :  { %1066 = vst [vmem:[#allocation8 + $0xc0] sm:$0xff] %v1252_v50  ;;  %1067 = vst [vmem:[#allocation8 + $0xc8] sm:$0xf] %v1253_v51  ;;  %v1254_v55 = vpack.c.bf16 %v481_v52, %v479_v43  ;;  %v1255_v56 = vpack.c.bf16 %v655_v53, %v655_v53 }
 0x174   :  { %1073 = vst [vmem:[#allocation8 + $0xec] sm:$0xf] %v1259_v54 }
 0x175   :  { %1068 = vst [vmem:[#allocation8 + $0xcc] sm:$0xff] %v1254_v55  ;;  %1069 = vst [vmem:[#allocation8 + $0xd4] sm:$0xf] %v1255_v56  ;;  %v484_v57 = vpop.f32.mrb[36].mxu0  ;;  %v1346_v58 = vpop.f32.mrb[36].mxu1 }
 0x176   :  { %v485_v59 = vadd.f32 %v484_v57, %v1622_v46  ;;  %v676_v60 = vadd.f32 %v1346_v58, %v1661_v42  ;;  %v486_v61 = vpop.f32.mrb[37].mxu0  ;;  %v667_v62 = vpop.f32.mrb[37].mxu1 }
 0x177   :  { %v487_v63 = vadd.f32 %v486_v61, %v1625_v47  ;;  %v668_v0 = vadd.f32 %v667_v62, %v1661_v42  ;;  %v488_v1 = vpop.f32.mrb[38].mxu0  ;;  %v1347_v2 = vpop.f32.mrb[38].mxu1 }
 0x178   :  { %v1265_v3 = vpack.c.bf16 %v676_v60, %v676_v60  ;;  %v489_v4 = vadd.f32 %v488_v1, %v1622_v46  ;;  %v679_v5 = vadd.f32 %v1347_v2, %v1661_v42  ;;  %v490_v6 = vpop.f32.mrb[39].mxu0  ;;  %v670_v7 = vpop.f32.mrb[39].mxu1 }
 0x179   :  { %v1256_v8 = vpack.c.bf16 %v487_v63, %v485_v59  ;;  %v1261_v9 = vpack.c.bf16 %v668_v0, %v668_v0  ;;  %v491_v10 = vadd.f32 %v490_v6, %v1625_v47  ;;  %v671_v11 = vadd.f32 %v670_v7, %v1661_v42 }
 0x17a   :  { %1079 = vst [vmem:[#allocation8 + $0x110] sm:$0xf] %v1265_v3  ;;  %v1267_v12 = vpack.c.bf16 %v679_v5, %v679_v5 }
 0x17b   :  { %1070 = vst [vmem:[#allocation8 + $0xd8] sm:$0xff] %v1256_v8  ;;  %1075 = vst [vmem:[#allocation8 + $0xf8] sm:$0xf] %v1261_v9  ;;  %v1258_v44 = vpack.c.bf16 %v491_v10, %v489_v4  ;;  %v1263_v13 = vpack.c.bf16 %v671_v11, %v671_v11 }
 0x17c   :  { %1081 = vst [vmem:[#allocation8 + $0x11c] sm:$0xf] %v1267_v12 }
 0x17d   :  { %1072 = vst [vmem:[#allocation8 + $0xe4] sm:$0xff] %v1258_v44  ;;  %1077 = vst [vmem:[#allocation8 + $0x104] sm:$0xf] %v1263_v13  ;;  %v494_v14 = vpop.f32.mrb[40].mxu0  ;;  %v1350_v15 = vpop.f32.mrb[40].mxu1 }
 0x17e   :  { %v495_v16 = vadd.f32 %v494_v14, %v1622_v46  ;;  %v692_v17 = vadd.f32 %v1350_v15, %v1661_v42  ;;  %v496_v18 = vpop.f32.mrb[41].mxu0  ;;  %v683_v19 = vpop.f32.mrb[41].mxu1 }
 0x17f   :  { %v497_v20 = vadd.f32 %v496_v18, %v1625_v47  ;;  %v684_v21 = vadd.f32 %v683_v19, %v1661_v42  ;;  %v498_v22 = vpop.f32.mrb[42].mxu0  ;;  %v1351_v23 = vpop.f32.mrb[42].mxu1 }
 0x180   :  { %v1273_v24 = vpack.c.bf16 %v692_v17, %v692_v17  ;;  %v499_v25 = vadd.f32 %v498_v22, %v1622_v46  ;;  %v695_v26 = vadd.f32 %v1351_v23, %v1661_v42  ;;  %v500_v27 = vpop.f32.mrb[43].mxu0  ;;  %v686_v28 = vpop.f32.mrb[43].mxu1 }
 0x181   :  { %v1260_v29 = vpack.c.bf16 %v497_v20, %v495_v16  ;;  %v1269_v30 = vpack.c.bf16 %v684_v21, %v684_v21  ;;  %v501_v31 = vadd.f32 %v500_v27, %v1625_v47  ;;  %v687_v32 = vadd.f32 %v686_v28, %v1661_v42 }
 0x182   :  { %1087 = vst [vmem:[#allocation8 + $0x140] sm:$0xf] %v1273_v24  ;;  %v1275_v33 = vpack.c.bf16 %v695_v26, %v695_v26 }
 0x183   :  { %1074 = vst [vmem:[#allocation8 + $0xf0] sm:$0xff] %v1260_v29  ;;  %1083 = vst [vmem:[#allocation8 + $0x128] sm:$0xf] %v1269_v30  ;;  %v1262_v34 = vpack.c.bf16 %v501_v31, %v499_v25  ;;  %v1271_v35 = vpack.c.bf16 %v687_v32, %v687_v32 }
 0x184   :  { %1089 = vst [vmem:[#allocation8 + $0x14c] sm:$0xf] %v1275_v33 }
 0x185   :  { %1076 = vst [vmem:[#allocation8 + $0xfc] sm:$0xff] %v1262_v34  ;;  %1085 = vst [vmem:[#allocation8 + $0x134] sm:$0xf] %v1271_v35  ;;  %v504_v36 = vpop.f32.mrb[44].mxu0  ;;  %v1354_v37 = vpop.f32.mrb[44].mxu1 }
 0x186   :  { %v505_v38 = vadd.f32 %v504_v36, %v1622_v46  ;;  %v708_v39 = vadd.f32 %v1354_v37, %v1661_v42  ;;  %v506_v40 = vpop.f32.mrb[45].mxu0  ;;  %v699_v41 = vpop.f32.mrb[45].mxu1 }
 0x187   :  { %v507_v43 = vadd.f32 %v506_v40, %v1625_v47  ;;  %v700_v45 = vadd.f32 %v699_v41, %v1661_v42  ;;  %v508_v48 = vpop.f32.mrb[46].mxu0  ;;  %v1355_v49 = vpop.f32.mrb[46].mxu1 }
 0x188   :  { %v1281_v50 = vpack.c.bf16 %v708_v39, %v708_v39  ;;  %v509_v51 = vadd.f32 %v508_v48, %v1622_v46  ;;  %v711_v52 = vadd.f32 %v1355_v49, %v1661_v42  ;;  %v510_v53 = vpop.f32.mrb[47].mxu0  ;;  %v702_v54 = vpop.f32.mrb[47].mxu1 }
 0x189   :  { %v1264_v55 = vpack.c.bf16 %v507_v43, %v505_v38  ;;  %v1277_v56 = vpack.c.bf16 %v700_v45, %v700_v45  ;;  %v511_v57 = vadd.f32 %v510_v53, %v1625_v47  ;;  %v703_v58 = vadd.f32 %v702_v54, %v1661_v42 }
 0x18a   :  { %1095 = vst [vmem:[#allocation8 + $0x170] sm:$0xf] %v1281_v50  ;;  %v1283_v59 = vpack.c.bf16 %v711_v52, %v711_v52 }
 0x18b   :  { %1078 = vst [vmem:[#allocation8 + $0x108] sm:$0xff] %v1264_v55  ;;  %1091 = vst [vmem:[#allocation8 + $0x158] sm:$0xf] %v1277_v56  ;;  %v1266_v60 = vpack.c.bf16 %v511_v57, %v509_v51  ;;  %v1279_v61 = vpack.c.bf16 %v703_v58, %v703_v58 }
 0x18c   :  { %1097 = vst [vmem:[#allocation8 + $0x17c] sm:$0xf] %v1283_v59 }
 0x18d   :  { %1080 = vst [vmem:[#allocation8 + $0x114] sm:$0xff] %v1266_v60  ;;  %1093 = vst [vmem:[#allocation8 + $0x164] sm:$0xf] %v1279_v61 }
 0x18e   :  { %1506 = shalt.err (!%p1503_p0)
}
 0x18f   :  { %s1507_s30 = scalar_lea.hbm %s1745_s3, 6144 }
 0x190   :  { %p1508_p1 = scmp.ne.s32.totalorder %s1745_s3, %s1507_s30  ;;  %p1511_p2 = scmp.lt.u32.totalorder %s1507_s30, %s1745_s3 }
 0x192   :  { %p1513_p3 = pnand %p1511_p2, %p1508_p1 }
 0x194   :  { %1516 = shalt.err (!%p1513_p3)
}
 0x195   :  { %1109 = dma.vmem_to_hbm [thread:$0]  %s1104_s26, 6144, %s1745_s3, [#allocation4], %s1524_s22, %s1524_s22, %s1525_s23  }
 0x196   :  { %1521 = dma.done.wait [#allocation4], 6144  }
 0x197   :  { %1522 = vsyncadd [#allocation4], 4294961152 }
 0x198   :  { %1113 = vsyncpa [#allocation3], 1 }
 0x199   :  { %1114 = vsyncpa [#allocation6], 1 }
 0x19a   :  { %1115 = vsyncpa [#allocation4], 1 }

// kernel: bookbert_forward.19
= control target key start
LH: loop header
LB: loop body
LE: loop exit
PB: predicated region body
PF: predicated region fallthrough
CT: control target
= control target key end

     0   :  { %s3476_s0 = inlined_call_operand.hbm [shape: bf16[2,128,384], index: 0, kind: input, shape index: {}, may-alias: {0,1,2}]   ;;  %s3477_s1 = inlined_call_operand.hbm [shape: bf16[2,128,384], index: 1, kind: input, shape index: {}, may-alias: {0,1,2}]   ;;  %s3478_s2 = inlined_call_operand.hbm [shape: bf16[2,128,384], index: 2, kind: input, shape index: {}, may-alias: {0,1,2}]   ;;  %s3479_s3 = inlined_call_operand.hbm [shape: f32[2,1,128], index: 3, kind: input, shape index: {}]   ;;  %s3480_s4 = inlined_call_operand.hbm [shape: bf16[2,128,128], index: 4, kind: output, shape index: {}]  }
   0x1   :  { %3495 = sst [smem:[#allocation20_spill]] %s3476_s0 }
   0x2   :  { %3496 = sst [smem:[#allocation21_spill]] %s3477_s1 }
   0x3   :  { %9 = vsyncpa [#allocation3], 0 }
   0x4   :  { %11 = vsyncpa [#allocation3 + $0x1], 0 }
   0x5   :  { %12 = vsyncpa [#allocation6], 0 }
   0x6   :  { %14 = vsyncpa [#allocation6 + $0x1], 0 }
   0x7   :  { %15 = vsyncpa [#allocation9], 0 }
   0x8   :  { %17 = vsyncpa [#allocation9 + $0x1], 0 }
   0x9   :  { %18 = vsyncpa [#allocation4], 0 }
   0xa   :  { %20 = vsyncpa [#allocation4 + $0x1], 0  ;;  %s2615_s15 = smov 0   ;;  %s2617_s16 = smov 0  }
   0xb   :  { %s2619_s17 = smov 0   ;;  %s2621_s18 = smov 0  }
   0xc   :  { %s2623_s19 = smov 0   ;;  %s2625_s20 = smov 0  }
   0xd LB: > { %3497 = sst [smem:[#allocation15_spill]] %s2566_s17  ;;  %s2646_s21 = sadd.s32 4294967295, %s2578_s20   ;;  %s2578_s20 = sphi %s2625_s20, %s26_s20   ;;  %s2574_s19 = sphi %s2623_s19, %s3528_s19   ;;  %s2570_s18 = sphi %s2621_s18, %s3527_s18   ;;  %s2566_s17 = sphi %s2619_s17, %s3523_s17   ;;  %s2562_s16 = sphi %s2617_s16, %s3526_s16   ;;  %s2558_s15 = sphi %s2615_s15, %s3525_s15  }
   0xe   : > { %3498 = sst [smem:[#allocation16_spill]] %s2578_s20  ;;  %s1742_s22 = sadd.s32 4294967294, %s2578_s20  }
   0xf   : > { %s45_s23 = sadd.s32 1, %s2574_s19  ;;  %s56_s24 = sadd.s32 1, %s2566_s17 }
  0x10   : > { %p47_p0 = scmp.ge.s32.totalorder %s45_s23, 2  ;;  %p63_p1 = scmp.ne.s32.totalorder %s2566_s17, %s2562_s16 }
  0x11   : > { %p64_p2 = scmp.eq.s32.totalorder %s2578_s20, 0  ;;  %p69_p3 = scmp.ne.s32.totalorder %s2562_s16, %s2558_s15 }
  0x12   : > { %s3530_s23 = smov (%p47_p0, %s45_s23), 0  ;;  %p70_p5 = scmp.eq.s32.totalorder %s2646_s21, 0 }
  0x13   : > { %3499 = sst [smem:[#allocation17_spill]] %s3530_s23  ;;  %p2658_p4 = por %p64_p2, %p63_p1 }
  0x14   : > { %s49_s26 = ssub.s32 %s2574_s19, %s3530_s23  ;;  %p183_p6 = scmp.eq.s32.totalorder %s2646_s21, 1 }
  0x15   : > { %p54_p7 = scmp.eq.s32.totalorder %s49_s26, 0  ;;  %p2666_p8 = por %p70_p5, %p69_p3 }
  0x16   : > { %p2670_p9 = por %p183_p6, %p63_p1  ;;  %p189_p10 = scmp.eq.s32.totalorder %s1742_s22, 1 }
  0x17   : > { %s3501_s27 = scalar_select %p2666_p8, 1, 0 }
  0x18   : > { %s3502_s28 = scalar_select %p2670_p9, 1, 0 }
  0x19   : > { %s2675_s29 = scalar_select %p54_p7, %s2566_s17, %s56_s24  }
  0x1a   : > { %p2677_p11 = por %p189_p10, %p69_p3  ;;  %p2119_p13 = scmp.lt.s32.totalorder %s2578_s20, 2 }
  0x1b   : > { %3503 = sst [smem:[#allocation18_spill]] %s2675_s29  ;;  %s2684_s5 = sand.u32 1, %s2566_s17  }
  0x1c   : > { %s3504_s30 = scalar_select %p2677_p11, 1, 0 }
  0x1d   : > { %s2687_s6 = sshll.u32 %s2684_s5, 6  ;;  %s2690_s7 = smul.u32 3072, %s2574_s19 }
  0x1e   : > { %3505 = sst [smem:[#allocation19_spill]] %s3504_s30  ;;  %p2694_p0 = pnand %p2119_p13, %p2658_p4 }
  0x1f   : > { %s234_s9 = sand.u32 1, %s2578_s20   ;;  %s3507_s1 = sld [smem:[#allocation21_spill]] }
  0x20   : > { %s3506_s8 = scalar_select %p2694_p0, 1, 0 }
  0x21   : > { %s238_s13 = scalar_lea.vmem [#allocation5], %s2687_s6  ;;  %s2708_s24 = scalar_lea.sflag [#allocation6], %s234_s9 }
  0x22   : > { %s247_s14 = sshll.u32 %s238_s13, 4  ;;  %p2713_p2 = pneg %p2694_p0  ;;  %s2706_s14 = int_to_ptr.vmem [resolvable:$true] %s247_s14 }
  0x25   : > { %s1628_s12 = scalar_lea.hbm %s3507_s1, %s2690_s7  ;;  %s2371_s13 = scalar_lea.hbm %s3507_s1, 6144 }
  0x26   : > { %s2704_s22 = scalar_lea.hbm %s1628_s12, 64  ;;  %s2396_s25 = scalar_lea.hbm %s1628_s12, 1088 }
  0x27   : > { %p2367_p1 = scmp.ne.s32.totalorder %s2704_s22, %s2396_s25  ;;  %p2372_p5 = scmp.lt.u32.totalorder %s2704_s22, %s3507_s1 }
  0x28   : > { %p2373_p6 = scmp.lt.u32.totalorder %s2371_s13, %s2396_s25  ;;  %p2375_p10 = scmp.lt.u32.totalorder %s2396_s25, %s2704_s22 }
  0x29   : > { %p2369_p3 = pnand %p2713_p2, %p2367_p1 }
  0x2a   : > { %p2374_p7 = por %p2373_p6, %p2372_p5 }
  0x2b   : > { %p2370_p4 = pneg %p2369_p3 }
  0x2c   : > { %p2376_p13 = por %p2375_p10, %p2374_p7 }
  0x2e   : > { %p2377_p12 = pnand %p2376_p13, %p2370_p4 }
  0x30   : > { %2380 = shalt.err (!%p2377_p12)
}
  0x31   : > { %s2381_s9 = scalar_lea.vmem %s2706_s14, 1024  ;;  %s2580_s12 = smov [#allocation5]  }
  0x32   : > { %p2382_p1 = scmp.ne.s32.totalorder %s2706_s14, %s2381_s9  ;;  %s2386_s10 = sshll.u32 %s2580_s12, 4  ;;  %s2387_s10 = int_to_ptr.vmem [resolvable:$false] %s2386_s10 }
  0x33   : > { %s2388_s23 = scalar_lea.vmem %s2387_s10, 2048  ;;  %p2389_p9 = scmp.lt.s32.totalorder %s2706_s14, %s2387_s10 }
  0x34   : > { %p2384_p3 = pnand %p2382_p1, %p2713_p2  ;;  %p2390_p8 = scmp.lt.s32.totalorder %s2388_s23, %s2381_s9 }
  0x36   : > { %p2385_p11 = pneg %p2384_p3  ;;  %p2391_p5 = por %p2390_p8, %p2389_p9 }
  0x38   : > { %p2392_p6 = pnand %p2391_p5, %p2385_p11 }
  0x3a   : > { %2395 = shalt.err (!%p2392_p6)
}
  0x3b   : > { %s3484_s29 = smov 192   ;;  %s3486_s25 = smov 64  }
  0x3c   : > { %s3488_s11 = smov 4   ;;  %p1752_p8 = scmp.ge.s32.totalorder %s2578_s20, 1 }
  0x3d   : > { %2108 = dma.hbm_to_vmem [thread:$0]  (!%p2694_p0), %s2704_s22, 1024, %s2706_s14, %s2708_s24, %s3484_s29, %s3486_s25, %s3488_s11  }
  0x3e   : > { %p295_p9 = scmp.lt.s32.totalorder %s2578_s20, 3  ;;  %s3510_s0 = sld [smem:[#allocation20_spill]] }
  0x3f   : > { %s213_s23 = scalar_lea.vmem [#allocation2], %s2687_s6  ;;  %s2759_s29 = scalar_lea.hbm %s3478_s2, %s2690_s7 }
  0x40   : > { %p2742_p11 = pnand %p1752_p8, %p295_p9  ;;  %s224_s1 = sshll.u32 %s213_s23, 4  ;;  %s2753_s1 = int_to_ptr.vmem [resolvable:$true] %s224_s1 }
  0x41   : > { %s210_s25 = scalar_lea.sflag [#allocation3], %s2684_s5 }
  0x42   : > { %s3509_s13 = scalar_select %p2742_p11, 1, 0 }
  0x44   : > { %s2750_s10 = scalar_lea.hbm %s3510_s0, %s2690_s7  ;;  %s2402_s17 = scalar_lea.hbm %s3510_s0, 6144 }
  0x45   : > { %s2397_s11 = scalar_lea.hbm %s2750_s10, 1024  ;;  %p2403_p10 = scmp.lt.u32.totalorder %s2750_s10, %s3510_s0 }
  0x46   : > { %p2398_p12 = scmp.ne.s32.totalorder %s2750_s10, %s2397_s11  ;;  %p2404_p13 = scmp.lt.u32.totalorder %s2402_s17, %s2397_s11 }
  0x47   : > { %p2406_p3 = scmp.lt.u32.totalorder %s2397_s11, %s2750_s10 }
  0x48   : > { %p2400_p4 = pnand %p2398_p12, %p2713_p2  ;;  %p2405_p1 = por %p2404_p13, %p2403_p10 }
  0x4a   : > { %p2401_p7 = pneg %p2400_p4  ;;  %p2407_p5 = por %p2406_p3, %p2405_p1 }
  0x4c   : > { %p2408_p6 = pnand %p2407_p5, %p2401_p7 }
  0x4e   : > { %2411 = shalt.err (!%p2408_p6)
}
  0x4f   : > { %s2412_s7 = scalar_lea.vmem %s2753_s1, 1024  ;;  %s2584_s23 = smov [#allocation2]  }
  0x50   : > { %p2413_p8 = scmp.ne.s32.totalorder %s2753_s1, %s2412_s7  ;;  %s2417_s14 = sshll.u32 %s2584_s23, 4  ;;  %s2418_s14 = int_to_ptr.vmem [resolvable:$false] %s2417_s14 }
  0x51   : > { %s2419_s20 = scalar_lea.vmem %s2418_s14, 2048  ;;  %p2420_p4 = scmp.lt.s32.totalorder %s2753_s1, %s2418_s14 }
  0x52   : > { %p2415_p9 = pnand %p2413_p8, %p2713_p2  ;;  %p2421_p11 = scmp.lt.s32.totalorder %s2419_s20, %s2412_s7 }
  0x54   : > { %p2416_p12 = pneg %p2415_p9  ;;  %p2422_p10 = por %p2421_p11, %p2420_p4 }
  0x56   : > { %p2423_p13 = pnand %p2422_p10, %p2416_p12 }
  0x58   : > { %2426 = shalt.err (!%p2423_p13)
}
  0x59   : > { %s3511_s17 = smov 4   ;;  %s3512_s30 = smov 64  }
  0x5a   : > { %s3513_s11 = smov 192   ;;  %s2789_s22 = scalar_lea.hbm %s2759_s29, 128 }
  0x5b   : > { %2105 = dma.hbm_to_vmem [thread:$0]  (!%p2694_p0), %s2750_s10, 1024, %s2753_s1, %s210_s25, %s3513_s11, %s3512_s30, %s3511_s17  }
  0x5c   : > { %s261_s9 = scalar_lea.vmem [#allocation7], %s2687_s6  ;;  %s2457_s7 = scalar_lea.hbm %s2759_s29, 1152 }
  0x5d   : > { %s270_s12 = sshll.u32 %s261_s9, 4  ;;  %p2428_p11 = scmp.ne.s32.totalorder %s2789_s22, %s2457_s7  ;;  %s2792_s12 = int_to_ptr.vmem [resolvable:$true] %s270_s12 }
  0x5e   : > { %s2432_s20 = scalar_lea.hbm %s3478_s2, 6144  ;;  %p2433_p3 = scmp.lt.u32.totalorder %s2789_s22, %s3478_s2 }
  0x5f   : > { %p2430_p7 = pnand %p2428_p11, %p2713_p2  ;;  %p2434_p5 = scmp.lt.u32.totalorder %s2432_s20, %s2457_s7 }
  0x60   : > { %p2436_p8 = scmp.lt.u32.totalorder %s2457_s7, %s2789_s22 }
  0x61   : > { %p2431_p1 = pneg %p2430_p7  ;;  %p2435_p6 = por %p2434_p5, %p2433_p3 }
  0x63   : > { %p2437_p9 = por %p2436_p8, %p2435_p6 }
  0x65   : > { %p2438_p12 = pnand %p2437_p9, %p2431_p1 }
  0x67   : > { %2441 = shalt.err (!%p2438_p12)
}
  0x68   : > { %s2442_s6 = scalar_lea.vmem %s2792_s12, 1024  ;;  %s2585_s29 = smov [#allocation7]  }
  0x69   : > { %p2443_p4 = scmp.ne.s32.totalorder %s2792_s12, %s2442_s6  ;;  %s2447_s25 = sshll.u32 %s2585_s29, 4  ;;  %s2448_s25 = int_to_ptr.vmem [resolvable:$false] %s2447_s25 }
  0x6a   : > { %s2449_s0 = scalar_lea.vmem %s2448_s25, 2048  ;;  %p2450_p11 = scmp.lt.s32.totalorder %s2792_s12, %s2448_s25 }
  0x6b   : > { %p2445_p10 = pnand %p2443_p4, %p2713_p2  ;;  %p2451_p7 = scmp.lt.s32.totalorder %s2449_s0, %s2442_s6 }
  0x6d   : > { %p2446_p13 = pneg %p2445_p10  ;;  %p2452_p3 = por %p2451_p7, %p2450_p11 }
  0x6f   : > { %p2453_p5 = pnand %p2452_p3, %p2446_p13 }
  0x71   : > { %2456 = shalt.err (!%p2453_p5)
}
  0x72   : > { %2111 = dma.hbm_to_vmem [thread:$0]  (!%p2694_p0), %s2789_s22, 1024, %s2792_s12, %s2708_s24, %s3513_s11, %s3512_s30, %s3511_s17  }
  0x73   : > { %s1751_s10 = sshll.u32 %s2574_s19, 4  ;;  %s283_s14 = scalar_lea.vmem [#allocation8], %s2684_s5 }
  0x74   : > { %s2823_s23 = scalar_lea.hbm %s3479_s3, %s1751_s10  ;;  %s290_s20 = sshll.u32 %s283_s14, 4  ;;  %s291_s20 = int_to_ptr.vmem [resolvable:$true] %s290_s20 }
  0x75   : > { %s281_s1 = scalar_lea.sflag [#allocation9], %s2684_s5  ;;  %s2458_s6 = scalar_lea.hbm %s2823_s23, 16 }
  0x76   : > { %p2459_p1 = scmp.ne.s32.totalorder %s2823_s23, %s2458_s6  ;;  %s2463_s30 = scalar_lea.hbm %s3479_s3, 32 }
  0x77   : > { %p2464_p9 = scmp.lt.u32.totalorder %s2823_s23, %s3479_s3  ;;  %p2465_p12 = scmp.lt.u32.totalorder %s2463_s30, %s2458_s6 }
  0x78   : > { %p2461_p6 = pnand %p2459_p1, %p2713_p2  ;;  %p2467_p10 = scmp.lt.u32.totalorder %s2458_s6, %s2823_s23 }
  0x79   : > { %p2466_p4 = por %p2465_p12, %p2464_p9 }
  0x7a   : > { %p2462_p8 = pneg %p2461_p6 }
  0x7b   : > { %p2468_p13 = por %p2467_p10, %p2466_p4 }
  0x7d   : > { %p2469_p11 = pnand %p2468_p13, %p2462_p8 }
  0x7f   : > { %2472 = shalt.err (!%p2469_p11)
}
  0x80   : > { %s2473_s5 = scalar_lea.vmem %s291_s20, 16  ;;  %s2586_s12 = smov [#allocation8]  }
  0x81   : > { %p2474_p7 = scmp.ne.s32.totalorder %s291_s20, %s2473_s5  ;;  %s2478_s29 = sshll.u32 %s2586_s12, 4  ;;  %s2479_s29 = int_to_ptr.vmem [resolvable:$false] %s2478_s29 }
  0x82   : > { %s2480_s25 = scalar_lea.vmem %s2479_s29, 32  ;;  %p2481_p1 = scmp.lt.s32.totalorder %s291_s20, %s2479_s29 }
  0x83   : > { %p2476_p3 = pnand %p2474_p7, %p2713_p2  ;;  %p2482_p6 = scmp.lt.s32.totalorder %s2480_s25, %s2473_s5 }
  0x85   : > { %p2477_p5 = pneg %p2476_p3  ;;  %p2483_p0 = por %p2482_p6, %p2481_p1 }
  0x87   : > { %p2484_p9 = pnand %p2483_p0, %p2477_p5 }
  0x89   : > { %2487 = shalt.err (!%p2484_p9)
}
  0x8a   : > { %p3514_p12 = scmp.ne.s32.totalorder %s3506_s8, 0  ;;  %p3515_p8 = scmp.ne.s32.totalorder %s3509_s13, 0 }
  0x8b   : > { %s2847_s26 = sand.u32 (!%p3515_p8), 1, %s2562_s16   ;;  %p3516_p0 = scmp.ne.s32.totalorder (!%p3515_p8), %s3501_s27, 0 }
  0x8c   : > { %2114 = dma.hbm_to_vmem [thread:$0]  (!%p3514_p12), %s2823_s23, 16, %s291_s20, %s281_s1  }
  0x8d   : > { %299 = sbr.rel (%p3515_p8) target bundleno = 1815 (0x717), region = 36  ;;  %s2850_s0 = sshll.u32 (!%p3515_p8), %s2847_s26, 6 }
  0x8e   : > { %s302_s10 = scalar_lea.sflag (!%p3515_p8), [#allocation3], %s2847_s26  ;;  %s2854_s9 = scalar_lea.vmem (!%p3515_p8), [#allocation2], %s2850_s0 }
  0x94   : > { %2541 = dma.done.wait (%p3516_p0), %s302_s10, 1024  }
  0x95   : > { %2543 = vsyncadd (%p3516_p0), %s302_s10, 4294966272  ;;  %s310_s8 = sand.u32 1, %s2646_s21   ;;  %s2862_s7 = scalar_lea.vmem [#allocation5], %s2850_s0 }
  0x96   : > { %s311_s13 = scalar_lea.sflag [#allocation6], %s310_s8 }
  0x97   : > { %2545 = dma.done.wait (%p3516_p0), %s311_s13, 2048  }
  0x98   : > { %2547 = vsyncadd (%p3516_p0), %s311_s13, 4294965248  ;;  %s2869_s23 = scalar_lea.vmem [#allocation7], %s2850_s0  ;;  %s329_s14 = scalar_lea.sflag [#allocation9], %s2847_s26 }
  0x99   : > { %s331_s20 = scalar_lea.vmem [#allocation8], %s2847_s26 }
  0x9a   : > { %2549 = dma.done.wait (%p3516_p0), %s329_s14, 16  }
  0x9b   : > { %2551 = vsyncadd (%p3516_p0), %s329_s14, 4294967280  ;;  %vm510_vm0 = vcmask 523264   ;;  %v2214_v0 = vld [vmem:[%s2862_s7] sm:$0xff]   ;;  %v2215_v1 = vld [vmem:[%s2862_s7 + $0x8] sm:$0xff]   ;;  %s2587_s21 = smov 64   ;;  %s3384_s27 = scalar_lea.vmem [#allocation10], %s2850_s0 }
  0x9c   : > { %2075 = vmatprep.subr.msk.bf16.mxu0 %vm510_vm0, %v2214_v0  ;;  %v536_v2 = vsel %vm510_vm0, %v2214_v0, 0  ;;  %969 = vrot.lane.b32.xlu0 %v2214_v0, %s2587_s21  ;;  %v2885_v3 = vld [vmem:[%s2862_s7 + $0x10] sm:$0xff]   ;;  %v539_v4 = vsel %vm510_vm0, %v2215_v1, 0  ;;  %v2889_v5 = vld [vmem:[%s2854_s9] sm:$0xff]   ;;  %v2898_v7 = vld [vmem:[%s2862_s7 + $0x18] sm:$0xff]   ;;  %s1835_s1 = sshll.u32 %s2570_s18, 10 }
  0x9d   : > { %1948 = vmatpush3.bf16.xpose.msra.mxu0 %v536_v2  ;;  %971 = vrot.lane.b32.xlu1 %v2215_v1, %s2587_s21  ;;  %v542_v6 = vsel %vm510_vm0, %v2885_v3, 0  ;;  %v545_v8 = vsel %vm510_vm0, %v2898_v7, 0  ;;  %v2905_v9 = vld [vmem:[%s2862_s7 + $0x20] sm:$0xff]   ;;  %v2912_v11 = vld [vmem:[%s2862_s7 + $0x28] sm:$0xff]   ;;  %v2919_v13 = vld [vmem:[%s2862_s7 + $0x30] sm:$0xff]   ;;  %s1580_s6 = sshll.u32 %s3384_s27, 4  ;;  %s3421_s18 = scalar_lea.hbm %s3480_s4, %s1835_s1  ;;  %s3423_s6 = int_to_ptr.vmem [resolvable:$true] %s1580_s6 }
  0x9e   : > { %2076 = vmatprep.subr.msk.bf16.mxu0 %vm510_vm0, %v2215_v1  ;;  %1963 = vmatprep.mubr.msk.bf16.mxu0 %vm510_vm0, %v2889_v5  ;;  %v548_v10 = vsel %vm510_vm0, %v2905_v9, 0  ;;  %v551_v12 = vsel %vm510_vm0, %v2912_v11, 0  ;;  %v554_v14 = vsel %vm510_vm0, %v2919_v13, 0  ;;  %v2926_v15 = vld [vmem:[%s2862_s7 + $0x38] sm:$0xff]   ;;  %v2933_v17 = vld [vmem:[%s2854_s9 + $0x8] sm:$0xff]   ;;  %v2936_v18 = vld [vmem:[%s2854_s9 + $0x10] sm:$0xff]  }
  0x9f   : > { %v557_v16 = vsel %vm510_vm0, %v2926_v15, 0  ;;  %v2943_v19 = vld [vmem:[%s2854_s9 + $0x18] sm:$0xff]   ;;  %v2946_v20 = vld [vmem:[%s2854_s9 + $0x20] sm:$0xff]   ;;  %v2953_v21 = vld [vmem:[%s2854_s9 + $0x28] sm:$0xff]   ;;  %s1564_s30 = scalar_lea.sflag [#allocation4], %s2847_s26  ;;  %s2488_s11 = scalar_lea.vmem %s3423_s6, 1024 }
  0xa0   : > { %v2956_v22 = vld [vmem:[%s2854_s9 + $0x30] sm:$0xff]   ;;  %v2963_v23 = vld [vmem:[%s2854_s9 + $0x38] sm:$0xff]   ;;  %v2968_v24 = vld [vmem:[%s2869_s23] sm:$0xff]   ;;  %p2489_p2 = scmp.ne.s32.totalorder %s3423_s6, %s2488_s11  ;;  %p3517_p4 = scmp.ne.s32.totalorder %s3502_s28, 0 }
  0xa1   : > { %v2971_v25 = vld [vmem:[%s2869_s23 + $0x8] sm:$0xff]   ;;  %1979 = vmatprep.subr.bf16.mxu1 %v2968_v24  ;;  %v2977_v26 = vld [vmem:[%s2869_s23 + $0x10] sm:$0xff]   ;;  %v2982_v27 = vld [vmem:[%s2869_s23 + $0x18] sm:$0xff]   ;;  %s2588_s22 = smov [#allocation10]  }
  0xa2   : > { %1980 = vmatpush3.bf16.msra.mxu1 %v2968_v24  ;;  %v2987_v28 = vld [vmem:[%s2869_s23 + $0x20] sm:$0xff]   ;;  %v2993_v29 = vld [vmem:[%s2869_s23 + $0x28] sm:$0xff]   ;;  %v2998_v30 = vld [vmem:[%s2869_s23 + $0x30] sm:$0xff]   ;;  %p2490_p10 = pnand %p2489_p2, %p3517_p4  ;;  %s2492_s5 = sshll.u32 %s2588_s22, 4  ;;  %s2493_s5 = int_to_ptr.vmem [resolvable:$false] %s2492_s5 }
  0xa3   : > { %1981 = vmatprep.subr.bf16.mxu1 %v2971_v25  ;;  %v3001_v31 = vld [vmem:[%s2869_s23 + $0x38] sm:$0xff]   ;;  %v3013_v33 = vld [vmem:[%s331_s20] ss:$0 sm:$0xff]  ;;  %s2494_s12 = scalar_lea.vmem %s2493_s5, 2048  ;;  %p2495_p11 = scmp.lt.s32.totalorder %s3423_s6, %s2493_s5 }
  0xa4   : > { %p2491_p13 = pneg %p2490_p10  ;;  %p2496_p7 = scmp.lt.s32.totalorder %s2494_s12, %s2488_s11 }
  0xa5   : > { %1950 = vmatpush3.bf16.xpose.msra.mxu0 %v539_v4 }
  0xa6   : > { %2077 = vmatprep.subr.msk.bf16.mxu0 %vm510_vm0, %v2885_v3  ;;  %1982 = vmatpush3.bf16.msra.mxu1 %v2971_v25  ;;  %p2497_p3 = por %p2496_p7, %p2495_p11 }
  0xa7   : > { %1983 = vmatprep.subr.bf16.mxu1 %v2977_v26 }
  0xa8   : > { %p2498_p5 = pnand %p2497_p3, %p2491_p13 }
  0xaa   : > { %1984 = vmatpush3.bf16.msra.mxu1 %v2977_v26 }
  0xab   : > { %1985 = vmatprep.subr.bf16.mxu1 %v2982_v27 }
  0xad   : > { %1952 = vmatpush3.bf16.xpose.msra.mxu0 %v542_v6 }
  0xae   : > { %2078 = vmatprep.subr.msk.bf16.mxu0 %vm510_vm0, %v2898_v7  ;;  %1986 = vmatpush3.bf16.msra.mxu1 %v2982_v27 }
  0xaf   : > { %1987 = vmatprep.subr.bf16.mxu1 %v2987_v28 }
  0xb2   : > { %1988 = vmatpush3.bf16.msra.mxu1 %v2987_v28 }
  0xb3   : > { %1989 = vmatprep.subr.bf16.mxu1 %v2993_v29 }
  0xb5   : > { %1954 = vmatpush3.bf16.xpose.msra.mxu0 %v545_v8 }
  0xb6   : > { %2079 = vmatprep.subr.msk.bf16.mxu0 %vm510_vm0, %v2905_v9  ;;  %1990 = vmatpush3.bf16.msra.mxu1 %v2993_v29 }
  0xb7   : > { %1991 = vmatprep.subr.bf16.mxu1 %v2998_v30 }
  0xba   : > { %1992 = vmatpush3.bf16.msra.mxu1 %v2998_v30 }
  0xbb   : > { %1993 = vmatprep.subr.bf16.mxu1 %v3001_v31 }
  0xbd   : > { %1956 = vmatpush3.bf16.xpose.msra.mxu0 %v548_v10 }
  0xbe   : > { %2080 = vmatprep.subr.msk.bf16.mxu0 %vm510_vm0, %v2912_v11  ;;  %1994 = vmatpush3.bf16.msra.mxu1 %v3001_v31 }
  0xc5   : > { %1958 = vmatpush3.bf16.xpose.msra.mxu0 %v551_v12 }
  0xc6   : > { %2081 = vmatprep.subr.msk.bf16.mxu0 %vm510_vm0, %v2919_v13 }
  0xcd   : > { %1960 = vmatpush3.bf16.xpose.msra.mxu0 %v554_v14 }
  0xce   : > { %2082 = vmatprep.subr.msk.bf16.mxu0 %vm510_vm0, %v2926_v15 }
  0xd5   : > { %1962 = vmatpush3.bf16.xpose.msra.mxu0 %v557_v16 }
  0xdc   : > { %1964 = vmatmul.mubr.msk.bf16.vlgmr.msra.gmra.mrb[0].mxu0 %vm510_vm0, %v2933_v17 }
  0xdd   : > { %1967 = vmatprep.mubr.msk.bf16.mxu0 %vm510_vm0, %v2936_v18 }
  0xe4   : > { %1968 = vmatmul.mubr.msk.bf16.gmra.mrb[4].mxu0 %vm510_vm0, %v2943_v19 }
  0xe5   : > { %1971 = vmatprep.mubr.msk.bf16.mxu0 %vm510_vm0, %v2946_v20 }
  0xec   : > { %1972 = vmatmul.mubr.msk.bf16.gmra.mrb[8].mxu0 %vm510_vm0, %v2953_v21 }
  0xed   : > { %1975 = vmatprep.mubr.msk.bf16.mxu0 %vm510_vm0, %v2956_v22 }
  0xf4   : > { %1976 = vmatmul.mubr.msk.bf16.gmra.mrb[12].mxu0 %vm510_vm0, %v2963_v23 }
 0x10e   : > { %v3006_v32 = vpop.permute.xlu0 %969 }
 0x10f   : > { %2083 = vmatprep.subr.msk.bf16.mxu1 %vm510_vm0, %v3006_v32  ;;  %v3071_v2 = vpop.permute.xlu1 %971 }
 0x1af   : > { %v1965_v34 = vpop.f32.mrb[0].mxu0 }
 0x1b0   : > { %v602_v35 = vadd.f32 %v1965_v34, %v3013_v33  ;;  %v593_v36 = vpop.f32.mrb[1].mxu0 }
 0x1b1   : > { %v594_v37 = vadd.f32 %v3013_v33, %v593_v36  ;;  %v1966_v38 = vpop.f32.mrb[2].mxu0 }
 0x1b2   : > { %660 = vmax.xlane.f32.xlu1 %v602_v35  ;;  %v596_v39 = vpop.f32.mrb[3].mxu0  ;;  %v605_v40 = vadd.f32 %v1966_v38, %v3013_v33 }
 0x1b3   : > { %656 = vmax.xlane.f32.xlu0 %v594_v37  ;;  %v597_v41 = vadd.f32 %v3013_v33, %v596_v39 }
 0x1b6   : > { %662 = vmax.xlane.f32.xlu1 %v605_v40 }
 0x1b7   : > { %v1969_v42 = vpop.f32.mrb[4].mxu0  ;;  %658 = vmax.xlane.f32.xlu0 %v597_v41 }
 0x1b8   : > { %v3020_v43 = vadd.f32 %v1969_v42, %v3013_v33  ;;  %v609_v44 = vpop.f32.mrb[5].mxu0 }
 0x1b9   : > { %v1970_v45 = vpop.f32.mrb[6].mxu0  ;;  %v3026_v48 = vadd.f32 %v3013_v33, %v609_v44 }
 0x1ba   : > { %v3023_v46 = vadd.f32 %v1970_v45, %v3013_v33  ;;  %v612_v47 = vpop.f32.mrb[7].mxu0 }
 0x1bb   : > { %668 = vmax.xlane.f32.xlu0 %v3020_v43  ;;  %v3031_v49 = vadd.f32 %v3013_v33, %v612_v47 }
 0x1bc   : > { %670 = vmax.xlane.f32.xlu1 %v3023_v46 }
 0x1bf   : > { %v1973_v50 = vpop.f32.mrb[8].mxu0  ;;  %664 = vmax.xlane.f32.xlu0 %v3026_v48 }
 0x1c0   : > { %v3035_v51 = vadd.f32 %v1973_v50, %v3013_v33  ;;  %v625_v52 = vpop.f32.mrb[9].mxu0  ;;  %666 = vmax.xlane.f32.xlu1 %v3031_v49 }
 0x1c1   : > { %v1974_v53 = vpop.f32.mrb[10].mxu0  ;;  %v3042_v56 = vadd.f32 %v3013_v33, %v625_v52 }
 0x1c2   : > { %v3039_v54 = vadd.f32 %v1974_v53, %v3013_v33  ;;  %v628_v55 = vpop.f32.mrb[11].mxu0 }
 0x1c3   : > { %676 = vmax.xlane.f32.xlu0 %v3035_v51  ;;  %v3047_v57 = vadd.f32 %v3013_v33, %v628_v55 }
 0x1c4   : > { %678 = vmax.xlane.f32.xlu1 %v3039_v54 }
 0x1c7   : > { %672 = vmax.xlane.f32.xlu0 %v3042_v56  ;;  %v1977_v58 = vpop.f32.mrb[12].mxu0 }
 0x1c8   : > { %v3051_v59 = vadd.f32 %v1977_v58, %v3013_v33  ;;  %674 = vmax.xlane.f32.xlu1 %v3047_v57  ;;  %v641_v60 = vpop.f32.mrb[13].mxu0 }
 0x1c9   : > { %v1978_v61 = vpop.f32.mrb[14].mxu0  ;;  %v3056_v63 = vadd.f32 %v3013_v33, %v641_v60 }
 0x1ca   : > { %v644_v62 = vpop.f32.mrb[15].mxu0  ;;  %v3064_v0 = vadd.f32 %v1978_v61, %v3013_v33 }
 0x1cb   : > { %684 = vmax.xlane.f32.xlu0 %v3051_v59  ;;  %v3068_v1 = vadd.f32 %v3013_v33, %v644_v62 }
 0x1cf   : > { %680 = vmax.xlane.f32.xlu0 %v3056_v63 }
 0x1d9   : > { %975 = vrot.lane.b32.xlu1 %v2898_v7, %s2587_s21 }
 0x1e5   : > { %973 = vrot.lane.b32.xlu0 %v2885_v3, %s2587_s21 }
 0x1fd   : > { %686 = vmax.xlane.f32.xlu1 %v3064_v0 }
 0x201   : > { %682 = vmax.xlane.f32.xlu1 %v3068_v1 }
 0x23f   : > { %v661_v4 = vpop.xlane.xlu1 %660 }
 0x240   : > { %v690_v6 = vsub.f32 %v602_v35, %v661_v4  ;;  %v657_v8 = vpop.xlane.xlu0 %656 }
 0x241   : > { %v688_v10 = vsub.f32 %v594_v37, %v657_v8 }
 0x242   : > { %v708_v7 = vmul.f32 1.442695, %v690_v6 }
 0x243   : > { %v704_v12 = vmul.f32 1.442695, %v688_v10  ;;  %v663_v14 = vpop.xlane.xlu1 %662 }
 0x244   : > { %2238 = vpow2.f32 %v708_v7  ;;  %v691_v3 = vsub.f32 %v605_v40, %v663_v14  ;;  %v659_v16 = vpop.xlane.xlu0 %658 }
 0x245   : > { %v689_v34 = vsub.f32 %v597_v41, %v659_v16  ;;  %2240 = vpow2.f32 %v704_v12 }
 0x246   : > { %v710_v36 = vmul.f32 1.442695, %v691_v3 }
 0x247   : > { %v706_v38 = vmul.f32 1.442695, %v689_v34 }
 0x248   : > { %2242 = vpow2.f32 %v710_v36  ;;  %v669_v40 = vpop.xlane.xlu0 %668 }
 0x249   : > { %2244 = vpow2.f32 %v706_v38  ;;  %v671_v45 = vpop.xlane.xlu1 %670  ;;  %v694_v52 = vsub.f32 %v3020_v43, %v669_v40 }
 0x24a   : > { %v695_v62 = vsub.f32 %v3023_v46, %v671_v45 }
 0x24b   : > { %v716_v58 = vmul.f32 1.442695, %v694_v52 }
 0x24c   : > { %v665_v41 = vpop.xlane.xlu0 %664  ;;  %v718_v8 = vmul.f32 1.442695, %v695_v62  ;;  %v1010_v62 = vsel %vm510_vm0, %v3006_v32, 0 }
 0x24d   : > { %v667_v50 = vpop.xlane.xlu1 %666  ;;  %v692_v53 = vsub.f32 %v3026_v48, %v665_v41  ;;  %2246 = vpow2.f32 %v716_v58 }
 0x24e   : > { %v3073_v39 = vpop.eup %2238  ;;  %v693_v60 = vsub.f32 %v3031_v49, %v667_v50 }
 0x24f   : > { %740 = vadd.xlane.f32.xlu0 %v3073_v39  ;;  %v3076_v42 = vpop.eup %2240  ;;  %v712_v4 = vmul.f32 1.442695, %v692_v53 }
 0x250   : > { %v677_v44 = vpop.xlane.xlu0 %676 }
 0x251   : > { %v679_v61 = vpop.xlane.xlu1 %678  ;;  %2248 = vpow2.f32 %v712_v4  ;;  %v698_v10 = vsub.f32 %v3035_v51, %v677_v44 }
 0x252   : > { %v3078_v35 = vpop.eup %2242  ;;  %v699_v51 = vsub.f32 %v3039_v54, %v679_v61 }
 0x253   : > { %742 = vadd.xlane.f32.xlu1 %v3078_v35  ;;  %736 = vadd.xlane.f32.xlu0 %v3076_v42  ;;  %v3082_v37 = vpop.eup %2244  ;;  %v724_v49 = vmul.f32 1.442695, %v698_v10 }
 0x254   : > { %v673_v47 = vpop.xlane.xlu0 %672  ;;  %v726_v36 = vmul.f32 1.442695, %v699_v51 }
 0x255   : > { %v675_v43 = vpop.xlane.xlu1 %674  ;;  %v696_v12 = vsub.f32 %v3042_v56, %v673_v47 }
 0x256   : > { %v697_v38 = vsub.f32 %v3047_v57, %v675_v43 }
 0x257   : > { %738 = vadd.xlane.f32.xlu1 %v3082_v37  ;;  %v3099_v3 = vpop.eup %2246 }
 0x258   : > { %v685_v55 = vpop.xlane.xlu0 %684 }
 0x259   : > { %v3097_v14 = vpop.permute.xlu1 %975 }
 0x25a   : > { %v1019_v32 = vsel %vm510_vm0, %v3097_v14, 0 }
 0x25b   : > { %v3103_v16 = vpop.eup %2248 }
 0x25c   : > { %v681_v6 = vpop.xlane.xlu0 %680 }
 0x25d   : > { %v700_v7 = vsub.f32 %v3056_v63, %v681_v6 }
 0x25f   : > { %v728_v46 = vmul.f32 1.442695, %v700_v7 }
 0x268   : > { %979 = vrot.lane.b32.xlu1 %v2912_v11, %s2587_s21  ;;  %v714_v11 = vmul.f32 1.442695, %v693_v60 }
 0x269   : > { %977 = vrot.lane.b32.xlu0 %v2905_v9, %s2587_s21  ;;  %v702_v9 = vsub.f32 %v3051_v59, %v685_v55  ;;  %v720_v59 = vmul.f32 1.442695, %v696_v12 }
 0x26a   : > { %2250 = vpow2.f32 %v714_v11 }
 0x26b   : > { %v732_v48 = vmul.f32 1.442695, %v702_v9  ;;  %2252 = vpow2.f32 %v718_v8 }
 0x26d   : > { %2254 = vpow2.f32 %v732_v48 }
 0x26e   : > { %2256 = vpow2.f32 %v724_v49 }
 0x26f   : > { %2258 = vpow2.f32 %v728_v46 }
 0x270   : > { %2260 = vpow2.f32 %v720_v59 }
 0x274   : > { %v3105_v34 = vpop.eup %2250 }
 0x275   : > { %v3111_v41 = vpop.eup %2252 }
 0x277   : > { %v3113_v44 = vpop.eup %2254 }
 0x278   : > { %v3118_v47 = vpop.eup %2256 }
 0x279   : > { %v3120_v50 = vpop.eup %2258 }
 0x27a   : > { %v3124_v52 = vpop.eup %2260 }
 0x288   : > { %748 = vadd.xlane.f32.xlu0 %v3099_v3 }
 0x28a   : > { %v687_v63 = vpop.xlane.xlu1 %686 }
 0x28b   : > { %v703_v56 = vsub.f32 %v3064_v0, %v687_v63  ;;  %v722_v0 = vmul.f32 1.442695, %v697_v38 }
 0x28c   : > { %746 = vadd.xlane.f32.xlu0 %v3105_v34  ;;  %744 = vadd.xlane.f32.xlu1 %v3103_v16 }
 0x28d   : > { %v734_v40 = vmul.f32 1.442695, %v703_v56 }
 0x28e   : > { %v683_v54 = vpop.xlane.xlu1 %682 }
 0x28f   : > { %2262 = vpow2.f32 %v734_v40  ;;  %v701_v45 = vsub.f32 %v3068_v1, %v683_v54 }
 0x290   : > { %750 = vadd.xlane.f32.xlu1 %v3111_v41  ;;  %764 = vadd.xlane.f32.xlu0 %v3113_v44  ;;  %2264 = vpow2.f32 %v726_v36 }
 0x291   : > { %2266 = vpow2.f32 %v722_v0  ;;  %v730_v57 = vmul.f32 1.442695, %v701_v45 }
 0x293   : > { %2268 = vpow2.f32 %v730_v57 }
 0x294   : > { %756 = vadd.xlane.f32.xlu1 %v3118_v47  ;;  %760 = vadd.xlane.f32.xlu0 %v3120_v50 }
 0x298   : > { %752 = vadd.xlane.f32.xlu1 %v3124_v52 }
 0x299   : > { %v3127_v53 = vpop.eup %2262 }
 0x29a   : > { %766 = vadd.xlane.f32.xlu0 %v3127_v53  ;;  %v3130_v1 = vpop.eup %2264 }
 0x29b   : > { %v3133_v55 = vpop.eup %2266 }
 0x29c   : > { %758 = vadd.xlane.f32.xlu1 %v3130_v1 }
 0x29d   : > { %v3136_v58 = vpop.eup %2268 }
 0x2a0   : > { %754 = vadd.xlane.f32.xlu1 %v3133_v55 }
 0x2a4   : > { %762 = vadd.xlane.f32.xlu1 %v3136_v58 }
 0x2b0   : > { %981 = vrot.lane.b32.xlu0 %v2919_v13, %s2587_s21 }
 0x2b4   : > { %953 = vrot.lane.b32.xlu0 %v2889_v5, %s2587_s21  ;;  %v974_v5 = vpop.permute.xlu0 %973 }
 0x2b5   : > { %983 = vrot.lane.b32.xlu1 %v2926_v15, %s2587_s21 }
 0x2b8   : > { %957 = vrot.lane.b32.xlu0 %v2936_v18, %s2587_s21 }
 0x2b9   : > { %955 = vrot.lane.b32.xlu1 %v2933_v17, %s2587_s21 }
 0x2bc   : > { %961 = vrot.lane.b32.xlu0 %v2946_v20, %s2587_s21 }
 0x2bd   : > { %959 = vrot.lane.b32.xlu1 %v2943_v19, %s2587_s21 }
 0x2c0   : > { %965 = vrot.lane.b32.xlu0 %v2956_v22, %s2587_s21 }
 0x2c1   : > { %963 = vrot.lane.b32.xlu1 %v2953_v21, %s2587_s21 }
 0x2c4   : > { %1282 = vrot.lane.b32.xlu0 %v2968_v24, %s2587_s21 }
 0x2c5   : > { %967 = vrot.lane.b32.xlu1 %v2963_v23, %s2587_s21 }
 0x2c8   : > { %1286 = vrot.lane.b32.xlu0 %v2977_v26, %s2587_s21 }
 0x2c9   : > { %1284 = vrot.lane.b32.xlu1 %v2971_v25, %s2587_s21 }
 0x2dc   : > { %v741_v13 = vpop.xlane.xlu0 %740 }
 0x2e0   : > { %v743_v15 = vpop.xlane.xlu1 %742  ;;  %v737_v17 = vpop.xlane.xlu0 %736 }
 0x2e1   : > { %2270 = vrcp.f32 %v743_v15 }
 0x2e2   : > { %2272 = vrcp.f32 %v737_v17 }
 0x2e3   : > { %2274 = vrcp.f32 %v741_v13 }
 0x2e4   : > { %v739_v18 = vpop.xlane.xlu1 %738 }
 0x2e5   : > { %2276 = vrcp.f32 %v739_v18 }
 0x2e8   : > { %v980_v4 = vpop.permute.xlu1 %979 }
 0x2e9   : > { %v1025_v6 = vsel %vm510_vm0, %v980_v4, 0 }
 0x2eb   : > { %v2271_v19 = vpop.eup %2270 }
 0x2ec   : > { %v2273_v20 = vpop.eup %2272  ;;  %v787_v23 = vmul.f32 %v2271_v19, %v3078_v35  ;;  %v1013_v35 = vsel %vm510_vm0, %v3071_v2, 0 }
 0x2ed   : > { %v2275_v21 = vpop.eup %2274  ;;  %v784_v24 = vmul.f32 %v2273_v20, %v3076_v42  ;;  %v1016_v42 = vsel %vm510_vm0, %v974_v5, 0 }
 0x2ee   : > { %v786_v25 = vmul.f32 %v2275_v21, %v3073_v39  ;;  %v978_v39 = vpop.permute.xlu0 %977 }
 0x2ef   : > { %v2277_v22 = vpop.eup %2276 }
 0x2f0   : > { %v785_v26 = vmul.f32 %v2277_v22, %v3082_v37  ;;  %v801_v61 = vpack.c.bf16 %v787_v23, %v786_v25  ;;  %v1022_v37 = vsel %vm510_vm0, %v978_v39, 0 }
 0x2f2   : > { %v800_v60 = vpack.c.bf16 %v785_v26, %v784_v24 }
 0x2f4   : > { %1995 = vmatprep.mubr.bf16.mxu1 %v800_v60 }
 0x2f5   : > { %1996 = vmatmul.mubr.bf16.vlgmr.msra.gmra.mrb[0].mxu1 %v801_v61 }
 0x2f6   : > { %2012 = vmatpush3.bf16.xpose.msra.mxu1 %v1010_v62 }
 0x2f7   : > { %2084 = vmatprep.subr.msk.bf16.mxu1 %vm510_vm0, %v3071_v2 }
 0x2fe   : > { %2014 = vmatpush3.bf16.xpose.msra.mxu1 %v1013_v35 }
 0x2ff   : > { %2085 = vmatprep.subr.msk.bf16.mxu1 %vm510_vm0, %v974_v5 }
 0x306   : > { %2016 = vmatpush3.bf16.xpose.msra.mxu1 %v1016_v42 }
 0x307   : > { %2086 = vmatprep.subr.msk.bf16.mxu1 %vm510_vm0, %v3097_v14 }
 0x30e   : > { %2018 = vmatpush3.bf16.xpose.msra.mxu1 %v1019_v32 }
 0x30f   : > { %2087 = vmatprep.subr.msk.bf16.mxu1 %vm510_vm0, %v978_v39 }
 0x315   : > { %v749_v2 = vpop.xlane.xlu0 %748 }
 0x316   : > { %2020 = vmatpush3.bf16.xpose.msra.mxu1 %v1022_v37 }
 0x317   : > { %2088 = vmatprep.subr.msk.bf16.mxu1 %vm510_vm0, %v980_v4 }
 0x319   : > { %v745_v11 = vpop.xlane.xlu1 %744  ;;  %v747_v9 = vpop.xlane.xlu0 %746 }
 0x31a   : > { %2278 = vrcp.f32 %v745_v11 }
 0x31b   : > { %2280 = vrcp.f32 %v747_v9 }
 0x31c   : > { %2282 = vrcp.f32 %v749_v2 }
 0x31d   : > { %v751_v8 = vpop.xlane.xlu1 %750  ;;  %v765_v10 = vpop.xlane.xlu0 %764 }
 0x31e   : > { %2284 = vrcp.f32 %v751_v8  ;;  %2022 = vmatpush3.bf16.xpose.msra.mxu1 %v1025_v6 }
 0x321   : > { %v757_v43 = vpop.xlane.xlu1 %756  ;;  %v761_v48 = vpop.xlane.xlu0 %760 }
 0x324   : > { %v2279_v7 = vpop.eup %2278 }
 0x325   : > { %v2281_v49 = vpop.eup %2280  ;;  %v753_v12 = vpop.xlane.xlu1 %752  ;;  %v788_v46 = vmul.f32 %v2279_v7, %v3103_v16 }
 0x326   : > { %v2283_v14 = vpop.eup %2282  ;;  %v789_v51 = vmul.f32 %v2281_v49, %v3105_v34 }
 0x327   : > { %v767_v59 = vpop.xlane.xlu0 %766  ;;  %v790_v38 = vmul.f32 %v2283_v14, %v3099_v3 }
 0x328   : > { %v2285_v63 = vpop.eup %2284  ;;  %v802_v56 = vpack.c.bf16 %v789_v51, %v788_v46 }
 0x329   : > { %v759_v36 = vpop.xlane.xlu1 %758  ;;  %v791_v40 = vmul.f32 %v2285_v63, %v3111_v41 }
 0x32a   : > { %1999 = vmatprep.mubr.bf16.mxu1 %v802_v56  ;;  %2286 = vrcp.f32 %v759_v36 }
 0x32b   : > { %v803_v54 = vpack.c.bf16 %v791_v40, %v790_v38  ;;  %v982_v0 = vpop.permute.xlu0 %981  ;;  %2288 = vrcp.f32 %v753_v12 }
 0x32c   : > { %v1028_v45 = vsel %vm510_vm0, %v982_v0, 0  ;;  %2089 = vmatprep.subr.msk.bf16.mxu1 %vm510_vm0, %v982_v0  ;;  %2290 = vrcp.f32 %v757_v43 }
 0x32d   : > { %v755_v16 = vpop.xlane.xlu1 %754  ;;  %2000 = vmatmul.mubr.bf16.gmra.mrb[4].mxu1 %v803_v54 }
 0x32e   : > { %2292 = vrcp.f32 %v755_v16  ;;  %2024 = vmatpush3.bf16.xpose.msra.mxu1 %v1028_v45 }
 0x32f   : > { %2294 = vrcp.f32 %v761_v48  ;;  %v954_v35 = vpop.permute.xlu0 %953 }
 0x331   : > { %v763_v34 = vpop.xlane.xlu1 %762 }
 0x332   : > { %2296 = vrcp.f32 %v763_v34 }
 0x333   : > { %2298 = vrcp.f32 %v767_v59  ;;  %v958_v42 = vpop.permute.xlu0 %957 }
 0x334   : > { %v2287_v3 = vpop.eup %2286  ;;  %2300 = vrcp.f32 %v765_v10 }
 0x335   : > { %v984_v41 = vpop.permute.xlu1 %983  ;;  %v2289_v57 = vpop.eup %2288  ;;  %v795_v17 = vmul.f32 %v2287_v3, %v3130_v1 }
 0x336   : > { %v1031_v5 = vsel %vm510_vm0, %v984_v41, 0  ;;  %2090 = vmatprep.subr.msk.bf16.mxu1 %vm510_vm0, %v984_v41  ;;  %v2291_v13 = vpop.eup %2290  ;;  %v792_v18 = vmul.f32 %v2289_v57, %v3124_v52 }
 0x337   : > { %2026 = vmatpush3.bf16.xpose.msra.mxu1 %v1031_v5  ;;  %v794_v21 = vmul.f32 %v2291_v13, %v3118_v47 }
 0x338   : > { %v2293_v15 = vpop.eup %2292 }
 0x339   : > { %v793_v19 = vmul.f32 %v2293_v15, %v3133_v55  ;;  %v2295_v20 = vpop.eup %2294  ;;  %v805_v24 = vpack.c.bf16 %v795_v17, %v794_v21  ;;  %v956_v47 = vpop.permute.xlu1 %955 }
 0x33a   : > { %v796_v25 = vmul.f32 %v2295_v20, %v3120_v50 }
 0x33b   : > { %v804_v22 = vpack.c.bf16 %v793_v19, %v792_v18 }
 0x33c   : > { %v2297_v23 = vpop.eup %2296 }
 0x33d   : > { %v2299_v26 = vpop.eup %2298  ;;  %2003 = vmatprep.mubr.bf16.mxu1 %v804_v22  ;;  %v797_v60 = vmul.f32 %v2297_v23, %v3136_v58  ;;  %v960_v50 = vpop.permute.xlu1 %959 }
 0x33e   : > { %2004 = vmatmul.mubr.bf16.gmra.mrb[8].mxu1 %v805_v24  ;;  %v2301_v61 = vpop.eup %2300  ;;  %v799_v1 = vmul.f32 %v2299_v26, %v3127_v53  ;;  %v962_v58 = vpop.permute.xlu0 %961 }
 0x33f   : > { %v806_v62 = vpack.c.bf16 %v797_v60, %v796_v25  ;;  %v798_v52 = vmul.f32 %v2301_v61, %v3113_v44 }
 0x341   : > { %2007 = vmatprep.mubr.bf16.mxu1 %v806_v62  ;;  %v807_v55 = vpack.c.bf16 %v799_v1, %v798_v52  ;;  %v964_v53 = vpop.permute.xlu1 %963 }
 0x342   : > { %v966_v32 = vpop.permute.xlu0 %965 }
 0x345   : > { %v968_v44 = vpop.permute.xlu1 %967 }
 0x346   : > { %2008 = vmatmul.mubr.bf16.gmra.mrb[12].mxu1 %v807_v55  ;;  %v1283_v11 = vpop.permute.xlu0 %1282 }
 0x347   : > { %2027 = vmatprep.mubr.msk.bf16.mxu1 %vm510_vm0, %v954_v35  ;;  %2043 = vmatprep.subr.bf16.mxu0 %v1283_v11 }
 0x348   : > { %2044 = vmatpush3.bf16.msra.mxu0 %v1283_v11 }
 0x349   : > { %v1285_v9 = vpop.permute.xlu1 %1284 }
 0x34a   : > { %2045 = vmatprep.subr.bf16.mxu0 %v1285_v9  ;;  %v1287_v6 = vpop.permute.xlu0 %1286 }
 0x34c   : > { %2046 = vmatpush3.bf16.msra.mxu0 %v1285_v9 }
 0x34d   : > { %2047 = vmatprep.subr.bf16.mxu0 %v1287_v6 }
 0x34e   : > { %2028 = vmatmul.mubr.msk.bf16.vlgmr.msra.gmra.mrb[16].mxu1 %vm510_vm0, %v956_v47 }
 0x34f   : > { %2031 = vmatprep.mubr.msk.bf16.mxu1 %vm510_vm0, %v958_v42 }
 0x350   : > { %2048 = vmatpush3.bf16.msra.mxu0 %v1287_v6 }
 0x356   : > { %2032 = vmatmul.mubr.msk.bf16.gmra.mrb[20].mxu1 %vm510_vm0, %v960_v50 }
 0x357   : > { %2035 = vmatprep.mubr.msk.bf16.mxu1 %vm510_vm0, %v962_v58 }
 0x35e   : > { %2036 = vmatmul.mubr.msk.bf16.gmra.mrb[24].mxu1 %vm510_vm0, %v964_v53 }
 0x35f   : > { %2039 = vmatprep.mubr.msk.bf16.mxu1 %vm510_vm0, %v966_v32 }
 0x366   : > { %2040 = vmatmul.mubr.msk.bf16.gmra.mrb[28].mxu1 %vm510_vm0, %v968_v44 }
 0x3c8   : > { %v3209_v39 = vpop.f32.mrb[0].mxu1 }
 0x3c9   : > { %v3211_v37 = vpop.f32.mrb[1].mxu1 }
 0x3ca   : > { %v3213_v4 = vpop.f32.mrb[2].mxu1 }
 0x3cb   : > { %v3215_v2 = vpop.f32.mrb[3].mxu1 }
 0x400   : > { %v3217_v8 = vpop.f32.mrb[4].mxu1 }
 0x401   : > { %v3219_v10 = vpop.f32.mrb[5].mxu1 }
 0x402   : > { %v3221_v43 = vpop.f32.mrb[6].mxu1 }
 0x403   : > { %v3223_v48 = vpop.f32.mrb[7].mxu1 }
 0x411   : > { %v3225_v7 = vpop.f32.mrb[8].mxu1 }
 0x412   : > { %v3227_v49 = vpop.f32.mrb[9].mxu1 }
 0x413   : > { %v3229_v12 = vpop.f32.mrb[10].mxu1 }
 0x414   : > { %v3231_v46 = vpop.f32.mrb[11].mxu1 }
 0x419   : > { %v3233_v14 = vpop.f32.mrb[12].mxu1 }
 0x41a   : > { %v3235_v51 = vpop.f32.mrb[13].mxu1 }
 0x41b   : > { %v3237_v59 = vpop.f32.mrb[14].mxu1 }
 0x41c   : > { %v3239_v63 = vpop.f32.mrb[15].mxu1 }
 0x421   : > { %v2029_v56 = vpop.f32.mrb[16].mxu1 }
 0x422   : > { %v1076_v36 = vadd.f32 %v2029_v56, %v3013_v33  ;;  %v1067_v38 = vpop.f32.mrb[17].mxu1 }
 0x423   : > { %v2030_v40 = vpop.f32.mrb[18].mxu1  ;;  %v1068_v45 = vadd.f32 %v3013_v33, %v1067_v38 }
 0x424   : > { %1134 = vmax.xlane.f32.xlu0 %v1076_v36  ;;  %v1070_v54 = vpop.f32.mrb[19].mxu1  ;;  %v1079_v34 = vadd.f32 %v2030_v40, %v3013_v33 }
 0x425   : > { %v1071_v0 = vadd.f32 %v3013_v33, %v1070_v54 }
 0x427   : > { %1132 = vmax.xlane.f32.xlu1 %v1071_v0 }
 0x428   : > { %1130 = vmax.xlane.f32.xlu0 %v1068_v45 }
 0x429   : > { %v2033_v16 = vpop.f32.mrb[20].mxu1 }
 0x42a   : > { %v1083_v3 = vpop.f32.mrb[21].mxu1  ;;  %v1092_v57 = vadd.f32 %v2033_v16, %v3013_v33 }
 0x42b   : > { %v2034_v41 = vpop.f32.mrb[22].mxu1  ;;  %v1084_v18 = vadd.f32 %v3013_v33, %v1083_v3 }
 0x42c   : > { %v3247_v5 = vadd.f32 %v2034_v41, %v3013_v33  ;;  %1136 = vmax.xlane.f32.xlu0 %v1079_v34  ;;  %v1086_v13 = vpop.f32.mrb[23].mxu1 }
 0x42d   : > { %v1087_v15 = vadd.f32 %v3013_v33, %v1086_v13 }
 0x42e   : > { %1144 = vmax.xlane.f32.xlu1 %v3247_v5 }
 0x430   : > { %1142 = vmax.xlane.f32.xlu0 %v1092_v57 }
 0x431   : > { %v2037_v17 = vpop.f32.mrb[24].mxu1 }
 0x432   : > { %1140 = vmax.xlane.f32.xlu1 %v1087_v15  ;;  %v1099_v19 = vpop.f32.mrb[25].mxu1  ;;  %v3253_v21 = vadd.f32 %v2037_v17, %v3013_v33 }
 0x433   : > { %v2038_v20 = vpop.f32.mrb[26].mxu1  ;;  %v3264_v25 = vadd.f32 %v3013_v33, %v1099_v19 }
 0x434   : > { %v3256_v22 = vadd.f32 %v2038_v20, %v3013_v33  ;;  %1138 = vmax.xlane.f32.xlu0 %v1084_v18  ;;  %v1102_v23 = vpop.f32.mrb[27].mxu1 }
 0x435   : > { %v3260_v24 = vadd.f32 %v3013_v33, %v1102_v23 }
 0x436   : > { %1152 = vmax.xlane.f32.xlu1 %v3256_v22 }
 0x438   : > { %1150 = vmax.xlane.f32.xlu0 %v3253_v21 }
 0x439   : > { %v2041_v26 = vpop.f32.mrb[28].mxu1 }
 0x43a   : > { %1148 = vmax.xlane.f32.xlu1 %v3260_v24  ;;  %v1115_v60 = vpop.f32.mrb[29].mxu1  ;;  %v3269_v62 = vadd.f32 %v2041_v26, %v3013_v33 }
 0x43b   : > { %v2042_v61 = vpop.f32.mrb[30].mxu1  ;;  %v3273_v52 = vadd.f32 %v3013_v33, %v1115_v60 }
 0x43c   : > { %1146 = vmax.xlane.f32.xlu0 %v3264_v25  ;;  %v1118_v1 = vpop.f32.mrb[31].mxu1  ;;  %v3281_v55 = vadd.f32 %v2042_v61, %v3013_v33 }
 0x43d   : > { %v3285_v35 = vadd.f32 %v3013_v33, %v1118_v1 }
 0x440   : > { %1158 = vmax.xlane.f32.xlu0 %v3269_v62 }
 0x444   : > { %1154 = vmax.xlane.f32.xlu0 %v3273_v52 }
 0x44b   : > { %1290 = vrot.lane.b32.xlu1 %v2987_v28, %s2587_s21 }
 0x45a   : > { %1288 = vrot.lane.b32.xlu0 %v2982_v27, %s2587_s21 }
 0x46f   : > { %1160 = vmax.xlane.f32.xlu1 %v3281_v55 }
 0x473   : > { %1156 = vmax.xlane.f32.xlu1 %v3285_v35 }
 0x484   : > { %1292 = vrot.lane.b32.xlu1 %v2993_v29, %s2587_s21 }
 0x4b1   : > { %v1135_v47 = vpop.xlane.xlu0 %1134 }
 0x4b2   : > { %v1164_v42 = vsub.f32 %v1076_v36, %v1135_v47 }
 0x4b4   : > { %v1182_v50 = vmul.f32 1.442695, %v1164_v42  ;;  %v1133_v58 = vpop.xlane.xlu1 %1132 }
 0x4b5   : > { %v1131_v28 = vpop.xlane.xlu0 %1130  ;;  %v1163_v32 = vsub.f32 %v1071_v0, %v1133_v58 }
 0x4b6   : > { %2302 = vpow2.f32 %v1182_v50  ;;  %v1162_v27 = vsub.f32 %v1068_v45, %v1131_v28 }
 0x4b7   : > { %v1180_v6 = vmul.f32 1.442695, %v1163_v32 }
 0x4b8   : > { %v1178_v53 = vmul.f32 1.442695, %v1162_v27 }
 0x4b9   : > { %v1137_v44 = vpop.xlane.xlu0 %1136 }
 0x4ba   : > { %2304 = vpow2.f32 %v1178_v53  ;;  %v1165_v11 = vsub.f32 %v1079_v34, %v1137_v44 }
 0x4bb   : > { %v1145_v9 = vpop.xlane.xlu1 %1144 }
 0x4bc   : > { %v1184_v33 = vmul.f32 1.442695, %v1165_v11  ;;  %v1169_v0 = vsub.f32 %v3247_v5, %v1145_v9 }
 0x4bd   : > { %v1143_v56 = vpop.xlane.xlu0 %1142 }
 0x4be   : > { %2306 = vpow2.f32 %v1184_v33  ;;  %v1168_v38 = vsub.f32 %v1092_v57, %v1143_v56  ;;  %v1192_v17 = vmul.f32 1.442695, %v1169_v0 }
 0x4bf   : > { %v1141_v40 = vpop.xlane.xlu1 %1140  ;;  %2308 = vpow2.f32 %v1180_v6 }
 0x4c0   : > { %v3290_v29 = vpop.eup %2302  ;;  %v1190_v36 = vmul.f32 1.442695, %v1168_v38  ;;  %v1167_v54 = vsub.f32 %v1087_v15, %v1141_v40 }
 0x4c1   : > { %1214 = vadd.xlane.f32.xlu1 %v3290_v29  ;;  %v1139_v45 = vpop.xlane.xlu0 %1138 }
 0x4c2   : > { %2310 = vpow2.f32 %v1190_v36  ;;  %v1188_v16 = vmul.f32 1.442695, %v1167_v54  ;;  %v1166_v34 = vsub.f32 %v1084_v18, %v1139_v45 }
 0x4c3   : > { %v1153_v13 = vpop.xlane.xlu1 %1152 }
 0x4c4   : > { %v3294_v3 = vpop.eup %2304  ;;  %v1186_v41 = vmul.f32 1.442695, %v1166_v34  ;;  %2312 = vpow2.f32 %v1188_v16  ;;  %v1173_v20 = vsub.f32 %v3256_v22, %v1153_v13 }
 0x4c5   : > { %1210 = vadd.xlane.f32.xlu1 %v3294_v3  ;;  %v1151_v57 = vpop.xlane.xlu0 %1150 }
 0x4c6   : > { %2314 = vpow2.f32 %v1186_v41  ;;  %v1172_v15 = vsub.f32 %v3253_v21, %v1151_v57  ;;  %v1200_v47 = vmul.f32 1.442695, %v1173_v20 }
 0x4c7   : > { %2316 = vpow2.f32 %v1192_v17  ;;  %v1149_v23 = vpop.xlane.xlu1 %1148 }
 0x4c8   : > { %v3298_v19 = vpop.eup %2306  ;;  %v1198_v5 = vmul.f32 1.442695, %v1172_v15  ;;  %v1171_v21 = vsub.f32 %v3260_v24, %v1149_v23 }
 0x4c9   : > { %1216 = vadd.xlane.f32.xlu1 %v3298_v19  ;;  %v1147_v18 = vpop.xlane.xlu0 %1146  ;;  %v3303_v60 = vpop.eup %2308 }
 0x4ca   : > { %v1170_v26 = vsub.f32 %v3264_v25, %v1147_v18  ;;  %2318 = vpow2.f32 %v1198_v5  ;;  %v1196_v58 = vmul.f32 1.442695, %v1171_v21 }
 0x4cb   : > { %v1291_v11 = vpop.permute.xlu1 %1290 }
 0x4cc   : > { %v3305_v61 = vpop.eup %2310  ;;  %v1194_v1 = vmul.f32 1.442695, %v1170_v26 }
 0x4cd   : > { %1212 = vadd.xlane.f32.xlu1 %v3303_v60  ;;  %1222 = vadd.xlane.f32.xlu0 %v3305_v61  ;;  %v1159_v22 = vpop.xlane.xlu0 %1158 }
 0x4ce   : > { %2320 = vpow2.f32 %v1194_v1  ;;  %v1176_v42 = vsub.f32 %v3269_v62, %v1159_v22  ;;  %v3311_v50 = vpop.eup %2312 }
 0x4cf   : > { %2322 = vpow2.f32 %v1200_v47 }
 0x4d0   : > { %v3313_v25 = vpop.eup %2314  ;;  %v1206_v28 = vmul.f32 1.442695, %v1176_v42 }
 0x4d1   : > { %1220 = vadd.xlane.f32.xlu1 %v3311_v50  ;;  %1218 = vadd.xlane.f32.xlu0 %v3313_v25  ;;  %v1155_v24 = vpop.xlane.xlu0 %1154  ;;  %v3318_v53 = vpop.eup %2316 }
 0x4d2   : > { %2324 = vpow2.f32 %v1206_v28  ;;  %v1174_v27 = vsub.f32 %v3273_v52, %v1155_v24 }
 0x4d3   : > { %2326 = vpow2.f32 %v1196_v58 }
 0x4d4   : > { %v1202_v32 = vmul.f32 1.442695, %v1174_v27  ;;  %v3321_v44 = vpop.eup %2318 }
 0x4d5   : > { %1224 = vadd.xlane.f32.xlu0 %v3318_v53  ;;  %v1289_v62 = vpop.permute.xlu0 %1288 }
 0x4d6   : > { %2328 = vpow2.f32 %v1202_v32  ;;  %2049 = vmatprep.subr.bf16.mxu0 %v1289_v62 }
 0x4d7   : > { %2050 = vmatpush3.bf16.msra.mxu0 %v1289_v62 }
 0x4d8   : > { %v3323_v9 = vpop.eup %2320  ;;  %2051 = vmatprep.subr.bf16.mxu0 %v1291_v11 }
 0x4d9   : > { %1230 = vadd.xlane.f32.xlu0 %v3321_v44  ;;  %1226 = vadd.xlane.f32.xlu1 %v3323_v9  ;;  %v3327_v52 = vpop.eup %2322 }
 0x4db   : > { %2052 = vmatpush3.bf16.msra.mxu0 %v1291_v11 }
 0x4dc   : > { %v3329_v33 = vpop.eup %2324 }
 0x4dd   : > { %1232 = vadd.xlane.f32.xlu0 %v3327_v52  ;;  %1238 = vadd.xlane.f32.xlu1 %v3329_v33  ;;  %v3333_v6 = vpop.eup %2326 }
 0x4e0   : > { %v3335_v56 = vpop.eup %2328 }
 0x4e1   : > { %1228 = vadd.xlane.f32.xlu0 %v3333_v6  ;;  %1234 = vadd.xlane.f32.xlu1 %v3335_v56 }
 0x4f2   : > { %1296 = vrot.lane.b32.xlu1 %v3001_v31, %s2587_s21 }
 0x4f7   : > { %1294 = vrot.lane.b32.xlu0 %v2998_v30, %s2587_s21 }
 0x4fc   : > { %v1161_v38 = vpop.xlane.xlu1 %1160 }
 0x4fd   : > { %v1177_v45 = vsub.f32 %v3281_v55, %v1161_v38 }
 0x4ff   : > { %v1208_v16 = vmul.f32 1.442695, %v1177_v45 }
 0x500   : > { %v1157_v40 = vpop.xlane.xlu1 %1156 }
 0x501   : > { %v1175_v36 = vsub.f32 %v3285_v35, %v1157_v40 }
 0x503   : > { %v1204_v0 = vmul.f32 1.442695, %v1175_v36 }
 0x504   : > { %v1293_v54 = vpop.permute.xlu1 %1292 }
 0x505   : > { %2053 = vmatprep.subr.bf16.mxu0 %v1293_v54  ;;  %2330 = vpow2.f32 %v1204_v0 }
 0x506   : > { %2054 = vmatpush3.bf16.msra.mxu0 %v1293_v54  ;;  %2332 = vpow2.f32 %v1208_v16 }
 0x50f   : > { %v3345_v34 = vpop.eup %2330 }
 0x510   : > { %v3348_v31 = vpop.eup %2332 }
 0x516   : > { %1236 = vadd.xlane.f32.xlu0 %v3345_v34 }
 0x51a   : > { %1240 = vadd.xlane.f32.xlu0 %v3348_v31 }
 0x54e   : > { %v1215_v30 = vpop.xlane.xlu1 %1214 }
 0x552   : > { %v1211_v41 = vpop.xlane.xlu1 %1210 }
 0x553   : > { %2334 = vrcp.f32 %v1211_v41 }
 0x556   : > { %v1217_v35 = vpop.xlane.xlu1 %1216 }
 0x55a   : > { %v1213_v13 = vpop.xlane.xlu1 %1212  ;;  %v1223_v57 = vpop.xlane.xlu0 %1222 }
 0x55b   : > { %2336 = vrcp.f32 %v1213_v13 }
 0x55c   : > { %2338 = vrcp.f32 %v1217_v35 }
 0x55d   : > { %v2335_v20 = vpop.eup %2334 }
 0x55e   : > { %v1219_v55 = vpop.xlane.xlu0 %1218  ;;  %v1221_v17 = vpop.xlane.xlu1 %1220  ;;  %v1258_v26 = vmul.f32 %v2335_v20, %v3294_v3 }
 0x55f   : > { %2340 = vrcp.f32 %v1221_v17 }
 0x560   : > { %2342 = vrcp.f32 %v1219_v55 }
 0x561   : > { %2344 = vrcp.f32 %v1215_v30 }
 0x562   : > { %v1225_v15 = vpop.xlane.xlu0 %1224 }
 0x563   : > { %2346 = vrcp.f32 %v1225_v15 }
 0x565   : > { %v2337_v5 = vpop.eup %2336 }
 0x566   : > { %v1227_v18 = vpop.xlane.xlu1 %1226  ;;  %v1231_v23 = vpop.xlane.xlu0 %1230  ;;  %v1259_v1 = vmul.f32 %v2337_v5, %v3303_v60 }
 0x567   : > { %v2339_v58 = vpop.eup %2338 }
 0x568   : > { %v1274_v47 = vpack.c.bf16 %v1259_v1, %v1258_v26  ;;  %v1261_v62 = vmul.f32 %v2339_v58, %v3298_v19 }
 0x569   : > { %v2341_v24 = vpop.eup %2340 }
 0x56a   : > { %2059 = vmatprep.mubr.bf16.mxu0 %v1274_v47  ;;  %v1239_v21 = vpop.xlane.xlu1 %1238  ;;  %v1233_v22 = vpop.xlane.xlu0 %1232  ;;  %v1263_v38 = vmul.f32 %v2341_v24, %v3311_v50 }
 0x56b   : > { %v2343_v3 = vpop.eup %2342 }
 0x56c   : > { %v2345_v60 = vpop.eup %2344  ;;  %v1262_v11 = vmul.f32 %v2343_v3, %v3313_v25 }
 0x56d   : > { %v1260_v40 = vmul.f32 %v2345_v60, %v3290_v29  ;;  %v2347_v54 = vpop.eup %2346 }
 0x56e   : > { %v1235_v42 = vpop.xlane.xlu1 %1234  ;;  %v1229_v28 = vpop.xlane.xlu0 %1228  ;;  %v1276_v45 = vpack.c.bf16 %v1263_v38, %v1262_v11  ;;  %v1265_v19 = vmul.f32 %v2347_v54, %v3318_v53 }
 0x56f   : > { %2348 = vrcp.f32 %v1229_v28  ;;  %v1275_v36 = vpack.c.bf16 %v1261_v62, %v1260_v40 }
 0x570   : > { %2350 = vrcp.f32 %v1223_v57 }
 0x571   : > { %2352 = vrcp.f32 %v1227_v18 }
 0x572   : > { %v1295_v27 = vpop.permute.xlu0 %1294  ;;  %v1297_v32 = vpop.permute.xlu1 %1296  ;;  %2354 = vrcp.f32 %v1233_v22 }
 0x573   : > { %2055 = vmatprep.subr.bf16.mxu0 %v1295_v27  ;;  %2356 = vrcp.f32 %v1231_v23 }
 0x574   : > { %2056 = vmatpush3.bf16.msra.mxu0 %v1295_v27  ;;  %2358 = vrcp.f32 %v1235_v42 }
 0x575   : > { %2057 = vmatprep.subr.bf16.mxu0 %v1297_v32 }
 0x578   : > { %2058 = vmatpush3.bf16.msra.mxu0 %v1297_v32 }
 0x579   : > { %v2349_v0 = vpop.eup %2348 }
 0x57a   : > { %v2351_v16 = vpop.eup %2350  ;;  %v1267_v41 = vmul.f32 %v2349_v0, %v3333_v6 }
 0x57b   : > { %2060 = vmatmul.mubr.bf16.vlgmr.msra.gmra.mrb[16].mxu0 %v1275_v36  ;;  %v2353_v30 = vpop.eup %2352  ;;  %v1264_v25 = vmul.f32 %v2351_v16, %v3305_v61 }
 0x57c   : > { %2063 = vmatprep.mubr.bf16.mxu0 %v1276_v45  ;;  %v1266_v50 = vmul.f32 %v2353_v30, %v3323_v9  ;;  %v2355_v35 = vpop.eup %2354 }
 0x57d   : > { %v1277_v29 = vpack.c.bf16 %v1265_v19, %v1264_v25  ;;  %v2357_v57 = vpop.eup %2356  ;;  %v1269_v55 = vmul.f32 %v2355_v35, %v3327_v52 }
 0x57e   : > { %v1278_v13 = vpack.c.bf16 %v1267_v41, %v1266_v50  ;;  %v1268_v17 = vmul.f32 %v2357_v57, %v3321_v44  ;;  %v2359_v61 = vpop.eup %2358 }
 0x57f   : > { %v1270_v20 = vmul.f32 %v2359_v61, %v3335_v56 }
 0x580   : > { %v1279_v15 = vpack.c.bf16 %v1269_v55, %v1268_v17 }
 0x583   : > { %2064 = vmatmul.mubr.bf16.gmra.mrb[20].mxu0 %v1277_v29 }
 0x584   : > { %2067 = vmatprep.mubr.bf16.mxu0 %v1278_v13 }
 0x58b   : > { %2068 = vmatmul.mubr.bf16.gmra.mrb[24].mxu0 %v1279_v15 }
 0x5a3   : > { %v1237_v53 = vpop.xlane.xlu0 %1236 }
 0x5a4   : > { %2360 = vrcp.f32 %v1237_v53 }
 0x5a5   : > { %2362 = vrcp.f32 %v1239_v21 }
 0x5a7   : > { %v1241_v6 = vpop.xlane.xlu0 %1240 }
 0x5a8   : > { %2364 = vrcp.f32 %v1241_v6 }
 0x5ae   : > { %v2361_v9 = vpop.eup %2360 }
 0x5af   : > { %v1271_v5 = vmul.f32 %v2361_v9, %v3345_v34  ;;  %v2363_v18 = vpop.eup %2362 }
 0x5b0   : > { %v1272_v44 = vmul.f32 %v2363_v18, %v3329_v33 }
 0x5b1   : > { %v1280_v23 = vpack.c.bf16 %v1271_v5, %v1270_v20 }
 0x5b2   : > { %v2365_v26 = vpop.eup %2364 }
 0x5b3   : > { %2071 = vmatprep.mubr.bf16.mxu0 %v1280_v23  ;;  %v1273_v52 = vmul.f32 %v2365_v26, %v3348_v31 }
 0x5b5   : > { %v1281_v1 = vpack.c.bf16 %v1273_v52, %v1272_v44 }
 0x5b7   : > { %2072 = vmatmul.mubr.bf16.gmra.mrb[28].mxu0 %v1281_v1 }
 0x64e   : > { %v2061_v47 = vpop.f32.mrb[16].mxu0 }
 0x64f   : > { %v1340_v21 = vpop.f32.mrb[17].mxu0 }
 0x650   : > { %v2062_v22 = vpop.f32.mrb[18].mxu0 }
 0x651   : > { %v2174_v42 = vpack.i.bf16 %v2062_v22, %v2061_v47  ;;  %v1343_v28 = vpop.f32.mrb[19].mxu0 }
 0x652   : > { %v2179_v58 = vpack.i.bf16 %v1343_v28, %v1340_v21 }
 0x653   : > { %2175 = vrot.lane.b32.xlu1 %v2174_v42, %s2587_s21 }
 0x654   : > { %2180 = vrot.lane.b32.xlu0 %v2179_v58, %s2587_s21 }
 0x656   : > { %v2065_v56 = vpop.f32.mrb[20].mxu0 }
 0x657   : > { %v1356_v34 = vpop.f32.mrb[21].mxu0 }
 0x658   : > { %v2066_v24 = vpop.f32.mrb[22].mxu0 }
 0x659   : > { %v2184_v27 = vpack.i.bf16 %v2066_v24, %v2065_v56  ;;  %v1359_v32 = vpop.f32.mrb[23].mxu0 }
 0x65a   : > { %v2189_v33 = vpack.i.bf16 %v1359_v32, %v1356_v34 }
 0x65b   : > { %2185 = vrot.lane.b32.xlu1 %v2184_v27, %s2587_s21 }
 0x65e   : > { %v2069_v31 = vpop.f32.mrb[24].mxu0 }
 0x65f   : > { %2190 = vrot.lane.b32.xlu1 %v2189_v33, %s2587_s21  ;;  %v1372_v3 = vpop.f32.mrb[25].mxu0 }
 0x660   : > { %v2070_v60 = vpop.f32.mrb[26].mxu0 }
 0x661   : > { %v2194_v62 = vpack.i.bf16 %v2070_v60, %v2069_v31  ;;  %v1375_v11 = vpop.f32.mrb[27].mxu0 }
 0x662   : > { %v2199_v38 = vpack.i.bf16 %v1375_v11, %v1372_v3 }
 0x663   : > { %2195 = vrot.lane.b32.xlu1 %v2194_v62, %s2587_s21 }
 0x664   : > { %2200 = vrot.lane.b32.xlu0 %v2199_v38, %s2587_s21 }
 0x68a   : > { %v2073_v40 = vpop.f32.mrb[28].mxu0 }
 0x68b   : > { %v1388_v36 = vpop.f32.mrb[29].mxu0 }
 0x68c   : > { %v2074_v54 = vpop.f32.mrb[30].mxu0 }
 0x68d   : > { %v2209_v45 = vpack.i.bf16 %v2074_v54, %v2073_v40  ;;  %v1391_v0 = vpop.f32.mrb[31].mxu0 }
 0x68e   : > { %v2204_v16 = vpack.i.bf16 %v1391_v0, %v1388_v36 }
 0x68f   : > { %2210 = vrot.lane.b32.xlu1 %v2209_v45, %s2587_s21 }
 0x690   : > { %2205 = vrot.lane.b32.xlu0 %v2204_v16, %s2587_s21 }
 0x6c5   : > { %v2176_v30 = vpop.permute.xlu1 %2175 }
 0x6c6   : > { %v2178_v19 = vunpack.i.h.bf16 %v2176_v30  ;;  %v2177_v41 = vunpack.i.l.bf16 %v2176_v30  ;;  %v2181_v25 = vpop.permute.xlu0 %2180 }
 0x6c7   : > { %v2183_v50 = vunpack.i.h.bf16 %v2181_v25  ;;  %v2182_v29 = vunpack.i.l.bf16 %v2181_v25 }
 0x6c8   : > { %v1470_v35 = vsel %vm510_vm0, %v3213_v4, %v2178_v19  ;;  %v1469_v13 = vsel %vm510_vm0, %v3209_v39, %v2177_v41 }
 0x6c9   : > { %v1844_v57 = vpack.c.bf16 %v1470_v35, %v1469_v13  ;;  %v1468_v55 = vsel %vm510_vm0, %v3215_v2, %v2183_v50  ;;  %v1467_v17 = vsel %vm510_vm0, %v3211_v37, %v2182_v29 }
 0x6ca   : > { %v1839_v15 = vpack.c.bf16 %v1468_v55, %v1467_v17 }
 0x6cb   : > { %1876 = vst [vmem:[%s3384_s27 + $0x8] sm:$0xff] %v1844_v57  }
 0x6cc   : > { %1840 = vst [vmem:[%s3384_s27] sm:$0xff] %v1839_v15  }
 0x6cd   : > { %v2186_v53 = vpop.permute.xlu1 %2185 }
 0x6ce   : > { %v2188_v4 = vunpack.i.h.bf16 %v2186_v53  ;;  %v2187_v6 = vunpack.i.l.bf16 %v2186_v53 }
 0x6d0   : > { %v1474_v39 = vsel %vm510_vm0, %v3221_v43, %v2188_v4  ;;  %v1473_v2 = vsel %vm510_vm0, %v3217_v8, %v2187_v6 }
 0x6d1   : > { %v1854_v61 = vpack.c.bf16 %v1474_v39, %v1473_v2  ;;  %v2191_v37 = vpop.permute.xlu1 %2190 }
 0x6d2   : > { %v2193_v9 = vunpack.i.h.bf16 %v2191_v37  ;;  %v2192_v20 = vunpack.i.l.bf16 %v2191_v37 }
 0x6d3   : > { %1878 = vst [vmem:[%s3384_s27 + $0x18] sm:$0xff] %v1854_v61  }
 0x6d4   : > { %v1472_v5 = vsel %vm510_vm0, %v3223_v48, %v2193_v9  ;;  %v1471_v18 = vsel %vm510_vm0, %v3219_v10, %v2192_v20 }
 0x6d5   : > { %v1849_v23 = vpack.c.bf16 %v1472_v5, %v1471_v18  ;;  %v2196_v26 = vpop.permute.xlu1 %2195 }
 0x6d6   : > { %v2198_v44 = vunpack.i.h.bf16 %v2196_v26  ;;  %v2197_v43 = vunpack.i.l.bf16 %v2196_v26  ;;  %v2201_v52 = vpop.permute.xlu0 %2200 }
 0x6d7   : > { %1877 = vst [vmem:[%s3384_s27 + $0x10] sm:$0xff] %v1849_v23   ;;  %v2203_v8 = vunpack.i.h.bf16 %v2201_v52  ;;  %v2202_v1 = vunpack.i.l.bf16 %v2201_v52 }
 0x6d8   : > { %v1478_v47 = vsel %vm510_vm0, %v3229_v12, %v2198_v44  ;;  %v1477_v48 = vsel %vm510_vm0, %v3225_v7, %v2197_v43 }
 0x6d9   : > { %v1864_v21 = vpack.c.bf16 %v1478_v47, %v1477_v48  ;;  %v1476_v10 = vsel %vm510_vm0, %v3231_v46, %v2203_v8  ;;  %v1475_v22 = vsel %vm510_vm0, %v3227_v49, %v2202_v1 }
 0x6da   : > { %v1859_v42 = vpack.c.bf16 %v1476_v10, %v1475_v22 }
 0x6db   : > { %1880 = vst [vmem:[%s3384_s27 + $0x28] sm:$0xff] %v1864_v21  }
 0x6dc   : > { %1879 = vst [vmem:[%s3384_s27 + $0x20] sm:$0xff] %v1859_v42  }
 0x701   : > { %v2211_v28 = vpop.permute.xlu1 %2210 }
 0x702   : > { %v2213_v58 = vunpack.i.h.bf16 %v2211_v28  ;;  %v2212_v56 = vunpack.i.l.bf16 %v2211_v28  ;;  %v2206_v12 = vpop.permute.xlu0 %2205 }
 0x703   : > { %v2208_v34 = vunpack.i.h.bf16 %v2206_v12  ;;  %v2207_v7 = vunpack.i.l.bf16 %v2206_v12 }
 0x704   : > { %v1482_v46 = vsel %vm510_vm0, %v3237_v59, %v2213_v58  ;;  %v1481_v49 = vsel %vm510_vm0, %v3233_v14, %v2212_v56 }
 0x705   : > { %v1874_v24 = vpack.c.bf16 %v1482_v46, %v1481_v49  ;;  %v1480_v27 = vsel %vm510_vm0, %v3239_v63, %v2208_v34  ;;  %v1479_v32 = vsel %vm510_vm0, %v3235_v51, %v2207_v7 }
 0x706   : > { %v1869_v33 = vpack.c.bf16 %v1480_v27, %v1479_v32 }
 0x707   : > { %1882 = vst [vmem:[%s3384_s27 + $0x38] sm:$0xff] %v1874_v24  }
 0x708   : > { %1881 = vst [vmem:[%s3384_s27 + $0x30] sm:$0xff] %v1869_v33  }
 0x709   : > { %2501 = shalt.err (!%p2498_p5)
}
 0x70a   : > { %s2502_s29 = scalar_lea.hbm %s3421_s18, 1024  ;;  %s2506_s10 = scalar_lea.hbm %s3480_s4, 2048 }
 0x70b   : > { %p2503_p1 = scmp.ne.s32.totalorder %s3421_s18, %s2502_s29  ;;  %p2507_p12 = scmp.lt.u32.totalorder %s3421_s18, %s3480_s4 }
 0x70c   : > { %p2508_p8 = scmp.lt.u32.totalorder %s2506_s10, %s2502_s29  ;;  %p2510_p2 = scmp.lt.u32.totalorder %s2502_s29, %s3421_s18 }
 0x70d   : > { %p2504_p6 = pnand %p2503_p1, %p3517_p4 }
 0x70e   : > { %p2509_p0 = por %p2508_p8, %p2507_p12 }
 0x70f   : > { %p2505_p9 = pneg %p2504_p6 }
 0x710   : > { %p2511_p10 = por %p2510_p2, %p2509_p0 }
 0x712   : > { %p2512_p13 = pnand %p2511_p10, %p2505_p9 }
 0x714   : > { %2515 = shalt.err (!%p2512_p13)
}
 0x715   : > { %s2589_s13 = smov 4  }
 0x716   : > { %2100 = dma.vmem_to_hbm [thread:$0]  (%p3517_p4), %s3423_s6, 1024, %s3421_s18, %s1564_s30, %s2587_s21, %s2587_s21, %s2589_s13  }
 0x717 PF: > { %s3518_s7 = sld [smem:[#allocation19_spill]]  ;;  %s3519_s23 = sld [smem:[#allocation16_spill]] }
 0x718   : > { %s1595_s14 = sand.u32 1, %s2558_s15  }
 0x719   : > { %s1596_s20 = scalar_lea.sflag [#allocation4], %s1595_s14 }
 0x71d   : > { %p3520_p11 = scmp.ne.s32.totalorder %s3518_s7, 0  ;;  %p3521_p7 = scmp.ge.s32.totalorder %s3519_s23, 2 }
 0x71f   : > { %p2116_p3 = pnand %p3521_p7, %p3520_p11 }
 0x721   : > { %2553 = dma.done.wait (!%p2116_p3), %s1596_s20, 1024  }
 0x722   : > { %2555 = vsyncadd (!%p2116_p3), %s1596_s20, 4294966272  ;;  %s26_s20 = sadd.s32 1, %s3519_s23   ;;  %s3522_s28 = sld [smem:[#allocation15_spill]] }
 0x723   : > { %p23_p5 = scmp.ge.s32.totalorder %s26_s20, 4   ;;  %s3523_s17 = sld [smem:[#allocation18_spill]] }
 0x724   : > { %s3524_s26 = sld [smem:[#allocation17_spill]]  ;;  %s3525_s15 = smov %s2562_s16 }
 0x725   : > { %s3527_s18 = smov %s2574_s19  ;;  %25 = sbr.rel (!%p23_p5) target bundleno = 13 (0xd), region = 118 }
 0x728   : > { %s3526_s16 = smov %s3522_s28 }
 0x72a   : > { %s3528_s19 = smov %s3524_s26 }
 0x72c   :  { %1601 = vsyncpa [#allocation3], 1 }
 0x72d   :  { %1603 = vsyncpa [#allocation3 + $0x1], 1 }
 0x72e   :  { %1604 = vsyncpa [#allocation6], 1 }
 0x72f   :  { %1606 = vsyncpa [#allocation6 + $0x1], 1 }
 0x730   :  { %1607 = vsyncpa [#allocation9], 1 }
 0x731   :  { %1609 = vsyncpa [#allocation9 + $0x1], 1 }
 0x732   :  { %1610 = vsyncpa [#allocation4], 1 }
 0x733   :  { %1612 = vsyncpa [#allocation4 + $0x1], 1 }

// kernel: bookbert_forward.21
= control target key start
LH: loop header
LB: loop body
LE: loop exit
PB: predicated region body
PF: predicated region fallthrough
CT: control target
= control target key end

     0   :  { %9 = vsyncpa [#allocation3], 0  ;;  %s1811_s0 = inlined_call_operand.hbm [shape: bf16[256,128], index: 0, kind: input, shape index: {}]   ;;  %s1812_s1 = inlined_call_operand.hbm [shape: bf16[256,128], index: 1, kind: input, shape index: {}]   ;;  %s1813_s2 = inlined_call_operand.hbm [shape: f32[1,128], index: 2, kind: input, shape index: {}]   ;;  %s1814_s3 = inlined_call_operand.hbm [shape: f32[1,128], index: 3, kind: input, shape index: {}]   ;;  %s1815_s4 = inlined_call_operand.hbm [shape: bf16[256,128], index: 4, kind: output, shape index: {}]  }
   0x1   :  { %10 = vsyncpa [#allocation6], 0 }
   0x2   :  { %11 = vsyncpa [#allocation9], 0 }
   0x3   :  { %12 = vsyncpa [#allocation4], 0  ;;  %s1347_s15 = smov [#allocation5]   ;;  %s1348_s17 = smov [#allocation2]  }
   0x4   :  { %s30_s16 = sshll.u32 %s1347_s15, 4  ;;  %s18_s18 = sshll.u32 %s1348_s17, 4  ;;  %s31_s16 = int_to_ptr.vmem [resolvable:$true] %s30_s16  ;;  %s1379_s18 = int_to_ptr.vmem [resolvable:$true] %s18_s18 }
   0x5   :  { %s1229_s21 = scalar_lea.hbm %s1812_s1, 2048 }
   0x6   :  { %p1230_p0 = scmp.ne.s32.totalorder %s1812_s1, %s1229_s21  ;;  %p1233_p1 = scmp.lt.u32.totalorder %s1229_s21, %s1812_s1 }
   0x8   :  { %p1235_p2 = pnand %p1233_p1, %p1230_p0 }
   0xa   :  { %1238 = shalt.err (!%p1235_p2)
}
   0xb   :  { %s1239_s26 = scalar_lea.vmem %s31_s16, 2048  ;;  %p1244_p4 = scmp.lt.s32.totalorder %s31_s16, %s31_s16 }
   0xc   :  { %p1240_p3 = scmp.ne.s32.totalorder %s31_s16, %s1239_s26  ;;  %p1245_p5 = scmp.lt.s32.totalorder %s1239_s26, %s1239_s26 }
   0xe   :  { %p1246_p6 = por %p1245_p5, %p1244_p4 }
  0x10   :  { %p1247_p7 = pnand %p1246_p6, %p1240_p3 }
  0x12   :  { %1250 = shalt.err (!%p1247_p7)
}
  0x13   :  { %s1349_s27 = smov 64   ;;  %s1350_s28 = smov 4  }
  0x14   :  { %36 = dma.hbm_to_vmem [thread:$0]  %s1812_s1, 2048, %s31_s16, [#allocation6], %s1349_s27, %s1349_s27, %s1350_s28  }
  0x15   :  { %s1251_s7 = scalar_lea.hbm %s1811_s0, 2048 }
  0x16   :  { %p1252_p8 = scmp.ne.s32.totalorder %s1811_s0, %s1251_s7  ;;  %p1255_p9 = scmp.lt.u32.totalorder %s1251_s7, %s1811_s0 }
  0x18   :  { %p1257_p10 = pnand %p1255_p9, %p1252_p8 }
  0x1a   :  { %1260 = shalt.err (!%p1257_p10)
}
  0x1b   :  { %s1261_s12 = scalar_lea.vmem %s1379_s18, 2048  ;;  %p1266_p12 = scmp.lt.s32.totalorder %s1379_s18, %s1379_s18 }
  0x1c   :  { %p1262_p11 = scmp.ne.s32.totalorder %s1379_s18, %s1261_s12  ;;  %p1267_p13 = scmp.lt.s32.totalorder %s1261_s12, %s1261_s12 }
  0x1e   :  { %p1268_p0 = por %p1267_p13, %p1266_p12 }
  0x20   :  { %p1269_p1 = pnand %p1268_p0, %p1262_p11 }
  0x22   :  { %1272 = shalt.err (!%p1269_p1)
}
  0x23   :  { %24 = dma.hbm_to_vmem [thread:$0]  %s1811_s0, 2048, %s1379_s18, [#allocation3], %s1349_s27, %s1349_s27, %s1350_s28  }
  0x24   :  { %s1351_s14 = smov [#allocation7]   ;;  %s1352_s16 = smov [#allocation8]  }
  0x25   :  { %s43_s15 = sshll.u32 %s1351_s14, 4  ;;  %s53_s17 = sshll.u32 %s1352_s16, 4  ;;  %s44_s15 = int_to_ptr.vmem [resolvable:$true] %s43_s15  ;;  %s54_s17 = int_to_ptr.vmem [resolvable:$true] %s53_s17 }
  0x26   :  { %s1273_s21 = scalar_lea.hbm %s1813_s2, 16 }
  0x27   :  { %p1274_p2 = scmp.ne.s32.totalorder %s1813_s2, %s1273_s21  ;;  %p1277_p3 = scmp.lt.u32.totalorder %s1273_s21, %s1813_s2 }
  0x29   :  { %p1279_p4 = pnand %p1277_p3, %p1274_p2 }
  0x2b   :  { %1282 = shalt.err (!%p1279_p4)
}
  0x2c   :  { %s1283_s0 = scalar_lea.vmem %s44_s15, 16  ;;  %s1287_s18 = scalar_lea.vmem %s44_s15, 32 }
  0x2d   :  { %p1284_p5 = scmp.ne.s32.totalorder %s44_s15, %s1283_s0  ;;  %p1288_p6 = scmp.lt.s32.totalorder %s44_s15, %s44_s15 }
  0x2e   :  { %p1289_p7 = scmp.lt.s32.totalorder %s1287_s18, %s1283_s0 }
  0x30   :  { %p1290_p8 = por %p1289_p7, %p1288_p6 }
  0x32   :  { %p1291_p9 = pnand %p1290_p8, %p1284_p5 }
  0x34   :  { %1294 = shalt.err (!%p1291_p9)
}
  0x35   :  { %46 = dma.hbm_to_vmem [thread:$0]  %s1813_s2, 16, %s44_s15, [#allocation6]  }
  0x36   :  { %s1295_s6 = scalar_lea.hbm %s1814_s3, 16 }
  0x37   :  { %p1296_p10 = scmp.ne.s32.totalorder %s1814_s3, %s1295_s6  ;;  %p1299_p11 = scmp.lt.u32.totalorder %s1295_s6, %s1814_s3 }
  0x39   :  { %p1301_p12 = pnand %p1299_p11, %p1296_p10 }
  0x3b   :  { %1304 = shalt.err (!%p1301_p12)
}
  0x3c   :  { %s1305_s11 = scalar_lea.vmem %s54_s17, 16  ;;  %s1309_s12 = scalar_lea.vmem %s54_s17, 32 }
  0x3d   :  { %p1306_p13 = scmp.ne.s32.totalorder %s54_s17, %s1305_s11  ;;  %p1310_p0 = scmp.lt.s32.totalorder %s54_s17, %s54_s17 }
  0x3e   :  { %p1311_p1 = scmp.lt.s32.totalorder %s1309_s12, %s1305_s11 }
  0x40   :  { %p1312_p2 = por %p1311_p1, %p1310_p0 }
  0x42   :  { %p1313_p3 = pnand %p1312_p2, %p1306_p13 }
  0x44   :  { %1316 = shalt.err (!%p1313_p3)
}
  0x45   :  { %56 = dma.hbm_to_vmem [thread:$0]  %s1814_s3, 16, %s54_s17, [#allocation9]  }
  0x46   :  { %1339 = dma.done.wait [#allocation3], 2048  }
  0x47   :  { %1340 = vsyncadd [#allocation3], 4294965248 }
  0x48   :  { %1341 = dma.done.wait [#allocation6], 2064  }
  0x49   :  { %1342 = vsyncadd [#allocation6], 4294965232 }
  0x4a   :  { %1343 = dma.done.wait [#allocation9], 16  }
  0x4b   :  { %1344 = vsyncadd [#allocation9], 4294967280  ;;  %v906_v0 = vld [vmem:[#allocation2] sm:$0xff]   ;;  %v1113_v2 = vld [vmem:[#allocation2 + $0x8] sm:$0xff]   ;;  %s1353_s3 = smov [#allocation10]  }
  0x4c   :  { %v970_v1 = vld [vmem:[#allocation5] sm:$0xff]   ;;  %v907_v3 = vunpack.c.l.bf16 %v906_v0  ;;  %v911_v5 = vunpack.c.l.bf16 %v1113_v2  ;;  %v1128_v6 = vld [vmem:[#allocation5 + $0x8] sm:$0xff]   ;;  %v908_v7 = vunpack.c.h.bf16 %v906_v0  ;;  %v912_v10 = vunpack.c.h.bf16 %v1113_v2  ;;  %v1114_v12 = vld [vmem:[#allocation2 + $0x10] sm:$0xff]   ;;  %s825_s13 = sshll.u32 %s1353_s3, 4  ;;  %s826_s13 = int_to_ptr.vmem [resolvable:$true] %s825_s13 }
  0x4d   :  { %v971_v4 = vunpack.c.l.bf16 %v970_v1  ;;  %v975_v8 = vunpack.c.l.bf16 %v1128_v6  ;;  %v972_v9 = vunpack.c.h.bf16 %v970_v1  ;;  %v976_v11 = vunpack.c.h.bf16 %v1128_v6  ;;  %v1129_v13 = vld [vmem:[#allocation5 + $0x10] sm:$0xff]   ;;  %v1115_v22 = vld [vmem:[#allocation2 + $0x18] sm:$0xff]   ;;  %v1116_v30 = vld [vmem:[#allocation2 + $0x20] sm:$0xff]   ;;  %s1317_s14 = scalar_lea.vmem %s826_s13, 2048  ;;  %p1322_p5 = scmp.lt.s32.totalorder %s826_s13, %s826_s13 }
  0x4e   :  { %v915_v17 = vunpack.c.l.bf16 %v1114_v12  ;;  %v979_v18 = vunpack.c.l.bf16 %v1129_v13  ;;  %v916_v20 = vunpack.c.h.bf16 %v1114_v12  ;;  %v980_v21 = vunpack.c.h.bf16 %v1129_v13  ;;  %v1130_v23 = vld [vmem:[#allocation5 + $0x18] sm:$0xff]   ;;  %v1131_v31 = vld [vmem:[#allocation5 + $0x20] sm:$0xff]   ;;  %v1117_v38 = vld [vmem:[#allocation2 + $0x28] sm:$0xff]   ;;  %p1318_p4 = scmp.ne.s32.totalorder %s826_s13, %s1317_s14  ;;  %p1323_p6 = scmp.lt.s32.totalorder %s1317_s14, %s1317_s14 }
  0x4f   :  { %v1440_v14 = vadd.f32 %v971_v4, %v907_v3  ;;  %v1442_v15 = vadd.f32 %v975_v8, %v911_v5  ;;  %v1445_v16 = vadd.f32 %v972_v9, %v908_v7  ;;  %v1448_v19 = vadd.f32 %v976_v11, %v912_v10  ;;  %v1132_v39 = vld [vmem:[#allocation5 + $0x28] sm:$0xff]   ;;  %v1118_v46 = vld [vmem:[#allocation2 + $0x30] sm:$0xff]   ;;  %v1119_v54 = vld [vmem:[#allocation2 + $0x38] sm:$0xff]  }
  0x50   :  { %v1451_v24 = vadd.f32 %v979_v18, %v915_v17  ;;  %v919_v25 = vunpack.c.l.bf16 %v1115_v22  ;;  %v983_v26 = vunpack.c.l.bf16 %v1130_v23  ;;  %v1454_v27 = vadd.f32 %v980_v21, %v916_v20  ;;  %v1133_v47 = vld [vmem:[#allocation5 + $0x30] sm:$0xff]   ;;  %v1134_v55 = vld [vmem:[#allocation5 + $0x38] sm:$0xff]   ;;  %v1120_v62 = vld [vmem:[#allocation2 + $0x40] sm:$0xff]   ;;  %p1324_p7 = por %p1323_p6, %p1322_p5 }
  0x51   :  { %229 = vadd.xlane.f32.xlu0 %v1440_v14  ;;  %233 = vadd.xlane.f32.xlu1 %v1442_v15  ;;  %v920_v28 = vunpack.c.h.bf16 %v1115_v22  ;;  %v984_v29 = vunpack.c.h.bf16 %v1130_v23  ;;  %v923_v33 = vunpack.c.l.bf16 %v1116_v30  ;;  %v987_v34 = vunpack.c.l.bf16 %v1131_v31  ;;  %v1135_v63 = vld [vmem:[#allocation5 + $0x40] sm:$0xff]   ;;  %v1121_v6 = vld [vmem:[#allocation2 + $0x48] sm:$0xff]   ;;  %v1122_v17 = vld [vmem:[#allocation2 + $0x50] sm:$0xff]  }
  0x52   :  { %v1457_v32 = vadd.f32 %v983_v26, %v919_v25  ;;  %v924_v36 = vunpack.c.h.bf16 %v1116_v30  ;;  %v988_v37 = vunpack.c.h.bf16 %v1131_v31  ;;  %v927_v41 = vunpack.c.l.bf16 %v1117_v38  ;;  %v1136_v7 = vld [vmem:[#allocation5 + $0x48] sm:$0xff]   ;;  %v1137_v18 = vld [vmem:[#allocation5 + $0x50] sm:$0xff]   ;;  %p1325_p8 = pnand %p1324_p7, %p1318_p4 }
  0x53   :  { %v1460_v35 = vadd.f32 %v984_v29, %v920_v28  ;;  %v1463_v40 = vadd.f32 %v987_v34, %v923_v33  ;;  %v991_v42 = vunpack.c.l.bf16 %v1132_v39  ;;  %v928_v44 = vunpack.c.h.bf16 %v1117_v38  ;;  %v1123_v28 = vld [vmem:[#allocation2 + $0x58] sm:$0xff]   ;;  %v1124_v38 = vld [vmem:[#allocation2 + $0x60] sm:$0xff]  }
  0x54   :  { %v1466_v43 = vadd.f32 %v988_v37, %v924_v36  ;;  %v992_v45 = vunpack.c.h.bf16 %v1132_v39  ;;  %v931_v49 = vunpack.c.l.bf16 %v1118_v46  ;;  %v995_v50 = vunpack.c.l.bf16 %v1133_v47  ;;  %v1138_v29 = vld [vmem:[#allocation5 + $0x58] sm:$0xff]   ;;  %v1139_v39 = vld [vmem:[#allocation5 + $0x60] sm:$0xff]  }
  0x55   :  { %231 = vadd.xlane.f32.xlu0 %v1445_v16  ;;  %235 = vadd.xlane.f32.xlu1 %v1448_v19  ;;  %v1469_v48 = vadd.f32 %v991_v42, %v927_v41  ;;  %v932_v52 = vunpack.c.h.bf16 %v1118_v46  ;;  %v996_v53 = vunpack.c.h.bf16 %v1133_v47  ;;  %v935_v57 = vunpack.c.l.bf16 %v1119_v54 }
  0x56   :  { %v1472_v51 = vadd.f32 %v992_v45, %v928_v44  ;;  %v1475_v56 = vadd.f32 %v995_v50, %v931_v49  ;;  %v999_v58 = vunpack.c.l.bf16 %v1134_v55  ;;  %v936_v60 = vunpack.c.h.bf16 %v1119_v54  ;;  %v1125_v49 = vld [vmem:[#allocation2 + $0x68] sm:$0xff]  }
  0x57   :  { %v1478_v59 = vadd.f32 %v996_v53, %v932_v52  ;;  %v1000_v61 = vunpack.c.h.bf16 %v1134_v55  ;;  %v939_v1 = vunpack.c.l.bf16 %v1120_v62  ;;  %v1003_v2 = vunpack.c.l.bf16 %v1135_v63  ;;  %v1140_v50 = vld [vmem:[#allocation5 + $0x68] sm:$0xff]  }
  0x58   :  { %v1481_v0 = vadd.f32 %v999_v58, %v935_v57  ;;  %v940_v4 = vunpack.c.h.bf16 %v1120_v62  ;;  %v1004_v5 = vunpack.c.h.bf16 %v1135_v63  ;;  %v943_v9 = vunpack.c.l.bf16 %v1121_v6 }
  0x59   :  { %237 = vadd.xlane.f32.xlu0 %v1451_v24  ;;  %239 = vadd.xlane.f32.xlu1 %v1454_v27  ;;  %v1484_v3 = vadd.f32 %v1000_v61, %v936_v60  ;;  %v1487_v8 = vadd.f32 %v1003_v2, %v939_v1  ;;  %v1007_v10 = vunpack.c.l.bf16 %v1136_v7  ;;  %v944_v12 = vunpack.c.h.bf16 %v1121_v6  ;;  %v1126_v60 = vld [vmem:[#allocation2 + $0x70] sm:$0xff]   ;;  %v1127_v6 = vld [vmem:[#allocation2 + $0x78] sm:$0xff]  }
  0x5a   :  { %v1490_v11 = vadd.f32 %v1004_v5, %v940_v4  ;;  %v1008_v13 = vunpack.c.h.bf16 %v1136_v7  ;;  %v947_v21 = vunpack.c.l.bf16 %v1122_v17  ;;  %v1011_v22 = vunpack.c.l.bf16 %v1137_v18  ;;  %v1141_v61 = vld [vmem:[#allocation5 + $0x70] sm:$0xff]   ;;  %v1142_v7 = vld [vmem:[#allocation5 + $0x78] sm:$0xff]  }
  0x5b   :  { %v1493_v20 = vadd.f32 %v1007_v10, %v943_v9  ;;  %v948_v25 = vunpack.c.h.bf16 %v1122_v17  ;;  %v1012_v26 = vunpack.c.h.bf16 %v1137_v18  ;;  %v951_v31 = vunpack.c.l.bf16 %v1123_v28 }
  0x5c   :  { %v1496_v23 = vadd.f32 %v1008_v13, %v944_v12  ;;  %v1499_v30 = vadd.f32 %v1011_v22, %v947_v21  ;;  %v1015_v33 = vunpack.c.l.bf16 %v1138_v29  ;;  %v952_v36 = vunpack.c.h.bf16 %v1123_v28 }
  0x5d   :  { %241 = vadd.xlane.f32.xlu0 %v1457_v32  ;;  %243 = vadd.xlane.f32.xlu1 %v1460_v35  ;;  %v1502_v34 = vadd.f32 %v1012_v26, %v948_v25  ;;  %v1016_v37 = vunpack.c.h.bf16 %v1138_v29  ;;  %v955_v42 = vunpack.c.l.bf16 %v1124_v38  ;;  %v1019_v44 = vunpack.c.l.bf16 %v1139_v39 }
  0x5e   :  { %v1505_v41 = vadd.f32 %v1015_v33, %v951_v31  ;;  %v956_v46 = vunpack.c.h.bf16 %v1124_v38  ;;  %v1020_v47 = vunpack.c.h.bf16 %v1139_v39  ;;  %v959_v53 = vunpack.c.l.bf16 %v1125_v49 }
  0x5f   :  { %v1508_v45 = vadd.f32 %v1016_v37, %v952_v36  ;;  %v1511_v52 = vadd.f32 %v1019_v44, %v955_v42  ;;  %v1023_v54 = vunpack.c.l.bf16 %v1140_v50  ;;  %v960_v57 = vunpack.c.h.bf16 %v1125_v49 }
  0x60   :  { %v1514_v55 = vadd.f32 %v1020_v47, %v956_v46  ;;  %v1024_v58 = vunpack.c.h.bf16 %v1140_v50  ;;  %v963_v63 = vunpack.c.l.bf16 %v1126_v60  ;;  %v1027_v1 = vunpack.c.l.bf16 %v1141_v61 }
  0x61   :  { %245 = vadd.xlane.f32.xlu0 %v1463_v40  ;;  %247 = vadd.xlane.f32.xlu1 %v1466_v43  ;;  %v1517_v62 = vadd.f32 %v1023_v54, %v959_v53  ;;  %v964_v4 = vunpack.c.h.bf16 %v1126_v60  ;;  %v1028_v5 = vunpack.c.h.bf16 %v1141_v61  ;;  %v967_v10 = vunpack.c.l.bf16 %v1127_v6 }
  0x62   :  { %v1520_v2 = vadd.f32 %v1024_v58, %v960_v57  ;;  %v1523_v9 = vadd.f32 %v1027_v1, %v963_v63  ;;  %v1031_v12 = vunpack.c.l.bf16 %v1142_v7  ;;  %v968_v17 = vunpack.c.h.bf16 %v1127_v6 }
  0x63   :  { %v1526_v13 = vadd.f32 %v1028_v5, %v964_v4  ;;  %v1032_v18 = vunpack.c.h.bf16 %v1142_v7 }
  0x64   :  { %v1529_v21 = vadd.f32 %v1031_v12, %v967_v10 }
  0x65   :  { %249 = vadd.xlane.f32.xlu0 %v1469_v48  ;;  %251 = vadd.xlane.f32.xlu1 %v1472_v51  ;;  %v1532_v22 = vadd.f32 %v1032_v18, %v968_v17 }
  0x69   :  { %253 = vadd.xlane.f32.xlu0 %v1475_v56  ;;  %255 = vadd.xlane.f32.xlu1 %v1478_v59 }
  0x6d   :  { %257 = vadd.xlane.f32.xlu0 %v1481_v0  ;;  %259 = vadd.xlane.f32.xlu1 %v1484_v3 }
  0x71   :  { %261 = vadd.xlane.f32.xlu0 %v1487_v8  ;;  %263 = vadd.xlane.f32.xlu1 %v1490_v11 }
  0x75   :  { %265 = vadd.xlane.f32.xlu0 %v1493_v20  ;;  %267 = vadd.xlane.f32.xlu1 %v1496_v23 }
  0x79   :  { %269 = vadd.xlane.f32.xlu0 %v1499_v30  ;;  %271 = vadd.xlane.f32.xlu1 %v1502_v34 }
  0x7d   :  { %273 = vadd.xlane.f32.xlu0 %v1505_v41  ;;  %275 = vadd.xlane.f32.xlu1 %v1508_v45 }
  0x81   :  { %277 = vadd.xlane.f32.xlu0 %v1511_v52  ;;  %279 = vadd.xlane.f32.xlu1 %v1514_v55 }
  0x85   :  { %281 = vadd.xlane.f32.xlu0 %v1517_v62  ;;  %283 = vadd.xlane.f32.xlu1 %v1520_v2 }
  0x89   :  { %285 = vadd.xlane.f32.xlu0 %v1523_v9  ;;  %287 = vadd.xlane.f32.xlu1 %v1526_v13 }
  0x8d   :  { %289 = vadd.xlane.f32.xlu0 %v1529_v21  ;;  %291 = vadd.xlane.f32.xlu1 %v1532_v22 }
  0xde   :  { %v230_v25 = vpop.xlane.xlu0 %229  ;;  %v234_v28 = vpop.xlane.xlu1 %233 }
  0xdf   :  { %v294_v26 = vmul.f32 0.0078125, %v230_v25  ;;  %v296_v29 = vmul.f32 0.0078125, %v234_v28 }
  0xe1   :  { %v1537_v31 = vsub.f32 %v1440_v14, %v294_v26  ;;  %v1540_v33 = vsub.f32 %v1442_v15, %v296_v29 }
  0xe2   :  { %v232_v36 = vpop.xlane.xlu0 %231  ;;  %v236_v39 = vpop.xlane.xlu1 %235 }
  0xe3   :  { %v295_v37 = vmul.f32 0.0078125, %v232_v36  ;;  %v358_v38 = vmul.f32 %v1537_v31, %v1537_v31  ;;  %v297_v42 = vmul.f32 0.0078125, %v236_v39  ;;  %v360_v46 = vmul.f32 %v1540_v33, %v1540_v33 }
  0xe5   :  { %v1545_v44 = vsub.f32 %v1445_v16, %v295_v37  ;;  %390 = vadd.xlane.f32.xlu0 %v358_v38  ;;  %v1550_v14 = vsub.f32 %v1448_v19, %v297_v42 }
  0xe6   :  { %v238_v47 = vpop.xlane.xlu0 %237  ;;  %v240_v50 = vpop.xlane.xlu1 %239 }
  0xe7   :  { %v298_v15 = vmul.f32 0.0078125, %v238_v47  ;;  %v359_v49 = vmul.f32 %v1545_v44, %v1545_v44  ;;  %v299_v53 = vmul.f32 0.0078125, %v240_v50  ;;  %v361_v16 = vmul.f32 %v1550_v14, %v1550_v14 }
  0xe9   :  { %v1555_v54 = vsub.f32 %v1451_v24, %v298_v15  ;;  %394 = vadd.xlane.f32.xlu0 %v360_v46  ;;  %392 = vadd.xlane.f32.xlu1 %v359_v49  ;;  %v1560_v57 = vsub.f32 %v1454_v27, %v299_v53 }
  0xea   :  { %v242_v19 = vpop.xlane.xlu0 %241  ;;  %v244_v61 = vpop.xlane.xlu1 %243 }
  0xeb   :  { %v300_v58 = vmul.f32 0.0078125, %v242_v19  ;;  %v362_v60 = vmul.f32 %v1555_v54, %v1555_v54  ;;  %v301_v63 = vmul.f32 0.0078125, %v244_v61  ;;  %v363_v24 = vmul.f32 %v1560_v57, %v1560_v57 }
  0xed   :  { %v1565_v1 = vsub.f32 %v1457_v32, %v300_v58  ;;  %396 = vadd.xlane.f32.xlu1 %v361_v16  ;;  %398 = vadd.xlane.f32.xlu0 %v362_v60  ;;  %v1570_v4 = vsub.f32 %v1460_v35, %v301_v63 }
  0xee   :  { %v246_v27 = vpop.xlane.xlu0 %245  ;;  %v248_v7 = vpop.xlane.xlu1 %247 }
  0xef   :  { %v302_v5 = vmul.f32 0.0078125, %v246_v27  ;;  %v364_v6 = vmul.f32 %v1565_v1, %v1565_v1  ;;  %v303_v10 = vmul.f32 0.0078125, %v248_v7  ;;  %v365_v32 = vmul.f32 %v1570_v4, %v1570_v4 }
  0xf1   :  { %v1575_v12 = vsub.f32 %v1463_v40, %v302_v5  ;;  %400 = vadd.xlane.f32.xlu1 %v363_v24  ;;  %402 = vadd.xlane.f32.xlu0 %v364_v6  ;;  %v1580_v17 = vsub.f32 %v1466_v43, %v303_v10 }
  0xf2   :  { %v250_v35 = vpop.xlane.xlu0 %249  ;;  %v252_v26 = vpop.xlane.xlu1 %251 }
  0xf3   :  { %v304_v18 = vmul.f32 0.0078125, %v250_v35  ;;  %v366_v25 = vmul.f32 %v1575_v12, %v1575_v12  ;;  %v305_v28 = vmul.f32 0.0078125, %v252_v26  ;;  %v367_v40 = vmul.f32 %v1580_v17, %v1580_v17 }
  0xf5   :  { %v1585_v29 = vsub.f32 %v1469_v48, %v304_v18  ;;  %404 = vadd.xlane.f32.xlu1 %v365_v32  ;;  %406 = vadd.xlane.f32.xlu0 %v366_v25  ;;  %v1590_v36 = vsub.f32 %v1472_v51, %v305_v28 }
  0xf6   :  { %v254_v43 = vpop.xlane.xlu0 %253  ;;  %v256_v39 = vpop.xlane.xlu1 %255 }
  0xf7   :  { %v306_v37 = vmul.f32 0.0078125, %v254_v43  ;;  %v368_v38 = vmul.f32 %v1585_v29, %v1585_v29  ;;  %v307_v42 = vmul.f32 0.0078125, %v256_v39  ;;  %v369_v48 = vmul.f32 %v1590_v36, %v1590_v36 }
  0xf9   :  { %v1595_v46 = vsub.f32 %v1475_v56, %v306_v37  ;;  %408 = vadd.xlane.f32.xlu1 %v367_v40  ;;  %410 = vadd.xlane.f32.xlu0 %v368_v38  ;;  %v1600_v47 = vsub.f32 %v1478_v59, %v307_v42 }
  0xfa   :  { %v258_v51 = vpop.xlane.xlu0 %257  ;;  %v260_v50 = vpop.xlane.xlu1 %259 }
  0xfb   :  { %v308_v15 = vmul.f32 0.0078125, %v258_v51  ;;  %v370_v49 = vmul.f32 %v1595_v46, %v1595_v46  ;;  %v309_v53 = vmul.f32 0.0078125, %v260_v50  ;;  %v371_v56 = vmul.f32 %v1600_v47, %v1600_v47 }
  0xfd   :  { %v1605_v16 = vsub.f32 %v1481_v0, %v308_v15  ;;  %412 = vadd.xlane.f32.xlu1 %v369_v48  ;;  %414 = vadd.xlane.f32.xlu0 %v370_v49  ;;  %v1610_v19 = vsub.f32 %v1484_v3, %v309_v53 }
  0xfe   :  { %v262_v59 = vpop.xlane.xlu0 %261  ;;  %v264_v61 = vpop.xlane.xlu1 %263 }
  0xff   :  { %v310_v58 = vmul.f32 0.0078125, %v262_v59  ;;  %v372_v60 = vmul.f32 %v1605_v16, %v1605_v16  ;;  %v311_v63 = vmul.f32 0.0078125, %v264_v61  ;;  %v373_v0 = vmul.f32 %v1610_v19, %v1610_v19 }
 0x101   :  { %v1615_v24 = vsub.f32 %v1487_v8, %v310_v58  ;;  %416 = vadd.xlane.f32.xlu1 %v371_v56  ;;  %418 = vadd.xlane.f32.xlu0 %v372_v60  ;;  %v1620_v27 = vsub.f32 %v1490_v11, %v311_v63 }
 0x102   :  { %v266_v3 = vpop.xlane.xlu0 %265  ;;  %v268_v7 = vpop.xlane.xlu1 %267 }
 0x103   :  { %v312_v5 = vmul.f32 0.0078125, %v266_v3  ;;  %v374_v6 = vmul.f32 %v1615_v24, %v1615_v24  ;;  %v313_v10 = vmul.f32 0.0078125, %v268_v7  ;;  %v375_v8 = vmul.f32 %v1620_v27, %v1620_v27 }
 0x105   :  { %v1625_v32 = vsub.f32 %v1493_v20, %v312_v5  ;;  %420 = vadd.xlane.f32.xlu1 %v373_v0  ;;  %422 = vadd.xlane.f32.xlu0 %v374_v6  ;;  %v1630_v35 = vsub.f32 %v1496_v23, %v313_v10 }
 0x106   :  { %v270_v11 = vpop.xlane.xlu0 %269  ;;  %v272_v26 = vpop.xlane.xlu1 %271 }
 0x107   :  { %v314_v18 = vmul.f32 0.0078125, %v270_v11  ;;  %v376_v25 = vmul.f32 %v1625_v32, %v1625_v32  ;;  %v315_v28 = vmul.f32 0.0078125, %v272_v26  ;;  %v377_v20 = vmul.f32 %v1630_v35, %v1630_v35 }
 0x109   :  { %v1635_v40 = vsub.f32 %v1499_v30, %v314_v18  ;;  %424 = vadd.xlane.f32.xlu1 %v375_v8  ;;  %426 = vadd.xlane.f32.xlu0 %v376_v25  ;;  %v1640_v43 = vsub.f32 %v1502_v34, %v315_v28 }
 0x10a   :  { %v274_v23 = vpop.xlane.xlu0 %273  ;;  %v276_v39 = vpop.xlane.xlu1 %275 }
 0x10b   :  { %v316_v37 = vmul.f32 0.0078125, %v274_v23  ;;  %v378_v38 = vmul.f32 %v1635_v40, %v1635_v40  ;;  %v317_v42 = vmul.f32 0.0078125, %v276_v39  ;;  %v379_v30 = vmul.f32 %v1640_v43, %v1640_v43 }
 0x10d   :  { %v1645_v48 = vsub.f32 %v1505_v41, %v316_v37  ;;  %428 = vadd.xlane.f32.xlu1 %v377_v20  ;;  %430 = vadd.xlane.f32.xlu0 %v378_v38  ;;  %v1650_v51 = vsub.f32 %v1508_v45, %v317_v42 }
 0x10e   :  { %v278_v34 = vpop.xlane.xlu0 %277  ;;  %v280_v50 = vpop.xlane.xlu1 %279 }
 0x10f   :  { %v318_v15 = vmul.f32 0.0078125, %v278_v34  ;;  %v380_v49 = vmul.f32 %v1645_v48, %v1645_v48  ;;  %v319_v53 = vmul.f32 0.0078125, %v280_v50  ;;  %v381_v41 = vmul.f32 %v1650_v51, %v1650_v51 }
 0x111   :  { %v1655_v56 = vsub.f32 %v1511_v52, %v318_v15  ;;  %432 = vadd.xlane.f32.xlu1 %v379_v30  ;;  %434 = vadd.xlane.f32.xlu0 %v380_v49  ;;  %v1660_v59 = vsub.f32 %v1514_v55, %v319_v53 }
 0x112   :  { %v282_v45 = vpop.xlane.xlu0 %281  ;;  %v284_v61 = vpop.xlane.xlu1 %283 }
 0x113   :  { %v320_v58 = vmul.f32 0.0078125, %v282_v45  ;;  %v382_v60 = vmul.f32 %v1655_v56, %v1655_v56  ;;  %v321_v63 = vmul.f32 0.0078125, %v284_v61  ;;  %v383_v52 = vmul.f32 %v1660_v59, %v1660_v59 }
 0x115   :  { %v1665_v0 = vsub.f32 %v1517_v62, %v320_v58  ;;  %436 = vadd.xlane.f32.xlu1 %v381_v41  ;;  %438 = vadd.xlane.f32.xlu0 %v382_v60  ;;  %v1670_v3 = vsub.f32 %v1520_v2, %v321_v63 }
 0x116   :  { %v286_v55 = vpop.xlane.xlu0 %285  ;;  %v288_v7 = vpop.xlane.xlu1 %287 }
 0x117   :  { %v322_v5 = vmul.f32 0.0078125, %v286_v55  ;;  %v384_v6 = vmul.f32 %v1665_v0, %v1665_v0  ;;  %v323_v10 = vmul.f32 0.0078125, %v288_v7  ;;  %v385_v62 = vmul.f32 %v1670_v3, %v1670_v3 }
 0x119   :  { %v1675_v8 = vsub.f32 %v1523_v9, %v322_v5  ;;  %440 = vadd.xlane.f32.xlu1 %v383_v52  ;;  %442 = vadd.xlane.f32.xlu0 %v384_v6  ;;  %v1680_v11 = vsub.f32 %v1526_v13, %v323_v10 }
 0x11a   :  { %v290_v2 = vpop.xlane.xlu0 %289  ;;  %v292_v26 = vpop.xlane.xlu1 %291 }
 0x11b   :  { %v324_v18 = vmul.f32 0.0078125, %v290_v2  ;;  %v386_v25 = vmul.f32 %v1675_v8, %v1675_v8  ;;  %v325_v28 = vmul.f32 0.0078125, %v292_v26  ;;  %v387_v9 = vmul.f32 %v1680_v11, %v1680_v11 }
 0x11d   :  { %v1685_v20 = vsub.f32 %v1529_v21, %v324_v18  ;;  %444 = vadd.xlane.f32.xlu1 %v385_v62  ;;  %446 = vadd.xlane.f32.xlu0 %v386_v25  ;;  %v1690_v23 = vsub.f32 %v1532_v22, %v325_v28  ;;  %v1697_v18 = vld [vmem:[#allocation7] ss:$0 sm:$0xff] }
 0x11f   :  { %v388_v13 = vmul.f32 %v1685_v20, %v1685_v20  ;;  %v389_v37 = vmul.f32 %v1690_v23, %v1690_v23 }
 0x121   :  { %448 = vadd.xlane.f32.xlu1 %v387_v9  ;;  %450 = vadd.xlane.f32.xlu0 %v388_v13 }
 0x125   :  { %452 = vadd.xlane.f32.xlu1 %v389_v37 }
 0x172   :  { %v391_v38 = vpop.xlane.xlu0 %390 }
 0x173   :  { %v454_v21 = vmul.f32 0.0078125, %v391_v38 }
 0x175   :  { %v486_v39 = vadd.f32 1e-12, %v454_v21 }
 0x176   :  { %v393_v42 = vpop.xlane.xlu1 %392  ;;  %v395_v30 = vpop.xlane.xlu0 %394 }
 0x177   :  { %1165 = vrsqrt.f32 %v486_v39  ;;  %v455_v34 = vmul.f32 0.0078125, %v393_v42  ;;  %v456_v15 = vmul.f32 0.0078125, %v395_v30  ;;  %v1701_v30 = vld [vmem:[#allocation8] ss:$0 sm:$0xff] }
 0x179   :  { %v487_v49 = vadd.f32 1e-12, %v455_v34  ;;  %v488_v22 = vadd.f32 1e-12, %v456_v15 }
 0x17a   :  { %v397_v50 = vpop.xlane.xlu1 %396  ;;  %v399_v53 = vpop.xlane.xlu0 %398 }
 0x17b   :  { %1167 = vrsqrt.f32 %v487_v49  ;;  %v457_v41 = vmul.f32 0.0078125, %v397_v50  ;;  %v458_v45 = vmul.f32 0.0078125, %v399_v53 }
 0x17c   :  { %1169 = vrsqrt.f32 %v488_v22 }
 0x17d   :  { %v489_v58 = vadd.f32 1e-12, %v457_v41  ;;  %v490_v60 = vadd.f32 1e-12, %v458_v45 }
 0x17e   :  { %v401_v61 = vpop.xlane.xlu1 %400  ;;  %v403_v63 = vpop.xlane.xlu0 %402 }
 0x17f   :  { %1171 = vrsqrt.f32 %v489_v58  ;;  %v459_v52 = vmul.f32 0.0078125, %v401_v61  ;;  %v460_v55 = vmul.f32 0.0078125, %v403_v63 }
 0x180   :  { %1173 = vrsqrt.f32 %v490_v60 }
 0x181   :  { %v1166_v5 = vpop.eup %1165  ;;  %v491_v6 = vadd.f32 1e-12, %v459_v52  ;;  %v492_v7 = vadd.f32 1e-12, %v460_v55 }
 0x182   :  { %v550_v10 = vmul.f32 %v1166_v5, %v1537_v31  ;;  %v405_v62 = vpop.xlane.xlu1 %404  ;;  %v407_v2 = vpop.xlane.xlu0 %406 }
 0x183   :  { %1175 = vrsqrt.f32 %v491_v6  ;;  %v461_v25 = vmul.f32 0.0078125, %v405_v62  ;;  %v462_v26 = vmul.f32 0.0078125, %v407_v2 }
 0x184   :  { %1177 = vrsqrt.f32 %v492_v7  ;;  %v589_v38 = vmul.f32 %v1697_v18, %v550_v10 }
 0x185   :  { %v1168_v28 = vpop.eup %1167  ;;  %v493_v9 = vadd.f32 1e-12, %v461_v25  ;;  %v494_v13 = vadd.f32 1e-12, %v462_v26 }
 0x186   :  { %v1170_v37 = vpop.eup %1169  ;;  %v551_v21 = vmul.f32 %v1168_v28, %v1545_v44  ;;  %v409_v39 = vpop.xlane.xlu1 %408  ;;  %v628_v45 = vadd.f32 %v1701_v30, %v589_v38 }
 0x187   :  { %v411_v42 = vpop.xlane.xlu0 %410  ;;  %v552_v31 = vmul.f32 %v1170_v37, %v1540_v33  ;;  %1179 = vrsqrt.f32 %v493_v9  ;;  %v463_v34 = vmul.f32 0.0078125, %v409_v39 }
 0x188   :  { %v464_v15 = vmul.f32 0.0078125, %v411_v42  ;;  %v590_v49 = vmul.f32 %v1697_v18, %v551_v21  ;;  %1181 = vrsqrt.f32 %v494_v13 }
 0x189   :  { %v1172_v22 = vpop.eup %1171  ;;  %v495_v50 = vadd.f32 1e-12, %v463_v34  ;;  %v591_v58 = vmul.f32 %v1697_v18, %v552_v31 }
 0x18a   :  { %v496_v53 = vadd.f32 1e-12, %v464_v15  ;;  %v1174_v41 = vpop.eup %1173  ;;  %v629_v44 = vadd.f32 %v1701_v30, %v590_v49  ;;  %v553_v60 = vmul.f32 %v1172_v22, %v1550_v14  ;;  %v413_v61 = vpop.xlane.xlu1 %412 }
 0x18b   :  { %v415_v33 = vpop.xlane.xlu0 %414  ;;  %v554_v63 = vmul.f32 %v1174_v41, %v1555_v54  ;;  %1183 = vrsqrt.f32 %v495_v50  ;;  %v465_v52 = vmul.f32 0.0078125, %v413_v61  ;;  %v630_v25 = vadd.f32 %v1701_v30, %v591_v58 }
 0x18c   :  { %v1036_v55 = vpack.c.bf16 %v629_v44, %v628_v45  ;;  %v592_v5 = vmul.f32 %v1697_v18, %v553_v60  ;;  %1185 = vrsqrt.f32 %v496_v53  ;;  %v466_v6 = vmul.f32 0.0078125, %v415_v33 }
 0x18d   :  { %v1176_v7 = vpop.eup %1175  ;;  %v593_v10 = vmul.f32 %v1697_v18, %v554_v63  ;;  %v497_v62 = vadd.f32 1e-12, %v465_v52 }
 0x18e   :  { %v1178_v2 = vpop.eup %1177  ;;  %1037 = vst [vmem:[#allocation10] sm:$0xff] %v1036_v55   ;;  %v631_v14 = vadd.f32 %v1701_v30, %v592_v5  ;;  %v555_v26 = vmul.f32 %v1176_v7, %v1560_v57  ;;  %v498_v54 = vadd.f32 1e-12, %v466_v6  ;;  %v417_v28 = vpop.xlane.xlu1 %416 }
 0x18f   :  { %v419_v9 = vpop.xlane.xlu0 %418  ;;  %v556_v13 = vmul.f32 %v1178_v2, %v1565_v1  ;;  %1187 = vrsqrt.f32 %v497_v62  ;;  %v467_v37 = vmul.f32 0.0078125, %v417_v28  ;;  %v632_v31 = vadd.f32 %v1701_v30, %v593_v10 }
 0x190   :  { %v1041_v38 = vpack.c.bf16 %v631_v14, %v630_v25  ;;  %v594_v21 = vmul.f32 %v1697_v18, %v555_v26  ;;  %1189 = vrsqrt.f32 %v498_v54  ;;  %v468_v39 = vmul.f32 0.0078125, %v419_v9 }
 0x191   :  { %v1180_v42 = vpop.eup %1179  ;;  %v499_v34 = vadd.f32 1e-12, %v467_v37  ;;  %v595_v49 = vmul.f32 %v1697_v18, %v556_v13 }
 0x192   :  { %v1182_v15 = vpop.eup %1181  ;;  %1143 = vst [vmem:[#allocation10 + $0x8] sm:$0xff] %v1041_v38   ;;  %v633_v57 = vadd.f32 %v1701_v30, %v594_v21  ;;  %v557_v22 = vmul.f32 %v1180_v42, %v1570_v4  ;;  %v500_v1 = vadd.f32 1e-12, %v468_v39  ;;  %v421_v50 = vpop.xlane.xlu1 %420 }
 0x193   :  { %v423_v53 = vpop.xlane.xlu0 %422  ;;  %v558_v41 = vmul.f32 %v1182_v15, %v1575_v12  ;;  %1191 = vrsqrt.f32 %v499_v34  ;;  %v469_v45 = vmul.f32 0.0078125, %v421_v50  ;;  %v634_v4 = vadd.f32 %v1701_v30, %v595_v49 }
 0x194   :  { %v1046_v44 = vpack.c.bf16 %v633_v57, %v632_v31  ;;  %v596_v58 = vmul.f32 %v1697_v18, %v557_v22  ;;  %1193 = vrsqrt.f32 %v500_v1  ;;  %v470_v60 = vmul.f32 0.0078125, %v423_v53 }
 0x195   :  { %v1184_v61 = vpop.eup %1183  ;;  %v597_v33 = vmul.f32 %v1697_v18, %v558_v41  ;;  %v501_v63 = vadd.f32 1e-12, %v469_v45 }
 0x196   :  { %v1186_v52 = vpop.eup %1185  ;;  %1144 = vst [vmem:[#allocation10 + $0x10] sm:$0xff] %v1046_v44   ;;  %v635_v55 = vadd.f32 %v1701_v30, %v596_v58  ;;  %v559_v5 = vmul.f32 %v1184_v61, %v1580_v17  ;;  %v502_v12 = vadd.f32 1e-12, %v470_v60  ;;  %v425_v6 = vpop.xlane.xlu1 %424 }
 0x197   :  { %v427_v7 = vpop.xlane.xlu0 %426  ;;  %v560_v10 = vmul.f32 %v1186_v52, %v1585_v29  ;;  %1195 = vrsqrt.f32 %v501_v63  ;;  %v471_v62 = vmul.f32 0.0078125, %v425_v6  ;;  %v636_v54 = vadd.f32 %v1701_v30, %v597_v33 }
 0x198   :  { %v1051_v2 = vpack.c.bf16 %v635_v55, %v634_v4  ;;  %v598_v25 = vmul.f32 %v1697_v18, %v559_v5  ;;  %1197 = vrsqrt.f32 %v502_v12  ;;  %v472_v14 = vmul.f32 0.0078125, %v427_v7 }
 0x199   :  { %v1188_v26 = vpop.eup %1187  ;;  %v503_v28 = vadd.f32 1e-12, %v471_v62  ;;  %v599_v13 = vmul.f32 %v1697_v18, %v560_v10 }
 0x19a   :  { %v1190_v9 = vpop.eup %1189  ;;  %1145 = vst [vmem:[#allocation10 + $0x18] sm:$0xff] %v1051_v2   ;;  %v637_v17 = vadd.f32 %v1701_v30, %v598_v25  ;;  %v561_v37 = vmul.f32 %v1188_v26, %v1590_v36  ;;  %v504_v29 = vadd.f32 1e-12, %v472_v14  ;;  %v429_v38 = vpop.xlane.xlu1 %428 }
 0x19b   :  { %v431_v21 = vpop.xlane.xlu0 %430  ;;  %v562_v39 = vmul.f32 %v1190_v9, %v1595_v46  ;;  %1199 = vrsqrt.f32 %v503_v28  ;;  %v473_v42 = vmul.f32 0.0078125, %v429_v38  ;;  %v638_v36 = vadd.f32 %v1701_v30, %v599_v13 }
 0x19c   :  { %v1056_v31 = vpack.c.bf16 %v637_v17, %v636_v54  ;;  %v600_v34 = vmul.f32 %v1697_v18, %v561_v37  ;;  %1201 = vrsqrt.f32 %v504_v29  ;;  %v474_v15 = vmul.f32 0.0078125, %v431_v21 }
 0x19d   :  { %v1192_v57 = vpop.eup %1191  ;;  %v601_v49 = vmul.f32 %v1697_v18, %v562_v39  ;;  %v505_v22 = vadd.f32 1e-12, %v473_v42 }
 0x19e   :  { %v1194_v1 = vpop.eup %1193  ;;  %1146 = vst [vmem:[#allocation10 + $0x20] sm:$0xff] %v1056_v31   ;;  %v639_v50 = vadd.f32 %v1701_v30, %v600_v34  ;;  %v563_v53 = vmul.f32 %v1192_v57, %v1600_v47  ;;  %v506_v46 = vadd.f32 1e-12, %v474_v15  ;;  %v433_v41 = vpop.xlane.xlu1 %432 }
 0x19f   :  { %v435_v45 = vpop.xlane.xlu0 %434  ;;  %v564_v44 = vmul.f32 %v1194_v1, %v1605_v16  ;;  %1203 = vrsqrt.f32 %v505_v22  ;;  %v475_v58 = vmul.f32 0.0078125, %v433_v41  ;;  %v640_v52 = vadd.f32 %v1701_v30, %v601_v49 }
 0x1a0   :  { %v1061_v60 = vpack.c.bf16 %v639_v50, %v638_v36  ;;  %v602_v61 = vmul.f32 %v1697_v18, %v563_v53  ;;  %1205 = vrsqrt.f32 %v506_v46  ;;  %v476_v33 = vmul.f32 0.0078125, %v435_v45 }
 0x1a1   :  { %v1196_v63 = vpop.eup %1195  ;;  %v507_v4 = vadd.f32 1e-12, %v475_v58  ;;  %v603_v5 = vmul.f32 %v1697_v18, %v564_v44 }
 0x1a2   :  { %v1198_v55 = vpop.eup %1197  ;;  %1147 = vst [vmem:[#allocation10 + $0x28] sm:$0xff] %v1061_v60   ;;  %v641_v47 = vadd.f32 %v1701_v30, %v602_v61  ;;  %v565_v12 = vmul.f32 %v1196_v63, %v1610_v19  ;;  %v508_v16 = vadd.f32 1e-12, %v476_v33  ;;  %v437_v6 = vpop.xlane.xlu1 %436 }
 0x1a3   :  { %v439_v7 = vpop.xlane.xlu0 %438  ;;  %v566_v10 = vmul.f32 %v1198_v55, %v1615_v24  ;;  %1207 = vrsqrt.f32 %v507_v4  ;;  %v477_v62 = vmul.f32 0.0078125, %v437_v6  ;;  %v642_v19 = vadd.f32 %v1701_v30, %v603_v5 }
 0x1a4   :  { %v1066_v2 = vpack.c.bf16 %v641_v47, %v640_v52  ;;  %v604_v25 = vmul.f32 %v1697_v18, %v565_v12  ;;  %1209 = vrsqrt.f32 %v508_v16  ;;  %v478_v14 = vmul.f32 0.0078125, %v439_v7 }
 0x1a5   :  { %v1200_v26 = vpop.eup %1199  ;;  %v605_v54 = vmul.f32 %v1697_v18, %v566_v10  ;;  %v509_v28 = vadd.f32 1e-12, %v477_v62 }
 0x1a6   :  { %v1202_v9 = vpop.eup %1201  ;;  %1148 = vst [vmem:[#allocation10 + $0x30] sm:$0xff] %v1066_v2   ;;  %v643_v17 = vadd.f32 %v1701_v30, %v604_v25  ;;  %v567_v13 = vmul.f32 %v1200_v26, %v1620_v27  ;;  %v510_v24 = vadd.f32 1e-12, %v478_v14  ;;  %v441_v37 = vpop.xlane.xlu1 %440 }
 0x1a7   :  { %v443_v29 = vpop.xlane.xlu0 %442  ;;  %v568_v38 = vmul.f32 %v1202_v9, %v1625_v32  ;;  %1211 = vrsqrt.f32 %v509_v28  ;;  %v479_v21 = vmul.f32 0.0078125, %v441_v37  ;;  %v644_v15 = vadd.f32 %v1701_v30, %v605_v54 }
 0x1a8   :  { %v1071_v39 = vpack.c.bf16 %v643_v17, %v642_v19  ;;  %v606_v42 = vmul.f32 %v1697_v18, %v567_v13  ;;  %1213 = vrsqrt.f32 %v510_v24  ;;  %v480_v31 = vmul.f32 0.0078125, %v443_v29 }
 0x1a9   :  { %v1204_v34 = vpop.eup %1203  ;;  %v511_v57 = vadd.f32 1e-12, %v479_v21  ;;  %v607_v22 = vmul.f32 %v1697_v18, %v568_v38 }
 0x1aa   :  { %v1206_v49 = vpop.eup %1205  ;;  %1149 = vst [vmem:[#allocation10 + $0x38] sm:$0xff] %v1071_v39   ;;  %v645_v27 = vadd.f32 %v1701_v30, %v606_v42  ;;  %v569_v1 = vmul.f32 %v1204_v34, %v1630_v35  ;;  %v512_v32 = vadd.f32 1e-12, %v480_v31  ;;  %v445_v36 = vpop.xlane.xlu1 %444 }
 0x1ab   :  { %v447_v50 = vpop.xlane.xlu0 %446  ;;  %v570_v53 = vmul.f32 %v1206_v49, %v1635_v40  ;;  %1215 = vrsqrt.f32 %v511_v57  ;;  %v481_v46 = vmul.f32 0.0078125, %v445_v36  ;;  %v646_v35 = vadd.f32 %v1701_v30, %v607_v22 }
 0x1ac   :  { %v1076_v41 = vpack.c.bf16 %v645_v27, %v644_v15  ;;  %v608_v45 = vmul.f32 %v1697_v18, %v569_v1  ;;  %1217 = vrsqrt.f32 %v512_v32  ;;  %v482_v44 = vmul.f32 0.0078125, %v447_v50 }
 0x1ad   :  { %v1208_v58 = vpop.eup %1207  ;;  %v609_v60 = vmul.f32 %v1697_v18, %v570_v53  ;;  %v513_v61 = vadd.f32 1e-12, %v481_v46 }
 0x1ae   :  { %v1210_v33 = vpop.eup %1209  ;;  %1150 = vst [vmem:[#allocation10 + $0x40] sm:$0xff] %v1076_v41   ;;  %v647_v63 = vadd.f32 %v1701_v30, %v608_v45  ;;  %v571_v52 = vmul.f32 %v1208_v58, %v1640_v43  ;;  %v514_v40 = vadd.f32 1e-12, %v482_v44  ;;  %v449_v4 = vpop.xlane.xlu1 %448 }
 0x1af   :  { %v451_v55 = vpop.xlane.xlu0 %450  ;;  %v572_v47 = vmul.f32 %v1210_v33, %v1645_v48  ;;  %1219 = vrsqrt.f32 %v513_v61  ;;  %v483_v5 = vmul.f32 0.0078125, %v449_v4  ;;  %v648_v10 = vadd.f32 %v1701_v30, %v609_v60 }
 0x1b0   :  { %v1081_v12 = vpack.c.bf16 %v647_v63, %v646_v35  ;;  %v610_v16 = vmul.f32 %v1697_v18, %v571_v52  ;;  %1221 = vrsqrt.f32 %v514_v40  ;;  %v484_v6 = vmul.f32 0.0078125, %v451_v55 }
 0x1b1   :  { %v1212_v7 = vpop.eup %1211  ;;  %v515_v62 = vadd.f32 1e-12, %v483_v5  ;;  %v611_v25 = vmul.f32 %v1697_v18, %v572_v47 }
 0x1b2   :  { %v1214_v2 = vpop.eup %1213  ;;  %1151 = vst [vmem:[#allocation10 + $0x48] sm:$0xff] %v1081_v12   ;;  %v649_v43 = vadd.f32 %v1701_v30, %v610_v16  ;;  %v573_v14 = vmul.f32 %v1212_v7, %v1650_v51  ;;  %v516_v48 = vadd.f32 1e-12, %v484_v6  ;;  %v453_v26 = vpop.xlane.xlu1 %452 }
 0x1b3   :  { %v574_v54 = vmul.f32 %v1214_v2, %v1655_v56  ;;  %1223 = vrsqrt.f32 %v515_v62  ;;  %v485_v28 = vmul.f32 0.0078125, %v453_v26  ;;  %v650_v37 = vadd.f32 %v1701_v30, %v611_v25 }
 0x1b4   :  { %v1086_v9 = vpack.c.bf16 %v649_v43, %v648_v10  ;;  %v612_v19 = vmul.f32 %v1697_v18, %v573_v14  ;;  %1225 = vrsqrt.f32 %v516_v48 }
 0x1b5   :  { %v1216_v17 = vpop.eup %1215  ;;  %v517_v13 = vadd.f32 1e-12, %v485_v28  ;;  %v613_v51 = vmul.f32 %v1697_v18, %v574_v54 }
 0x1b6   :  { %v1218_v24 = vpop.eup %1217  ;;  %1152 = vst [vmem:[#allocation10 + $0x50] sm:$0xff] %v1086_v9   ;;  %v651_v29 = vadd.f32 %v1701_v30, %v612_v19  ;;  %v575_v38 = vmul.f32 %v1216_v17, %v1660_v59 }
 0x1b7   :  { %v576_v56 = vmul.f32 %v1218_v24, %v1665_v0  ;;  %1227 = vrsqrt.f32 %v517_v13  ;;  %v652_v34 = vadd.f32 %v1701_v30, %v613_v51 }
 0x1b8   :  { %v1091_v21 = vpack.c.bf16 %v651_v29, %v650_v37  ;;  %v614_v39 = vmul.f32 %v1697_v18, %v575_v38 }
 0x1b9   :  { %v1220_v42 = vpop.eup %1219  ;;  %v615_v57 = vmul.f32 %v1697_v18, %v576_v56 }
 0x1ba   :  { %v1222_v31 = vpop.eup %1221  ;;  %1153 = vst [vmem:[#allocation10 + $0x58] sm:$0xff] %v1091_v21   ;;  %v653_v15 = vadd.f32 %v1701_v30, %v614_v39  ;;  %v577_v49 = vmul.f32 %v1220_v42, %v1670_v3 }
 0x1bb   :  { %v578_v27 = vmul.f32 %v1222_v31, %v1675_v8  ;;  %v654_v32 = vadd.f32 %v1701_v30, %v615_v57 }
 0x1bc   :  { %v1096_v59 = vpack.c.bf16 %v653_v15, %v652_v34  ;;  %v616_v0 = vmul.f32 %v1697_v18, %v577_v49 }
 0x1bd   :  { %v1224_v22 = vpop.eup %1223  ;;  %v617_v50 = vmul.f32 %v1697_v18, %v578_v27 }
 0x1be   :  { %v1226_v1 = vpop.eup %1225  ;;  %1154 = vst [vmem:[#allocation10 + $0x60] sm:$0xff] %v1096_v59   ;;  %v655_v36 = vadd.f32 %v1701_v30, %v616_v0  ;;  %v579_v53 = vmul.f32 %v1224_v22, %v1680_v11 }
 0x1bf   :  { %v580_v46 = vmul.f32 %v1226_v1, %v1685_v20  ;;  %v656_v45 = vadd.f32 %v1701_v30, %v617_v50 }
 0x1c0   :  { %v1101_v41 = vpack.c.bf16 %v655_v36, %v654_v32  ;;  %v618_v3 = vmul.f32 %v1697_v18, %v579_v53 }
 0x1c1   :  { %v1228_v8 = vpop.eup %1227  ;;  %v619_v58 = vmul.f32 %v1697_v18, %v580_v46 }
 0x1c2   :  { %1155 = vst [vmem:[#allocation10 + $0x68] sm:$0xff] %v1101_v41   ;;  %v657_v44 = vadd.f32 %v1701_v30, %v618_v3  ;;  %v581_v60 = vmul.f32 %v1228_v8, %v1690_v23 }
 0x1c3   :  { %v658_v11 = vadd.f32 %v1701_v30, %v619_v58 }
 0x1c4   :  { %v1106_v61 = vpack.c.bf16 %v657_v44, %v656_v45  ;;  %v620_v33 = vmul.f32 %v1697_v18, %v581_v60 }
 0x1c6   :  { %1156 = vst [vmem:[#allocation10 + $0x70] sm:$0xff] %v1106_v61   ;;  %v659_v20 = vadd.f32 %v1701_v30, %v620_v33 }
 0x1c8   :  { %v1111_v35 = vpack.c.bf16 %v659_v20, %v658_v11 }
 0x1ca   :  { %1157 = vst [vmem:[#allocation10 + $0x78] sm:$0xff] %v1111_v35  }
 0x1cb   :  { %1328 = shalt.err (!%p1325_p8)
}
 0x1cc   :  { %s1329_s17 = scalar_lea.hbm %s1815_s4, 2048 }
 0x1cd   :  { %p1330_p9 = scmp.ne.s32.totalorder %s1815_s4, %s1329_s17  ;;  %p1333_p10 = scmp.lt.u32.totalorder %s1329_s17, %s1815_s4 }
 0x1cf   :  { %p1335_p11 = pnand %p1333_p10, %p1330_p9 }
 0x1d1   :  { %1338 = shalt.err (!%p1335_p11)
}
 0x1d2   :  { %831 = dma.vmem_to_hbm [thread:$0]  %s826_s13, 2048, %s1815_s4, [#allocation4], %s1349_s27, %s1349_s27, %s1350_s28  }
 0x1d3   :  { %1345 = dma.done.wait [#allocation4], 2048  }
 0x1d4   :  { %1346 = vsyncadd [#allocation4], 4294965248 }
 0x1d5   :  { %835 = vsyncpa [#allocation3], 1 }
 0x1d6   :  { %836 = vsyncpa [#allocation6], 1 }
 0x1d7   :  { %837 = vsyncpa [#allocation9], 1 }
 0x1d8   :  { %838 = vsyncpa [#allocation4], 1 }

// kernel: bookbert_forward.31
= control target key start
LH: loop header
LB: loop body
LE: loop exit
PB: predicated region body
PF: predicated region fallthrough
CT: control target
= control target key end

     0   :  { %9 = vsyncpa [#allocation3], 0  ;;  %s1519_s0 = inlined_call_operand.hbm [shape: bf16[256,128], index: 0, kind: input, shape index: {}]   ;;  %s1520_s1 = inlined_call_operand.hbm [shape: bf16[256,128], index: 1, kind: input, shape index: {}]   ;;  %s1521_s2 = inlined_call_operand.hbm [shape: f32[1,128], index: 2, kind: input, shape index: {}]   ;;  %s1522_s3 = inlined_call_operand.hbm [shape: f32[1,128], index: 3, kind: input, shape index: {}]   ;;  %s1523_s4 = inlined_call_operand.hbm [shape: bf16[256,128], index: 4, kind: output, shape index: {}]  }
   0x1   :  { %10 = vsyncpa [#allocation6], 0 }
   0x2   :  { %11 = vsyncpa [#allocation9], 0 }
   0x3   :  { %12 = vsyncpa [#allocation4], 0  ;;  %s1062_s15 = smov [#allocation5]   ;;  %s1063_s17 = smov [#allocation2]  }
   0x4   :  { %s30_s16 = sshll.u32 %s1062_s15, 4  ;;  %s18_s18 = sshll.u32 %s1063_s17, 4  ;;  %s31_s16 = int_to_ptr.vmem [resolvable:$true] %s30_s16  ;;  %s1096_s18 = int_to_ptr.vmem [resolvable:$true] %s18_s18 }
   0x5   :  { %s944_s21 = scalar_lea.hbm %s1520_s1, 2048 }
   0x6   :  { %p945_p0 = scmp.ne.s32.totalorder %s1520_s1, %s944_s21  ;;  %p948_p1 = scmp.lt.u32.totalorder %s944_s21, %s1520_s1 }
   0x8   :  { %p950_p2 = pnand %p948_p1, %p945_p0 }
   0xa   :  { %953 = shalt.err (!%p950_p2)
}
   0xb   :  { %s954_s26 = scalar_lea.vmem %s31_s16, 2048  ;;  %p959_p4 = scmp.lt.s32.totalorder %s31_s16, %s31_s16 }
   0xc   :  { %p955_p3 = scmp.ne.s32.totalorder %s31_s16, %s954_s26  ;;  %p960_p5 = scmp.lt.s32.totalorder %s954_s26, %s954_s26 }
   0xe   :  { %p961_p6 = por %p960_p5, %p959_p4 }
  0x10   :  { %p962_p7 = pnand %p961_p6, %p955_p3 }
  0x12   :  { %965 = shalt.err (!%p962_p7)
}
  0x13   :  { %s1064_s27 = smov 64   ;;  %s1065_s28 = smov 4  }
  0x14   :  { %36 = dma.hbm_to_vmem [thread:$0]  %s1520_s1, 2048, %s31_s16, [#allocation6], %s1064_s27, %s1064_s27, %s1065_s28  }
  0x15   :  { %s966_s7 = scalar_lea.hbm %s1519_s0, 2048 }
  0x16   :  { %p967_p8 = scmp.ne.s32.totalorder %s1519_s0, %s966_s7  ;;  %p970_p9 = scmp.lt.u32.totalorder %s966_s7, %s1519_s0 }
  0x18   :  { %p972_p10 = pnand %p970_p9, %p967_p8 }
  0x1a   :  { %975 = shalt.err (!%p972_p10)
}
  0x1b   :  { %s976_s12 = scalar_lea.vmem %s1096_s18, 2048  ;;  %p981_p12 = scmp.lt.s32.totalorder %s1096_s18, %s1096_s18 }
  0x1c   :  { %p977_p11 = scmp.ne.s32.totalorder %s1096_s18, %s976_s12  ;;  %p982_p13 = scmp.lt.s32.totalorder %s976_s12, %s976_s12 }
  0x1e   :  { %p983_p0 = por %p982_p13, %p981_p12 }
  0x20   :  { %p984_p1 = pnand %p983_p0, %p977_p11 }
  0x22   :  { %987 = shalt.err (!%p984_p1)
}
  0x23   :  { %24 = dma.hbm_to_vmem [thread:$0]  %s1519_s0, 2048, %s1096_s18, [#allocation3], %s1064_s27, %s1064_s27, %s1065_s28  }
  0x24   :  { %s1066_s14 = smov [#allocation7]   ;;  %s1067_s16 = smov [#allocation8]  }
  0x25   :  { %s43_s15 = sshll.u32 %s1066_s14, 4  ;;  %s53_s17 = sshll.u32 %s1067_s16, 4  ;;  %s44_s15 = int_to_ptr.vmem [resolvable:$true] %s43_s15  ;;  %s54_s17 = int_to_ptr.vmem [resolvable:$true] %s53_s17 }
  0x26   :  { %s988_s21 = scalar_lea.hbm %s1521_s2, 16 }
  0x27   :  { %p989_p2 = scmp.ne.s32.totalorder %s1521_s2, %s988_s21  ;;  %p992_p3 = scmp.lt.u32.totalorder %s988_s21, %s1521_s2 }
  0x29   :  { %p994_p4 = pnand %p992_p3, %p989_p2 }
  0x2b   :  { %997 = shalt.err (!%p994_p4)
}
  0x2c   :  { %s998_s0 = scalar_lea.vmem %s44_s15, 16  ;;  %s1002_s18 = scalar_lea.vmem %s44_s15, 32 }
  0x2d   :  { %p999_p5 = scmp.ne.s32.totalorder %s44_s15, %s998_s0  ;;  %p1003_p6 = scmp.lt.s32.totalorder %s44_s15, %s44_s15 }
  0x2e   :  { %p1004_p7 = scmp.lt.s32.totalorder %s1002_s18, %s998_s0 }
  0x30   :  { %p1005_p8 = por %p1004_p7, %p1003_p6 }
  0x32   :  { %p1006_p9 = pnand %p1005_p8, %p999_p5 }
  0x34   :  { %1009 = shalt.err (!%p1006_p9)
}
  0x35   :  { %46 = dma.hbm_to_vmem [thread:$0]  %s1521_s2, 16, %s44_s15, [#allocation6]  }
  0x36   :  { %s1010_s30 = scalar_lea.hbm %s1522_s3, 16 }
  0x37   :  { %p1011_p10 = scmp.ne.s32.totalorder %s1522_s3, %s1010_s30  ;;  %p1014_p11 = scmp.lt.u32.totalorder %s1010_s30, %s1522_s3 }
  0x39   :  { %p1016_p12 = pnand %p1014_p11, %p1011_p10 }
  0x3b   :  { %1019 = shalt.err (!%p1016_p12)
}
  0x3c   :  { %s1020_s9 = scalar_lea.vmem %s54_s17, 16  ;;  %s1024_s10 = scalar_lea.vmem %s54_s17, 32 }
  0x3d   :  { %p1021_p13 = scmp.ne.s32.totalorder %s54_s17, %s1020_s9  ;;  %p1025_p0 = scmp.lt.s32.totalorder %s54_s17, %s54_s17 }
  0x3e   :  { %p1026_p1 = scmp.lt.s32.totalorder %s1024_s10, %s1020_s9 }
  0x40   :  { %p1027_p2 = por %p1026_p1, %p1025_p0 }
  0x42   :  { %p1028_p3 = pnand %p1027_p2, %p1021_p13 }
  0x44   :  { %1031 = shalt.err (!%p1028_p3)
}
  0x45   :  { %56 = dma.hbm_to_vmem [thread:$0]  %s1522_s3, 16, %s54_s17, [#allocation9]  }
  0x46   :  { %1054 = dma.done.wait [#allocation3], 2048  }
  0x47   :  { %1055 = vsyncadd [#allocation3], 4294965248 }
  0x48   :  { %1056 = dma.done.wait [#allocation6], 2064  }
  0x49   :  { %1057 = vsyncadd [#allocation6], 4294965232 }
  0x4a   :  { %1058 = dma.done.wait [#allocation9], 16  }
  0x4b   :  { %1059 = vsyncadd [#allocation9], 4294967280  ;;  %v714_v0 = vld [vmem:[#allocation2] sm:$0xff]   ;;  %v841_v2 = vld [vmem:[#allocation2 + $0x8] sm:$0xff]   ;;  %s1068_s3 = smov [#allocation10]  }
  0x4c   :  { %v778_v1 = vld [vmem:[#allocation5] sm:$0xff]   ;;  %v715_v3 = vunpack.c.l.bf16 %v714_v0  ;;  %v719_v5 = vunpack.c.l.bf16 %v841_v2  ;;  %v856_v6 = vld [vmem:[#allocation5 + $0x8] sm:$0xff]   ;;  %v716_v7 = vunpack.c.h.bf16 %v714_v0  ;;  %v720_v10 = vunpack.c.h.bf16 %v841_v2  ;;  %v842_v12 = vld [vmem:[#allocation2 + $0x10] sm:$0xff]   ;;  %s697_s12 = sshll.u32 %s1068_s3, 4  ;;  %s698_s12 = int_to_ptr.vmem [resolvable:$true] %s697_s12 }
  0x4d   :  { %v779_v4 = vunpack.c.l.bf16 %v778_v1  ;;  %v783_v8 = vunpack.c.l.bf16 %v856_v6  ;;  %v780_v9 = vunpack.c.h.bf16 %v778_v1  ;;  %v784_v11 = vunpack.c.h.bf16 %v856_v6  ;;  %v857_v13 = vld [vmem:[#allocation5 + $0x10] sm:$0xff]   ;;  %v843_v22 = vld [vmem:[#allocation2 + $0x18] sm:$0xff]   ;;  %v844_v30 = vld [vmem:[#allocation2 + $0x20] sm:$0xff]   ;;  %s1032_s1 = scalar_lea.vmem %s698_s12, 2048  ;;  %p1037_p5 = scmp.lt.s32.totalorder %s698_s12, %s698_s12 }
  0x4e   :  { %v723_v17 = vunpack.c.l.bf16 %v842_v12  ;;  %v787_v18 = vunpack.c.l.bf16 %v857_v13  ;;  %v724_v20 = vunpack.c.h.bf16 %v842_v12  ;;  %v788_v21 = vunpack.c.h.bf16 %v857_v13  ;;  %v858_v23 = vld [vmem:[#allocation5 + $0x18] sm:$0xff]   ;;  %v859_v31 = vld [vmem:[#allocation5 + $0x20] sm:$0xff]   ;;  %v845_v38 = vld [vmem:[#allocation2 + $0x28] sm:$0xff]   ;;  %p1033_p4 = scmp.ne.s32.totalorder %s698_s12, %s1032_s1  ;;  %p1038_p6 = scmp.lt.s32.totalorder %s1032_s1, %s1032_s1 }
  0x4f   :  { %v1151_v14 = vadd.f32 %v779_v4, %v715_v3  ;;  %v1153_v15 = vadd.f32 %v783_v8, %v719_v5  ;;  %v1156_v16 = vadd.f32 %v780_v9, %v716_v7  ;;  %v1159_v19 = vadd.f32 %v784_v11, %v720_v10  ;;  %v860_v39 = vld [vmem:[#allocation5 + $0x28] sm:$0xff]   ;;  %v846_v46 = vld [vmem:[#allocation2 + $0x30] sm:$0xff]   ;;  %v847_v54 = vld [vmem:[#allocation2 + $0x38] sm:$0xff]  }
  0x50   :  { %v1162_v24 = vadd.f32 %v787_v18, %v723_v17  ;;  %v727_v25 = vunpack.c.l.bf16 %v843_v22  ;;  %v791_v26 = vunpack.c.l.bf16 %v858_v23  ;;  %v1165_v27 = vadd.f32 %v788_v21, %v724_v20  ;;  %v861_v47 = vld [vmem:[#allocation5 + $0x30] sm:$0xff]   ;;  %v862_v55 = vld [vmem:[#allocation5 + $0x38] sm:$0xff]   ;;  %v848_v62 = vld [vmem:[#allocation2 + $0x40] sm:$0xff]   ;;  %p1039_p7 = por %p1038_p6, %p1037_p5 }
  0x51   :  { %229 = vadd.xlane.f32.xlu0 %v1151_v14  ;;  %233 = vadd.xlane.f32.xlu1 %v1153_v15  ;;  %v728_v28 = vunpack.c.h.bf16 %v843_v22  ;;  %v792_v29 = vunpack.c.h.bf16 %v858_v23  ;;  %v731_v33 = vunpack.c.l.bf16 %v844_v30  ;;  %v795_v34 = vunpack.c.l.bf16 %v859_v31  ;;  %v863_v63 = vld [vmem:[#allocation5 + $0x40] sm:$0xff]   ;;  %v849_v6 = vld [vmem:[#allocation2 + $0x48] sm:$0xff]   ;;  %v850_v17 = vld [vmem:[#allocation2 + $0x50] sm:$0xff]  }
  0x52   :  { %v1168_v32 = vadd.f32 %v791_v26, %v727_v25  ;;  %v732_v36 = vunpack.c.h.bf16 %v844_v30  ;;  %v796_v37 = vunpack.c.h.bf16 %v859_v31  ;;  %v735_v41 = vunpack.c.l.bf16 %v845_v38  ;;  %v864_v7 = vld [vmem:[#allocation5 + $0x48] sm:$0xff]   ;;  %v865_v18 = vld [vmem:[#allocation5 + $0x50] sm:$0xff]   ;;  %p1040_p8 = pnand %p1039_p7, %p1033_p4 }
  0x53   :  { %v1171_v35 = vadd.f32 %v792_v29, %v728_v28  ;;  %v1174_v40 = vadd.f32 %v795_v34, %v731_v33  ;;  %v799_v42 = vunpack.c.l.bf16 %v860_v39  ;;  %v736_v44 = vunpack.c.h.bf16 %v845_v38  ;;  %v851_v28 = vld [vmem:[#allocation2 + $0x58] sm:$0xff]   ;;  %v852_v38 = vld [vmem:[#allocation2 + $0x60] sm:$0xff]  }
  0x54   :  { %v1177_v43 = vadd.f32 %v796_v37, %v732_v36  ;;  %v800_v45 = vunpack.c.h.bf16 %v860_v39  ;;  %v739_v49 = vunpack.c.l.bf16 %v846_v46  ;;  %v803_v50 = vunpack.c.l.bf16 %v861_v47  ;;  %v866_v29 = vld [vmem:[#allocation5 + $0x58] sm:$0xff]   ;;  %v867_v39 = vld [vmem:[#allocation5 + $0x60] sm:$0xff]  }
  0x55   :  { %231 = vadd.xlane.f32.xlu0 %v1156_v16  ;;  %235 = vadd.xlane.f32.xlu1 %v1159_v19  ;;  %v1180_v48 = vadd.f32 %v799_v42, %v735_v41  ;;  %v740_v52 = vunpack.c.h.bf16 %v846_v46  ;;  %v804_v53 = vunpack.c.h.bf16 %v861_v47  ;;  %v743_v57 = vunpack.c.l.bf16 %v847_v54 }
  0x56   :  { %v1183_v51 = vadd.f32 %v800_v45, %v736_v44  ;;  %v1186_v56 = vadd.f32 %v803_v50, %v739_v49  ;;  %v807_v58 = vunpack.c.l.bf16 %v862_v55  ;;  %v744_v60 = vunpack.c.h.bf16 %v847_v54  ;;  %v853_v49 = vld [vmem:[#allocation2 + $0x68] sm:$0xff]  }
  0x57   :  { %v1189_v59 = vadd.f32 %v804_v53, %v740_v52  ;;  %v808_v61 = vunpack.c.h.bf16 %v862_v55  ;;  %v747_v1 = vunpack.c.l.bf16 %v848_v62  ;;  %v811_v2 = vunpack.c.l.bf16 %v863_v63  ;;  %v868_v50 = vld [vmem:[#allocation5 + $0x68] sm:$0xff]  }
  0x58   :  { %v1192_v0 = vadd.f32 %v807_v58, %v743_v57  ;;  %v748_v4 = vunpack.c.h.bf16 %v848_v62  ;;  %v812_v5 = vunpack.c.h.bf16 %v863_v63  ;;  %v751_v9 = vunpack.c.l.bf16 %v849_v6 }
  0x59   :  { %237 = vadd.xlane.f32.xlu0 %v1162_v24  ;;  %239 = vadd.xlane.f32.xlu1 %v1165_v27  ;;  %v1195_v3 = vadd.f32 %v808_v61, %v744_v60  ;;  %v1198_v8 = vadd.f32 %v811_v2, %v747_v1  ;;  %v815_v10 = vunpack.c.l.bf16 %v864_v7  ;;  %v752_v12 = vunpack.c.h.bf16 %v849_v6  ;;  %v854_v60 = vld [vmem:[#allocation2 + $0x70] sm:$0xff]   ;;  %v855_v6 = vld [vmem:[#allocation2 + $0x78] sm:$0xff]  }
  0x5a   :  { %v1201_v11 = vadd.f32 %v812_v5, %v748_v4  ;;  %v816_v13 = vunpack.c.h.bf16 %v864_v7  ;;  %v755_v21 = vunpack.c.l.bf16 %v850_v17  ;;  %v819_v22 = vunpack.c.l.bf16 %v865_v18  ;;  %v869_v61 = vld [vmem:[#allocation5 + $0x70] sm:$0xff]   ;;  %v870_v7 = vld [vmem:[#allocation5 + $0x78] sm:$0xff]  }
  0x5b   :  { %v1204_v20 = vadd.f32 %v815_v10, %v751_v9  ;;  %v756_v25 = vunpack.c.h.bf16 %v850_v17  ;;  %v820_v26 = vunpack.c.h.bf16 %v865_v18  ;;  %v759_v31 = vunpack.c.l.bf16 %v851_v28 }
  0x5c   :  { %v1207_v23 = vadd.f32 %v816_v13, %v752_v12  ;;  %v1210_v30 = vadd.f32 %v819_v22, %v755_v21  ;;  %v823_v33 = vunpack.c.l.bf16 %v866_v29  ;;  %v760_v36 = vunpack.c.h.bf16 %v851_v28 }
  0x5d   :  { %241 = vadd.xlane.f32.xlu0 %v1168_v32  ;;  %243 = vadd.xlane.f32.xlu1 %v1171_v35  ;;  %v1213_v34 = vadd.f32 %v820_v26, %v756_v25  ;;  %v824_v37 = vunpack.c.h.bf16 %v866_v29  ;;  %v763_v42 = vunpack.c.l.bf16 %v852_v38  ;;  %v827_v44 = vunpack.c.l.bf16 %v867_v39 }
  0x5e   :  { %v1216_v41 = vadd.f32 %v823_v33, %v759_v31  ;;  %v764_v46 = vunpack.c.h.bf16 %v852_v38  ;;  %v828_v47 = vunpack.c.h.bf16 %v867_v39  ;;  %v767_v53 = vunpack.c.l.bf16 %v853_v49 }
  0x5f   :  { %v1219_v45 = vadd.f32 %v824_v37, %v760_v36  ;;  %v1222_v52 = vadd.f32 %v827_v44, %v763_v42  ;;  %v831_v54 = vunpack.c.l.bf16 %v868_v50  ;;  %v768_v57 = vunpack.c.h.bf16 %v853_v49 }
  0x60   :  { %v1225_v55 = vadd.f32 %v828_v47, %v764_v46  ;;  %v832_v58 = vunpack.c.h.bf16 %v868_v50  ;;  %v771_v63 = vunpack.c.l.bf16 %v854_v60  ;;  %v835_v1 = vunpack.c.l.bf16 %v869_v61 }
  0x61   :  { %245 = vadd.xlane.f32.xlu0 %v1174_v40  ;;  %247 = vadd.xlane.f32.xlu1 %v1177_v43  ;;  %v1228_v62 = vadd.f32 %v831_v54, %v767_v53  ;;  %v772_v4 = vunpack.c.h.bf16 %v854_v60  ;;  %v836_v5 = vunpack.c.h.bf16 %v869_v61  ;;  %v775_v10 = vunpack.c.l.bf16 %v855_v6 }
  0x62   :  { %v1231_v2 = vadd.f32 %v832_v58, %v768_v57  ;;  %v1234_v9 = vadd.f32 %v835_v1, %v771_v63  ;;  %v839_v12 = vunpack.c.l.bf16 %v870_v7  ;;  %v776_v17 = vunpack.c.h.bf16 %v855_v6 }
  0x63   :  { %v1237_v13 = vadd.f32 %v836_v5, %v772_v4  ;;  %v840_v18 = vunpack.c.h.bf16 %v870_v7 }
  0x64   :  { %v1240_v21 = vadd.f32 %v839_v12, %v775_v10 }
  0x65   :  { %249 = vadd.xlane.f32.xlu0 %v1180_v48  ;;  %251 = vadd.xlane.f32.xlu1 %v1183_v51  ;;  %v1243_v22 = vadd.f32 %v840_v18, %v776_v17 }
  0x69   :  { %253 = vadd.xlane.f32.xlu0 %v1186_v56  ;;  %255 = vadd.xlane.f32.xlu1 %v1189_v59 }
  0x6d   :  { %257 = vadd.xlane.f32.xlu0 %v1192_v0  ;;  %259 = vadd.xlane.f32.xlu1 %v1195_v3 }
  0x71   :  { %261 = vadd.xlane.f32.xlu0 %v1198_v8  ;;  %263 = vadd.xlane.f32.xlu1 %v1201_v11 }
  0x75   :  { %265 = vadd.xlane.f32.xlu0 %v1204_v20  ;;  %267 = vadd.xlane.f32.xlu1 %v1207_v23 }
  0x79   :  { %269 = vadd.xlane.f32.xlu0 %v1210_v30  ;;  %271 = vadd.xlane.f32.xlu1 %v1213_v34 }
  0x7d   :  { %273 = vadd.xlane.f32.xlu0 %v1216_v41  ;;  %275 = vadd.xlane.f32.xlu1 %v1219_v45 }
  0x81   :  { %277 = vadd.xlane.f32.xlu0 %v1222_v52  ;;  %279 = vadd.xlane.f32.xlu1 %v1225_v55 }
  0x85   :  { %281 = vadd.xlane.f32.xlu0 %v1228_v62  ;;  %283 = vadd.xlane.f32.xlu1 %v1231_v2 }
  0x89   :  { %285 = vadd.xlane.f32.xlu0 %v1234_v9  ;;  %287 = vadd.xlane.f32.xlu1 %v1237_v13 }
  0x8d   :  { %289 = vadd.xlane.f32.xlu0 %v1240_v21  ;;  %291 = vadd.xlane.f32.xlu1 %v1243_v22 }
  0xde   :  { %v230_v25 = vpop.xlane.xlu0 %229  ;;  %v234_v28 = vpop.xlane.xlu1 %233 }
  0xdf   :  { %v294_v26 = vmul.f32 0.0078125, %v230_v25  ;;  %v296_v29 = vmul.f32 0.0078125, %v234_v28 }
  0xe1   :  { %v1248_v31 = vsub.f32 %v1151_v14, %v294_v26  ;;  %v1251_v33 = vsub.f32 %v1153_v15, %v296_v29 }
  0xe2   :  { %v232_v36 = vpop.xlane.xlu0 %231  ;;  %v236_v39 = vpop.xlane.xlu1 %235 }
  0xe3   :  { %v295_v37 = vmul.f32 0.0078125, %v232_v36  ;;  %v358_v38 = vmul.f32 %v1248_v31, %v1248_v31  ;;  %v297_v42 = vmul.f32 0.0078125, %v236_v39  ;;  %v360_v46 = vmul.f32 %v1251_v33, %v1251_v33 }
  0xe5   :  { %v1256_v44 = vsub.f32 %v1156_v16, %v295_v37  ;;  %390 = vadd.xlane.f32.xlu0 %v358_v38  ;;  %v1261_v14 = vsub.f32 %v1159_v19, %v297_v42 }
  0xe6   :  { %v238_v47 = vpop.xlane.xlu0 %237  ;;  %v240_v50 = vpop.xlane.xlu1 %239 }
  0xe7   :  { %v298_v15 = vmul.f32 0.0078125, %v238_v47  ;;  %v359_v49 = vmul.f32 %v1256_v44, %v1256_v44  ;;  %v299_v53 = vmul.f32 0.0078125, %v240_v50  ;;  %v361_v16 = vmul.f32 %v1261_v14, %v1261_v14 }
  0xe9   :  { %v1266_v54 = vsub.f32 %v1162_v24, %v298_v15  ;;  %394 = vadd.xlane.f32.xlu0 %v360_v46  ;;  %392 = vadd.xlane.f32.xlu1 %v359_v49  ;;  %v1271_v57 = vsub.f32 %v1165_v27, %v299_v53 }
  0xea   :  { %v242_v19 = vpop.xlane.xlu0 %241  ;;  %v244_v61 = vpop.xlane.xlu1 %243 }
  0xeb   :  { %v300_v58 = vmul.f32 0.0078125, %v242_v19  ;;  %v362_v60 = vmul.f32 %v1266_v54, %v1266_v54  ;;  %v301_v63 = vmul.f32 0.0078125, %v244_v61  ;;  %v363_v24 = vmul.f32 %v1271_v57, %v1271_v57 }
  0xed   :  { %v1276_v1 = vsub.f32 %v1168_v32, %v300_v58  ;;  %396 = vadd.xlane.f32.xlu1 %v361_v16  ;;  %398 = vadd.xlane.f32.xlu0 %v362_v60  ;;  %v1281_v4 = vsub.f32 %v1171_v35, %v301_v63 }
  0xee   :  { %v246_v27 = vpop.xlane.xlu0 %245  ;;  %v248_v7 = vpop.xlane.xlu1 %247 }
  0xef   :  { %v302_v5 = vmul.f32 0.0078125, %v246_v27  ;;  %v364_v6 = vmul.f32 %v1276_v1, %v1276_v1  ;;  %v303_v10 = vmul.f32 0.0078125, %v248_v7  ;;  %v365_v32 = vmul.f32 %v1281_v4, %v1281_v4 }
  0xf1   :  { %v1286_v12 = vsub.f32 %v1174_v40, %v302_v5  ;;  %400 = vadd.xlane.f32.xlu1 %v363_v24  ;;  %402 = vadd.xlane.f32.xlu0 %v364_v6  ;;  %v1291_v17 = vsub.f32 %v1177_v43, %v303_v10 }
  0xf2   :  { %v250_v35 = vpop.xlane.xlu0 %249  ;;  %v252_v26 = vpop.xlane.xlu1 %251 }
  0xf3   :  { %v304_v18 = vmul.f32 0.0078125, %v250_v35  ;;  %v366_v25 = vmul.f32 %v1286_v12, %v1286_v12  ;;  %v305_v28 = vmul.f32 0.0078125, %v252_v26  ;;  %v367_v40 = vmul.f32 %v1291_v17, %v1291_v17 }
  0xf5   :  { %v1296_v29 = vsub.f32 %v1180_v48, %v304_v18  ;;  %404 = vadd.xlane.f32.xlu1 %v365_v32  ;;  %406 = vadd.xlane.f32.xlu0 %v366_v25  ;;  %v1301_v36 = vsub.f32 %v1183_v51, %v305_v28 }
  0xf6   :  { %v254_v43 = vpop.xlane.xlu0 %253  ;;  %v256_v39 = vpop.xlane.xlu1 %255 }
  0xf7   :  { %v306_v37 = vmul.f32 0.0078125, %v254_v43  ;;  %v368_v38 = vmul.f32 %v1296_v29, %v1296_v29  ;;  %v307_v42 = vmul.f32 0.0078125, %v256_v39  ;;  %v369_v48 = vmul.f32 %v1301_v36, %v1301_v36 }
  0xf9   :  { %v1306_v46 = vsub.f32 %v1186_v56, %v306_v37  ;;  %408 = vadd.xlane.f32.xlu1 %v367_v40  ;;  %410 = vadd.xlane.f32.xlu0 %v368_v38  ;;  %v1311_v47 = vsub.f32 %v1189_v59, %v307_v42 }
  0xfa   :  { %v258_v51 = vpop.xlane.xlu0 %257  ;;  %v260_v50 = vpop.xlane.xlu1 %259 }
  0xfb   :  { %v308_v15 = vmul.f32 0.0078125, %v258_v51  ;;  %v370_v49 = vmul.f32 %v1306_v46, %v1306_v46  ;;  %v309_v53 = vmul.f32 0.0078125, %v260_v50  ;;  %v371_v56 = vmul.f32 %v1311_v47, %v1311_v47 }
  0xfd   :  { %v1316_v16 = vsub.f32 %v1192_v0, %v308_v15  ;;  %412 = vadd.xlane.f32.xlu1 %v369_v48  ;;  %414 = vadd.xlane.f32.xlu0 %v370_v49  ;;  %v1321_v19 = vsub.f32 %v1195_v3, %v309_v53 }
  0xfe   :  { %v262_v59 = vpop.xlane.xlu0 %261  ;;  %v264_v61 = vpop.xlane.xlu1 %263 }
  0xff   :  { %v310_v58 = vmul.f32 0.0078125, %v262_v59  ;;  %v372_v60 = vmul.f32 %v1316_v16, %v1316_v16  ;;  %v311_v63 = vmul.f32 0.0078125, %v264_v61  ;;  %v373_v0 = vmul.f32 %v1321_v19, %v1321_v19 }
 0x101   :  { %v1326_v24 = vsub.f32 %v1198_v8, %v310_v58  ;;  %416 = vadd.xlane.f32.xlu1 %v371_v56  ;;  %418 = vadd.xlane.f32.xlu0 %v372_v60  ;;  %v1331_v27 = vsub.f32 %v1201_v11, %v311_v63 }
 0x102   :  { %v266_v3 = vpop.xlane.xlu0 %265  ;;  %v268_v7 = vpop.xlane.xlu1 %267 }
 0x103   :  { %v312_v5 = vmul.f32 0.0078125, %v266_v3  ;;  %v374_v6 = vmul.f32 %v1326_v24, %v1326_v24  ;;  %v313_v10 = vmul.f32 0.0078125, %v268_v7  ;;  %v375_v8 = vmul.f32 %v1331_v27, %v1331_v27 }
 0x105   :  { %v1336_v32 = vsub.f32 %v1204_v20, %v312_v5  ;;  %420 = vadd.xlane.f32.xlu1 %v373_v0  ;;  %422 = vadd.xlane.f32.xlu0 %v374_v6  ;;  %v1341_v35 = vsub.f32 %v1207_v23, %v313_v10 }
 0x106   :  { %v270_v11 = vpop.xlane.xlu0 %269  ;;  %v272_v26 = vpop.xlane.xlu1 %271 }
 0x107   :  { %v314_v18 = vmul.f32 0.0078125, %v270_v11  ;;  %v376_v25 = vmul.f32 %v1336_v32, %v1336_v32  ;;  %v315_v28 = vmul.f32 0.0078125, %v272_v26  ;;  %v377_v20 = vmul.f32 %v1341_v35, %v1341_v35 }
 0x109   :  { %v1346_v40 = vsub.f32 %v1210_v30, %v314_v18  ;;  %424 = vadd.xlane.f32.xlu1 %v375_v8  ;;  %426 = vadd.xlane.f32.xlu0 %v376_v25  ;;  %v1351_v43 = vsub.f32 %v1213_v34, %v315_v28 }
 0x10a   :  { %v274_v23 = vpop.xlane.xlu0 %273  ;;  %v276_v39 = vpop.xlane.xlu1 %275 }
 0x10b   :  { %v316_v37 = vmul.f32 0.0078125, %v274_v23  ;;  %v378_v38 = vmul.f32 %v1346_v40, %v1346_v40  ;;  %v317_v42 = vmul.f32 0.0078125, %v276_v39  ;;  %v379_v30 = vmul.f32 %v1351_v43, %v1351_v43 }
 0x10d   :  { %v1356_v48 = vsub.f32 %v1216_v41, %v316_v37  ;;  %428 = vadd.xlane.f32.xlu1 %v377_v20  ;;  %430 = vadd.xlane.f32.xlu0 %v378_v38  ;;  %v1361_v51 = vsub.f32 %v1219_v45, %v317_v42 }
 0x10e   :  { %v278_v34 = vpop.xlane.xlu0 %277  ;;  %v280_v50 = vpop.xlane.xlu1 %279 }
 0x10f   :  { %v318_v15 = vmul.f32 0.0078125, %v278_v34  ;;  %v380_v49 = vmul.f32 %v1356_v48, %v1356_v48  ;;  %v319_v53 = vmul.f32 0.0078125, %v280_v50  ;;  %v381_v41 = vmul.f32 %v1361_v51, %v1361_v51 }
 0x111   :  { %v1366_v56 = vsub.f32 %v1222_v52, %v318_v15  ;;  %432 = vadd.xlane.f32.xlu1 %v379_v30  ;;  %434 = vadd.xlane.f32.xlu0 %v380_v49  ;;  %v1371_v59 = vsub.f32 %v1225_v55, %v319_v53 }
 0x112   :  { %v282_v45 = vpop.xlane.xlu0 %281  ;;  %v284_v61 = vpop.xlane.xlu1 %283 }
 0x113   :  { %v320_v58 = vmul.f32 0.0078125, %v282_v45  ;;  %v382_v60 = vmul.f32 %v1366_v56, %v1366_v56  ;;  %v321_v63 = vmul.f32 0.0078125, %v284_v61  ;;  %v383_v52 = vmul.f32 %v1371_v59, %v1371_v59 }
 0x115   :  { %v1376_v0 = vsub.f32 %v1228_v62, %v320_v58  ;;  %436 = vadd.xlane.f32.xlu1 %v381_v41  ;;  %438 = vadd.xlane.f32.xlu0 %v382_v60  ;;  %v1381_v3 = vsub.f32 %v1231_v2, %v321_v63 }
 0x116   :  { %v286_v55 = vpop.xlane.xlu0 %285  ;;  %v288_v7 = vpop.xlane.xlu1 %287 }
 0x117   :  { %v322_v5 = vmul.f32 0.0078125, %v286_v55  ;;  %v384_v6 = vmul.f32 %v1376_v0, %v1376_v0  ;;  %v323_v10 = vmul.f32 0.0078125, %v288_v7  ;;  %v385_v62 = vmul.f32 %v1381_v3, %v1381_v3 }
 0x119   :  { %v1386_v8 = vsub.f32 %v1234_v9, %v322_v5  ;;  %440 = vadd.xlane.f32.xlu1 %v383_v52  ;;  %442 = vadd.xlane.f32.xlu0 %v384_v6  ;;  %v1391_v11 = vsub.f32 %v1237_v13, %v323_v10 }
 0x11a   :  { %v290_v2 = vpop.xlane.xlu0 %289  ;;  %v292_v26 = vpop.xlane.xlu1 %291 }
 0x11b   :  { %v324_v18 = vmul.f32 0.0078125, %v290_v2  ;;  %v386_v25 = vmul.f32 %v1386_v8, %v1386_v8  ;;  %v325_v28 = vmul.f32 0.0078125, %v292_v26  ;;  %v387_v9 = vmul.f32 %v1391_v11, %v1391_v11 }
 0x11d   :  { %v1396_v20 = vsub.f32 %v1240_v21, %v324_v18  ;;  %444 = vadd.xlane.f32.xlu1 %v385_v62  ;;  %446 = vadd.xlane.f32.xlu0 %v386_v25  ;;  %v1401_v23 = vsub.f32 %v1243_v22, %v325_v28  ;;  %v1408_v18 = vld [vmem:[#allocation7] ss:$0 sm:$0xff] }
 0x11f   :  { %v388_v13 = vmul.f32 %v1396_v20, %v1396_v20  ;;  %v389_v37 = vmul.f32 %v1401_v23, %v1401_v23 }
 0x121   :  { %448 = vadd.xlane.f32.xlu1 %v387_v9  ;;  %450 = vadd.xlane.f32.xlu0 %v388_v13 }
 0x125   :  { %452 = vadd.xlane.f32.xlu1 %v389_v37 }
 0x172   :  { %v391_v38 = vpop.xlane.xlu0 %390 }
 0x173   :  { %v454_v21 = vmul.f32 0.0078125, %v391_v38 }
 0x175   :  { %v486_v39 = vadd.f32 1e-12, %v454_v21 }
 0x176   :  { %v393_v42 = vpop.xlane.xlu1 %392  ;;  %v395_v30 = vpop.xlane.xlu0 %394 }
 0x177   :  { %880 = vrsqrt.f32 %v486_v39  ;;  %v455_v34 = vmul.f32 0.0078125, %v393_v42  ;;  %v456_v15 = vmul.f32 0.0078125, %v395_v30  ;;  %v1412_v30 = vld [vmem:[#allocation8] ss:$0 sm:$0xff] }
 0x179   :  { %v487_v49 = vadd.f32 1e-12, %v455_v34  ;;  %v488_v22 = vadd.f32 1e-12, %v456_v15 }
 0x17a   :  { %v397_v50 = vpop.xlane.xlu1 %396  ;;  %v399_v53 = vpop.xlane.xlu0 %398 }
 0x17b   :  { %882 = vrsqrt.f32 %v487_v49  ;;  %v457_v41 = vmul.f32 0.0078125, %v397_v50  ;;  %v458_v45 = vmul.f32 0.0078125, %v399_v53 }
 0x17c   :  { %884 = vrsqrt.f32 %v488_v22 }
 0x17d   :  { %v489_v58 = vadd.f32 1e-12, %v457_v41  ;;  %v490_v60 = vadd.f32 1e-12, %v458_v45 }
 0x17e   :  { %v401_v61 = vpop.xlane.xlu1 %400  ;;  %v403_v63 = vpop.xlane.xlu0 %402 }
 0x17f   :  { %886 = vrsqrt.f32 %v489_v58  ;;  %v459_v52 = vmul.f32 0.0078125, %v401_v61  ;;  %v460_v55 = vmul.f32 0.0078125, %v403_v63 }
 0x180   :  { %888 = vrsqrt.f32 %v490_v60 }
 0x181   :  { %v881_v5 = vpop.eup %880  ;;  %v491_v6 = vadd.f32 1e-12, %v459_v52  ;;  %v492_v7 = vadd.f32 1e-12, %v460_v55 }
 0x182   :  { %v550_v10 = vmul.f32 %v881_v5, %v1248_v31  ;;  %v405_v62 = vpop.xlane.xlu1 %404  ;;  %v407_v2 = vpop.xlane.xlu0 %406 }
 0x183   :  { %890 = vrsqrt.f32 %v491_v6  ;;  %v461_v25 = vmul.f32 0.0078125, %v405_v62  ;;  %v462_v26 = vmul.f32 0.0078125, %v407_v2 }
 0x184   :  { %892 = vrsqrt.f32 %v492_v7  ;;  %v589_v38 = vmul.f32 %v1408_v18, %v550_v10 }
 0x185   :  { %v883_v28 = vpop.eup %882  ;;  %v493_v9 = vadd.f32 1e-12, %v461_v25  ;;  %v494_v13 = vadd.f32 1e-12, %v462_v26 }
 0x186   :  { %v885_v37 = vpop.eup %884  ;;  %v551_v21 = vmul.f32 %v883_v28, %v1256_v44  ;;  %v409_v39 = vpop.xlane.xlu1 %408  ;;  %v628_v45 = vadd.f32 %v1412_v30, %v589_v38 }
 0x187   :  { %v411_v42 = vpop.xlane.xlu0 %410  ;;  %v552_v31 = vmul.f32 %v885_v37, %v1251_v33  ;;  %894 = vrsqrt.f32 %v493_v9  ;;  %v463_v34 = vmul.f32 0.0078125, %v409_v39 }
 0x188   :  { %v464_v15 = vmul.f32 0.0078125, %v411_v42  ;;  %v590_v49 = vmul.f32 %v1408_v18, %v551_v21  ;;  %896 = vrsqrt.f32 %v494_v13 }
 0x189   :  { %v887_v22 = vpop.eup %886  ;;  %v495_v50 = vadd.f32 1e-12, %v463_v34  ;;  %v591_v58 = vmul.f32 %v1408_v18, %v552_v31 }
 0x18a   :  { %v496_v53 = vadd.f32 1e-12, %v464_v15  ;;  %v889_v41 = vpop.eup %888  ;;  %v629_v44 = vadd.f32 %v1412_v30, %v590_v49  ;;  %v553_v60 = vmul.f32 %v887_v22, %v1261_v14  ;;  %v413_v61 = vpop.xlane.xlu1 %412 }
 0x18b   :  { %v415_v33 = vpop.xlane.xlu0 %414  ;;  %v554_v63 = vmul.f32 %v889_v41, %v1266_v54  ;;  %898 = vrsqrt.f32 %v495_v50  ;;  %v465_v52 = vmul.f32 0.0078125, %v413_v61  ;;  %v630_v25 = vadd.f32 %v1412_v30, %v591_v58 }
 0x18c   :  { %v660_v55 = vpack.c.bf16 %v629_v44, %v628_v45  ;;  %v592_v5 = vmul.f32 %v1408_v18, %v553_v60  ;;  %900 = vrsqrt.f32 %v496_v53  ;;  %v466_v6 = vmul.f32 0.0078125, %v415_v33 }
 0x18d   :  { %v891_v7 = vpop.eup %890  ;;  %v593_v10 = vmul.f32 %v1408_v18, %v554_v63  ;;  %v497_v62 = vadd.f32 1e-12, %v465_v52 }
 0x18e   :  { %v893_v2 = vpop.eup %892  ;;  %676 = vst [vmem:[#allocation10] sm:$0xff] %v660_v55  ;;  %v631_v14 = vadd.f32 %v1412_v30, %v592_v5  ;;  %v555_v26 = vmul.f32 %v891_v7, %v1271_v57  ;;  %v498_v54 = vadd.f32 1e-12, %v466_v6  ;;  %v417_v28 = vpop.xlane.xlu1 %416 }
 0x18f   :  { %v419_v9 = vpop.xlane.xlu0 %418  ;;  %v556_v13 = vmul.f32 %v893_v2, %v1276_v1  ;;  %902 = vrsqrt.f32 %v497_v62  ;;  %v467_v37 = vmul.f32 0.0078125, %v417_v28  ;;  %v632_v31 = vadd.f32 %v1412_v30, %v593_v10 }
 0x190   :  { %v661_v38 = vpack.c.bf16 %v631_v14, %v630_v25  ;;  %v594_v21 = vmul.f32 %v1408_v18, %v555_v26  ;;  %904 = vrsqrt.f32 %v498_v54  ;;  %v468_v39 = vmul.f32 0.0078125, %v419_v9 }
 0x191   :  { %v895_v42 = vpop.eup %894  ;;  %v499_v34 = vadd.f32 1e-12, %v467_v37  ;;  %v595_v49 = vmul.f32 %v1408_v18, %v556_v13 }
 0x192   :  { %v897_v15 = vpop.eup %896  ;;  %677 = vst [vmem:[#allocation10 + $0x8] sm:$0xff] %v661_v38  ;;  %v633_v57 = vadd.f32 %v1412_v30, %v594_v21  ;;  %v557_v22 = vmul.f32 %v895_v42, %v1281_v4  ;;  %v500_v1 = vadd.f32 1e-12, %v468_v39  ;;  %v421_v50 = vpop.xlane.xlu1 %420 }
 0x193   :  { %v423_v53 = vpop.xlane.xlu0 %422  ;;  %v558_v41 = vmul.f32 %v897_v15, %v1286_v12  ;;  %906 = vrsqrt.f32 %v499_v34  ;;  %v469_v45 = vmul.f32 0.0078125, %v421_v50  ;;  %v634_v4 = vadd.f32 %v1412_v30, %v595_v49 }
 0x194   :  { %v662_v44 = vpack.c.bf16 %v633_v57, %v632_v31  ;;  %v596_v58 = vmul.f32 %v1408_v18, %v557_v22  ;;  %908 = vrsqrt.f32 %v500_v1  ;;  %v470_v60 = vmul.f32 0.0078125, %v423_v53 }
 0x195   :  { %v899_v61 = vpop.eup %898  ;;  %v597_v33 = vmul.f32 %v1408_v18, %v558_v41  ;;  %v501_v63 = vadd.f32 1e-12, %v469_v45 }
 0x196   :  { %v901_v52 = vpop.eup %900  ;;  %678 = vst [vmem:[#allocation10 + $0x10] sm:$0xff] %v662_v44  ;;  %v635_v55 = vadd.f32 %v1412_v30, %v596_v58  ;;  %v559_v5 = vmul.f32 %v899_v61, %v1291_v17  ;;  %v502_v12 = vadd.f32 1e-12, %v470_v60  ;;  %v425_v6 = vpop.xlane.xlu1 %424 }
 0x197   :  { %v427_v7 = vpop.xlane.xlu0 %426  ;;  %v560_v10 = vmul.f32 %v901_v52, %v1296_v29  ;;  %910 = vrsqrt.f32 %v501_v63  ;;  %v471_v62 = vmul.f32 0.0078125, %v425_v6  ;;  %v636_v54 = vadd.f32 %v1412_v30, %v597_v33 }
 0x198   :  { %v663_v2 = vpack.c.bf16 %v635_v55, %v634_v4  ;;  %v598_v25 = vmul.f32 %v1408_v18, %v559_v5  ;;  %912 = vrsqrt.f32 %v502_v12  ;;  %v472_v14 = vmul.f32 0.0078125, %v427_v7 }
 0x199   :  { %v903_v26 = vpop.eup %902  ;;  %v503_v28 = vadd.f32 1e-12, %v471_v62  ;;  %v599_v13 = vmul.f32 %v1408_v18, %v560_v10 }
 0x19a   :  { %v905_v9 = vpop.eup %904  ;;  %679 = vst [vmem:[#allocation10 + $0x18] sm:$0xff] %v663_v2  ;;  %v637_v17 = vadd.f32 %v1412_v30, %v598_v25  ;;  %v561_v37 = vmul.f32 %v903_v26, %v1301_v36  ;;  %v504_v29 = vadd.f32 1e-12, %v472_v14  ;;  %v429_v38 = vpop.xlane.xlu1 %428 }
 0x19b   :  { %v431_v21 = vpop.xlane.xlu0 %430  ;;  %v562_v39 = vmul.f32 %v905_v9, %v1306_v46  ;;  %914 = vrsqrt.f32 %v503_v28  ;;  %v473_v42 = vmul.f32 0.0078125, %v429_v38  ;;  %v638_v36 = vadd.f32 %v1412_v30, %v599_v13 }
 0x19c   :  { %v664_v31 = vpack.c.bf16 %v637_v17, %v636_v54  ;;  %v600_v34 = vmul.f32 %v1408_v18, %v561_v37  ;;  %916 = vrsqrt.f32 %v504_v29  ;;  %v474_v15 = vmul.f32 0.0078125, %v431_v21 }
 0x19d   :  { %v907_v57 = vpop.eup %906  ;;  %v601_v49 = vmul.f32 %v1408_v18, %v562_v39  ;;  %v505_v22 = vadd.f32 1e-12, %v473_v42 }
 0x19e   :  { %v909_v1 = vpop.eup %908  ;;  %680 = vst [vmem:[#allocation10 + $0x20] sm:$0xff] %v664_v31  ;;  %v639_v50 = vadd.f32 %v1412_v30, %v600_v34  ;;  %v563_v53 = vmul.f32 %v907_v57, %v1311_v47  ;;  %v506_v46 = vadd.f32 1e-12, %v474_v15  ;;  %v433_v41 = vpop.xlane.xlu1 %432 }
 0x19f   :  { %v435_v45 = vpop.xlane.xlu0 %434  ;;  %v564_v44 = vmul.f32 %v909_v1, %v1316_v16  ;;  %918 = vrsqrt.f32 %v505_v22  ;;  %v475_v58 = vmul.f32 0.0078125, %v433_v41  ;;  %v640_v52 = vadd.f32 %v1412_v30, %v601_v49 }
 0x1a0   :  { %v665_v60 = vpack.c.bf16 %v639_v50, %v638_v36  ;;  %v602_v61 = vmul.f32 %v1408_v18, %v563_v53  ;;  %920 = vrsqrt.f32 %v506_v46  ;;  %v476_v33 = vmul.f32 0.0078125, %v435_v45 }
 0x1a1   :  { %v911_v63 = vpop.eup %910  ;;  %v507_v4 = vadd.f32 1e-12, %v475_v58  ;;  %v603_v5 = vmul.f32 %v1408_v18, %v564_v44 }
 0x1a2   :  { %v913_v55 = vpop.eup %912  ;;  %681 = vst [vmem:[#allocation10 + $0x28] sm:$0xff] %v665_v60  ;;  %v641_v47 = vadd.f32 %v1412_v30, %v602_v61  ;;  %v565_v12 = vmul.f32 %v911_v63, %v1321_v19  ;;  %v508_v16 = vadd.f32 1e-12, %v476_v33  ;;  %v437_v6 = vpop.xlane.xlu1 %436 }
 0x1a3   :  { %v439_v7 = vpop.xlane.xlu0 %438  ;;  %v566_v10 = vmul.f32 %v913_v55, %v1326_v24  ;;  %922 = vrsqrt.f32 %v507_v4  ;;  %v477_v62 = vmul.f32 0.0078125, %v437_v6  ;;  %v642_v19 = vadd.f32 %v1412_v30, %v603_v5 }
 0x1a4   :  { %v666_v2 = vpack.c.bf16 %v641_v47, %v640_v52  ;;  %v604_v25 = vmul.f32 %v1408_v18, %v565_v12  ;;  %924 = vrsqrt.f32 %v508_v16  ;;  %v478_v14 = vmul.f32 0.0078125, %v439_v7 }
 0x1a5   :  { %v915_v26 = vpop.eup %914  ;;  %v605_v54 = vmul.f32 %v1408_v18, %v566_v10  ;;  %v509_v28 = vadd.f32 1e-12, %v477_v62 }
 0x1a6   :  { %v917_v9 = vpop.eup %916  ;;  %682 = vst [vmem:[#allocation10 + $0x30] sm:$0xff] %v666_v2  ;;  %v643_v17 = vadd.f32 %v1412_v30, %v604_v25  ;;  %v567_v13 = vmul.f32 %v915_v26, %v1331_v27  ;;  %v510_v24 = vadd.f32 1e-12, %v478_v14  ;;  %v441_v37 = vpop.xlane.xlu1 %440 }
 0x1a7   :  { %v443_v29 = vpop.xlane.xlu0 %442  ;;  %v568_v38 = vmul.f32 %v917_v9, %v1336_v32  ;;  %926 = vrsqrt.f32 %v509_v28  ;;  %v479_v21 = vmul.f32 0.0078125, %v441_v37  ;;  %v644_v15 = vadd.f32 %v1412_v30, %v605_v54 }
 0x1a8   :  { %v667_v39 = vpack.c.bf16 %v643_v17, %v642_v19  ;;  %v606_v42 = vmul.f32 %v1408_v18, %v567_v13  ;;  %928 = vrsqrt.f32 %v510_v24  ;;  %v480_v31 = vmul.f32 0.0078125, %v443_v29 }
 0x1a9   :  { %v919_v34 = vpop.eup %918  ;;  %v511_v57 = vadd.f32 1e-12, %v479_v21  ;;  %v607_v22 = vmul.f32 %v1408_v18, %v568_v38 }
 0x1aa   :  { %v921_v49 = vpop.eup %920  ;;  %683 = vst [vmem:[#allocation10 + $0x38] sm:$0xff] %v667_v39  ;;  %v645_v27 = vadd.f32 %v1412_v30, %v606_v42  ;;  %v569_v1 = vmul.f32 %v919_v34, %v1341_v35  ;;  %v512_v32 = vadd.f32 1e-12, %v480_v31  ;;  %v445_v36 = vpop.xlane.xlu1 %444 }
 0x1ab   :  { %v447_v50 = vpop.xlane.xlu0 %446  ;;  %v570_v53 = vmul.f32 %v921_v49, %v1346_v40  ;;  %930 = vrsqrt.f32 %v511_v57  ;;  %v481_v46 = vmul.f32 0.0078125, %v445_v36  ;;  %v646_v35 = vadd.f32 %v1412_v30, %v607_v22 }
 0x1ac   :  { %v668_v41 = vpack.c.bf16 %v645_v27, %v644_v15  ;;  %v608_v45 = vmul.f32 %v1408_v18, %v569_v1  ;;  %932 = vrsqrt.f32 %v512_v32  ;;  %v482_v44 = vmul.f32 0.0078125, %v447_v50 }
 0x1ad   :  { %v923_v58 = vpop.eup %922  ;;  %v609_v60 = vmul.f32 %v1408_v18, %v570_v53  ;;  %v513_v61 = vadd.f32 1e-12, %v481_v46 }
 0x1ae   :  { %v925_v33 = vpop.eup %924  ;;  %684 = vst [vmem:[#allocation10 + $0x40] sm:$0xff] %v668_v41  ;;  %v647_v63 = vadd.f32 %v1412_v30, %v608_v45  ;;  %v571_v52 = vmul.f32 %v923_v58, %v1351_v43  ;;  %v514_v40 = vadd.f32 1e-12, %v482_v44  ;;  %v449_v4 = vpop.xlane.xlu1 %448 }
 0x1af   :  { %v451_v55 = vpop.xlane.xlu0 %450  ;;  %v572_v47 = vmul.f32 %v925_v33, %v1356_v48  ;;  %934 = vrsqrt.f32 %v513_v61  ;;  %v483_v5 = vmul.f32 0.0078125, %v449_v4  ;;  %v648_v10 = vadd.f32 %v1412_v30, %v609_v60 }
 0x1b0   :  { %v669_v12 = vpack.c.bf16 %v647_v63, %v646_v35  ;;  %v610_v16 = vmul.f32 %v1408_v18, %v571_v52  ;;  %936 = vrsqrt.f32 %v514_v40  ;;  %v484_v6 = vmul.f32 0.0078125, %v451_v55 }
 0x1b1   :  { %v927_v7 = vpop.eup %926  ;;  %v515_v62 = vadd.f32 1e-12, %v483_v5  ;;  %v611_v25 = vmul.f32 %v1408_v18, %v572_v47 }
 0x1b2   :  { %v929_v2 = vpop.eup %928  ;;  %685 = vst [vmem:[#allocation10 + $0x48] sm:$0xff] %v669_v12  ;;  %v649_v43 = vadd.f32 %v1412_v30, %v610_v16  ;;  %v573_v14 = vmul.f32 %v927_v7, %v1361_v51  ;;  %v516_v48 = vadd.f32 1e-12, %v484_v6  ;;  %v453_v26 = vpop.xlane.xlu1 %452 }
 0x1b3   :  { %v574_v54 = vmul.f32 %v929_v2, %v1366_v56  ;;  %938 = vrsqrt.f32 %v515_v62  ;;  %v485_v28 = vmul.f32 0.0078125, %v453_v26  ;;  %v650_v37 = vadd.f32 %v1412_v30, %v611_v25 }
 0x1b4   :  { %v670_v9 = vpack.c.bf16 %v649_v43, %v648_v10  ;;  %v612_v19 = vmul.f32 %v1408_v18, %v573_v14  ;;  %940 = vrsqrt.f32 %v516_v48 }
 0x1b5   :  { %v931_v17 = vpop.eup %930  ;;  %v517_v13 = vadd.f32 1e-12, %v485_v28  ;;  %v613_v51 = vmul.f32 %v1408_v18, %v574_v54 }
 0x1b6   :  { %v933_v24 = vpop.eup %932  ;;  %686 = vst [vmem:[#allocation10 + $0x50] sm:$0xff] %v670_v9  ;;  %v651_v29 = vadd.f32 %v1412_v30, %v612_v19  ;;  %v575_v38 = vmul.f32 %v931_v17, %v1371_v59 }
 0x1b7   :  { %v576_v56 = vmul.f32 %v933_v24, %v1376_v0  ;;  %942 = vrsqrt.f32 %v517_v13  ;;  %v652_v34 = vadd.f32 %v1412_v30, %v613_v51 }
 0x1b8   :  { %v671_v21 = vpack.c.bf16 %v651_v29, %v650_v37  ;;  %v614_v39 = vmul.f32 %v1408_v18, %v575_v38 }
 0x1b9   :  { %v935_v42 = vpop.eup %934  ;;  %v615_v57 = vmul.f32 %v1408_v18, %v576_v56 }
 0x1ba   :  { %v937_v31 = vpop.eup %936  ;;  %687 = vst [vmem:[#allocation10 + $0x58] sm:$0xff] %v671_v21  ;;  %v653_v15 = vadd.f32 %v1412_v30, %v614_v39  ;;  %v577_v49 = vmul.f32 %v935_v42, %v1381_v3 }
 0x1bb   :  { %v578_v27 = vmul.f32 %v937_v31, %v1386_v8  ;;  %v654_v32 = vadd.f32 %v1412_v30, %v615_v57 }
 0x1bc   :  { %v672_v59 = vpack.c.bf16 %v653_v15, %v652_v34  ;;  %v616_v0 = vmul.f32 %v1408_v18, %v577_v49 }
 0x1bd   :  { %v939_v22 = vpop.eup %938  ;;  %v617_v50 = vmul.f32 %v1408_v18, %v578_v27 }
 0x1be   :  { %v941_v1 = vpop.eup %940  ;;  %688 = vst [vmem:[#allocation10 + $0x60] sm:$0xff] %v672_v59  ;;  %v655_v36 = vadd.f32 %v1412_v30, %v616_v0  ;;  %v579_v53 = vmul.f32 %v939_v22, %v1391_v11 }
 0x1bf   :  { %v580_v46 = vmul.f32 %v941_v1, %v1396_v20  ;;  %v656_v45 = vadd.f32 %v1412_v30, %v617_v50 }
 0x1c0   :  { %v673_v41 = vpack.c.bf16 %v655_v36, %v654_v32  ;;  %v618_v3 = vmul.f32 %v1408_v18, %v579_v53 }
 0x1c1   :  { %v943_v8 = vpop.eup %942  ;;  %v619_v58 = vmul.f32 %v1408_v18, %v580_v46 }
 0x1c2   :  { %689 = vst [vmem:[#allocation10 + $0x68] sm:$0xff] %v673_v41  ;;  %v657_v44 = vadd.f32 %v1412_v30, %v618_v3  ;;  %v581_v60 = vmul.f32 %v943_v8, %v1401_v23 }
 0x1c3   :  { %v658_v11 = vadd.f32 %v1412_v30, %v619_v58 }
 0x1c4   :  { %v674_v61 = vpack.c.bf16 %v657_v44, %v656_v45  ;;  %v620_v33 = vmul.f32 %v1408_v18, %v581_v60 }
 0x1c6   :  { %690 = vst [vmem:[#allocation10 + $0x70] sm:$0xff] %v674_v61  ;;  %v659_v20 = vadd.f32 %v1412_v30, %v620_v33 }
 0x1c8   :  { %v675_v35 = vpack.c.bf16 %v659_v20, %v658_v11 }
 0x1ca   :  { %691 = vst [vmem:[#allocation10 + $0x78] sm:$0xff] %v675_v35 }
 0x1cb   :  { %1043 = shalt.err (!%p1040_p8)
}
 0x1cc   :  { %s1044_s15 = scalar_lea.hbm %s1523_s4, 2048 }
 0x1cd   :  { %p1045_p9 = scmp.ne.s32.totalorder %s1523_s4, %s1044_s15  ;;  %p1048_p10 = scmp.lt.u32.totalorder %s1044_s15, %s1523_s4 }
 0x1cf   :  { %p1050_p11 = pnand %p1048_p10, %p1045_p9 }
 0x1d1   :  { %1053 = shalt.err (!%p1050_p11)
}
 0x1d2   :  { %s1069_s21 = smov 128   ;;  %s1070_s22 = smov 8  }
 0x1d3   :  { %703 = dma.vmem_to_hbm [thread:$0]  %s698_s12, 2048, %s1523_s4, [#allocation4], %s1069_s21, %s1069_s21, %s1070_s22  }
 0x1d4   :  { %1060 = dma.done.wait [#allocation4], 2048  }
 0x1d5   :  { %1061 = vsyncadd [#allocation4], 4294965248 }
 0x1d6   :  { %707 = vsyncpa [#allocation3], 1 }
 0x1d7   :  { %708 = vsyncpa [#allocation6], 1 }
 0x1d8   :  { %709 = vsyncpa [#allocation9], 1 }
 0x1d9   :  { %710 = vsyncpa [#allocation4], 1 }

// kernel: bookbert_forward.23
= control target key start
LH: loop header
LB: loop body
LE: loop exit
PB: predicated region body
PF: predicated region fallthrough
CT: control target
= control target key end

     0   :  { %8 = vsyncpa [#allocation3], 0  ;;  %s2028_s0 = inlined_call_operand.hbm [shape: bf16[256,512], index: 0, kind: input, shape index: {}]   ;;  %s2029_s1 = inlined_call_operand.hbm [shape: bf16[512,128], index: 1, kind: input, shape index: {}]   ;;  %s2030_s2 = inlined_call_operand.hbm [shape: f32[1,128], index: 2, kind: input, shape index: {}]   ;;  %s2031_s3 = inlined_call_operand.hbm [shape: bf16[256,128], index: 3, kind: output, shape index: {}]  }
   0x1   :  { %9 = vsyncpa [#allocation6], 0 }
   0x2   :  { %10 = vsyncpa [#allocation4], 0  ;;  %s1912_s12 = smov [#allocation5]   ;;  %s1818_s16 = scalar_lea.hbm %s2029_s1, 4096 }
   0x3   :  { %s28_s13 = sshll.u32 %s1912_s12, 4  ;;  %p1819_p0 = scmp.ne.s32.totalorder %s2029_s1, %s1818_s16  ;;  %s29_s13 = int_to_ptr.vmem [resolvable:$true] %s28_s13 }
   0x4   :  { %p1822_p1 = scmp.lt.u32.totalorder %s1818_s16, %s2029_s1 }
   0x6   :  { %p1824_p2 = pnand %p1822_p1, %p1819_p0 }
   0x8   :  { %1827 = shalt.err (!%p1824_p2)
}
   0x9   :  { %s1828_s21 = scalar_lea.vmem %s29_s13, 4096  ;;  %p1833_p4 = scmp.lt.s32.totalorder %s29_s13, %s29_s13 }
   0xa   :  { %p1829_p3 = scmp.ne.s32.totalorder %s29_s13, %s1828_s21  ;;  %p1834_p5 = scmp.lt.s32.totalorder %s1828_s21, %s1828_s21 }
   0xc   :  { %p1835_p6 = por %p1834_p5, %p1833_p4 }
   0xe   :  { %p1836_p7 = pnand %p1835_p6, %p1829_p3 }
  0x10   :  { %1839 = shalt.err (!%p1836_p7)
}
  0x11   :  { %s1913_s22 = smov 64   ;;  %s1914_s23 = smov 4  }
  0x12   :  { %34 = dma.hbm_to_vmem [thread:$0]  %s2029_s1, 4096, %s29_s13, [#allocation6], %s1913_s22, %s1913_s22, %s1914_s23  }
  0x13   :  { %s1915_s26 = smov [#allocation2]   ;;  %s1840_s30 = scalar_lea.hbm %s2028_s0, 8192 }
  0x14   :  { %s16_s27 = sshll.u32 %s1915_s26, 4  ;;  %p1841_p8 = scmp.ne.s32.totalorder %s2028_s0, %s1840_s30  ;;  %s17_s27 = int_to_ptr.vmem [resolvable:$true] %s16_s27 }
  0x15   :  { %p1844_p9 = scmp.lt.u32.totalorder %s1840_s30, %s2028_s0 }
  0x17   :  { %p1846_p10 = pnand %p1844_p9, %p1841_p8 }
  0x19   :  { %1849 = shalt.err (!%p1846_p10)
}
  0x1a   :  { %s1850_s8 = scalar_lea.vmem %s17_s27, 8192  ;;  %p1855_p12 = scmp.lt.s32.totalorder %s17_s27, %s17_s27 }
  0x1b   :  { %p1851_p11 = scmp.ne.s32.totalorder %s17_s27, %s1850_s8  ;;  %p1856_p13 = scmp.lt.s32.totalorder %s1850_s8, %s1850_s8 }
  0x1d   :  { %p1857_p0 = por %p1856_p13, %p1855_p12 }
  0x1f   :  { %p1858_p1 = pnand %p1857_p0, %p1851_p11 }
  0x21   :  { %1861 = shalt.err (!%p1858_p1)
}
  0x22   :  { %s1916_s1 = smov 256   ;;  %s1917_s9 = smov 16  }
  0x23   :  { %22 = dma.hbm_to_vmem [thread:$0]  %s2028_s0, 8192, %s17_s27, [#allocation3], %s1916_s1, %s1916_s1, %s1917_s9  }
  0x24   :  { %s1918_s12 = smov [#allocation7]   ;;  %s1862_s16 = scalar_lea.hbm %s2030_s2, 16 }
  0x25   :  { %s41_s13 = sshll.u32 %s1918_s12, 4  ;;  %p1863_p2 = scmp.ne.s32.totalorder %s2030_s2, %s1862_s16  ;;  %s42_s13 = int_to_ptr.vmem [resolvable:$true] %s41_s13 }
  0x26   :  { %p1866_p3 = scmp.lt.u32.totalorder %s1862_s16, %s2030_s2 }
  0x28   :  { %p1868_p4 = pnand %p1866_p3, %p1863_p2 }
  0x2a   :  { %1871 = shalt.err (!%p1868_p4)
}
  0x2b   :  { %s1872_s21 = scalar_lea.vmem %s42_s13, 16  ;;  %s1876_s0 = scalar_lea.vmem %s42_s13, 32 }
  0x2c   :  { %p1873_p5 = scmp.ne.s32.totalorder %s42_s13, %s1872_s21  ;;  %p1877_p6 = scmp.lt.s32.totalorder %s42_s13, %s42_s13 }
  0x2d   :  { %p1878_p7 = scmp.lt.s32.totalorder %s1876_s0, %s1872_s21 }
  0x2f   :  { %p1879_p8 = por %p1878_p7, %p1877_p6 }
  0x31   :  { %p1880_p9 = pnand %p1879_p8, %p1873_p5 }
  0x33   :  { %1883 = shalt.err (!%p1880_p9)
}
  0x34   :  { %44 = dma.hbm_to_vmem [thread:$0]  %s2030_s2, 16, %s42_s13, [#allocation6]  }
  0x35   :  { %1906 = dma.done.wait [#allocation3], 8192  }
  0x36   :  { %1907 = vsyncadd [#allocation3], 4294959104 }
  0x37   :  { %1908 = dma.done.wait [#allocation6], 4112  }
  0x38   :  { %1909 = vsyncadd [#allocation6], 4294963184  ;;  %v1690_v0 = vld [vmem:[#allocation5 + $0x40] sm:$0xff]   ;;  %v1694_v4 = vld [vmem:[#allocation5 + $0x48] sm:$0xff]   ;;  %s1919_s2 = smov [#allocation8]  }
  0x39   :  { %v1691_v1 = vld [vmem:[#allocation5 + $0xc0] sm:$0xff]   ;;  %1458 = vmatprep.subr.bf16.mxu0 %v1690_v0  ;;  %v1695_v5 = vld [vmem:[#allocation5 + $0xc8] sm:$0xff]   ;;  %v1698_v8 = vld [vmem:[#allocation5 + $0x50] sm:$0xff]   ;;  %s1189_s26 = sshll.u32 %s1919_s2, 4  ;;  %s1190_s26 = int_to_ptr.vmem [resolvable:$true] %s1189_s26 }
  0x3a   :  { %v1692_v2 = vld [vmem:[#allocation5] sm:$0xff]   ;;  %1570 = vmatprep.subr.bf16.mxu1 %v1691_v1  ;;  %v1696_v6 = vld [vmem:[#allocation5 + $0x8] sm:$0xff]   ;;  %v1699_v9 = vld [vmem:[#allocation5 + $0xd0] sm:$0xff]   ;;  %s1884_s27 = scalar_lea.vmem %s1190_s26, 2048  ;;  %p1889_p11 = scmp.lt.s32.totalorder %s1190_s26, %s1190_s26 }
  0x3b   :  { %v1693_v3 = vld [vmem:[#allocation5 + $0x80] sm:$0xff]   ;;  %1459 = vmatpush3.bf16.msra.mxu0 %v1692_v2  ;;  %v1697_v7 = vld [vmem:[#allocation5 + $0x88] sm:$0xff]   ;;  %v1700_v10 = vld [vmem:[#allocation5 + $0x10] sm:$0xff]   ;;  %p1885_p10 = scmp.ne.s32.totalorder %s1190_s26, %s1884_s27  ;;  %p1890_p12 = scmp.lt.s32.totalorder %s1884_s27, %s1884_s27 }
  0x3c   :  { %1571 = vmatpush3.bf16.msra.mxu1 %v1693_v3  ;;  %1460 = vmatprep.subr.bf16.mxu0 %v1694_v4  ;;  %v1701_v11 = vld [vmem:[#allocation5 + $0x90] sm:$0xff]   ;;  %v1702_v12 = vld [vmem:[#allocation5 + $0x58] sm:$0xff]   ;;  %v1706_v16 = vld [vmem:[#allocation5 + $0x60] sm:$0xff]  }
  0x3d   :  { %1572 = vmatprep.subr.bf16.mxu1 %v1695_v5  ;;  %v1703_v13 = vld [vmem:[#allocation5 + $0xd8] sm:$0xff]   ;;  %v1707_v17 = vld [vmem:[#allocation5 + $0xe0] sm:$0xff]   ;;  %v1710_v20 = vld [vmem:[#allocation5 + $0x68] sm:$0xff]   ;;  %p1891_p13 = por %p1890_p12, %p1889_p11 }
  0x3e   :  { %v1704_v14 = vld [vmem:[#allocation5 + $0x18] sm:$0xff]   ;;  %v1708_v18 = vld [vmem:[#allocation5 + $0x20] sm:$0xff]   ;;  %v1711_v21 = vld [vmem:[#allocation5 + $0xe8] sm:$0xff]  }
  0x3f   :  { %1461 = vmatpush3.bf16.msra.mxu0 %v1696_v6  ;;  %v1705_v15 = vld [vmem:[#allocation5 + $0x98] sm:$0xff]   ;;  %v1709_v19 = vld [vmem:[#allocation5 + $0xa0] sm:$0xff]   ;;  %v1712_v22 = vld [vmem:[#allocation5 + $0x28] sm:$0xff]   ;;  %p1892_p0 = pnand %p1891_p13, %p1885_p10 }
  0x40   :  { %1573 = vmatpush3.bf16.msra.mxu1 %v1697_v7  ;;  %1462 = vmatprep.subr.bf16.mxu0 %v1698_v8  ;;  %v1713_v23 = vld [vmem:[#allocation5 + $0xa8] sm:$0xff]   ;;  %v1714_v24 = vld [vmem:[#allocation5 + $0x70] sm:$0xff]   ;;  %v1718_v28 = vld [vmem:[#allocation5 + $0x78] sm:$0xff]  }
  0x41   :  { %1574 = vmatprep.subr.bf16.mxu1 %v1699_v9  ;;  %v1715_v25 = vld [vmem:[#allocation5 + $0xf0] sm:$0xff]   ;;  %v1719_v29 = vld [vmem:[#allocation5 + $0xf8] sm:$0xff]  }
  0x42   :  { %v1716_v26 = vld [vmem:[#allocation5 + $0x30] sm:$0xff]   ;;  %v1720_v30 = vld [vmem:[#allocation5 + $0x38] sm:$0xff]  }
  0x43   :  { %1463 = vmatpush3.bf16.msra.mxu0 %v1700_v10  ;;  %v1717_v27 = vld [vmem:[#allocation5 + $0xb0] sm:$0xff]   ;;  %v1721_v31 = vld [vmem:[#allocation5 + $0xb8] sm:$0xff]  }
  0x44   :  { %1575 = vmatpush3.bf16.msra.mxu1 %v1701_v11  ;;  %1464 = vmatprep.subr.bf16.mxu0 %v1702_v12  ;;  %v1722_v32 = vld [vmem:[#allocation2] ss:$16 sps:$4 sm:$0xff]   ;;  %v1724_v33 = vld [vmem:[#allocation2 + $0x4] ss:$16 sps:$4 sm:$0xff]   ;;  %v1725_v34 = vld [vmem:[#allocation2 + $0x8] ss:$16 sps:$4 sm:$0xff]  }
  0x45   :  { %1576 = vmatprep.subr.bf16.mxu1 %v1703_v13  ;;  %v1727_v35 = vld [vmem:[#allocation2 + $0xc] ss:$16 sps:$4 sm:$0xff]   ;;  %734 = vmatprep.mubr.bf16.mxu0 %v1724_v33  ;;  %v1728_v36 = vld [vmem:[#allocation2 + $0x24] ss:$16 sps:$4 sm:$0xff]   ;;  %v1732_v38 = vld [vmem:[#allocation2 + $0x20] ss:$16 sps:$4 sm:$0xff]  }
  0x46   :  { %895 = vmatprep.mubr.bf16.mxu1 %v1727_v35  ;;  %v1730_v37 = vld [vmem:[#allocation2 + $0x2c] ss:$16 sps:$4 sm:$0xff]   ;;  %v1733_v39 = vld [vmem:[#allocation2 + $0x28] ss:$16 sps:$4 sm:$0xff]   ;;  %v1734_v40 = vld [vmem:[#allocation2 + $0x44] ss:$16 sps:$4 sm:$0xff]  }
  0x47   :  { %1465 = vmatpush3.bf16.msra.mxu0 %v1704_v14  ;;  %v1736_v41 = vld [vmem:[#allocation2 + $0x4c] ss:$16 sps:$4 sm:$0xff]   ;;  %v1738_v42 = vld [vmem:[#allocation2 + $0x40] ss:$16 sps:$4 sm:$0xff]   ;;  %v1739_v43 = vld [vmem:[#allocation2 + $0x48] ss:$16 sps:$4 sm:$0xff]  }
  0x48   :  { %1577 = vmatpush3.bf16.msra.mxu1 %v1705_v15  ;;  %1466 = vmatprep.subr.bf16.mxu0 %v1706_v16  ;;  %v1740_v44 = vld [vmem:[#allocation2 + $0x64] ss:$16 sps:$4 sm:$0xff]   ;;  %v1742_v45 = vld [vmem:[#allocation2 + $0x6c] ss:$16 sps:$4 sm:$0xff]   ;;  %v1744_v46 = vld [vmem:[#allocation2 + $0x60] ss:$16 sps:$4 sm:$0xff]  }
  0x49   :  { %1578 = vmatprep.subr.bf16.mxu1 %v1707_v17  ;;  %v1745_v47 = vld [vmem:[#allocation2 + $0x68] ss:$16 sps:$4 sm:$0xff]   ;;  %v1746_v48 = vld [vmem:[#allocation2 + $0x84] ss:$16 sps:$4 sm:$0xff]   ;;  %v1748_v49 = vld [vmem:[#allocation2 + $0x8c] ss:$16 sps:$4 sm:$0xff]  }
  0x4a   :  { %v1750_v50 = vld [vmem:[#allocation2 + $0x80] ss:$16 sps:$4 sm:$0xff]   ;;  %v1751_v51 = vld [vmem:[#allocation2 + $0x88] ss:$16 sps:$4 sm:$0xff]   ;;  %v1752_v52 = vld [vmem:[#allocation2 + $0xa4] ss:$16 sps:$4 sm:$0xff]  }
  0x4b   :  { %1467 = vmatpush3.bf16.msra.mxu0 %v1708_v18  ;;  %v1754_v53 = vld [vmem:[#allocation2 + $0xac] ss:$16 sps:$4 sm:$0xff]   ;;  %v1756_v54 = vld [vmem:[#allocation2 + $0xa0] ss:$16 sps:$4 sm:$0xff]   ;;  %v1757_v55 = vld [vmem:[#allocation2 + $0xa8] ss:$16 sps:$4 sm:$0xff]  }
  0x4c   :  { %1579 = vmatpush3.bf16.msra.mxu1 %v1709_v19  ;;  %1468 = vmatprep.subr.bf16.mxu0 %v1710_v20  ;;  %v1758_v56 = vld [vmem:[#allocation2 + $0xc4] ss:$16 sps:$4 sm:$0xff]   ;;  %v1760_v57 = vld [vmem:[#allocation2 + $0xcc] ss:$16 sps:$4 sm:$0xff]   ;;  %v1762_v58 = vld [vmem:[#allocation2 + $0xc0] ss:$16 sps:$4 sm:$0xff]  }
  0x4d   :  { %1580 = vmatprep.subr.bf16.mxu1 %v1711_v21  ;;  %v1763_v59 = vld [vmem:[#allocation2 + $0xc8] ss:$16 sps:$4 sm:$0xff]   ;;  %v1764_v60 = vld [vmem:[#allocation2 + $0xe4] ss:$16 sps:$4 sm:$0xff]   ;;  %v1766_v61 = vld [vmem:[#allocation2 + $0xec] ss:$16 sps:$4 sm:$0xff]  }
  0x4e   :  { %v1768_v62 = vld [vmem:[#allocation2 + $0xe0] ss:$16 sps:$4 sm:$0xff]   ;;  %v1769_v63 = vld [vmem:[#allocation2 + $0xe8] ss:$16 sps:$4 sm:$0xff]   ;;  %v1770_v0 = vld [vmem:[#allocation2 + $0x104] ss:$16 sps:$4 sm:$0xff]  }
  0x4f   :  { %1469 = vmatpush3.bf16.msra.mxu0 %v1712_v22  ;;  %v1772_v1 = vld [vmem:[#allocation2 + $0x10c] ss:$16 sps:$4 sm:$0xff]   ;;  %v1774_v2 = vld [vmem:[#allocation2 + $0x100] ss:$16 sps:$4 sm:$0xff]   ;;  %v1775_v3 = vld [vmem:[#allocation2 + $0x108] ss:$16 sps:$4 sm:$0xff]  }
  0x50   :  { %1581 = vmatpush3.bf16.msra.mxu1 %v1713_v23  ;;  %1470 = vmatprep.subr.bf16.mxu0 %v1714_v24  ;;  %v1776_v4 = vld [vmem:[#allocation2 + $0x124] ss:$16 sps:$4 sm:$0xff]   ;;  %v1778_v5 = vld [vmem:[#allocation2 + $0x12c] ss:$16 sps:$4 sm:$0xff]   ;;  %v1780_v6 = vld [vmem:[#allocation2 + $0x120] ss:$16 sps:$4 sm:$0xff]  }
  0x51   :  { %1582 = vmatprep.subr.bf16.mxu1 %v1715_v25  ;;  %v1781_v7 = vld [vmem:[#allocation2 + $0x128] ss:$16 sps:$4 sm:$0xff]   ;;  %v1782_v8 = vld [vmem:[#allocation2 + $0x144] ss:$16 sps:$4 sm:$0xff]   ;;  %v1784_v9 = vld [vmem:[#allocation2 + $0x14c] ss:$16 sps:$4 sm:$0xff]  }
  0x52   :  { %v1786_v10 = vld [vmem:[#allocation2 + $0x140] ss:$16 sps:$4 sm:$0xff]   ;;  %v1787_v11 = vld [vmem:[#allocation2 + $0x148] ss:$16 sps:$4 sm:$0xff]   ;;  %v1788_v12 = vld [vmem:[#allocation2 + $0x164] ss:$16 sps:$4 sm:$0xff]  }
  0x53   :  { %1471 = vmatpush3.bf16.msra.mxu0 %v1716_v26  ;;  %v1790_v13 = vld [vmem:[#allocation2 + $0x16c] ss:$16 sps:$4 sm:$0xff]   ;;  %v1792_v14 = vld [vmem:[#allocation2 + $0x160] ss:$16 sps:$4 sm:$0xff]   ;;  %v1793_v15 = vld [vmem:[#allocation2 + $0x168] ss:$16 sps:$4 sm:$0xff]  }
  0x54   :  { %1583 = vmatpush3.bf16.msra.mxu1 %v1717_v27  ;;  %1472 = vmatprep.subr.bf16.mxu0 %v1718_v28  ;;  %v1794_v16 = vld [vmem:[#allocation2 + $0x184] ss:$16 sps:$4 sm:$0xff]   ;;  %v1796_v17 = vld [vmem:[#allocation2 + $0x18c] ss:$16 sps:$4 sm:$0xff]   ;;  %v1798_v18 = vld [vmem:[#allocation2 + $0x180] ss:$16 sps:$4 sm:$0xff]  }
  0x55   :  { %1584 = vmatprep.subr.bf16.mxu1 %v1719_v29  ;;  %v1799_v19 = vld [vmem:[#allocation2 + $0x188] ss:$16 sps:$4 sm:$0xff]   ;;  %v1800_v20 = vld [vmem:[#allocation2 + $0x1a4] ss:$16 sps:$4 sm:$0xff]   ;;  %v1802_v21 = vld [vmem:[#allocation2 + $0x1ac] ss:$16 sps:$4 sm:$0xff]  }
  0x56   :  { %v1804_v22 = vld [vmem:[#allocation2 + $0x1a0] ss:$16 sps:$4 sm:$0xff]   ;;  %v1805_v23 = vld [vmem:[#allocation2 + $0x1a8] ss:$16 sps:$4 sm:$0xff]   ;;  %v1806_v24 = vld [vmem:[#allocation2 + $0x1c4] ss:$16 sps:$4 sm:$0xff]  }
  0x57   :  { %1473 = vmatpush3.bf16.msra.mxu0 %v1720_v30  ;;  %v1808_v25 = vld [vmem:[#allocation2 + $0x1cc] ss:$16 sps:$4 sm:$0xff]   ;;  %v1810_v26 = vld [vmem:[#allocation2 + $0x1c0] ss:$16 sps:$4 sm:$0xff]   ;;  %v1811_v27 = vld [vmem:[#allocation2 + $0x1c8] ss:$16 sps:$4 sm:$0xff]  }
  0x58   :  { %1585 = vmatpush3.bf16.msra.mxu1 %v1721_v31  ;;  %v1812_v28 = vld [vmem:[#allocation2 + $0x1e4] ss:$16 sps:$4 sm:$0xff]   ;;  %v1814_v29 = vld [vmem:[#allocation2 + $0x1ec] ss:$16 sps:$4 sm:$0xff]   ;;  %v1816_v30 = vld [vmem:[#allocation2 + $0x1e0] ss:$16 sps:$4 sm:$0xff]  }
  0x59   :  { %v1817_v31 = vld [vmem:[#allocation2 + $0x1e8] ss:$16 sps:$4 sm:$0xff]  }
  0x5a   :  { %735 = vmatmul.mubr.bf16.vlgmr.msra.gmra.mrb[0].mxu0 %v1722_v32 }
  0x5b   :  { %896 = vmatmul.mubr.bf16.vlgmr.msra.gmra.mrb[0].mxu1 %v1725_v34  ;;  %742 = vmatprep.mubr.bf16.mxu0 %v1728_v36  ;;  %v1979_v34 = vld [vmem:[#allocation7] ss:$0 sm:$0xff] }
  0x5c   :  { %903 = vmatprep.mubr.bf16.mxu1 %v1730_v37 }
  0x62   :  { %743 = vmatmul.mubr.bf16.gmra.mrb[4].mxu0 %v1732_v38 }
  0x63   :  { %904 = vmatmul.mubr.bf16.gmra.mrb[4].mxu1 %v1733_v39  ;;  %750 = vmatprep.mubr.bf16.mxu0 %v1734_v40 }
  0x64   :  { %911 = vmatprep.mubr.bf16.mxu1 %v1736_v41 }
  0x6a   :  { %751 = vmatmul.mubr.bf16.gmra.mrb[8].mxu0 %v1738_v42 }
  0x6b   :  { %912 = vmatmul.mubr.bf16.gmra.mrb[8].mxu1 %v1739_v43  ;;  %758 = vmatprep.mubr.bf16.mxu0 %v1740_v44 }
  0x6c   :  { %919 = vmatprep.mubr.bf16.mxu1 %v1742_v45 }
  0x72   :  { %759 = vmatmul.mubr.bf16.gmra.mrb[12].mxu0 %v1744_v46 }
  0x73   :  { %920 = vmatmul.mubr.bf16.gmra.mrb[12].mxu1 %v1745_v47  ;;  %766 = vmatprep.mubr.bf16.mxu0 %v1746_v48 }
  0x74   :  { %927 = vmatprep.mubr.bf16.mxu1 %v1748_v49 }
  0x7a   :  { %767 = vmatmul.mubr.bf16.gmra.mrb[16].mxu0 %v1750_v50 }
  0x7b   :  { %928 = vmatmul.mubr.bf16.gmra.mrb[16].mxu1 %v1751_v51  ;;  %774 = vmatprep.mubr.bf16.mxu0 %v1752_v52 }
  0x7c   :  { %935 = vmatprep.mubr.bf16.mxu1 %v1754_v53 }
  0x82   :  { %775 = vmatmul.mubr.bf16.gmra.mrb[20].mxu0 %v1756_v54 }
  0x83   :  { %936 = vmatmul.mubr.bf16.gmra.mrb[20].mxu1 %v1757_v55  ;;  %782 = vmatprep.mubr.bf16.mxu0 %v1758_v56 }
  0x84   :  { %943 = vmatprep.mubr.bf16.mxu1 %v1760_v57 }
  0x8a   :  { %783 = vmatmul.mubr.bf16.gmra.mrb[24].mxu0 %v1762_v58 }
  0x8b   :  { %944 = vmatmul.mubr.bf16.gmra.mrb[24].mxu1 %v1763_v59  ;;  %790 = vmatprep.mubr.bf16.mxu0 %v1764_v60 }
  0x8c   :  { %951 = vmatprep.mubr.bf16.mxu1 %v1766_v61 }
  0x92   :  { %791 = vmatmul.mubr.bf16.gmra.mrb[28].mxu0 %v1768_v62 }
  0x93   :  { %952 = vmatmul.mubr.bf16.gmra.mrb[28].mxu1 %v1769_v63  ;;  %798 = vmatprep.mubr.bf16.mxu0 %v1770_v0 }
  0x94   :  { %959 = vmatprep.mubr.bf16.mxu1 %v1772_v1 }
  0x9a   :  { %799 = vmatmul.mubr.bf16.gmra.mrb[32].mxu0 %v1774_v2 }
  0x9b   :  { %960 = vmatmul.mubr.bf16.gmra.mrb[32].mxu1 %v1775_v3  ;;  %806 = vmatprep.mubr.bf16.mxu0 %v1776_v4 }
  0x9c   :  { %967 = vmatprep.mubr.bf16.mxu1 %v1778_v5 }
  0xa2   :  { %807 = vmatmul.mubr.bf16.gmra.mrb[36].mxu0 %v1780_v6 }
  0xa3   :  { %968 = vmatmul.mubr.bf16.gmra.mrb[36].mxu1 %v1781_v7  ;;  %814 = vmatprep.mubr.bf16.mxu0 %v1782_v8 }
  0xa4   :  { %975 = vmatprep.mubr.bf16.mxu1 %v1784_v9 }
  0xaa   :  { %815 = vmatmul.mubr.bf16.gmra.mrb[40].mxu0 %v1786_v10 }
  0xab   :  { %976 = vmatmul.mubr.bf16.gmra.mrb[40].mxu1 %v1787_v11  ;;  %822 = vmatprep.mubr.bf16.mxu0 %v1788_v12 }
  0xac   :  { %983 = vmatprep.mubr.bf16.mxu1 %v1790_v13 }
  0xb2   :  { %823 = vmatmul.mubr.bf16.gmra.mrb[44].mxu0 %v1792_v14 }
  0xb3   :  { %984 = vmatmul.mubr.bf16.gmra.mrb[44].mxu1 %v1793_v15  ;;  %830 = vmatprep.mubr.bf16.mxu0 %v1794_v16 }
  0xb4   :  { %991 = vmatprep.mubr.bf16.mxu1 %v1796_v17 }
  0xba   :  { %831 = vmatmul.mubr.bf16.gmra.mrb[48].mxu0 %v1798_v18 }
  0xbb   :  { %992 = vmatmul.mubr.bf16.gmra.mrb[48].mxu1 %v1799_v19  ;;  %838 = vmatprep.mubr.bf16.mxu0 %v1800_v20 }
  0xbc   :  { %999 = vmatprep.mubr.bf16.mxu1 %v1802_v21 }
  0xc2   :  { %839 = vmatmul.mubr.bf16.gmra.mrb[52].mxu0 %v1804_v22 }
  0xc3   :  { %1000 = vmatmul.mubr.bf16.gmra.mrb[52].mxu1 %v1805_v23  ;;  %846 = vmatprep.mubr.bf16.mxu0 %v1806_v24 }
  0xc4   :  { %1007 = vmatprep.mubr.bf16.mxu1 %v1808_v25 }
  0xca   :  { %847 = vmatmul.mubr.bf16.gmra.mrb[56].mxu0 %v1810_v26 }
  0xcb   :  { %1008 = vmatmul.mubr.bf16.gmra.mrb[56].mxu1 %v1811_v27  ;;  %854 = vmatprep.mubr.bf16.mxu0 %v1812_v28 }
  0xcc   :  { %1015 = vmatprep.mubr.bf16.mxu1 %v1814_v29 }
  0xd2   :  { %855 = vmatmul.mubr.bf16.gmra.mrb[60].mxu0 %v1816_v30 }
  0xd3   :  { %1016 = vmatmul.mubr.bf16.gmra.mrb[60].mxu1 %v1817_v31 }
 0x12d   :  { %v1474_v32 = vpop.f32.mrb[0].mxu0 }
 0x12e   :  { %v1586_v33 = vpop.f32.mrb[0].mxu1  ;;  %v1475_v35 = vpop.f32.mrb[1].mxu0 }
 0x12f   :  { %v1476_v36 = vadd.f32 %v1475_v35, %v1474_v32  ;;  %v1587_v37 = vpop.f32.mrb[1].mxu1  ;;  %v1477_v38 = vpop.f32.mrb[2].mxu0 }
 0x130   :  { %v1588_v39 = vadd.f32 %v1587_v37, %v1586_v33  ;;  %v1589_v40 = vpop.f32.mrb[2].mxu1  ;;  %v1478_v41 = vpop.f32.mrb[3].mxu0 }
 0x131   :  { %v737_v42 = vadd.f32 %v1476_v36, %v1979_v34  ;;  %v1479_v43 = vadd.f32 %v1478_v41, %v1477_v38  ;;  %v1590_v44 = vpop.f32.mrb[3].mxu1 }
 0x132   :  { %v1591_v45 = vadd.f32 %v1590_v44, %v1589_v40 }
 0x133   :  { %v898_v46 = vadd.f32 %v1588_v39, %v737_v42  ;;  %v740_v47 = vadd.f32 %v1479_v43, %v1979_v34 }
 0x135   :  { %v901_v48 = vadd.f32 %v1591_v45, %v740_v47  ;;  %v1480_v49 = vpop.f32.mrb[4].mxu0 }
 0x136   :  { %v1592_v50 = vpop.f32.mrb[4].mxu1  ;;  %v1481_v51 = vpop.f32.mrb[5].mxu0 }
 0x137   :  { %v1366_v52 = vpack.c.bf16 %v901_v48, %v898_v46  ;;  %v1482_v53 = vadd.f32 %v1481_v51, %v1480_v49  ;;  %v1593_v54 = vpop.f32.mrb[5].mxu1  ;;  %v1483_v55 = vpop.f32.mrb[6].mxu0 }
 0x138   :  { %v1594_v56 = vadd.f32 %v1593_v54, %v1592_v50  ;;  %v1595_v57 = vpop.f32.mrb[6].mxu1  ;;  %v1484_v58 = vpop.f32.mrb[7].mxu0 }
 0x139   :  { %1367 = vst [vmem:[#allocation8] sm:$0xff] %v1366_v52   ;;  %v745_v59 = vadd.f32 %v1482_v53, %v1979_v34  ;;  %v1485_v60 = vadd.f32 %v1484_v58, %v1483_v55  ;;  %v1596_v61 = vpop.f32.mrb[7].mxu1 }
 0x13a   :  { %v1597_v62 = vadd.f32 %v1596_v61, %v1595_v57 }
 0x13b   :  { %v906_v63 = vadd.f32 %v1594_v56, %v745_v59  ;;  %v748_v0 = vadd.f32 %v1485_v60, %v1979_v34 }
 0x13d   :  { %v909_v1 = vadd.f32 %v1597_v62, %v748_v0  ;;  %v1486_v2 = vpop.f32.mrb[8].mxu0 }
 0x13e   :  { %v1598_v3 = vpop.f32.mrb[8].mxu1  ;;  %v1487_v4 = vpop.f32.mrb[9].mxu0 }
 0x13f   :  { %v1371_v5 = vpack.c.bf16 %v909_v1, %v906_v63  ;;  %v1488_v6 = vadd.f32 %v1487_v4, %v1486_v2  ;;  %v1599_v7 = vpop.f32.mrb[9].mxu1  ;;  %v1489_v8 = vpop.f32.mrb[10].mxu0 }
 0x140   :  { %v1600_v9 = vadd.f32 %v1599_v7, %v1598_v3  ;;  %v1601_v10 = vpop.f32.mrb[10].mxu1  ;;  %v1490_v11 = vpop.f32.mrb[11].mxu0 }
 0x141   :  { %1443 = vst [vmem:[#allocation8 + $0x8] sm:$0xff] %v1371_v5   ;;  %v753_v12 = vadd.f32 %v1488_v6, %v1979_v34  ;;  %v1491_v13 = vadd.f32 %v1490_v11, %v1489_v8  ;;  %v1602_v14 = vpop.f32.mrb[11].mxu1 }
 0x142   :  { %v1603_v15 = vadd.f32 %v1602_v14, %v1601_v10 }
 0x143   :  { %v914_v16 = vadd.f32 %v1600_v9, %v753_v12  ;;  %v756_v17 = vadd.f32 %v1491_v13, %v1979_v34 }
 0x145   :  { %v917_v18 = vadd.f32 %v1603_v15, %v756_v17  ;;  %v1492_v19 = vpop.f32.mrb[12].mxu0 }
 0x146   :  { %v1604_v20 = vpop.f32.mrb[12].mxu1  ;;  %v1493_v21 = vpop.f32.mrb[13].mxu0 }
 0x147   :  { %v1376_v22 = vpack.c.bf16 %v917_v18, %v914_v16  ;;  %v1494_v23 = vadd.f32 %v1493_v21, %v1492_v19  ;;  %v1605_v24 = vpop.f32.mrb[13].mxu1  ;;  %v1495_v25 = vpop.f32.mrb[14].mxu0 }
 0x148   :  { %v1606_v26 = vadd.f32 %v1605_v24, %v1604_v20  ;;  %v1607_v27 = vpop.f32.mrb[14].mxu1  ;;  %v1496_v28 = vpop.f32.mrb[15].mxu0 }
 0x149   :  { %1444 = vst [vmem:[#allocation8 + $0x10] sm:$0xff] %v1376_v22   ;;  %v761_v29 = vadd.f32 %v1494_v23, %v1979_v34  ;;  %v1497_v30 = vadd.f32 %v1496_v28, %v1495_v25  ;;  %v1608_v31 = vpop.f32.mrb[15].mxu1 }
 0x14a   :  { %v1609_v32 = vadd.f32 %v1608_v31, %v1607_v27 }
 0x14b   :  { %v922_v33 = vadd.f32 %v1606_v26, %v761_v29  ;;  %v764_v35 = vadd.f32 %v1497_v30, %v1979_v34 }
 0x14d   :  { %v925_v36 = vadd.f32 %v1609_v32, %v764_v35  ;;  %v1498_v37 = vpop.f32.mrb[16].mxu0 }
 0x14e   :  { %v1610_v38 = vpop.f32.mrb[16].mxu1  ;;  %v1499_v39 = vpop.f32.mrb[17].mxu0 }
 0x14f   :  { %v1381_v40 = vpack.c.bf16 %v925_v36, %v922_v33  ;;  %v1500_v41 = vadd.f32 %v1499_v39, %v1498_v37  ;;  %v1611_v42 = vpop.f32.mrb[17].mxu1  ;;  %v1501_v43 = vpop.f32.mrb[18].mxu0 }
 0x150   :  { %v1612_v44 = vadd.f32 %v1611_v42, %v1610_v38  ;;  %v1613_v45 = vpop.f32.mrb[18].mxu1  ;;  %v1502_v46 = vpop.f32.mrb[19].mxu0 }
 0x151   :  { %1445 = vst [vmem:[#allocation8 + $0x18] sm:$0xff] %v1381_v40   ;;  %v769_v47 = vadd.f32 %v1500_v41, %v1979_v34  ;;  %v1503_v48 = vadd.f32 %v1502_v46, %v1501_v43  ;;  %v1614_v49 = vpop.f32.mrb[19].mxu1 }
 0x152   :  { %v1615_v50 = vadd.f32 %v1614_v49, %v1613_v45 }
 0x153   :  { %v930_v51 = vadd.f32 %v1612_v44, %v769_v47  ;;  %v772_v52 = vadd.f32 %v1503_v48, %v1979_v34 }
 0x155   :  { %v933_v53 = vadd.f32 %v1615_v50, %v772_v52  ;;  %v1504_v54 = vpop.f32.mrb[20].mxu0 }
 0x156   :  { %v1616_v55 = vpop.f32.mrb[20].mxu1  ;;  %v1505_v56 = vpop.f32.mrb[21].mxu0 }
 0x157   :  { %v1386_v57 = vpack.c.bf16 %v933_v53, %v930_v51  ;;  %v1506_v58 = vadd.f32 %v1505_v56, %v1504_v54  ;;  %v1617_v59 = vpop.f32.mrb[21].mxu1  ;;  %v1507_v60 = vpop.f32.mrb[22].mxu0 }
 0x158   :  { %v1618_v61 = vadd.f32 %v1617_v59, %v1616_v55  ;;  %v1619_v62 = vpop.f32.mrb[22].mxu1  ;;  %v1508_v63 = vpop.f32.mrb[23].mxu0 }
 0x159   :  { %1446 = vst [vmem:[#allocation8 + $0x20] sm:$0xff] %v1386_v57   ;;  %v777_v0 = vadd.f32 %v1506_v58, %v1979_v34  ;;  %v1509_v1 = vadd.f32 %v1508_v63, %v1507_v60  ;;  %v1620_v2 = vpop.f32.mrb[23].mxu1 }
 0x15a   :  { %v1621_v3 = vadd.f32 %v1620_v2, %v1619_v62 }
 0x15b   :  { %v938_v4 = vadd.f32 %v1618_v61, %v777_v0  ;;  %v780_v5 = vadd.f32 %v1509_v1, %v1979_v34 }
 0x15d   :  { %v941_v6 = vadd.f32 %v1621_v3, %v780_v5  ;;  %v1510_v7 = vpop.f32.mrb[24].mxu0 }
 0x15e   :  { %v1622_v8 = vpop.f32.mrb[24].mxu1  ;;  %v1511_v9 = vpop.f32.mrb[25].mxu0 }
 0x15f   :  { %v1391_v10 = vpack.c.bf16 %v941_v6, %v938_v4  ;;  %v1512_v11 = vadd.f32 %v1511_v9, %v1510_v7  ;;  %v1623_v12 = vpop.f32.mrb[25].mxu1  ;;  %v1513_v13 = vpop.f32.mrb[26].mxu0 }
 0x160   :  { %v1624_v14 = vadd.f32 %v1623_v12, %v1622_v8  ;;  %v1625_v15 = vpop.f32.mrb[26].mxu1  ;;  %v1514_v16 = vpop.f32.mrb[27].mxu0 }
 0x161   :  { %1447 = vst [vmem:[#allocation8 + $0x28] sm:$0xff] %v1391_v10   ;;  %v785_v17 = vadd.f32 %v1512_v11, %v1979_v34  ;;  %v1515_v18 = vadd.f32 %v1514_v16, %v1513_v13  ;;  %v1626_v19 = vpop.f32.mrb[27].mxu1 }
 0x162   :  { %v1627_v20 = vadd.f32 %v1626_v19, %v1625_v15 }
 0x163   :  { %v946_v21 = vadd.f32 %v1624_v14, %v785_v17  ;;  %v788_v22 = vadd.f32 %v1515_v18, %v1979_v34 }
 0x165   :  { %v949_v23 = vadd.f32 %v1627_v20, %v788_v22  ;;  %v1516_v24 = vpop.f32.mrb[28].mxu0 }
 0x166   :  { %v1628_v25 = vpop.f32.mrb[28].mxu1  ;;  %v1517_v26 = vpop.f32.mrb[29].mxu0 }
 0x167   :  { %v1396_v27 = vpack.c.bf16 %v949_v23, %v946_v21  ;;  %v1518_v28 = vadd.f32 %v1517_v26, %v1516_v24  ;;  %v1629_v29 = vpop.f32.mrb[29].mxu1  ;;  %v1519_v30 = vpop.f32.mrb[30].mxu0 }
 0x168   :  { %v1630_v31 = vadd.f32 %v1629_v29, %v1628_v25  ;;  %v1631_v32 = vpop.f32.mrb[30].mxu1  ;;  %v1520_v33 = vpop.f32.mrb[31].mxu0 }
 0x169   :  { %1448 = vst [vmem:[#allocation8 + $0x30] sm:$0xff] %v1396_v27   ;;  %v793_v35 = vadd.f32 %v1518_v28, %v1979_v34  ;;  %v1521_v36 = vadd.f32 %v1520_v33, %v1519_v30  ;;  %v1632_v37 = vpop.f32.mrb[31].mxu1 }
 0x16a   :  { %v1633_v38 = vadd.f32 %v1632_v37, %v1631_v32 }
 0x16b   :  { %v954_v39 = vadd.f32 %v1630_v31, %v793_v35  ;;  %v796_v40 = vadd.f32 %v1521_v36, %v1979_v34 }
 0x16d   :  { %v957_v41 = vadd.f32 %v1633_v38, %v796_v40  ;;  %v1522_v42 = vpop.f32.mrb[32].mxu0 }
 0x16e   :  { %v1634_v43 = vpop.f32.mrb[32].mxu1  ;;  %v1523_v44 = vpop.f32.mrb[33].mxu0 }
 0x16f   :  { %v1401_v45 = vpack.c.bf16 %v957_v41, %v954_v39  ;;  %v1524_v46 = vadd.f32 %v1523_v44, %v1522_v42  ;;  %v1635_v47 = vpop.f32.mrb[33].mxu1  ;;  %v1525_v48 = vpop.f32.mrb[34].mxu0 }
 0x170   :  { %v1636_v49 = vadd.f32 %v1635_v47, %v1634_v43  ;;  %v1637_v50 = vpop.f32.mrb[34].mxu1  ;;  %v1526_v51 = vpop.f32.mrb[35].mxu0 }
 0x171   :  { %1449 = vst [vmem:[#allocation8 + $0x38] sm:$0xff] %v1401_v45   ;;  %v801_v52 = vadd.f32 %v1524_v46, %v1979_v34  ;;  %v1527_v53 = vadd.f32 %v1526_v51, %v1525_v48  ;;  %v1638_v54 = vpop.f32.mrb[35].mxu1 }
 0x172   :  { %v1639_v55 = vadd.f32 %v1638_v54, %v1637_v50 }
 0x173   :  { %v962_v56 = vadd.f32 %v1636_v49, %v801_v52  ;;  %v804_v57 = vadd.f32 %v1527_v53, %v1979_v34 }
 0x175   :  { %v965_v58 = vadd.f32 %v1639_v55, %v804_v57  ;;  %v1528_v59 = vpop.f32.mrb[36].mxu0 }
 0x176   :  { %v1640_v60 = vpop.f32.mrb[36].mxu1  ;;  %v1529_v61 = vpop.f32.mrb[37].mxu0 }
 0x177   :  { %v1406_v62 = vpack.c.bf16 %v965_v58, %v962_v56  ;;  %v1530_v63 = vadd.f32 %v1529_v61, %v1528_v59  ;;  %v1641_v0 = vpop.f32.mrb[37].mxu1  ;;  %v1531_v1 = vpop.f32.mrb[38].mxu0 }
 0x178   :  { %v1642_v2 = vadd.f32 %v1641_v0, %v1640_v60  ;;  %v1643_v3 = vpop.f32.mrb[38].mxu1  ;;  %v1532_v4 = vpop.f32.mrb[39].mxu0 }
 0x179   :  { %1450 = vst [vmem:[#allocation8 + $0x40] sm:$0xff] %v1406_v62   ;;  %v809_v5 = vadd.f32 %v1530_v63, %v1979_v34  ;;  %v1533_v6 = vadd.f32 %v1532_v4, %v1531_v1  ;;  %v1644_v7 = vpop.f32.mrb[39].mxu1 }
 0x17a   :  { %v1645_v8 = vadd.f32 %v1644_v7, %v1643_v3 }
 0x17b   :  { %v970_v9 = vadd.f32 %v1642_v2, %v809_v5  ;;  %v812_v10 = vadd.f32 %v1533_v6, %v1979_v34 }
 0x17d   :  { %v973_v11 = vadd.f32 %v1645_v8, %v812_v10  ;;  %v1534_v12 = vpop.f32.mrb[40].mxu0 }
 0x17e   :  { %v1646_v13 = vpop.f32.mrb[40].mxu1  ;;  %v1535_v14 = vpop.f32.mrb[41].mxu0 }
 0x17f   :  { %v1411_v15 = vpack.c.bf16 %v973_v11, %v970_v9  ;;  %v1536_v16 = vadd.f32 %v1535_v14, %v1534_v12  ;;  %v1647_v17 = vpop.f32.mrb[41].mxu1  ;;  %v1537_v18 = vpop.f32.mrb[42].mxu0 }
 0x180   :  { %v1648_v19 = vadd.f32 %v1647_v17, %v1646_v13  ;;  %v1649_v20 = vpop.f32.mrb[42].mxu1  ;;  %v1538_v21 = vpop.f32.mrb[43].mxu0 }
 0x181   :  { %1451 = vst [vmem:[#allocation8 + $0x48] sm:$0xff] %v1411_v15   ;;  %v817_v22 = vadd.f32 %v1536_v16, %v1979_v34  ;;  %v1539_v23 = vadd.f32 %v1538_v21, %v1537_v18  ;;  %v1650_v24 = vpop.f32.mrb[43].mxu1 }
 0x182   :  { %v1651_v25 = vadd.f32 %v1650_v24, %v1649_v20 }
 0x183   :  { %v978_v26 = vadd.f32 %v1648_v19, %v817_v22  ;;  %v820_v27 = vadd.f32 %v1539_v23, %v1979_v34 }
 0x185   :  { %v981_v28 = vadd.f32 %v1651_v25, %v820_v27  ;;  %v1540_v29 = vpop.f32.mrb[44].mxu0 }
 0x186   :  { %v1652_v30 = vpop.f32.mrb[44].mxu1  ;;  %v1541_v31 = vpop.f32.mrb[45].mxu0 }
 0x187   :  { %v1416_v32 = vpack.c.bf16 %v981_v28, %v978_v26  ;;  %v1542_v33 = vadd.f32 %v1541_v31, %v1540_v29  ;;  %v1653_v35 = vpop.f32.mrb[45].mxu1  ;;  %v1543_v36 = vpop.f32.mrb[46].mxu0 }
 0x188   :  { %v1654_v37 = vadd.f32 %v1653_v35, %v1652_v30  ;;  %v1655_v38 = vpop.f32.mrb[46].mxu1  ;;  %v1544_v39 = vpop.f32.mrb[47].mxu0 }
 0x189   :  { %1452 = vst [vmem:[#allocation8 + $0x50] sm:$0xff] %v1416_v32   ;;  %v825_v40 = vadd.f32 %v1542_v33, %v1979_v34  ;;  %v1545_v41 = vadd.f32 %v1544_v39, %v1543_v36  ;;  %v1656_v42 = vpop.f32.mrb[47].mxu1 }
 0x18a   :  { %v1657_v43 = vadd.f32 %v1656_v42, %v1655_v38 }
 0x18b   :  { %v986_v44 = vadd.f32 %v1654_v37, %v825_v40  ;;  %v828_v45 = vadd.f32 %v1545_v41, %v1979_v34 }
 0x18d   :  { %v989_v46 = vadd.f32 %v1657_v43, %v828_v45  ;;  %v1546_v47 = vpop.f32.mrb[48].mxu0 }
 0x18e   :  { %v1658_v48 = vpop.f32.mrb[48].mxu1  ;;  %v1547_v49 = vpop.f32.mrb[49].mxu0 }
 0x18f   :  { %v1421_v50 = vpack.c.bf16 %v989_v46, %v986_v44  ;;  %v1548_v51 = vadd.f32 %v1547_v49, %v1546_v47  ;;  %v1659_v52 = vpop.f32.mrb[49].mxu1  ;;  %v1549_v53 = vpop.f32.mrb[50].mxu0 }
 0x190   :  { %v1660_v54 = vadd.f32 %v1659_v52, %v1658_v48  ;;  %v1661_v55 = vpop.f32.mrb[50].mxu1  ;;  %v1550_v56 = vpop.f32.mrb[51].mxu0 }
 0x191   :  { %1453 = vst [vmem:[#allocation8 + $0x58] sm:$0xff] %v1421_v50   ;;  %v833_v57 = vadd.f32 %v1548_v51, %v1979_v34  ;;  %v1551_v58 = vadd.f32 %v1550_v56, %v1549_v53  ;;  %v1662_v59 = vpop.f32.mrb[51].mxu1 }
 0x192   :  { %v1663_v60 = vadd.f32 %v1662_v59, %v1661_v55 }
 0x193   :  { %v994_v61 = vadd.f32 %v1660_v54, %v833_v57  ;;  %v836_v62 = vadd.f32 %v1551_v58, %v1979_v34 }
 0x195   :  { %v997_v63 = vadd.f32 %v1663_v60, %v836_v62  ;;  %v1552_v0 = vpop.f32.mrb[52].mxu0 }
 0x196   :  { %v1664_v1 = vpop.f32.mrb[52].mxu1  ;;  %v1553_v2 = vpop.f32.mrb[53].mxu0 }
 0x197   :  { %v1426_v3 = vpack.c.bf16 %v997_v63, %v994_v61  ;;  %v1554_v4 = vadd.f32 %v1553_v2, %v1552_v0  ;;  %v1665_v5 = vpop.f32.mrb[53].mxu1  ;;  %v1555_v6 = vpop.f32.mrb[54].mxu0 }
 0x198   :  { %v1666_v7 = vadd.f32 %v1665_v5, %v1664_v1  ;;  %v1667_v8 = vpop.f32.mrb[54].mxu1  ;;  %v1556_v9 = vpop.f32.mrb[55].mxu0 }
 0x199   :  { %1454 = vst [vmem:[#allocation8 + $0x60] sm:$0xff] %v1426_v3   ;;  %v841_v10 = vadd.f32 %v1554_v4, %v1979_v34  ;;  %v1557_v11 = vadd.f32 %v1556_v9, %v1555_v6  ;;  %v1668_v12 = vpop.f32.mrb[55].mxu1 }
 0x19a   :  { %v1669_v13 = vadd.f32 %v1668_v12, %v1667_v8 }
 0x19b   :  { %v1002_v14 = vadd.f32 %v1666_v7, %v841_v10  ;;  %v844_v15 = vadd.f32 %v1557_v11, %v1979_v34 }
 0x19d   :  { %v1005_v16 = vadd.f32 %v1669_v13, %v844_v15  ;;  %v1558_v17 = vpop.f32.mrb[56].mxu0 }
 0x19e   :  { %v1670_v18 = vpop.f32.mrb[56].mxu1  ;;  %v1559_v19 = vpop.f32.mrb[57].mxu0 }
 0x19f   :  { %v1431_v20 = vpack.c.bf16 %v1005_v16, %v1002_v14  ;;  %v1560_v21 = vadd.f32 %v1559_v19, %v1558_v17  ;;  %v1671_v22 = vpop.f32.mrb[57].mxu1  ;;  %v1561_v23 = vpop.f32.mrb[58].mxu0 }
 0x1a0   :  { %v1672_v24 = vadd.f32 %v1671_v22, %v1670_v18  ;;  %v1673_v25 = vpop.f32.mrb[58].mxu1  ;;  %v1562_v26 = vpop.f32.mrb[59].mxu0 }
 0x1a1   :  { %1455 = vst [vmem:[#allocation8 + $0x68] sm:$0xff] %v1431_v20   ;;  %v849_v27 = vadd.f32 %v1560_v21, %v1979_v34  ;;  %v1563_v28 = vadd.f32 %v1562_v26, %v1561_v23  ;;  %v1674_v29 = vpop.f32.mrb[59].mxu1 }
 0x1a2   :  { %v1675_v30 = vadd.f32 %v1674_v29, %v1673_v25 }
 0x1a3   :  { %v1010_v31 = vadd.f32 %v1672_v24, %v849_v27  ;;  %v852_v32 = vadd.f32 %v1563_v28, %v1979_v34 }
 0x1a5   :  { %v1013_v33 = vadd.f32 %v1675_v30, %v852_v32  ;;  %v1564_v35 = vpop.f32.mrb[60].mxu0 }
 0x1a6   :  { %v1676_v36 = vpop.f32.mrb[60].mxu1  ;;  %v1565_v37 = vpop.f32.mrb[61].mxu0 }
 0x1a7   :  { %v1436_v38 = vpack.c.bf16 %v1013_v33, %v1010_v31  ;;  %v1566_v39 = vadd.f32 %v1565_v37, %v1564_v35  ;;  %v1677_v40 = vpop.f32.mrb[61].mxu1  ;;  %v1567_v41 = vpop.f32.mrb[62].mxu0 }
 0x1a8   :  { %v1678_v42 = vadd.f32 %v1677_v40, %v1676_v36  ;;  %v1679_v43 = vpop.f32.mrb[62].mxu1  ;;  %v1568_v44 = vpop.f32.mrb[63].mxu0 }
 0x1a9   :  { %1456 = vst [vmem:[#allocation8 + $0x70] sm:$0xff] %v1436_v38   ;;  %v857_v45 = vadd.f32 %v1566_v39, %v1979_v34  ;;  %v1569_v46 = vadd.f32 %v1568_v44, %v1567_v41  ;;  %v1680_v47 = vpop.f32.mrb[63].mxu1 }
 0x1aa   :  { %v1681_v48 = vadd.f32 %v1680_v47, %v1679_v43 }
 0x1ab   :  { %v1018_v49 = vadd.f32 %v1678_v42, %v857_v45  ;;  %v860_v50 = vadd.f32 %v1569_v46, %v1979_v34 }
 0x1ad   :  { %v1021_v51 = vadd.f32 %v1681_v48, %v860_v50 }
 0x1af   :  { %v1441_v52 = vpack.c.bf16 %v1021_v51, %v1018_v49 }
 0x1b1   :  { %1457 = vst [vmem:[#allocation8 + $0x78] sm:$0xff] %v1441_v52  }
 0x1b2   :  { %1895 = shalt.err (!%p1892_p0)
}
 0x1b3   :  { %s1896_s30 = scalar_lea.hbm %s2031_s3, 2048 }
 0x1b4   :  { %p1897_p1 = scmp.ne.s32.totalorder %s2031_s3, %s1896_s30  ;;  %p1900_p2 = scmp.lt.u32.totalorder %s1896_s30, %s2031_s3 }
 0x1b6   :  { %p1902_p3 = pnand %p1900_p2, %p1897_p1 }
 0x1b8   :  { %1905 = shalt.err (!%p1902_p3)
}
 0x1b9   :  { %1195 = dma.vmem_to_hbm [thread:$0]  %s1190_s26, 2048, %s2031_s3, [#allocation4], %s1913_s22, %s1913_s22, %s1914_s23  }
 0x1ba   :  { %1910 = dma.done.wait [#allocation4], 2048  }
 0x1bb   :  { %1911 = vsyncadd [#allocation4], 4294965248 }
 0x1bc   :  { %1199 = vsyncpa [#allocation3], 1 }
 0x1bd   :  { %1200 = vsyncpa [#allocation6], 1 }
 0x1be   :  { %1201 = vsyncpa [#allocation4], 1 }

// kernel: bookbert_forward.22
= control target key start
LH: loop header
LB: loop body
LE: loop exit
PB: predicated region body
PF: predicated region fallthrough
CT: control target
= control target key end

     0   :  { %8 = vsyncpa [#allocation3], 0  ;;  %s4485_s0 = inlined_call_operand.hbm [shape: bf16[256,128], index: 0, kind: input, shape index: {}]   ;;  %s4486_s1 = inlined_call_operand.hbm [shape: bf16[128,512], index: 1, kind: input, shape index: {}]   ;;  %s4487_s2 = inlined_call_operand.hbm [shape: f32[1,512], index: 2, kind: input, shape index: {}]   ;;  %s4488_s3 = inlined_call_operand.hbm [shape: bf16[256,512], index: 3, kind: output, shape index: {}]  }
   0x1   :  { %9 = vsyncpa [#allocation6], 0 }
   0x2   :  { %10 = vsyncpa [#allocation4], 0  ;;  %s3000_s12 = smov [#allocation5]   ;;  %s2906_s16 = scalar_lea.hbm %s4486_s1, 4096 }
   0x3   :  { %s28_s13 = sshll.u32 %s3000_s12, 4  ;;  %p2907_p0 = scmp.ne.s32.totalorder %s4486_s1, %s2906_s16  ;;  %s29_s13 = int_to_ptr.vmem [resolvable:$true] %s28_s13 }
   0x4   :  { %p2910_p1 = scmp.lt.u32.totalorder %s2906_s16, %s4486_s1 }
   0x6   :  { %p2912_p2 = pnand %p2910_p1, %p2907_p0 }
   0x8   :  { %2915 = shalt.err (!%p2912_p2)
}
   0x9   :  { %s2916_s21 = scalar_lea.vmem %s29_s13, 4096  ;;  %p2921_p4 = scmp.lt.s32.totalorder %s29_s13, %s29_s13 }
   0xa   :  { %p2917_p3 = scmp.ne.s32.totalorder %s29_s13, %s2916_s21  ;;  %p2922_p5 = scmp.lt.s32.totalorder %s2916_s21, %s2916_s21 }
   0xc   :  { %p2923_p6 = por %p2922_p5, %p2921_p4 }
   0xe   :  { %p2924_p7 = pnand %p2923_p6, %p2917_p3 }
  0x10   :  { %2927 = shalt.err (!%p2924_p7)
}
  0x11   :  { %s3001_s22 = smov 256   ;;  %s3002_s23 = smov 16  }
  0x12   :  { %34 = dma.hbm_to_vmem [thread:$0]  %s4486_s1, 4096, %s29_s13, [#allocation6], %s3001_s22, %s3001_s22, %s3002_s23  }
  0x13   :  { %s3003_s26 = smov [#allocation2]   ;;  %s2928_s30 = scalar_lea.hbm %s4485_s0, 2048 }
  0x14   :  { %s16_s27 = sshll.u32 %s3003_s26, 4  ;;  %p2929_p8 = scmp.ne.s32.totalorder %s4485_s0, %s2928_s30  ;;  %s17_s27 = int_to_ptr.vmem [resolvable:$true] %s16_s27 }
  0x15   :  { %p2932_p9 = scmp.lt.u32.totalorder %s2928_s30, %s4485_s0 }
  0x17   :  { %p2934_p10 = pnand %p2932_p9, %p2929_p8 }
  0x19   :  { %2937 = shalt.err (!%p2934_p10)
}
  0x1a   :  { %s2938_s8 = scalar_lea.vmem %s17_s27, 2048  ;;  %p2943_p12 = scmp.lt.s32.totalorder %s17_s27, %s17_s27 }
  0x1b   :  { %p2939_p11 = scmp.ne.s32.totalorder %s17_s27, %s2938_s8  ;;  %p2944_p13 = scmp.lt.s32.totalorder %s2938_s8, %s2938_s8 }
  0x1d   :  { %p2945_p0 = por %p2944_p13, %p2943_p12 }
  0x1f   :  { %p2946_p1 = pnand %p2945_p0, %p2939_p11 }
  0x21   :  { %2949 = shalt.err (!%p2946_p1)
}
  0x22   :  { %s3004_s1 = smov 64   ;;  %s3005_s9 = smov 4  }
  0x23   :  { %22 = dma.hbm_to_vmem [thread:$0]  %s4485_s0, 2048, %s17_s27, [#allocation3], %s3004_s1, %s3004_s1, %s3005_s9  }
  0x24   :  { %s3006_s12 = smov [#allocation7]   ;;  %s2950_s16 = scalar_lea.hbm %s4487_s2, 64 }
  0x25   :  { %s41_s13 = sshll.u32 %s3006_s12, 4  ;;  %p2951_p2 = scmp.ne.s32.totalorder %s4487_s2, %s2950_s16  ;;  %s42_s13 = int_to_ptr.vmem [resolvable:$true] %s41_s13 }
  0x26   :  { %p2954_p3 = scmp.lt.u32.totalorder %s2950_s16, %s4487_s2 }
  0x28   :  { %p2956_p4 = pnand %p2954_p3, %p2951_p2 }
  0x2a   :  { %2959 = shalt.err (!%p2956_p4)
}
  0x2b   :  { %s2960_s21 = scalar_lea.vmem %s42_s13, 64  ;;  %p2965_p6 = scmp.lt.s32.totalorder %s42_s13, %s42_s13 }
  0x2c   :  { %p2961_p5 = scmp.ne.s32.totalorder %s42_s13, %s2960_s21  ;;  %p2966_p7 = scmp.lt.s32.totalorder %s2960_s21, %s2960_s21 }
  0x2e   :  { %p2967_p8 = por %p2966_p7, %p2965_p6 }
  0x30   :  { %p2968_p9 = pnand %p2967_p8, %p2961_p5 }
  0x32   :  { %2971 = shalt.err (!%p2968_p9)
}
  0x33   :  { %44 = dma.hbm_to_vmem [thread:$0]  %s4487_s2, 64, %s42_s13, [#allocation6]  }
  0x34   :  { %2994 = dma.done.wait [#allocation3], 2048  }
  0x35   :  { %2995 = vsyncadd [#allocation3], 4294965248 }
  0x36   :  { %2996 = dma.done.wait [#allocation6], 4160  }
  0x37   :  { %2997 = vsyncadd [#allocation6], 4294963136  ;;  %v3007_v0 = vmov 0   ;;  %v2586_v1 = vld [vmem:[#allocation5 + $0x4] ss:$16 sps:$4 sm:$0xff]   ;;  %v2635_v34 = vld [vmem:[#allocation2 + $0x8] sm:$0xff]   ;;  %v121_v49 = vlaneseq }
  0x38   :  { %429 = vmatprep.mubr.bf16.mxu0 %v3007_v0  ;;  %622 = vmatprep.mubr.bf16.mxu1 %v3007_v0  ;;  %v2588_v2 = vld [vmem:[#allocation5 + $0xc] ss:$16 sps:$4 sm:$0xff]   ;;  %v2590_v3 = vld [vmem:[#allocation5] ss:$16 sps:$4 sm:$0xff]   ;;  %v2591_v4 = vld [vmem:[#allocation5 + $0x8] ss:$16 sps:$4 sm:$0xff]  }
  0x39   :  { %397 = vmatprep.subr.bf16.mxu0 %v2586_v1  ;;  %590 = vmatprep.subr.bf16.mxu1 %v2588_v2  ;;  %v2592_v5 = vld [vmem:[#allocation5 + $0x24] ss:$16 sps:$4 sm:$0xff]   ;;  %v2594_v6 = vld [vmem:[#allocation5 + $0x2c] ss:$16 sps:$4 sm:$0xff]   ;;  %v2596_v7 = vld [vmem:[#allocation5 + $0x20] ss:$16 sps:$4 sm:$0xff]  }
  0x3a   :  { %398 = vmatpush1.bf16.msra.mxu0 %v2590_v3  ;;  %591 = vmatpush1.bf16.msra.mxu1 %v2591_v4  ;;  %v2597_v8 = vld [vmem:[#allocation5 + $0x28] ss:$16 sps:$4 sm:$0xff]   ;;  %v2598_v9 = vld [vmem:[#allocation5 + $0x44] ss:$16 sps:$4 sm:$0xff]   ;;  %v2600_v10 = vld [vmem:[#allocation5 + $0x4c] ss:$16 sps:$4 sm:$0xff]  }
  0x3b   :  { %399 = vmatprep.subr.bf16.mxu0 %v2592_v5  ;;  %592 = vmatprep.subr.bf16.mxu1 %v2594_v6  ;;  %v2602_v11 = vld [vmem:[#allocation5 + $0x40] ss:$16 sps:$4 sm:$0xff]   ;;  %v2603_v12 = vld [vmem:[#allocation5 + $0x48] ss:$16 sps:$4 sm:$0xff]   ;;  %v2604_v13 = vld [vmem:[#allocation5 + $0x64] ss:$16 sps:$4 sm:$0xff]  }
  0x3c   :  { %v2606_v14 = vld [vmem:[#allocation5 + $0x6c] ss:$16 sps:$4 sm:$0xff]   ;;  %v2608_v15 = vld [vmem:[#allocation5 + $0x60] ss:$16 sps:$4 sm:$0xff]   ;;  %v2609_v16 = vld [vmem:[#allocation5 + $0x68] ss:$16 sps:$4 sm:$0xff]  }
  0x3d   :  { %v2610_v17 = vld [vmem:[#allocation5 + $0x84] ss:$16 sps:$4 sm:$0xff]   ;;  %v2612_v18 = vld [vmem:[#allocation5 + $0x8c] ss:$16 sps:$4 sm:$0xff]   ;;  %v2614_v19 = vld [vmem:[#allocation5 + $0x80] ss:$16 sps:$4 sm:$0xff]  }
  0x3e   :  { %400 = vmatpush1.bf16.msra.mxu0 %v2596_v7  ;;  %593 = vmatpush1.bf16.msra.mxu1 %v2597_v8  ;;  %v2615_v20 = vld [vmem:[#allocation5 + $0x88] ss:$16 sps:$4 sm:$0xff]   ;;  %v2616_v21 = vld [vmem:[#allocation5 + $0xa4] ss:$16 sps:$4 sm:$0xff]   ;;  %v2618_v22 = vld [vmem:[#allocation5 + $0xac] ss:$16 sps:$4 sm:$0xff]  }
  0x3f   :  { %401 = vmatprep.subr.bf16.mxu0 %v2598_v9  ;;  %594 = vmatprep.subr.bf16.mxu1 %v2600_v10  ;;  %v2620_v23 = vld [vmem:[#allocation5 + $0xa0] ss:$16 sps:$4 sm:$0xff]   ;;  %v2621_v24 = vld [vmem:[#allocation5 + $0xa8] ss:$16 sps:$4 sm:$0xff]   ;;  %v2622_v25 = vld [vmem:[#allocation5 + $0xc4] ss:$16 sps:$4 sm:$0xff]  }
  0x40   :  { %v2624_v26 = vld [vmem:[#allocation5 + $0xcc] ss:$16 sps:$4 sm:$0xff]   ;;  %v2626_v27 = vld [vmem:[#allocation5 + $0xc0] ss:$16 sps:$4 sm:$0xff]   ;;  %v2627_v28 = vld [vmem:[#allocation5 + $0xc8] ss:$16 sps:$4 sm:$0xff]  }
  0x41   :  { %v2628_v29 = vld [vmem:[#allocation5 + $0xe4] ss:$16 sps:$4 sm:$0xff]   ;;  %v2630_v30 = vld [vmem:[#allocation5 + $0xec] ss:$16 sps:$4 sm:$0xff]   ;;  %v2632_v31 = vld [vmem:[#allocation5 + $0xe0] ss:$16 sps:$4 sm:$0xff]  }
  0x42   :  { %402 = vmatpush1.bf16.msra.mxu0 %v2602_v11  ;;  %595 = vmatpush1.bf16.msra.mxu1 %v2603_v12  ;;  %v2633_v32 = vld [vmem:[#allocation5 + $0xe8] ss:$16 sps:$4 sm:$0xff]   ;;  %v2634_v33 = vld [vmem:[#allocation2] sm:$0xff]   ;;  %v2636_v35 = vld [vmem:[#allocation2 + $0x10] sm:$0xff]   ;;  %v122_v50 = vshrl.u32 %v121_v49, 7  ;;  %s3008_s2 = smov [#allocation8]  }
  0x43   :  { %403 = vmatprep.subr.bf16.mxu0 %v2604_v13  ;;  %596 = vmatprep.subr.bf16.mxu1 %v2606_v14  ;;  %v2637_v36 = vld [vmem:[#allocation2 + $0x18] sm:$0xff]   ;;  %v2638_v37 = vld [vmem:[#allocation2 + $0x20] sm:$0xff]   ;;  %v2639_v38 = vld [vmem:[#allocation2 + $0x28] sm:$0xff]   ;;  %s2388_s25 = sshll.u32 %s3008_s2, 4  ;;  %s2389_s25 = int_to_ptr.vmem [resolvable:$true] %s2388_s25 }
  0x44   :  { %v2640_v39 = vld [vmem:[#allocation2 + $0x30] sm:$0xff]   ;;  %v2641_v40 = vld [vmem:[#allocation2 + $0x38] sm:$0xff]   ;;  %v2642_v41 = vld [vmem:[#allocation2 + $0x40] sm:$0xff]   ;;  %v123_v51 = vsub.s32 0, %v122_v50  ;;  %v131_v52 = vsub.s32 2, %v122_v50  ;;  %v127_v54 = vsub.s32 1, %v122_v50  ;;  %p2977_p11 = scmp.lt.s32.totalorder %s2389_s25, %s2389_s25 }
  0x45   :  { %v2643_v42 = vld [vmem:[#allocation2 + $0x48] sm:$0xff]   ;;  %v2644_v43 = vld [vmem:[#allocation2 + $0x50] sm:$0xff]   ;;  %v2645_v44 = vld [vmem:[#allocation2 + $0x58] sm:$0xff]   ;;  %v135_v55 = vsub.s32 3, %v122_v50  ;;  %s2972_s26 = scalar_lea.vmem %s2389_s25, 8192 }
  0x46   :  { %404 = vmatpush1.bf16.msra.mxu0 %v2608_v15  ;;  %597 = vmatpush1.bf16.msra.mxu1 %v2609_v16  ;;  %v2646_v45 = vld [vmem:[#allocation2 + $0x60] sm:$0xff]   ;;  %v2647_v46 = vld [vmem:[#allocation2 + $0x68] sm:$0xff]   ;;  %v2648_v47 = vld [vmem:[#allocation2 + $0x70] sm:$0xff]   ;;  %p2973_p10 = scmp.ne.s32.totalorder %s2389_s25, %s2972_s26  ;;  %p2978_p12 = scmp.lt.s32.totalorder %s2972_s26, %s2972_s26 }
  0x47   :  { %405 = vmatprep.subr.bf16.mxu0 %v2610_v17  ;;  %598 = vmatprep.subr.bf16.mxu1 %v2612_v18  ;;  %v2649_v48 = vld [vmem:[#allocation2 + $0x78] sm:$0xff]   ;;  %v119_v53 = vld [vmem:[#allocation7] sm:$0xf] }
  0x48   :  { %v3100_v56 = vrot.slane %v119_v53, %v123_v51  ;;  %v3102_v57 = vrot.slane %v119_v53, %v131_v52  ;;  %v3104_v58 = vrot.slane %v119_v53, %v127_v54  ;;  %v3106_v59 = vrot.slane %v119_v53, %v135_v55  ;;  %p2979_p13 = por %p2978_p12, %p2977_p11 }
  0x4a   :  { %406 = vmatpush1.bf16.msra.mxu0 %v2614_v19  ;;  %599 = vmatpush1.bf16.msra.mxu1 %v2615_v20  ;;  %p2980_p0 = pnand %p2979_p13, %p2973_p10 }
  0x4b   :  { %407 = vmatprep.subr.bf16.mxu0 %v2616_v21  ;;  %600 = vmatprep.subr.bf16.mxu1 %v2618_v22 }
  0x4e   :  { %408 = vmatpush1.bf16.msra.mxu0 %v2620_v23  ;;  %601 = vmatpush1.bf16.msra.mxu1 %v2621_v24 }
  0x4f   :  { %409 = vmatprep.subr.bf16.mxu0 %v2622_v25  ;;  %602 = vmatprep.subr.bf16.mxu1 %v2624_v26 }
  0x52   :  { %410 = vmatpush1.bf16.msra.mxu0 %v2626_v27  ;;  %603 = vmatpush1.bf16.msra.mxu1 %v2627_v28 }
  0x53   :  { %411 = vmatprep.subr.bf16.mxu0 %v2628_v29  ;;  %604 = vmatprep.subr.bf16.mxu1 %v2630_v30 }
  0x56   :  { %412 = vmatpush1.bf16.msra.mxu0 %v2632_v31  ;;  %605 = vmatpush1.bf16.msra.mxu1 %v2633_v32 }
  0x59   :  { %430 = vmatmul.mubr.bf16.vlgmr.msra.gmra.mrb[0].mxu0 %v2634_v33  ;;  %623 = vmatmul.mubr.bf16.vlgmr.msra.gmra.mrb[0].mxu1 %v2634_v33 }
  0x5a   :  { %439 = vmatprep.mubr.bf16.mxu0 %v3007_v0  ;;  %632 = vmatprep.mubr.bf16.mxu1 %v3007_v0 }
  0x61   :  { %440 = vmatmul.mubr.bf16.gmra.mrb[4].mxu0 %v2635_v34  ;;  %633 = vmatmul.mubr.bf16.gmra.mrb[4].mxu1 %v2635_v34 }
  0x62   :  { %449 = vmatprep.mubr.bf16.mxu0 %v3007_v0  ;;  %642 = vmatprep.mubr.bf16.mxu1 %v3007_v0 }
  0x69   :  { %450 = vmatmul.mubr.bf16.gmra.mrb[8].mxu0 %v2636_v35  ;;  %643 = vmatmul.mubr.bf16.gmra.mrb[8].mxu1 %v2636_v35 }
  0x6a   :  { %459 = vmatprep.mubr.bf16.mxu0 %v3007_v0  ;;  %652 = vmatprep.mubr.bf16.mxu1 %v3007_v0 }
  0x71   :  { %460 = vmatmul.mubr.bf16.gmra.mrb[12].mxu0 %v2637_v36  ;;  %653 = vmatmul.mubr.bf16.gmra.mrb[12].mxu1 %v2637_v36 }
  0x72   :  { %469 = vmatprep.mubr.bf16.mxu0 %v3007_v0  ;;  %662 = vmatprep.mubr.bf16.mxu1 %v3007_v0 }
  0x79   :  { %470 = vmatmul.mubr.bf16.gmra.mrb[16].mxu0 %v2638_v37  ;;  %663 = vmatmul.mubr.bf16.gmra.mrb[16].mxu1 %v2638_v37 }
  0x7a   :  { %479 = vmatprep.mubr.bf16.mxu0 %v3007_v0  ;;  %672 = vmatprep.mubr.bf16.mxu1 %v3007_v0 }
  0x81   :  { %480 = vmatmul.mubr.bf16.gmra.mrb[20].mxu0 %v2639_v38  ;;  %673 = vmatmul.mubr.bf16.gmra.mrb[20].mxu1 %v2639_v38 }
  0x82   :  { %489 = vmatprep.mubr.bf16.mxu0 %v3007_v0  ;;  %682 = vmatprep.mubr.bf16.mxu1 %v3007_v0 }
  0x89   :  { %490 = vmatmul.mubr.bf16.gmra.mrb[24].mxu0 %v2640_v39  ;;  %683 = vmatmul.mubr.bf16.gmra.mrb[24].mxu1 %v2640_v39 }
  0x8a   :  { %499 = vmatprep.mubr.bf16.mxu0 %v3007_v0  ;;  %692 = vmatprep.mubr.bf16.mxu1 %v3007_v0 }
  0x91   :  { %500 = vmatmul.mubr.bf16.gmra.mrb[28].mxu0 %v2641_v40  ;;  %693 = vmatmul.mubr.bf16.gmra.mrb[28].mxu1 %v2641_v40 }
  0x92   :  { %509 = vmatprep.mubr.bf16.mxu0 %v3007_v0  ;;  %702 = vmatprep.mubr.bf16.mxu1 %v3007_v0 }
  0x99   :  { %510 = vmatmul.mubr.bf16.gmra.mrb[32].mxu0 %v2642_v41  ;;  %703 = vmatmul.mubr.bf16.gmra.mrb[32].mxu1 %v2642_v41 }
  0x9a   :  { %519 = vmatprep.mubr.bf16.mxu0 %v3007_v0  ;;  %712 = vmatprep.mubr.bf16.mxu1 %v3007_v0 }
  0xa1   :  { %520 = vmatmul.mubr.bf16.gmra.mrb[36].mxu0 %v2643_v42  ;;  %713 = vmatmul.mubr.bf16.gmra.mrb[36].mxu1 %v2643_v42 }
  0xa2   :  { %529 = vmatprep.mubr.bf16.mxu0 %v3007_v0  ;;  %722 = vmatprep.mubr.bf16.mxu1 %v3007_v0 }
  0xa9   :  { %530 = vmatmul.mubr.bf16.gmra.mrb[40].mxu0 %v2644_v43  ;;  %723 = vmatmul.mubr.bf16.gmra.mrb[40].mxu1 %v2644_v43 }
  0xaa   :  { %539 = vmatprep.mubr.bf16.mxu0 %v3007_v0  ;;  %732 = vmatprep.mubr.bf16.mxu1 %v3007_v0 }
  0xb1   :  { %540 = vmatmul.mubr.bf16.gmra.mrb[44].mxu0 %v2645_v44  ;;  %733 = vmatmul.mubr.bf16.gmra.mrb[44].mxu1 %v2645_v44 }
  0xb2   :  { %549 = vmatprep.mubr.bf16.mxu0 %v3007_v0  ;;  %742 = vmatprep.mubr.bf16.mxu1 %v3007_v0 }
  0xb9   :  { %550 = vmatmul.mubr.bf16.gmra.mrb[48].mxu0 %v2646_v45  ;;  %743 = vmatmul.mubr.bf16.gmra.mrb[48].mxu1 %v2646_v45 }
  0xba   :  { %559 = vmatprep.mubr.bf16.mxu0 %v3007_v0  ;;  %752 = vmatprep.mubr.bf16.mxu1 %v3007_v0 }
  0xc1   :  { %560 = vmatmul.mubr.bf16.gmra.mrb[52].mxu0 %v2647_v46  ;;  %753 = vmatmul.mubr.bf16.gmra.mrb[52].mxu1 %v2647_v46 }
  0xc2   :  { %569 = vmatprep.mubr.bf16.mxu0 %v3007_v0  ;;  %762 = vmatprep.mubr.bf16.mxu1 %v3007_v0 }
  0xc9   :  { %570 = vmatmul.mubr.bf16.gmra.mrb[56].mxu0 %v2648_v47  ;;  %763 = vmatmul.mubr.bf16.gmra.mrb[56].mxu1 %v2648_v47 }
  0xca   :  { %579 = vmatprep.mubr.bf16.mxu0 %v3007_v0  ;;  %772 = vmatprep.mubr.bf16.mxu1 %v3007_v0 }
  0xd1   :  { %580 = vmatmul.mubr.bf16.gmra.mrb[60].mxu0 %v2649_v48  ;;  %773 = vmatmul.mubr.bf16.gmra.mrb[60].mxu1 %v2649_v48 }
 0x12c   :  { %v431_v60 = vpop.f32.mrb[0].mxu0  ;;  %v624_v61 = vpop.f32.mrb[0].mxu1 }
 0x12d   :  { %v432_v62 = vadd.f32 %v431_v60, %v3100_v56  ;;  %v625_v63 = vadd.f32 %v624_v61, %v3102_v57  ;;  %v433_v0 = vpop.f32.mrb[1].mxu0  ;;  %v626_v1 = vpop.f32.mrb[1].mxu1 }
 0x12e   :  { %v3111_v2 = vadd.f32 %v433_v0, %v3104_v58  ;;  %v3114_v3 = vadd.f32 %v626_v1, %v3106_v59  ;;  %v435_v4 = vpop.f32.mrb[2].mxu0  ;;  %v628_v5 = vpop.f32.mrb[2].mxu1 }
 0x12f   :  { %v911_v6 = vmul.f32 0.044715, %v432_v62  ;;  %v913_v7 = vmul.f32 0.044715, %v625_v63  ;;  %v3119_v12 = vadd.f32 %v435_v4, %v3100_v56  ;;  %v3122_v13 = vadd.f32 %v628_v5, %v3102_v57  ;;  %v437_v14 = vpop.f32.mrb[3].mxu0  ;;  %v630_v15 = vpop.f32.mrb[3].mxu1 }
 0x130   :  { %v912_v8 = vmul.f32 0.044715, %v3111_v2  ;;  %v914_v9 = vmul.f32 0.044715, %v3114_v3  ;;  %v3127_v18 = vadd.f32 %v437_v14, %v3104_v58  ;;  %v3135_v30 = vadd.f32 %v630_v15, %v3106_v59 }
 0x131   :  { %v1039_v10 = vmul.f32 %v911_v6, %v432_v62  ;;  %v1041_v11 = vmul.f32 %v913_v7, %v625_v63  ;;  %v915_v21 = vmul.f32 0.044715, %v3119_v12  ;;  %v917_v24 = vmul.f32 0.044715, %v3122_v13 }
 0x132   :  { %v1040_v16 = vmul.f32 %v912_v8, %v3111_v2  ;;  %v1042_v17 = vmul.f32 %v914_v9, %v3114_v3  ;;  %v916_v36 = vmul.f32 0.044715, %v3127_v18  ;;  %v3143_v39 = vmul.f32 0.5, %v432_v62 }
 0x133   :  { %v1167_v19 = vmul.f32 %v1039_v10, %v432_v62  ;;  %v1169_v20 = vmul.f32 %v1041_v11, %v625_v63  ;;  %v1043_v29 = vmul.f32 %v915_v21, %v3119_v12  ;;  %v1045_v35 = vmul.f32 %v917_v24, %v3122_v13 }
 0x134   :  { %v1168_v22 = vmul.f32 %v1040_v16, %v3111_v2  ;;  %v1170_v23 = vmul.f32 %v1042_v17, %v3114_v3  ;;  %v441_v25 = vpop.f32.mrb[4].mxu0  ;;  %v634_v26 = vpop.f32.mrb[4].mxu1  ;;  %v1044_v47 = vmul.f32 %v916_v36, %v3127_v18  ;;  %v918_v50 = vmul.f32 0.044715, %v3135_v30 }
 0x135   :  { %v1295_v27 = vadd.f32 %v1167_v19, %v432_v62  ;;  %v1297_v28 = vadd.f32 %v1169_v20, %v625_v63  ;;  %v443_v31 = vpop.f32.mrb[5].mxu0  ;;  %v636_v32 = vpop.f32.mrb[5].mxu1  ;;  %v1171_v42 = vmul.f32 %v1043_v29, %v3119_v12  ;;  %v1173_v46 = vmul.f32 %v1045_v35, %v3122_v13 }
 0x136   :  { %v1296_v33 = vadd.f32 %v1168_v22, %v3111_v2  ;;  %v1298_v34 = vadd.f32 %v1170_v23, %v3114_v3  ;;  %v445_v37 = vpop.f32.mrb[6].mxu0  ;;  %v3141_v38 = vpop.f32.mrb[6].mxu1  ;;  %v3155_v51 = vadd.f32 %v441_v25, %v3100_v56  ;;  %v1172_v53 = vmul.f32 %v1044_v47, %v3127_v18 }
 0x137   :  { %v1423_v40 = vmul.f32 0.7978846, %v1295_v27  ;;  %v1425_v41 = vmul.f32 0.7978846, %v1297_v28  ;;  %v3146_v43 = vpop.f32.mrb[7].mxu0  ;;  %v3150_v48 = vpop.f32.mrb[7].mxu1  ;;  %v1299_v49 = vadd.f32 %v1171_v42, %v3119_v12  ;;  %v1301_v52 = vadd.f32 %v1173_v46, %v3122_v13 }
 0x138   :  { %v1424_v44 = vmul.f32 0.7978846, %v1296_v33  ;;  %v1426_v45 = vmul.f32 0.7978846, %v1298_v34  ;;  %v3160_v54 = vadd.f32 %v634_v26, %v3102_v57  ;;  %v3162_v55 = vmul.f32 0.5, %v625_v63 }
 0x139   :  { %2650 = vtanh.f32 %v1423_v40  ;;  %v1427_v60 = vmul.f32 0.7978846, %v1299_v49  ;;  %v1046_v61 = vmul.f32 %v918_v50, %v3135_v30  ;;  %v1429_v62 = vmul.f32 0.7978846, %v1301_v52 }
 0x13a   :  { %2652 = vtanh.f32 %v1425_v41  ;;  %v1300_v0 = vadd.f32 %v1172_v53, %v3127_v18  ;;  %v919_v1 = vmul.f32 0.044715, %v3155_v51  ;;  %v3172_v6 = vmul.f32 0.5, %v3111_v2 }
 0x13b   :  { %2654 = vtanh.f32 %v1424_v44  ;;  %v1174_v63 = vmul.f32 %v1046_v61, %v3135_v30  ;;  %v921_v7 = vmul.f32 0.044715, %v3160_v54  ;;  %v3182_v14 = vadd.f32 %v443_v31, %v3104_v58 }
 0x13c   :  { %2656 = vtanh.f32 %v1426_v45  ;;  %v3167_v4 = vpop.f32.mrb[8].mxu0  ;;  %v3169_v5 = vpop.f32.mrb[8].mxu1  ;;  %v1428_v10 = vmul.f32 0.7978846, %v1300_v0  ;;  %v1047_v11 = vmul.f32 %v919_v1, %v3155_v51  ;;  %v3191_v19 = vadd.f32 %v636_v32, %v3106_v59 }
 0x13d   :  { %2658 = vtanh.f32 %v1427_v60  ;;  %v3176_v8 = vpop.f32.mrb[9].mxu0  ;;  %v3178_v9 = vpop.f32.mrb[9].mxu1  ;;  %v1302_v16 = vadd.f32 %v1174_v63, %v3135_v30  ;;  %v1049_v17 = vmul.f32 %v921_v7, %v3160_v54  ;;  %v3194_v20 = vadd.f32 %v445_v37, %v3100_v56 }
 0x13e   :  { %2660 = vtanh.f32 %v1429_v62  ;;  %v3184_v15 = vpop.f32.mrb[10].mxu0  ;;  %v3186_v2 = vpop.f32.mrb[10].mxu1  ;;  %v786_v23 = vmul.f32 0.5, %v3114_v3  ;;  %v1175_v24 = vmul.f32 %v1047_v11, %v3155_v51  ;;  %v920_v25 = vmul.f32 0.044715, %v3182_v14 }
 0x13f   :  { %v3196_v21 = vpop.f32.mrb[11].mxu0  ;;  %v3198_v22 = vpop.f32.mrb[11].mxu1  ;;  %2662 = vtanh.f32 %v1428_v10  ;;  %v787_v26 = vmul.f32 0.5, %v3119_v12  ;;  %v1430_v27 = vmul.f32 0.7978846, %v1302_v16  ;;  %v1177_v28 = vmul.f32 %v1049_v17, %v3160_v54 }
 0x140   :  { %v922_v29 = vmul.f32 0.044715, %v3191_v19  ;;  %v3207_v31 = vmul.f32 0.5, %v3122_v13  ;;  %v1303_v32 = vadd.f32 %v1175_v24, %v3155_v51  ;;  %v1048_v33 = vmul.f32 %v920_v25, %v3182_v14 }
 0x141   :  { %v923_v3 = vmul.f32 0.044715, %v3194_v20  ;;  %v788_v35 = vmul.f32 0.5, %v3127_v18  ;;  %2664 = vtanh.f32 %v1430_v27  ;;  %v1305_v12 = vadd.f32 %v1177_v28, %v3160_v54 }
 0x142   :  { %v1050_v36 = vmul.f32 %v922_v29, %v3191_v19  ;;  %v1431_v41 = vmul.f32 0.7978846, %v1303_v32  ;;  %v1176_v13 = vmul.f32 %v1048_v33, %v3182_v14  ;;  %v3224_v50 = vadd.f32 %v3141_v38, %v3102_v57 }
 0x143   :  { %v2651_v34 = vpop.eup %2650  ;;  %v1051_v42 = vmul.f32 %v923_v3, %v3194_v20  ;;  %v1433_v49 = vmul.f32 0.7978846, %v1305_v12  ;;  %v790_v32 = vmul.f32 0.5, %v3135_v30  ;;  %v3250_v30 = vadd.f32 %v3146_v43, %v3104_v58 }
 0x144   :  { %v2653_v37 = vpop.eup %2652  ;;  %v1679_v40 = vadd.f32 1.0, %v2651_v34  ;;  %v3217_v44 = vpop.f32.mrb[12].mxu0  ;;  %v1178_v18 = vmul.f32 %v1050_v36, %v3191_v19  ;;  %2666 = vtanh.f32 %v1431_v41  ;;  %v1304_v0 = vadd.f32 %v1176_v13, %v3182_v14 }
 0x145   :  { %v3219_v45 = vpop.f32.mrb[12].mxu1  ;;  %v2655_v46 = vpop.eup %2654  ;;  %v1681_v47 = vadd.f32 1.0, %v2653_v37  ;;  %2668 = vtanh.f32 %v1433_v49  ;;  %v1179_v28 = vmul.f32 %v1051_v42, %v3194_v20  ;;  %v791_v49 = vmul.f32 0.5, %v3155_v51 }
 0x146   :  { %v3226_v52 = vpop.f32.mrb[13].mxu0  ;;  %v3228_v53 = vpop.f32.mrb[13].mxu1  ;;  %v1807_v61 = vmul.f32 %v1679_v40, %v3143_v39  ;;  %v1680_v62 = vadd.f32 1.0, %v2655_v46  ;;  %v1306_v11 = vadd.f32 %v1178_v18, %v3191_v19  ;;  %v1432_v27 = vmul.f32 0.7978846, %v1304_v0 }
 0x147   :  { %v2657_v60 = vpop.eup %2656  ;;  %v3232_v1 = vpop.f32.mrb[14].mxu0  ;;  %v1809_v10 = vmul.f32 %v1681_v47, %v3162_v55  ;;  %v925_v55 = vmul.f32 0.044715, %v3224_v50  ;;  %v1307_v36 = vadd.f32 %v1179_v28, %v3194_v20  ;;  %v793_v18 = vmul.f32 0.5, %v3160_v54 }
 0x148   :  { %v3234_v63 = vpop.f32.mrb[14].mxu1  ;;  %v2659_v7 = vpop.eup %2658  ;;  %v1682_v38 = vadd.f32 1.0, %v2657_v60  ;;  %v1808_v24 = vmul.f32 %v1680_v62, %v3172_v6  ;;  %v1434_v33 = vmul.f32 0.7978846, %v1306_v11  ;;  %2670 = vtanh.f32 %v1432_v27 }
 0x149   :  { %v3238_v16 = vpop.f32.mrb[15].mxu0  ;;  %v3240_v17 = vpop.f32.mrb[15].mxu1  ;;  %v1683_v25 = vadd.f32 1.0, %v2659_v7  ;;  %v1435_v6 = vmul.f32 0.7978846, %v1307_v36  ;;  %v1053_v13 = vmul.f32 %v925_v55, %v3224_v50  ;;  %v3264_v60 = vadd.f32 %v3167_v4, %v3100_v56 }
 0x14a   :  { %v2661_v39 = vpop.eup %2660  ;;  %v1810_v29 = vmul.f32 %v1682_v38, %v786_v23  ;;  %v2513_v34 = vpack.c.bf16 %v1808_v24, %v1807_v61  ;;  %2672 = vtanh.f32 %v1434_v33  ;;  %v3254_v23 = vadd.f32 %v3150_v48, %v3106_v59 }
 0x14b   :  { %v2663_v3 = vpop.eup %2662  ;;  %v1685_v12 = vadd.f32 1.0, %v2661_v39  ;;  %v1811_v40 = vmul.f32 %v1683_v25, %v787_v26  ;;  %v792_v0 = vmul.f32 0.5, %v3182_v14  ;;  %v1181_v7 = vmul.f32 %v1053_v13, %v3224_v50 }
 0x14c   :  { %v2514_v37 = vpack.c.bf16 %v1810_v29, %v1809_v10  ;;  %v1684_v41 = vadd.f32 1.0, %v2663_v3  ;;  %2319 = vst [vmem:[#allocation8] sm:$0xff] %v2513_v34  ;;  %v3256_v42 = vpop.f32.mrb[16].mxu0  ;;  %v3258_v46 = vpop.f32.mrb[16].mxu1  ;;  %v924_v10 = vmul.f32 0.044715, %v3250_v30  ;;  %v3281_v38 = vadd.f32 %v3169_v5, %v3102_v57 }
 0x14d   :  { %v2665_v47 = vpop.eup %2664  ;;  %v3266_v43 = vpop.f32.mrb[17].mxu0  ;;  %v1813_v48 = vmul.f32 %v1685_v12, %v3207_v31  ;;  %v926_v4 = vmul.f32 0.044715, %v3254_v23  ;;  %2674 = vtanh.f32 %v1435_v6  ;;  %v1309_v14 = vadd.f32 %v1181_v7, %v3224_v50 }
 0x14e   :  { %2320 = vst [vmem:[#allocation8 + $0x8] sm:$0xff] %v2514_v37  ;;  %v1812_v26 = vmul.f32 %v1684_v41, %v788_v35  ;;  %v3268_v61 = vpop.f32.mrb[17].mxu1  ;;  %v1686_v62 = vadd.f32 1.0, %v2665_v47  ;;  %v3273_v35 = vpop.f32.mrb[18].mxu0  ;;  %v927_v24 = vmul.f32 0.044715, %v3264_v60  ;;  %v1052_v29 = vmul.f32 %v924_v10, %v3250_v30 }
 0x14f   :  { %v3275_v51 = vpop.f32.mrb[18].mxu1  ;;  %v3283_v11 = vpop.f32.mrb[19].mxu0  ;;  %v1054_v33 = vmul.f32 %v926_v4, %v3254_v23  ;;  %v3293_v5 = vadd.f32 %v3176_v8, %v3104_v58  ;;  %v1437_v3 = vmul.f32 0.7978846, %v1309_v14  ;;  %v794_v12 = vmul.f32 0.5, %v3191_v19 }
 0x150   :  { %v2515_v54 = vpack.c.bf16 %v1812_v26, %v1811_v40  ;;  %v2667_v31 = vpop.eup %2666  ;;  %v1814_v39 = vmul.f32 %v1686_v62, %v790_v32  ;;  %v3287_v25 = vpop.f32.mrb[19].mxu1  ;;  %v1055_v34 = vmul.f32 %v927_v24, %v3264_v60  ;;  %v1180_v36 = vmul.f32 %v1052_v29, %v3250_v30 }
 0x151   :  { %v2669_v27 = vpop.eup %2668  ;;  %v1687_v28 = vadd.f32 1.0, %v2667_v31  ;;  %v1182_v37 = vmul.f32 %v1054_v33, %v3254_v23  ;;  %v929_v40 = vmul.f32 0.044715, %v3281_v38  ;;  %2676 = vtanh.f32 %v1437_v3 }
 0x152   :  { %2321 = vst [vmem:[#allocation8 + $0x10] sm:$0xff] %v2515_v54  ;;  %v2516_v55 = vpack.c.bf16 %v1814_v39, %v1813_v48  ;;  %v1689_v32 = vadd.f32 1.0, %v2669_v27  ;;  %v2671_v41 = vpop.eup %2670  ;;  %v1183_v8 = vmul.f32 %v1055_v34, %v3264_v60  ;;  %v1308_v19 = vadd.f32 %v1180_v36, %v3250_v30 }
 0x153   :  { %v1815_v6 = vmul.f32 %v1687_v28, %v791_v49  ;;  %v1688_v62 = vadd.f32 1.0, %v2671_v41  ;;  %v1310_v7 = vadd.f32 %v1182_v37, %v3254_v23  ;;  %v1057_v54 = vmul.f32 %v929_v40, %v3281_v38 }
 0x154   :  { %2322 = vst [vmem:[#allocation8 + $0x18] sm:$0xff] %v2516_v55  ;;  %v1817_v13 = vmul.f32 %v1689_v32, %v793_v18  ;;  %v3301_v47 = vpop.f32.mrb[20].mxu0  ;;  %v3303_v26 = vpop.f32.mrb[20].mxu1  ;;  %v1311_v18 = vadd.f32 %v1183_v8, %v3264_v60  ;;  %v928_v31 = vmul.f32 0.044715, %v3293_v5  ;;  %v3316_v39 = vadd.f32 %v3178_v9, %v3106_v59 }
 0x155   :  { %v2673_v48 = vpop.eup %2672  ;;  %v3308_v10 = vpop.f32.mrb[21].mxu0  ;;  %v1816_v27 = vmul.f32 %v1688_v62, %v792_v0  ;;  %v1436_v28 = vmul.f32 0.7978846, %v1308_v19  ;;  %v1438_v29 = vmul.f32 0.7978846, %v1310_v7  ;;  %v1185_v33 = vmul.f32 %v1057_v54, %v3281_v38 }
 0x156   :  { %v3310_v4 = vpop.f32.mrb[21].mxu1  ;;  %v1690_v49 = vadd.f32 1.0, %v2673_v48  ;;  %v3318_v14 = vpop.f32.mrb[22].mxu0  ;;  %v795_v34 = vmul.f32 0.5, %v3194_v20  ;;  %v1439_v36 = vmul.f32 0.7978846, %v1311_v18  ;;  %v1056_v9 = vmul.f32 %v928_v31, %v3293_v5 }
 0x157   :  { %v3320_v24 = vpop.f32.mrb[22].mxu1  ;;  %v3323_v55 = vpop.f32.mrb[23].mxu0  ;;  %v2517_v37 = vpack.c.bf16 %v1816_v27, %v1815_v6  ;;  %v797_v40 = vmul.f32 0.5, %v3224_v50  ;;  %2678 = vtanh.f32 %v1436_v28  ;;  %v1313_v0 = vadd.f32 %v1185_v33, %v3281_v38 }
 0x158   :  { %v3325_v32 = vpop.f32.mrb[23].mxu1  ;;  %v1818_v3 = vmul.f32 %v1690_v49, %v794_v12  ;;  %v2675_v41 = vpop.eup %2674  ;;  %2680 = vtanh.f32 %v1438_v29  ;;  %v1184_v48 = vmul.f32 %v1056_v9, %v3293_v5  ;;  %v930_v62 = vmul.f32 0.044715, %v3316_v39 }
 0x159   :  { %2323 = vst [vmem:[#allocation8 + $0x20] sm:$0xff] %v2517_v37  ;;  %v796_v12 = vmul.f32 0.5, %v3250_v30  ;;  %2682 = vtanh.f32 %v1439_v36  ;;  %v1441_v20 = vmul.f32 0.7978846, %v1313_v0  ;;  %v3336_v6 = vadd.f32 %v3184_v15, %v3100_v56 }
 0x15a   :  { %v2518_v8 = vpack.c.bf16 %v1818_v3, %v1817_v13  ;;  %v1312_v50 = vadd.f32 %v1184_v48, %v3293_v5  ;;  %v1058_v19 = vmul.f32 %v930_v62, %v3316_v39  ;;  %v3342_v13 = vadd.f32 %v3186_v2, %v3102_v57 }
 0x15b   :  { %v3346_v7 = vadd.f32 %v3196_v21, %v3104_v58  ;;  %v1691_v49 = vadd.f32 1.0, %v2675_v41  ;;  %2684 = vtanh.f32 %v1441_v20  ;;  %v931_v15 = vmul.f32 0.044715, %v3336_v6  ;;  %v2677_v27 = vpop.eup %2676 }
 0x15c   :  { %2324 = vst [vmem:[#allocation8 + $0x28] sm:$0xff] %v2518_v8  ;;  %v3348_v30 = vpop.f32.mrb[24].mxu0  ;;  %v3350_v54 = vpop.f32.mrb[24].mxu1  ;;  %v3355_v18 = vadd.f32 %v3198_v22, %v3106_v59  ;;  %v798_v21 = vmul.f32 0.5, %v3254_v23  ;;  %v1440_v28 = vmul.f32 0.7978846, %v1312_v50  ;;  %v1186_v29 = vmul.f32 %v1058_v19, %v3316_v39 }
 0x15d   :  { %v3357_v31 = vpop.f32.mrb[25].mxu0  ;;  %v3359_v2 = vpop.f32.mrb[25].mxu1  ;;  %v933_v33 = vmul.f32 0.044715, %v3342_v13  ;;  %v1693_v36 = vadd.f32 1.0, %v2677_v27  ;;  %v799_v9 = vmul.f32 0.5, %v3264_v60  ;;  %v1059_v22 = vmul.f32 %v931_v15, %v3336_v6 }
 0x15e   :  { %v3364_v3 = vpop.f32.mrb[26].mxu0  ;;  %v932_v37 = vmul.f32 0.044715, %v3346_v7  ;;  %v3369_v0 = vpop.f32.mrb[26].mxu1  ;;  %v3374_v23 = vmul.f32 0.5, %v3281_v38  ;;  %2686 = vtanh.f32 %v1440_v28  ;;  %v1314_v8 = vadd.f32 %v1186_v29, %v3316_v39 }
 0x15f   :  { %4489 = vst [vmem:[#allocation12_spill] sm:$0xff] %v3364_v3  ;;  %4490 = vst [vmem:[#allocation13_spill] sm:$0xff] %v3369_v0  ;;  %v3371_v41 = vpop.f32.mrb[27].mxu0  ;;  %v1061_v48 = vmul.f32 %v933_v33, %v3342_v13  ;;  %v3378_v62 = vpop.f32.mrb[27].mxu1  ;;  %v1819_v20 = vmul.f32 %v1691_v49, %v795_v34  ;;  %v1187_v60 = vmul.f32 %v1059_v22, %v3336_v6  ;;  %v934_v19 = vmul.f32 0.044715, %v3355_v18 }
 0x160   :  { %4491 = vst [vmem:[#allocation14_spill] sm:$0xff] %v3371_v41  ;;  %4492 = vst [vmem:[#allocation15_spill] sm:$0xff] %v3378_v62  ;;  %v1060_v50 = vmul.f32 %v932_v37, %v3346_v7  ;;  %v1821_v15 = vmul.f32 %v1693_v36, %v797_v40  ;;  %v1442_v27 = vmul.f32 0.7978846, %v1314_v8  ;;  %v3386_v38 = vadd.f32 %v3217_v44, %v3100_v56 }
 0x161   :  { %v1189_v41 = vmul.f32 %v1061_v48, %v3342_v13  ;;  %v2679_v28 = vpop.eup %2678  ;;  %v1315_v29 = vadd.f32 %v1187_v60, %v3336_v6  ;;  %v1062_v34 = vmul.f32 %v934_v19, %v3355_v18  ;;  %v3393_v49 = vadd.f32 %v3219_v45, %v3102_v57 }
 0x162   :  { %v1188_v33 = vmul.f32 %v1060_v50, %v3346_v7  ;;  %v2681_v22 = vpop.eup %2680  ;;  %v1692_v40 = vadd.f32 1.0, %v2679_v28  ;;  %2688 = vtanh.f32 %v1442_v27  ;;  %v3398_v44 = vadd.f32 %v3226_v52, %v3104_v58 }
 0x163   :  { %v1317_v36 = vadd.f32 %v1189_v41, %v3342_v13  ;;  %v2683_v48 = vpop.eup %2682  ;;  %v1694_v60 = vadd.f32 1.0, %v2681_v22  ;;  %v1443_v50 = vmul.f32 0.7978846, %v1315_v29  ;;  %v1190_v45 = vmul.f32 %v1062_v34, %v3355_v18 }
 0x164   :  { %v3400_v37 = vpop.f32.mrb[28].mxu0  ;;  %v3402_v8 = vpop.f32.mrb[28].mxu1  ;;  %v1316_v19 = vadd.f32 %v1188_v33, %v3346_v7  ;;  %v1820_v41 = vmul.f32 %v1692_v40, %v796_v12  ;;  %v1695_v28 = vadd.f32 1.0, %v2683_v48  ;;  %v935_v52 = vmul.f32 0.044715, %v3386_v38 }
 0x165   :  { %4493 = vst [vmem:[#allocation16_spill] sm:$0xff] %v3400_v37  ;;  %4494 = vst [vmem:[#allocation17_spill] sm:$0xff] %v3402_v8  ;;  %v3406_v62 = vpop.f32.mrb[29].mxu0  ;;  %v3408_v27 = vpop.f32.mrb[29].mxu1  ;;  %v1445_v0 = vmul.f32 0.7978846, %v1317_v36  ;;  %v1822_v8 = vmul.f32 %v1694_v60, %v798_v21  ;;  %2690 = vtanh.f32 %v1443_v50  ;;  %v1318_v29 = vadd.f32 %v1190_v45, %v3355_v18 }
 0x166   :  { %4495 = vst [vmem:[#allocation18_spill] sm:$0xff] %v3406_v62  ;;  %4496 = vst [vmem:[#allocation19_spill] sm:$0xff] %v3408_v27  ;;  %v3411_v3 = vpop.f32.mrb[30].mxu0  ;;  %v2685_v37 = vpop.eup %2684  ;;  %v1444_v22 = vmul.f32 0.7978846, %v1316_v19  ;;  %v2519_v62 = vpack.c.bf16 %v1820_v41, %v1819_v20  ;;  %v800_v27 = vmul.f32 0.5, %v3293_v5  ;;  %v1063_v21 = vmul.f32 %v935_v52, %v3386_v38 }
 0x167   :  { %v3414_v33 = vpop.f32.mrb[30].mxu1  ;;  %v3416_v34 = vpop.f32.mrb[31].mxu0  ;;  %v802_v12 = vmul.f32 0.5, %v3316_v39  ;;  %2692 = vtanh.f32 %v1445_v0  ;;  %v2520_v36 = vpack.c.bf16 %v1822_v8, %v1821_v15  ;;  %v1446_v48 = vmul.f32 0.7978846, %v1318_v29 }
 0x168   :  { %v3420_v40 = vpop.f32.mrb[31].mxu1  ;;  %2694 = vtanh.f32 %v1444_v22  ;;  %v2687_v60 = vpop.eup %2686  ;;  %2325 = vst [vmem:[#allocation8 + $0x30] sm:$0xff] %v2519_v62  ;;  %v1823_v50 = vmul.f32 %v1695_v28, %v799_v9  ;;  %v1697_v19 = vadd.f32 1.0, %v2685_v37  ;;  %v803_v45 = vmul.f32 0.5, %v3336_v6 }
 0x169   :  { %v937_v20 = vmul.f32 0.044715, %v3393_v49  ;;  %2326 = vst [vmem:[#allocation8 + $0x38] sm:$0xff] %v2520_v36  ;;  %v1696_v5 = vadd.f32 1.0, %v2687_v60  ;;  %2696 = vtanh.f32 %v1446_v48  ;;  %v1191_v39 = vmul.f32 %v1063_v21, %v3386_v38 }
 0x16a   :  { %v936_v0 = vmul.f32 0.044715, %v3398_v44  ;;  %v805_v15 = vmul.f32 0.5, %v3342_v13  ;;  %v3431_v62 = vadd.f32 %v3228_v53, %v3106_v59  ;;  %v3435_v6 = vadd.f32 %v3232_v1, %v3100_v56 }
 0x16b   :  { %v1065_v8 = vmul.f32 %v937_v20, %v3393_v49  ;;  %v1824_v41 = vmul.f32 %v1696_v5, %v800_v27  ;;  %v1319_v28 = vadd.f32 %v1191_v39, %v3386_v38  ;;  %v3445_v13 = vadd.f32 %v3234_v63, %v3102_v57 }
 0x16c   :  { %v3437_v9 = vpop.f32.mrb[32].mxu0  ;;  %v3439_v37 = vpop.f32.mrb[32].mxu1  ;;  %v1064_v52 = vmul.f32 %v936_v0, %v3398_v44  ;;  %v1825_v1 = vmul.f32 %v1697_v19, %v3374_v23  ;;  %v804_v36 = vmul.f32 0.5, %v3346_v7  ;;  %v938_v27 = vmul.f32 0.044715, %v3431_v62 }
 0x16d   :  { %4497 = vst [vmem:[#allocation20_spill] sm:$0xff] %v3439_v37  ;;  %v3447_v22 = vpop.f32.mrb[33].mxu0  ;;  %v3449_v53 = vpop.f32.mrb[33].mxu1  ;;  %v1193_v48 = vmul.f32 %v1065_v8, %v3393_v49  ;;  %v2521_v20 = vpack.c.bf16 %v1824_v41, %v1823_v50  ;;  %v1447_v5 = vmul.f32 0.7978846, %v1319_v28  ;;  %v3469_v8 = vadd.f32 %v3238_v16, %v3104_v58 }
 0x16e   :  { %4498 = vst [vmem:[#allocation21_spill] sm:$0xff] %v3447_v22  ;;  %4499 = vst [vmem:[#allocation22_spill] sm:$0xff] %v3449_v53  ;;  %v2689_v29 = vpop.eup %2688  ;;  %v3455_v21 = vpop.f32.mrb[34].mxu0  ;;  %v1192_v39 = vmul.f32 %v1064_v52, %v3398_v44  ;;  %v1066_v7 = vmul.f32 %v938_v27, %v3431_v62  ;;  %v939_v19 = vmul.f32 0.044715, %v3435_v6 }
 0x16f   :  { %4500 = vst [vmem:[#allocation23_spill] sm:$0xff] %v3455_v21  ;;  %v3457_v60 = vpop.f32.mrb[34].mxu1  ;;  %v1698_v63 = vadd.f32 1.0, %v2689_v29  ;;  %v3460_v0 = vpop.f32.mrb[35].mxu0  ;;  %v1321_v23 = vadd.f32 %v1193_v48, %v3393_v49  ;;  %2327 = vst [vmem:[#allocation8 + $0x40] sm:$0xff] %v2521_v20  ;;  %2698 = vtanh.f32 %v1447_v5 }
 0x170   :  { %4501 = vst [vmem:[#allocation24_spill] sm:$0xff] %v3457_v60  ;;  %4502 = vst [vmem:[#allocation25_spill] sm:$0xff] %v3460_v0  ;;  %v3462_v53 = vpop.f32.mrb[35].mxu1  ;;  %v2691_v60 = vpop.eup %2690  ;;  %v1320_v41 = vadd.f32 %v1192_v39, %v3398_v44  ;;  %v941_v28 = vmul.f32 0.044715, %v3445_v13  ;;  %v1194_v48 = vmul.f32 %v1066_v7, %v3431_v62  ;;  %v1067_v27 = vmul.f32 %v939_v19, %v3435_v6 }
 0x171   :  { %4503 = vst [vmem:[#allocation26_spill] sm:$0xff] %v3462_v53  ;;  %v1826_v50 = vmul.f32 %v1698_v63, %v802_v12  ;;  %v2693_v52 = vpop.eup %2692  ;;  %v1699_v29 = vadd.f32 1.0, %v2691_v60  ;;  %v1449_v53 = vmul.f32 0.7978846, %v1321_v23  ;;  %v806_v23 = vmul.f32 0.5, %v3355_v18 }
 0x172   :  { %v2695_v0 = vpop.eup %2694  ;;  %v1701_v22 = vadd.f32 1.0, %v2693_v52  ;;  %v1448_v16 = vmul.f32 0.7978846, %v1320_v41  ;;  %v1069_v37 = vmul.f32 %v941_v28, %v3445_v13  ;;  %v1322_v63 = vadd.f32 %v1194_v48, %v3431_v62 }
 0x173   :  { %v2522_v21 = vpack.c.bf16 %v1826_v50, %v1825_v1  ;;  %v1827_v20 = vmul.f32 %v1699_v29, %v803_v45  ;;  %v1700_v12 = vadd.f32 1.0, %v2695_v0  ;;  %2700 = vtanh.f32 %v1449_v53  ;;  %v2697_v60 = vpop.eup %2696 }
 0x174   :  { %v3477_v5 = vpop.f32.mrb[36].mxu0  ;;  %v3479_v39 = vpop.f32.mrb[36].mxu1  ;;  %2702 = vtanh.f32 %v1448_v16  ;;  %v1195_v1 = vmul.f32 %v1067_v27, %v3435_v6  ;;  %v1197_v7 = vmul.f32 %v1069_v37, %v3445_v13  ;;  %v1829_v53 = vmul.f32 %v1701_v22, %v805_v15 }
 0x175   :  { %2328 = vst [vmem:[#allocation8 + $0x48] sm:$0xff] %v2522_v21  ;;  %v3484_v19 = vpop.f32.mrb[37].mxu0  ;;  %v3486_v45 = vpop.f32.mrb[37].mxu1  ;;  %v1828_v0 = vmul.f32 %v1700_v12, %v804_v36  ;;  %v1702_v50 = vadd.f32 1.0, %v2697_v60  ;;  %v1450_v41 = vmul.f32 0.7978846, %v1322_v63  ;;  %v3497_v37 = vadd.f32 %v3240_v17, %v3106_v59 }
 0x176   :  { %v3488_v28 = vpop.f32.mrb[38].mxu0  ;;  %v3490_v52 = vpop.f32.mrb[38].mxu1  ;;  %v1323_v21 = vadd.f32 %v1195_v1, %v3435_v6  ;;  %v1325_v18 = vadd.f32 %v1197_v7, %v3445_v13  ;;  %v940_v29 = vmul.f32 0.044715, %v3469_v8  ;;  %v3505_v27 = vadd.f32 %v3256_v42, %v3100_v56 }
 0x177   :  { %v3499_v48 = vpop.f32.mrb[39].mxu0  ;;  %v3501_v15 = vpop.f32.mrb[39].mxu1  ;;  %v2523_v22 = vpack.c.bf16 %v1828_v0, %v1827_v20  ;;  %v1830_v36 = vmul.f32 %v1702_v50, %v806_v23  ;;  %2704 = vtanh.f32 %v1450_v41  ;;  %v807_v16 = vmul.f32 0.5, %v3386_v38 }
 0x178   :  { %4504 = vst [vmem:[#allocation27_spill] sm:$0xff] %v3501_v15  ;;  %v1451_v12 = vmul.f32 0.7978846, %v1323_v21  ;;  %v1453_v63 = vmul.f32 0.7978846, %v1325_v18  ;;  %v1068_v60 = vmul.f32 %v940_v29, %v3469_v8  ;;  %v809_v1 = vmul.f32 0.5, %v3393_v49 }
 0x179   :  { %2329 = vst [vmem:[#allocation8 + $0x50] sm:$0xff] %v2523_v22  ;;  %v2524_v17 = vpack.c.bf16 %v1830_v36, %v1829_v53  ;;  %v942_v7 = vmul.f32 0.044715, %v3497_v37  ;;  %v943_v20 = vmul.f32 0.044715, %v3505_v27  ;;  %v2699_v23 = vpop.eup %2698  ;;  %v3515_v42 = vadd.f32 %v3258_v46, %v3102_v57 }
 0x17a   :  { %2706 = vtanh.f32 %v1451_v12  ;;  %v1196_v0 = vmul.f32 %v1068_v60, %v3469_v8  ;;  %v3519_v38 = vadd.f32 %v3266_v43, %v3104_v58  ;;  %v1703_v53 = vadd.f32 1.0, %v2699_v23 }
 0x17b   :  { %2330 = vst [vmem:[#allocation8 + $0x58] sm:$0xff] %v2524_v17  ;;  %v808_v49 = vmul.f32 0.5, %v3398_v44  ;;  %v1070_v50 = vmul.f32 %v942_v7, %v3497_v37  ;;  %v1071_v41 = vmul.f32 %v943_v20, %v3505_v27  ;;  %v810_v29 = vmul.f32 0.5, %v3431_v62 }
 0x17c   :  { %v3524_v21 = vpop.f32.mrb[40].mxu0  ;;  %v3526_v18 = vpop.f32.mrb[40].mxu1  ;;  %2708 = vtanh.f32 %v1453_v63  ;;  %v1324_v46 = vadd.f32 %v1196_v0, %v3469_v8  ;;  %v945_v43 = vmul.f32 0.044715, %v3515_v42  ;;  %v1831_v12 = vmul.f32 %v1703_v53, %v807_v16 }
 0x17d   :  { %4505 = vst [vmem:[#allocation28_spill] sm:$0xff] %v3524_v21  ;;  %4506 = vst [vmem:[#allocation29_spill] sm:$0xff] %v3526_v18  ;;  %v3531_v22 = vpop.f32.mrb[41].mxu0  ;;  %v3533_v36 = vpop.f32.mrb[41].mxu1  ;;  %v1198_v60 = vmul.f32 %v1070_v50, %v3497_v37  ;;  %v1199_v17 = vmul.f32 %v1071_v41, %v3505_v27  ;;  %v944_v7 = vmul.f32 0.044715, %v3519_v38 }
 0x17e   :  { %4507 = vst [vmem:[#allocation30_spill] sm:$0xff] %v3531_v22  ;;  %4508 = vst [vmem:[#allocation31_spill] sm:$0xff] %v3533_v36  ;;  %v2701_v44 = vpop.eup %2700  ;;  %v3538_v20 = vpop.f32.mrb[42].mxu0  ;;  %v1452_v23 = vmul.f32 0.7978846, %v1324_v46  ;;  %v1073_v0 = vmul.f32 %v945_v43, %v3515_v42  ;;  %v3543_v22 = vadd.f32 %v3268_v61, %v3106_v59 }
 0x17f   :  { %4509 = vst [vmem:[#allocation32_spill] sm:$0xff] %v3538_v20  ;;  %v2703_v62 = vpop.eup %2702  ;;  %v1705_v63 = vadd.f32 1.0, %v2701_v44  ;;  %v1326_v16 = vadd.f32 %v1198_v60, %v3497_v37  ;;  %v1327_v53 = vadd.f32 %v1199_v17, %v3505_v27  ;;  %v1072_v50 = vmul.f32 %v944_v7, %v3519_v38  ;;  %v3548_v41 = vpop.f32.mrb[42].mxu1 }
 0x180   :  { %v1704_v36 = vadd.f32 1.0, %v2703_v62  ;;  %v811_v20 = vmul.f32 0.5, %v3435_v6  ;;  %2710 = vtanh.f32 %v1452_v23  ;;  %v1201_v46 = vmul.f32 %v1073_v0, %v3515_v42  ;;  %v3553_v15 = vpop.f32.mrb[43].mxu0 }
 0x181   :  { %v1833_v18 = vmul.f32 %v1705_v63, %v809_v1  ;;  %v2705_v43 = vpop.eup %2704  ;;  %v1454_v21 = vmul.f32 0.7978846, %v1326_v16  ;;  %v1455_v61 = vmul.f32 0.7978846, %v1327_v53  ;;  %v1200_v62 = vmul.f32 %v1072_v50, %v3519_v38 }
 0x182   :  { %v1832_v44 = vmul.f32 %v1704_v36, %v808_v49  ;;  %v1706_v60 = vadd.f32 1.0, %v2705_v43  ;;  %v1329_v17 = vadd.f32 %v1201_v46, %v3515_v42  ;;  %v946_v7 = vmul.f32 0.044715, %v3543_v22 }
 0x183   :  { %v3559_v1 = vadd.f32 %v3273_v35, %v3100_v56  ;;  %2712 = vtanh.f32 %v1454_v21  ;;  %v1328_v63 = vadd.f32 %v1200_v62, %v3519_v38  ;;  %v3564_v49 = vadd.f32 %v3275_v51, %v3102_v57 }
 0x184   :  { %v2525_v6 = vpack.c.bf16 %v1832_v44, %v1831_v12  ;;  %v2707_v36 = vpop.eup %2706  ;;  %v1834_v23 = vmul.f32 %v1706_v60, %v810_v29  ;;  %2714 = vtanh.f32 %v1455_v61  ;;  %v1457_v0 = vmul.f32 0.7978846, %v1329_v17  ;;  %v3572_v29 = vpop.f32.mrb[43].mxu1 }
 0x185   :  { %v1074_v16 = vmul.f32 %v946_v7, %v3543_v22  ;;  %v813_v53 = vmul.f32 0.5, %v3445_v13  ;;  %v812_v35 = vmul.f32 0.5, %v3469_v8  ;;  %v1456_v50 = vmul.f32 0.7978846, %v1328_v63 }
 0x186   :  { %2331 = vst [vmem:[#allocation8 + $0x60] sm:$0xff] %v2525_v6  ;;  %v947_v21 = vmul.f32 0.044715, %v3559_v1  ;;  %v2709_v12 = vpop.eup %2708  ;;  %v2526_v46 = vpack.c.bf16 %v1834_v23, %v1833_v18  ;;  %v814_v43 = vmul.f32 0.5, %v3497_v37  ;;  %2716 = vtanh.f32 %v1457_v0 }
 0x187   :  { %v1202_v51 = vmul.f32 %v1074_v16, %v3543_v22  ;;  %v1707_v44 = vadd.f32 1.0, %v2707_v36  ;;  %v815_v61 = vmul.f32 0.5, %v3505_v27  ;;  %2718 = vtanh.f32 %v1456_v50 }
 0x188   :  { %v1075_v13 = vmul.f32 %v947_v21, %v3559_v1  ;;  %2332 = vst [vmem:[#allocation8 + $0x68] sm:$0xff] %v2526_v46  ;;  %v3577_v8 = vmul.f32 0.5, %v3515_v42  ;;  %v949_v18 = vmul.f32 0.044715, %v3564_v49  ;;  %v3583_v37 = vadd.f32 %v3283_v11, %v3104_v58 }
 0x189   :  { %v1330_v62 = vadd.f32 %v1202_v51, %v3543_v22  ;;  %v816_v60 = vmul.f32 0.5, %v3519_v38  ;;  %v3589_v27 = vadd.f32 %v3287_v25, %v3106_v59  ;;  %v3593_v42 = vadd.f32 %v3301_v47, %v3100_v56 }
 0x18a   :  { %v1203_v17 = vmul.f32 %v1075_v13, %v3559_v1  ;;  %v2711_v7 = vpop.eup %2710  ;;  %v1709_v6 = vadd.f32 1.0, %v2709_v12  ;;  %v1077_v36 = vmul.f32 %v949_v18, %v3564_v49  ;;  %v948_v11 = vmul.f32 0.044715, %v3583_v37 }
 0x18b   :  { %v1458_v63 = vmul.f32 0.7978846, %v1330_v62  ;;  %v1835_v23 = vmul.f32 %v1707_v44, %v811_v20  ;;  %v1708_v0 = vadd.f32 1.0, %v2711_v7  ;;  %v950_v16 = vmul.f32 0.044715, %v3589_v27 }
 0x18c   :  { %v1331_v38 = vadd.f32 %v1203_v17, %v3559_v1  ;;  %v1205_v25 = vmul.f32 %v1077_v36, %v3564_v49  ;;  %v1076_v50 = vmul.f32 %v948_v11, %v3583_v37  ;;  %v3603_v47 = vadd.f32 %v3303_v26, %v3102_v57  ;;  %v3610_v36 = vpop.f32.mrb[44].mxu0 }
 0x18d   :  { %2720 = vtanh.f32 %v1458_v63  ;;  %v2713_v21 = vpop.eup %2712  ;;  %v1836_v12 = vmul.f32 %v1708_v0, %v812_v35  ;;  %v1078_v51 = vmul.f32 %v950_v16, %v3589_v27  ;;  %v951_v20 = vmul.f32 0.044715, %v3593_v42  ;;  %v3612_v35 = vpop.f32.mrb[44].mxu1 }
 0x18e   :  { %v1459_v46 = vmul.f32 0.7978846, %v1331_v38  ;;  %v2715_v44 = vpop.eup %2714  ;;  %v1837_v13 = vmul.f32 %v1709_v6, %v813_v53  ;;  %v1710_v62 = vadd.f32 1.0, %v2713_v21  ;;  %v1333_v18 = vadd.f32 %v1205_v25, %v3564_v49  ;;  %v3616_v6 = vpop.f32.mrb[45].mxu0 }
 0x18f   :  { %v1204_v17 = vmul.f32 %v1076_v50, %v3583_v37  ;;  %v2527_v7 = vpack.c.bf16 %v1836_v12, %v1835_v23  ;;  %v1711_v63 = vadd.f32 1.0, %v2715_v44  ;;  %v1206_v26 = vmul.f32 %v1078_v51, %v3589_v27  ;;  %v3618_v25 = vpop.f32.mrb[45].mxu1 }
 0x190   :  { %2722 = vtanh.f32 %v1459_v46  ;;  %v2717_v11 = vpop.eup %2716  ;;  %v1838_v0 = vmul.f32 %v1710_v62, %v814_v43  ;;  %v1461_v38 = vmul.f32 0.7978846, %v1333_v18  ;;  %v1079_v53 = vmul.f32 %v951_v20, %v3593_v42  ;;  %4510 = vst [vmem:[#allocation33_spill] sm:$0xff] %v3618_v25  ;;  %v3625_v25 = vpop.f32.mrb[46].mxu0 }
 0x191   :  { %v1332_v16 = vadd.f32 %v1204_v17, %v3583_v37  ;;  %v2719_v23 = vpop.eup %2718  ;;  %2333 = vst [vmem:[#allocation8 + $0x70] sm:$0xff] %v2527_v7  ;;  %v1839_v50 = vmul.f32 %v1711_v63, %v815_v61  ;;  %v1713_v21 = vadd.f32 1.0, %v2717_v11  ;;  %v1334_v12 = vadd.f32 %v1206_v26, %v3589_v27  ;;  %v3635_v63 = vpop.f32.mrb[46].mxu1 }
 0x192   :  { %v953_v46 = vmul.f32 0.044715, %v3603_v47  ;;  %v2528_v51 = vpack.c.bf16 %v1838_v0, %v1837_v13  ;;  %v1712_v44 = vadd.f32 1.0, %v2719_v23  ;;  %2724 = vtanh.f32 %v1461_v38 }
 0x193   :  { %v1460_v43 = vmul.f32 0.7978846, %v1332_v16  ;;  %v818_v62 = vmul.f32 0.5, %v3543_v22  ;;  %v1462_v18 = vmul.f32 0.7978846, %v1334_v12  ;;  %v1207_v20 = vmul.f32 %v1079_v53, %v3593_v42 }
 0x194   :  { %v1081_v17 = vmul.f32 %v953_v46, %v3603_v47  ;;  %2334 = vst [vmem:[#allocation8 + $0x78] sm:$0xff] %v2528_v51  ;;  %v1840_v61 = vmul.f32 %v1712_v44, %v816_v60  ;;  %v3629_v7 = vadd.f32 %v3308_v10, %v3104_v58  ;;  %v3633_v13 = vadd.f32 %v3310_v4, %v3106_v59 }
 0x195   :  { %2726 = vtanh.f32 %v1460_v43  ;;  %v1335_v22 = vadd.f32 %v1207_v20, %v3593_v42  ;;  %v3641_v11 = vadd.f32 %v3318_v14, %v3100_v56  ;;  %v1841_v0 = vmul.f32 %v1713_v21, %v3577_v8 }
 0x196   :  { %2728 = vtanh.f32 %v1462_v18  ;;  %v1209_v26 = vmul.f32 %v1081_v17, %v3603_v47  ;;  %v2529_v10 = vpack.c.bf16 %v1840_v61, %v1839_v50  ;;  %v819_v38 = vmul.f32 0.5, %v3559_v1  ;;  %v3659_v17 = vpop.f32.mrb[47].mxu0  ;;  %v3661_v61 = vpop.f32.mrb[47].mxu1 }
 0x197   :  { %v2721_v60 = vpop.eup %2720  ;;  %v952_v4 = vmul.f32 0.044715, %v3629_v7  ;;  %v1463_v53 = vmul.f32 0.7978846, %v1335_v22  ;;  %v954_v12 = vmul.f32 0.044715, %v3633_v13  ;;  %v3653_v8 = vadd.f32 %v3320_v24, %v3102_v57 }
 0x198   :  { %v1714_v16 = vadd.f32 1.0, %v2721_v60  ;;  %v1337_v23 = vadd.f32 %v1209_v26, %v3603_v47  ;;  %2335 = vst [vmem:[#allocation8 + $0x80] sm:$0xff] %v2529_v10  ;;  %v821_v46 = vmul.f32 0.5, %v3564_v49  ;;  %v955_v51 = vmul.f32 0.044715, %v3641_v11 }
 0x199   :  { %v1080_v14 = vmul.f32 %v952_v4, %v3629_v7  ;;  %2730 = vtanh.f32 %v1463_v53  ;;  %v1082_v44 = vmul.f32 %v954_v12, %v3633_v13  ;;  %v820_v18 = vmul.f32 0.5, %v3583_v37 }
 0x19a   :  { %v2723_v1 = vpop.eup %2722  ;;  %v1842_v50 = vmul.f32 %v1714_v16, %v818_v62  ;;  %v1465_v21 = vmul.f32 0.7978846, %v1337_v23  ;;  %v1083_v49 = vmul.f32 %v955_v51, %v3641_v11  ;;  %v957_v62 = vmul.f32 0.044715, %v3653_v8 }
 0x19b   :  { %v1715_v43 = vadd.f32 1.0, %v2723_v1  ;;  %v1208_v20 = vmul.f32 %v1080_v14, %v3629_v7  ;;  %v1210_v24 = vmul.f32 %v1082_v44, %v3633_v13  ;;  %v822_v60 = vmul.f32 0.5, %v3589_v27 }
 0x19c   :  { %v2530_v22 = vpack.c.bf16 %v1842_v50, %v1841_v0  ;;  %2732 = vtanh.f32 %v1465_v21  ;;  %v2725_v26 = vpop.eup %2724  ;;  %v1211_v37 = vmul.f32 %v1083_v49, %v3641_v11  ;;  %v3670_v4 = vadd.f32 %v3323_v55, %v3104_v58 }
 0x19d   :  { %v1336_v10 = vadd.f32 %v1208_v20, %v3629_v7  ;;  %v1843_v16 = vmul.f32 %v1715_v43, %v819_v38  ;;  %v1717_v53 = vadd.f32 1.0, %v2725_v26  ;;  %v1338_v0 = vadd.f32 %v1210_v24, %v3633_v13  ;;  %v3684_v24 = vpop.f32.mrb[48].mxu1 }
 0x19e   :  { %2336 = vst [vmem:[#allocation8 + $0x88] sm:$0xff] %v2530_v22  ;;  %v1085_v23 = vmul.f32 %v957_v62, %v3653_v8  ;;  %v1339_v51 = vadd.f32 %v1211_v37, %v3641_v11  ;;  %v956_v27 = vmul.f32 0.044715, %v3670_v4  ;;  %v3678_v1 = vadd.f32 %v3325_v32, %v3106_v59  ;;  %v3682_v22 = vpop.f32.mrb[48].mxu0 }
 0x19f   :  { %v2727_v12 = vpop.eup %2726  ;;  %v1464_v14 = vmul.f32 0.7978846, %v1336_v10  ;;  %v1845_v55 = vmul.f32 %v1717_v53, %v821_v46  ;;  %v1466_v44 = vmul.f32 0.7978846, %v1338_v0  ;;  %v823_v26 = vmul.f32 0.5, %v3593_v42  ;;  %v3688_v46 = vpop.f32.mrb[49].mxu0 }
 0x1a0   :  { %v2729_v50 = vpop.eup %2728  ;;  %v1716_v21 = vadd.f32 1.0, %v2727_v12  ;;  %v1213_v38 = vmul.f32 %v1085_v23, %v3653_v8  ;;  %v1467_v20 = vmul.f32 0.7978846, %v1339_v51  ;;  %v1084_v49 = vmul.f32 %v956_v27, %v3670_v4 }
 0x1a1   :  { %v1718_v43 = vadd.f32 1.0, %v2729_v50  ;;  %2734 = vtanh.f32 %v1464_v14  ;;  %v958_v53 = vmul.f32 0.044715, %v3678_v1  ;;  %v3694_v14 = vadd.f32 %v3348_v30, %v3100_v56 }
 0x1a2   :  { %v1844_v62 = vmul.f32 %v1716_v21, %v820_v18  ;;  %2736 = vtanh.f32 %v1466_v44  ;;  %v1341_v32 = vadd.f32 %v1213_v38, %v3653_v8  ;;  %v1212_v37 = vmul.f32 %v1084_v49, %v3670_v4  ;;  %v3706_v44 = vpop.f32.mrb[49].mxu1 }
 0x1a3   :  { %v1846_v10 = vmul.f32 %v1718_v43, %v822_v60  ;;  %2738 = vtanh.f32 %v1467_v20  ;;  %v2731_v0 = vpop.eup %2730  ;;  %v3698_v42 = vadd.f32 %v3350_v54, %v3102_v57  ;;  %v825_v51 = vmul.f32 0.5, %v3603_v47 }
 0x1a4   :  { %v2531_v23 = vpack.c.bf16 %v1844_v62, %v1843_v16  ;;  %v1469_v12 = vmul.f32 0.7978846, %v1341_v32  ;;  %v1340_v60 = vadd.f32 %v1212_v37, %v3670_v4  ;;  %v1086_v27 = vmul.f32 %v958_v53, %v3678_v1  ;;  %v4511_v32 = vld [vmem:[#allocation12_spill] sm:$0xff]  ;;  %v3725_v37 = vpop.f32.mrb[50].mxu0 }
 0x1a5   :  { %v2532_v18 = vpack.c.bf16 %v1846_v10, %v1845_v55  ;;  %v824_v16 = vmul.f32 0.5, %v3629_v7  ;;  %v826_v21 = vmul.f32 0.5, %v3633_v13  ;;  %v959_v30 = vmul.f32 0.044715, %v3694_v14  ;;  %4512 = vst [vmem:[#allocation12_spill] sm:$0xff] %v3725_v37 }
 0x1a6   :  { %v2733_v50 = vpop.eup %2732  ;;  %2337 = vst [vmem:[#allocation8 + $0x90] sm:$0xff] %v2531_v23  ;;  %2740 = vtanh.f32 %v1469_v12  ;;  %v1719_v54 = vadd.f32 1.0, %v2731_v0  ;;  %v1468_v38 = vmul.f32 0.7978846, %v1340_v60  ;;  %v1214_v47 = vmul.f32 %v1086_v27, %v3678_v1 }
 0x1a7   :  { %2338 = vst [vmem:[#allocation8 + $0x98] sm:$0xff] %v2532_v18  ;;  %v1721_v55 = vadd.f32 1.0, %v2733_v50  ;;  %v1087_v43 = vmul.f32 %v959_v30, %v3694_v14  ;;  %v961_v20 = vmul.f32 0.044715, %v3698_v42  ;;  %v3713_v7 = vadd.f32 %v3357_v31, %v3104_v58 }
 0x1a8   :  { %v3717_v13 = vadd.f32 %v3359_v2, %v3106_v59  ;;  %v827_v49 = vmul.f32 0.5, %v3641_v11  ;;  %2742 = vtanh.f32 %v1468_v38  ;;  %v1342_v62 = vadd.f32 %v1214_v47, %v3678_v1  ;;  %v3735_v47 = vpop.f32.mrb[50].mxu1 }
 0x1a9   :  { %v3723_v10 = vadd.f32 %v4511_v32, %v3100_v56  ;;  %v829_v53 = vmul.f32 0.5, %v3653_v8  ;;  %v1215_v31 = vmul.f32 %v1087_v43, %v3694_v14  ;;  %v1089_v0 = vmul.f32 %v961_v20, %v3698_v42  ;;  %4513 = vst [vmem:[#allocation34_spill] sm:$0xff] %v3735_v47 }
 0x1aa   :  { %v960_v2 = vmul.f32 0.044715, %v3713_v7  ;;  %v1847_v12 = vmul.f32 %v1719_v54, %v823_v26  ;;  %v1849_v11 = vmul.f32 %v1721_v55, %v825_v51  ;;  %v1470_v18 = vmul.f32 0.7978846, %v1342_v62 }
 0x1ab   :  { %v2735_v23 = vpop.eup %2734  ;;  %v962_v60 = vmul.f32 0.044715, %v3717_v13  ;;  %v1343_v30 = vadd.f32 %v1215_v31, %v3694_v14  ;;  %v1217_v38 = vmul.f32 %v1089_v0, %v3698_v42  ;;  %v963_v26 = vmul.f32 0.044715, %v3723_v10  ;;  %v3741_v31 = vpop.f32.mrb[51].mxu0 }
 0x1ac   :  { %v2737_v27 = vpop.eup %2736  ;;  %v1720_v50 = vadd.f32 1.0, %v2735_v23  ;;  %v1088_v8 = vmul.f32 %v960_v2, %v3713_v7  ;;  %2744 = vtanh.f32 %v1470_v18  ;;  %v828_v54 = vmul.f32 0.5, %v3670_v4  ;;  %v3743_v0 = vpop.f32.mrb[51].mxu1 }
 0x1ad   :  { %v2739_v43 = vpop.eup %2738  ;;  %v1722_v20 = vadd.f32 1.0, %v2737_v27  ;;  %v1090_v32 = vmul.f32 %v962_v60, %v3717_v13  ;;  %v1471_v55 = vmul.f32 0.7978846, %v1343_v30  ;;  %v1345_v62 = vadd.f32 %v1217_v38, %v3698_v42 }
 0x1ae   :  { %v1848_v51 = vmul.f32 %v1720_v50, %v824_v16  ;;  %v1216_v23 = vmul.f32 %v1088_v8, %v3713_v7  ;;  %v1091_v18 = vmul.f32 %v963_v26, %v3723_v10  ;;  %v1723_v37 = vadd.f32 1.0, %v2739_v43  ;;  %v4514_v8 = vld [vmem:[#allocation13_spill] sm:$0xff] }
 0x1af   :  { %v1850_v2 = vmul.f32 %v1722_v20, %v826_v21  ;;  %v1218_v27 = vmul.f32 %v1090_v32, %v3717_v13  ;;  %2746 = vtanh.f32 %v1471_v55  ;;  %v1473_v16 = vmul.f32 0.7978846, %v1345_v62  ;;  %v4515_v32 = vld [vmem:[#allocation14_spill] sm:$0xff]  ;;  %v4516_v55 = vld [vmem:[#allocation15_spill] sm:$0xff] }
 0x1b0   :  { %v2741_v60 = vpop.eup %2740  ;;  %v2533_v47 = vpack.c.bf16 %v1848_v51, %v1847_v12  ;;  %v1344_v30 = vadd.f32 %v1216_v23, %v3713_v7  ;;  %v1219_v21 = vmul.f32 %v1091_v18, %v3723_v10  ;;  %v3753_v20 = vadd.f32 %v4514_v8, %v3102_v57 }
 0x1b1   :  { %v2534_v4 = vpack.c.bf16 %v1850_v2, %v1849_v11  ;;  %v1725_v50 = vadd.f32 1.0, %v2741_v60  ;;  %v1346_v38 = vadd.f32 %v1218_v27, %v3717_v13  ;;  %2748 = vtanh.f32 %v1473_v16 }
 0x1b2   :  { %2339 = vst [vmem:[#allocation8 + $0xa0] sm:$0xff] %v2533_v47  ;;  %v3757_v12 = vadd.f32 %v4515_v32, %v3104_v58  ;;  %v2743_v43 = vpop.eup %2742  ;;  %v830_v11 = vmul.f32 0.5, %v3678_v1  ;;  %v1472_v26 = vmul.f32 0.7978846, %v1344_v30  ;;  %v3762_v47 = vadd.f32 %v4516_v55, %v3106_v59 }
 0x1b3   :  { %2340 = vst [vmem:[#allocation8 + $0xa8] sm:$0xff] %v2534_v4  ;;  %v1474_v51 = vmul.f32 0.7978846, %v1346_v38  ;;  %v1851_v62 = vmul.f32 %v1723_v37, %v827_v49  ;;  %v1724_v2 = vadd.f32 1.0, %v2743_v43  ;;  %v1347_v23 = vadd.f32 %v1219_v21, %v3723_v10  ;;  %v4517_v37 = vld [vmem:[#allocation16_spill] sm:$0xff]  ;;  %v3780_v43 = vpop.f32.mrb[52].mxu0 }
 0x1b4   :  { %v965_v27 = vmul.f32 0.044715, %v3753_v20  ;;  %v1853_v18 = vmul.f32 %v1725_v50, %v829_v53  ;;  %v831_v60 = vmul.f32 0.5, %v3694_v14  ;;  %2750 = vtanh.f32 %v1472_v26  ;;  %v4518_v53 = vld [vmem:[#allocation17_spill] sm:$0xff]  ;;  %v3782_v26 = vpop.f32.mrb[52].mxu1 }
 0x1b5   :  { %v964_v16 = vmul.f32 0.044715, %v3757_v12  ;;  %v1852_v4 = vmul.f32 %v1724_v2, %v828_v54  ;;  %2752 = vtanh.f32 %v1474_v51  ;;  %v1475_v1 = vmul.f32 0.7978846, %v1347_v23  ;;  %4519 = vst [vmem:[#allocation13_spill] sm:$0xff] %v3782_v26 }
 0x1b6   :  { %v1093_v30 = vmul.f32 %v965_v27, %v3753_v20  ;;  %v2745_v38 = vpop.eup %2744  ;;  %v966_v49 = vmul.f32 0.044715, %v3762_v47  ;;  %v3773_v21 = vadd.f32 %v4517_v37, %v3100_v56  ;;  %v3777_v14 = vadd.f32 %v4518_v53, %v3102_v57 }
 0x1b7   :  { %v1092_v8 = vmul.f32 %v964_v16, %v3757_v12  ;;  %v2535_v50 = vpack.c.bf16 %v1852_v4, %v1851_v62  ;;  %v1726_v32 = vadd.f32 1.0, %v2745_v38  ;;  %2754 = vtanh.f32 %v1475_v1  ;;  %v3793_v38 = vpop.f32.mrb[53].mxu1 }
 0x1b8   :  { %v1221_v54 = vmul.f32 %v1093_v30, %v3753_v20  ;;  %v833_v51 = vmul.f32 0.5, %v3698_v42  ;;  %v1094_v2 = vmul.f32 %v966_v49, %v3762_v47  ;;  %v967_v23 = vmul.f32 0.044715, %v3773_v21  ;;  %v3791_v30 = vpop.f32.mrb[53].mxu0  ;;  %4521 = vst [vmem:[#allocation15_spill] sm:$0xff] %v3793_v38 }
 0x1b9   :  { %v1220_v55 = vmul.f32 %v1092_v8, %v3757_v12  ;;  %v2747_v27 = vpop.eup %2746  ;;  %2341 = vst [vmem:[#allocation8 + $0xb0] sm:$0xff] %v2535_v50  ;;  %v1854_v16 = vmul.f32 %v1726_v32, %v830_v11  ;;  %v832_v62 = vmul.f32 0.5, %v3713_v7  ;;  %v969_v1 = vmul.f32 0.044715, %v3777_v14  ;;  %4520 = vst [vmem:[#allocation14_spill] sm:$0xff] %v3791_v30  ;;  %v4522_v32 = vld [vmem:[#allocation18_spill] sm:$0xff] }
 0x1ba   :  { %v1349_v4 = vadd.f32 %v1221_v54, %v3753_v20  ;;  %v1727_v42 = vadd.f32 1.0, %v2747_v27  ;;  %v1222_v49 = vmul.f32 %v1094_v2, %v3762_v47  ;;  %v1095_v37 = vmul.f32 %v967_v23, %v3773_v21  ;;  %v3803_v26 = vpop.f32.mrb[54].mxu0 }
 0x1bb   :  { %v1348_v8 = vadd.f32 %v1220_v55, %v3757_v12  ;;  %v2749_v53 = vpop.eup %2748  ;;  %v2536_v50 = vpack.c.bf16 %v1854_v16, %v1853_v18  ;;  %v1097_v7 = vmul.f32 %v969_v1, %v3777_v14  ;;  %v3801_v54 = vadd.f32 %v4522_v32, %v3104_v58  ;;  %4523 = vst [vmem:[#allocation16_spill] sm:$0xff] %v3803_v26  ;;  %v3810_v26 = vpop.f32.mrb[54].mxu1 }
 0x1bc   :  { %v1477_v11 = vmul.f32 0.7978846, %v1349_v4  ;;  %v1729_v30 = vadd.f32 1.0, %v2749_v53  ;;  %v834_v27 = vmul.f32 0.5, %v3717_v13  ;;  %v1350_v55 = vadd.f32 %v1222_v49, %v3762_v47  ;;  %4524 = vst [vmem:[#allocation17_spill] sm:$0xff] %v3810_v26 }
 0x1bd   :  { %v1476_v38 = vmul.f32 0.7978846, %v1348_v8  ;;  %2342 = vst [vmem:[#allocation8 + $0xb8] sm:$0xff] %v2536_v50  ;;  %v1855_v2 = vmul.f32 %v1727_v42, %v831_v60  ;;  %v1223_v18 = vmul.f32 %v1095_v37, %v3773_v21  ;;  %v1225_v23 = vmul.f32 %v1097_v7, %v3777_v14  ;;  %v4525_v60 = vld [vmem:[#allocation19_spill] sm:$0xff] }
 0x1be   :  { %2756 = vtanh.f32 %v1477_v11  ;;  %v2751_v16 = vpop.eup %2750  ;;  %v1857_v4 = vmul.f32 %v1729_v30, %v833_v51  ;;  %v1478_v1 = vmul.f32 0.7978846, %v1350_v55  ;;  %v968_v32 = vmul.f32 0.044715, %v3801_v54 }
 0x1bf   :  { %2758 = vtanh.f32 %v1476_v38  ;;  %v2753_v53 = vpop.eup %2752  ;;  %v1728_v13 = vadd.f32 1.0, %v2751_v16  ;;  %v1351_v8 = vadd.f32 %v1223_v18, %v3773_v21  ;;  %v1353_v49 = vadd.f32 %v1225_v23, %v3777_v14 }
 0x1c0   :  { %v3816_v42 = vadd.f32 %v4525_v60, %v3106_v59  ;;  %v1730_v37 = vadd.f32 1.0, %v2753_v53  ;;  %2760 = vtanh.f32 %v1478_v1  ;;  %v1096_v51 = vmul.f32 %v968_v32, %v3801_v54 }
 0x1c1   :  { %v3821_v30 = vadd.f32 %v3411_v3, %v3100_v56  ;;  %v2755_v38 = vpop.eup %2754  ;;  %v1856_v50 = vmul.f32 %v1728_v13, %v832_v62  ;;  %v835_v11 = vmul.f32 0.5, %v3723_v10  ;;  %v1479_v7 = vmul.f32 0.7978846, %v1351_v8  ;;  %v3828_v3 = vpop.f32.mrb[55].mxu0 }
 0x1c2   :  { %v1481_v55 = vmul.f32 0.7978846, %v1353_v49  ;;  %v1858_v18 = vmul.f32 %v1730_v37, %v834_v27  ;;  %v837_v23 = vmul.f32 0.5, %v3753_v20  ;;  %v1224_v16 = vmul.f32 %v1096_v51, %v3801_v54  ;;  %v3842_v8 = vpop.f32.mrb[55].mxu1 }
 0x1c3   :  { %v970_v53 = vmul.f32 0.044715, %v3816_v42  ;;  %v2537_v1 = vpack.c.bf16 %v1856_v50, %v1855_v2  ;;  %v1731_v60 = vadd.f32 1.0, %v2755_v38  ;;  %2762 = vtanh.f32 %v1479_v7 }
 0x1c4   :  { %v971_v32 = vmul.f32 0.044715, %v3821_v30  ;;  %v2538_v26 = vpack.c.bf16 %v1858_v18, %v1857_v4  ;;  %v836_v62 = vmul.f32 0.5, %v3757_v12  ;;  %2764 = vtanh.f32 %v1481_v55 }
 0x1c5   :  { %v1352_v10 = vadd.f32 %v1224_v16, %v3801_v54  ;;  %2343 = vst [vmem:[#allocation8 + $0xc0] sm:$0xff] %v2537_v1  ;;  %v1098_v20 = vmul.f32 %v970_v53, %v3816_v42  ;;  %v3836_v2 = vadd.f32 %v3414_v33, %v3102_v57  ;;  %v3840_v13 = vadd.f32 %v3416_v34, %v3104_v58 }
 0x1c6   :  { %v1099_v27 = vmul.f32 %v971_v32, %v3821_v30  ;;  %2344 = vst [vmem:[#allocation8 + $0xc8] sm:$0xff] %v2538_v26  ;;  %v838_v12 = vmul.f32 0.5, %v3762_v47  ;;  %v839_v4 = vmul.f32 0.5, %v3773_v21  ;;  %v3848_v37 = vadd.f32 %v3420_v40, %v3106_v59 }
 0x1c7   :  { %v1480_v49 = vmul.f32 0.7978846, %v1352_v10  ;;  %v1859_v38 = vmul.f32 %v1731_v60, %v835_v11  ;;  %v1226_v33 = vmul.f32 %v1098_v20, %v3816_v42  ;;  %v973_v34 = vmul.f32 0.044715, %v3836_v2 }
 0x1c8   :  { %v2757_v51 = vpop.eup %2756  ;;  %v1227_v50 = vmul.f32 %v1099_v27, %v3821_v30  ;;  %v972_v47 = vmul.f32 0.044715, %v3840_v13  ;;  %v3856_v21 = vadd.f32 %v3437_v9, %v3100_v56  ;;  %v841_v1 = vmul.f32 0.5, %v3777_v14  ;;  %v3873_v14 = vpop.f32.mrb[56].mxu1 }
 0x1c9   :  { %v2759_v7 = vpop.eup %2758  ;;  %v1733_v55 = vadd.f32 1.0, %v2757_v51  ;;  %2766 = vtanh.f32 %v1480_v49  ;;  %v1354_v40 = vadd.f32 %v1226_v33, %v3816_v42  ;;  %v1101_v18 = vmul.f32 %v973_v34, %v3836_v2  ;;  %v3864_v49 = vpop.f32.mrb[56].mxu0  ;;  %4527 = vst [vmem:[#allocation18_spill] sm:$0xff] %v3873_v14 }
 0x1ca   :  { %v1732_v26 = vadd.f32 1.0, %v2759_v7  ;;  %v1355_v11 = vadd.f32 %v1227_v50, %v3821_v30  ;;  %v2761_v16 = vpop.eup %2760  ;;  %v1100_v60 = vmul.f32 %v972_v47, %v3840_v13  ;;  %v974_v32 = vmul.f32 0.044715, %v3848_v37  ;;  %v3875_v7 = vpop.f32.mrb[57].mxu0 }
 0x1cb   :  { %v1861_v53 = vmul.f32 %v1733_v55, %v837_v23  ;;  %v1734_v20 = vadd.f32 1.0, %v2761_v16  ;;  %v1482_v27 = vmul.f32 0.7978846, %v1354_v40  ;;  %v1229_v51 = vmul.f32 %v1101_v18, %v3836_v2  ;;  %v4526_v23 = vld [vmem:[#allocation20_spill] sm:$0xff]  ;;  %4528 = vst [vmem:[#allocation19_spill] sm:$0xff] %v3875_v7 }
 0x1cc   :  { %v1860_v10 = vmul.f32 %v1732_v26, %v836_v62  ;;  %v1483_v9 = vmul.f32 0.7978846, %v1355_v11  ;;  %v1228_v33 = vmul.f32 %v1100_v60, %v3840_v13  ;;  %v1102_v50 = vmul.f32 %v974_v32, %v3848_v37 }
 0x1cd   :  { %v3871_v34 = vadd.f32 %v4526_v23, %v3102_v57  ;;  %v2763_v62 = vpop.eup %2762  ;;  %v1862_v47 = vmul.f32 %v1734_v20, %v838_v12  ;;  %2768 = vtanh.f32 %v1482_v27  ;;  %v975_v26 = vmul.f32 0.044715, %v3856_v21 }
 0x1ce   :  { %v2539_v55 = vpack.c.bf16 %v1860_v10, %v1859_v38  ;;  %v2765_v40 = vpop.eup %2764  ;;  %v1735_v11 = vadd.f32 1.0, %v2763_v62  ;;  %2770 = vtanh.f32 %v1483_v9  ;;  %v1357_v18 = vadd.f32 %v1229_v51, %v3836_v2  ;;  %v3883_v38 = vpop.f32.mrb[57].mxu1 }
 0x1cf   :  { %v1356_v16 = vadd.f32 %v1228_v33, %v3840_v13  ;;  %v2540_v60 = vpack.c.bf16 %v1862_v47, %v1861_v53  ;;  %v840_v32 = vmul.f32 0.5, %v3801_v54  ;;  %v1230_v23 = vmul.f32 %v1102_v50, %v3848_v37  ;;  %4529 = vst [vmem:[#allocation20_spill] sm:$0xff] %v3883_v38  ;;  %v4530_v50 = vld [vmem:[#allocation21_spill] sm:$0xff] }
 0x1d0   :  { %2345 = vst [vmem:[#allocation8 + $0xd0] sm:$0xff] %v2539_v55  ;;  %v1103_v7 = vmul.f32 %v975_v26, %v3856_v21  ;;  %v1737_v12 = vadd.f32 1.0, %v2765_v40  ;;  %v842_v10 = vmul.f32 0.5, %v3816_v42  ;;  %v1485_v20 = vmul.f32 0.7978846, %v1357_v18  ;;  %v4531_v55 = vld [vmem:[#allocation22_spill] sm:$0xff] }
 0x1d1   :  { %v1484_v27 = vmul.f32 0.7978846, %v1356_v16  ;;  %2346 = vst [vmem:[#allocation8 + $0xd8] sm:$0xff] %v2540_v60  ;;  %v1863_v9 = vmul.f32 %v1735_v11, %v839_v4  ;;  %v1358_v51 = vadd.f32 %v1230_v23, %v3848_v37  ;;  %v977_v53 = vmul.f32 0.044715, %v3871_v34  ;;  %v4532_v42 = vld [vmem:[#allocation23_spill] sm:$0xff] }
 0x1d2   :  { %v1231_v33 = vmul.f32 %v1103_v7, %v3856_v21  ;;  %2772 = vtanh.f32 %v1485_v20  ;;  %v3891_v62 = vadd.f32 %v4530_v50, %v3104_v58  ;;  %v3895_v47 = vadd.f32 %v4531_v55, %v3106_v59  ;;  %v3901_v4 = vpop.f32.mrb[58].mxu0  ;;  %v3908_v20 = vpop.f32.mrb[58].mxu1 }
 0x1d3   :  { %v2767_v54 = vpop.eup %2766  ;;  %v3899_v26 = vadd.f32 %v4532_v42, %v3100_v56  ;;  %4533 = vst [vmem:[#allocation21_spill] sm:$0xff] %v3901_v4  ;;  %2774 = vtanh.f32 %v1484_v27  ;;  %v1486_v7 = vmul.f32 0.7978846, %v1358_v51  ;;  %v843_v18 = vmul.f32 0.5, %v3821_v30  ;;  %4534 = vst [vmem:[#allocation22_spill] sm:$0xff] %v3908_v20  ;;  %v4535_v4 = vld [vmem:[#allocation24_spill] sm:$0xff] }
 0x1d4   :  { %v1736_v40 = vadd.f32 1.0, %v2767_v54  ;;  %v1359_v11 = vadd.f32 %v1231_v33, %v3856_v21  ;;  %v845_v16 = vmul.f32 0.5, %v3836_v2  ;;  %v1105_v60 = vmul.f32 %v977_v53, %v3871_v34 }
 0x1d5   :  { %v976_v23 = vmul.f32 0.044715, %v3891_v62  ;;  %2776 = vtanh.f32 %v1486_v7  ;;  %v978_v42 = vmul.f32 0.044715, %v3895_v47  ;;  %v1865_v54 = vmul.f32 %v1737_v12, %v841_v1 }
 0x1d6   :  { %v1864_v50 = vmul.f32 %v1736_v40, %v840_v32  ;;  %v1487_v55 = vmul.f32 0.7978846, %v1359_v11  ;;  %v1233_v27 = vmul.f32 %v1105_v60, %v3871_v34  ;;  %v979_v30 = vmul.f32 0.044715, %v3899_v26  ;;  %v3919_v32 = vpop.f32.mrb[59].mxu0  ;;  %v3924_v60 = vpop.f32.mrb[59].mxu1 }
 0x1d7   :  { %v1104_v51 = vmul.f32 %v976_v23, %v3891_v62  ;;  %v2769_v33 = vpop.eup %2768  ;;  %v1106_v53 = vmul.f32 %v978_v42, %v3895_v47  ;;  %v3917_v20 = vadd.f32 %v4535_v4, %v3102_v57  ;;  %4536 = vst [vmem:[#allocation23_spill] sm:$0xff] %v3919_v32  ;;  %4537 = vst [vmem:[#allocation24_spill] sm:$0xff] %v3924_v60  ;;  %v844_v23 = vmul.f32 0.5, %v3840_v13 }
 0x1d8   :  { %v2541_v2 = vpack.c.bf16 %v1864_v50, %v1863_v9  ;;  %2778 = vtanh.f32 %v1487_v55  ;;  %v2771_v40 = vpop.eup %2770  ;;  %v1738_v7 = vadd.f32 1.0, %v2769_v33  ;;  %v1361_v1 = vadd.f32 %v1233_v27, %v3871_v34 }
 0x1d9   :  { %v1232_v12 = vmul.f32 %v1104_v51, %v3891_v62  ;;  %v1107_v11 = vmul.f32 %v979_v30, %v3899_v26  ;;  %v1739_v9 = vadd.f32 1.0, %v2771_v40  ;;  %v1234_v50 = vmul.f32 %v1106_v53, %v3895_v47 }
 0x1da   :  { %2347 = vst [vmem:[#allocation8 + $0xe0] sm:$0xff] %v2541_v2  ;;  %v981_v4 = vmul.f32 0.044715, %v3917_v20  ;;  %v1866_v55 = vmul.f32 %v1738_v7, %v842_v10  ;;  %v1489_v42 = vmul.f32 0.7978846, %v1361_v1  ;;  %v846_v51 = vmul.f32 0.5, %v3848_v37 }
 0x1db   :  { %v1360_v33 = vadd.f32 %v1232_v12, %v3891_v62  ;;  %v1235_v27 = vmul.f32 %v1107_v11, %v3899_v26  ;;  %v1362_v30 = vadd.f32 %v1234_v50, %v3895_v47  ;;  %v4538_v2 = vld [vmem:[#allocation25_spill] sm:$0xff]  ;;  %v1867_v1 = vmul.f32 %v1739_v9, %v843_v18  ;;  %v4539_v18 = vld [vmem:[#allocation26_spill] sm:$0xff] }
 0x1dc   :  { %v1109_v60 = vmul.f32 %v981_v4, %v3917_v20  ;;  %v3936_v40 = vadd.f32 %v4538_v2, %v3104_v58  ;;  %v2773_v13 = vpop.eup %2772  ;;  %v2542_v53 = vpack.c.bf16 %v1866_v55, %v1865_v54  ;;  %2780 = vtanh.f32 %v1489_v42  ;;  %v3941_v2 = vpop.f32.mrb[60].mxu0 }
 0x1dd   :  { %v1488_v32 = vmul.f32 0.7978846, %v1360_v33  ;;  %v1363_v10 = vadd.f32 %v1235_v27, %v3899_v26  ;;  %v2775_v7 = vpop.eup %2774  ;;  %v1741_v12 = vadd.f32 1.0, %v2773_v13  ;;  %v1490_v11 = vmul.f32 0.7978846, %v1362_v30  ;;  %v3950_v27 = vpop.f32.mrb[60].mxu1 }
 0x1de   :  { %v1237_v37 = vmul.f32 %v1109_v60, %v3917_v20  ;;  %2348 = vst [vmem:[#allocation8 + $0xe8] sm:$0xff] %v2542_v53  ;;  %v1740_v50 = vadd.f32 1.0, %v2775_v7  ;;  %v980_v38 = vmul.f32 0.044715, %v3936_v40  ;;  %v847_v54 = vmul.f32 0.5, %v3856_v21 }
 0x1df   :  { %2782 = vtanh.f32 %v1488_v32  ;;  %v1491_v4 = vmul.f32 0.7978846, %v1363_v10  ;;  %v2777_v14 = vpop.eup %2776  ;;  %v3947_v9 = vadd.f32 %v4539_v18, %v3106_v59  ;;  %v1869_v42 = vmul.f32 %v1741_v12, %v845_v16  ;;  %v3962_v12 = vpop.f32.mrb[61].mxu0 }
 0x1e0   :  { %2784 = vtanh.f32 %v1490_v11  ;;  %v1365_v55 = vadd.f32 %v1237_v37, %v3917_v20  ;;  %v1868_v60 = vmul.f32 %v1740_v50, %v844_v23  ;;  %v1742_v33 = vadd.f32 1.0, %v2777_v14  ;;  %v3964_v37 = vpop.f32.mrb[61].mxu1 }
 0x1e1   :  { %v1108_v32 = vmul.f32 %v980_v38, %v3936_v40  ;;  %2786 = vtanh.f32 %v1491_v4  ;;  %v982_v53 = vmul.f32 0.044715, %v3947_v9  ;;  %v3955_v21 = vadd.f32 %v3477_v5, %v3100_v56 }
 0x1e2   :  { %v2779_v30 = vpop.eup %2778  ;;  %v1493_v13 = vmul.f32 0.7978846, %v1365_v55  ;;  %v2543_v10 = vpack.c.bf16 %v1868_v60, %v1867_v1  ;;  %v1870_v7 = vmul.f32 %v1742_v33, %v846_v51  ;;  %v849_v11 = vmul.f32 0.5, %v3871_v34 }
 0x1e3   :  { %v1236_v16 = vmul.f32 %v1108_v32, %v3936_v40  ;;  %v848_v14 = vmul.f32 0.5, %v3891_v62  ;;  %v1110_v38 = vmul.f32 %v982_v53, %v3947_v9  ;;  %v983_v23 = vmul.f32 0.044715, %v3955_v21 }
 0x1e4   :  { %2788 = vtanh.f32 %v1493_v13  ;;  %2349 = vst [vmem:[#allocation8 + $0xf0] sm:$0xff] %v2543_v10  ;;  %v2544_v5 = vpack.c.bf16 %v1870_v7, %v1869_v42  ;;  %v1743_v50 = vadd.f32 1.0, %v2779_v30  ;;  %v3969_v34 = vadd.f32 %v3479_v39, %v3102_v57 }
 0x1e5   :  { %v1364_v51 = vadd.f32 %v1236_v16, %v3936_v40  ;;  %v850_v62 = vmul.f32 0.5, %v3895_v47  ;;  %v1238_v1 = vmul.f32 %v1110_v38, %v3947_v9  ;;  %v1111_v4 = vmul.f32 %v983_v23, %v3955_v21  ;;  %v3984_v47 = vpop.f32.mrb[62].mxu0  ;;  %v3991_v16 = vpop.f32.mrb[62].mxu1 }
 0x1e6   :  { %v3976_v55 = vadd.f32 %v3484_v19, %v3104_v58  ;;  %v2781_v18 = vpop.eup %2780  ;;  %2350 = vst [vmem:[#allocation8 + $0xf8] sm:$0xff] %v2544_v5  ;;  %v851_v42 = vmul.f32 0.5, %v3899_v26  ;;  %v985_v33 = vmul.f32 0.044715, %v3969_v34  ;;  %v3982_v39 = vadd.f32 %v3486_v45, %v3106_v59 }
 0x1e7   :  { %v1492_v60 = vmul.f32 0.7978846, %v1364_v51  ;;  %v1745_v32 = vadd.f32 1.0, %v2781_v18  ;;  %v853_v30 = vmul.f32 0.5, %v3917_v20  ;;  %v1366_v13 = vadd.f32 %v1238_v1, %v3947_v9 }
 0x1e8   :  { %v1239_v19 = vmul.f32 %v1111_v4, %v3955_v21  ;;  %v1871_v10 = vmul.f32 %v1743_v50, %v847_v54  ;;  %v1113_v26 = vmul.f32 %v985_v33, %v3969_v34  ;;  %v984_v7 = vmul.f32 0.044715, %v3976_v55 }
 0x1e9   :  { %v2783_v53 = vpop.eup %2782  ;;  %2790 = vtanh.f32 %v1492_v60  ;;  %v1873_v38 = vmul.f32 %v1745_v32, %v849_v11  ;;  %v1494_v5 = vmul.f32 0.7978846, %v1366_v13  ;;  %v986_v54 = vmul.f32 0.044715, %v3982_v39 }
 0x1ea   :  { %v2785_v45 = vpop.eup %2784  ;;  %v1744_v23 = vadd.f32 1.0, %v2783_v53  ;;  %v1367_v51 = vadd.f32 %v1239_v19, %v3955_v21  ;;  %v1241_v1 = vmul.f32 %v1113_v26, %v3969_v34  ;;  %v1112_v4 = vmul.f32 %v984_v7, %v3976_v55 }
 0x1eb   :  { %v1746_v20 = vadd.f32 1.0, %v2785_v45  ;;  %v2787_v50 = vpop.eup %2786  ;;  %2792 = vtanh.f32 %v1494_v5  ;;  %v3999_v33 = vadd.f32 %v3488_v28, %v3100_v56  ;;  %v1114_v19 = vmul.f32 %v986_v54, %v3982_v39 }
 0x1ec   :  { %v1872_v18 = vmul.f32 %v1744_v23, %v848_v14  ;;  %v1495_v60 = vmul.f32 0.7978846, %v1367_v51  ;;  %v1369_v32 = vadd.f32 %v1241_v1, %v3969_v34  ;;  %v1240_v13 = vmul.f32 %v1112_v4, %v3976_v55  ;;  %v4006_v14 = vpop.f32.mrb[63].mxu0  ;;  %v4009_v51 = vpop.f32.mrb[63].mxu1  ;;  %v4540_v4 = vld [vmem:[#allocation27_spill] sm:$0xff] }
 0x1ed   :  { %v1874_v11 = vmul.f32 %v1746_v20, %v850_v62  ;;  %v852_v7 = vmul.f32 0.5, %v3936_v40  ;;  %v854_v45 = vmul.f32 0.5, %v3947_v9  ;;  %v1747_v5 = vadd.f32 1.0, %v2787_v50 }
 0x1ee   :  { %v2789_v53 = vpop.eup %2788  ;;  %v2545_v26 = vpack.c.bf16 %v1872_v18, %v1871_v10  ;;  %2794 = vtanh.f32 %v1495_v60  ;;  %v1497_v28 = vmul.f32 0.7978846, %v1369_v32  ;;  %v1368_v62 = vadd.f32 %v1240_v13, %v3976_v55 }
 0x1ef   :  { %v2546_v23 = vpack.c.bf16 %v1874_v11, %v1873_v38  ;;  %v1242_v20 = vmul.f32 %v1114_v19, %v3982_v39  ;;  %v987_v1 = vmul.f32 0.044715, %v3999_v33  ;;  %v4015_v40 = vadd.f32 %v3490_v52, %v3102_v57 }
 0x1f0   :  { %2351 = vst [vmem:[#allocation8 + $0x100] sm:$0xff] %v2545_v26  ;;  %v4019_v9 = vadd.f32 %v3499_v48, %v3104_v58  ;;  %v1749_v10 = vadd.f32 1.0, %v2789_v53  ;;  %2796 = vtanh.f32 %v1497_v28  ;;  %v1496_v38 = vmul.f32 0.7978846, %v1368_v62 }
 0x1f1   :  { %2352 = vst [vmem:[#allocation8 + $0x108] sm:$0xff] %v2546_v23  ;;  %v4023_v54 = vadd.f32 %v4540_v4, %v3106_v59  ;;  %v855_v50 = vmul.f32 0.5, %v3955_v21  ;;  %v1370_v18 = vadd.f32 %v1242_v20, %v3982_v39  ;;  %v1115_v60 = vmul.f32 %v987_v1, %v3999_v33  ;;  %v4541_v20 = vld [vmem:[#allocation28_spill] sm:$0xff] }
 0x1f2   :  { %v989_v52 = vmul.f32 0.044715, %v4015_v40  ;;  %v1875_v32 = vmul.f32 %v1747_v5, %v851_v42  ;;  %v857_v48 = vmul.f32 0.5, %v3969_v34  ;;  %2798 = vtanh.f32 %v1496_v38 }
 0x1f3   :  { %v2791_v11 = vpop.eup %2790  ;;  %v988_v13 = vmul.f32 0.044715, %v4019_v9  ;;  %v1498_v53 = vmul.f32 0.7978846, %v1370_v18  ;;  %v1243_v26 = vmul.f32 %v1115_v60, %v3999_v33  ;;  %v1877_v21 = vmul.f32 %v1749_v10, %v853_v30  ;;  %v4542_v10 = vld [vmem:[#allocation29_spill] sm:$0xff] }
 0x1f4   :  { %v1748_v19 = vadd.f32 1.0, %v2791_v11  ;;  %v1117_v23 = vmul.f32 %v989_v52, %v4015_v40  ;;  %v990_v62 = vmul.f32 0.044715, %v4023_v54  ;;  %v4037_v1 = vadd.f32 %v4541_v20, %v3100_v56 }
 0x1f5   :  { %v1116_v28 = vmul.f32 %v988_v13, %v4019_v9  ;;  %v2793_v42 = vpop.eup %2792  ;;  %2800 = vtanh.f32 %v1498_v53  ;;  %v1371_v5 = vadd.f32 %v1243_v26, %v3999_v33  ;;  %v4045_v60 = vadd.f32 %v4542_v10, %v3102_v57 }
 0x1f6   :  { %v1876_v34 = vmul.f32 %v1748_v19, %v852_v7  ;;  %v1245_v38 = vmul.f32 %v1117_v23, %v4015_v40  ;;  %v1750_v4 = vadd.f32 1.0, %v2793_v42  ;;  %v1118_v30 = vmul.f32 %v990_v62, %v4023_v54 }
 0x1f7   :  { %v1244_v18 = vmul.f32 %v1116_v28, %v4019_v9  ;;  %v1499_v13 = vmul.f32 0.7978846, %v1371_v5  ;;  %v991_v7 = vmul.f32 0.044715, %v4037_v1  ;;  %v856_v53 = vmul.f32 0.5, %v3976_v55 }
 0x1f8   :  { %v2795_v52 = vpop.eup %2794  ;;  %v2547_v11 = vpack.c.bf16 %v1876_v34, %v1875_v32  ;;  %v1373_v20 = vadd.f32 %v1245_v38, %v4015_v40  ;;  %v1878_v19 = vmul.f32 %v1750_v4, %v854_v45  ;;  %v1246_v23 = vmul.f32 %v1118_v30, %v4023_v54 }
 0x1f9   :  { %v1372_v26 = vadd.f32 %v1244_v18, %v4019_v9  ;;  %v1751_v28 = vadd.f32 1.0, %v2795_v52  ;;  %2802 = vtanh.f32 %v1499_v13  ;;  %v1119_v42 = vmul.f32 %v991_v7, %v4037_v1  ;;  %v4543_v52 = vld [vmem:[#allocation30_spill] sm:$0xff] }
 0x1fa   :  { %2353 = vst [vmem:[#allocation8 + $0x110] sm:$0xff] %v2547_v11  ;;  %v1501_v62 = vmul.f32 0.7978846, %v1373_v20  ;;  %v2797_v10 = vpop.eup %2796  ;;  %v2548_v32 = vpack.c.bf16 %v1878_v19, %v1877_v21  ;;  %v858_v34 = vmul.f32 0.5, %v3982_v39  ;;  %v1374_v38 = vadd.f32 %v1246_v23, %v4023_v54  ;;  %v4544_v21 = vld [vmem:[#allocation31_spill] sm:$0xff] }
 0x1fb   :  { %v1500_v5 = vmul.f32 0.7978846, %v1372_v26  ;;  %v1753_v45 = vadd.f32 1.0, %v2797_v10  ;;  %v1247_v55 = vmul.f32 %v1119_v42, %v4037_v1  ;;  %v993_v4 = vmul.f32 0.044715, %v4045_v60 }
 0x1fc   :  { %2804 = vtanh.f32 %v1501_v62  ;;  %v2799_v18 = vpop.eup %2798  ;;  %2354 = vst [vmem:[#allocation8 + $0x118] sm:$0xff] %v2548_v32  ;;  %v1502_v30 = vmul.f32 0.7978846, %v1374_v38  ;;  %v4059_v11 = vadd.f32 %v4543_v52, %v3104_v58  ;;  %v4063_v39 = vadd.f32 %v4544_v21, %v3106_v59 }
 0x1fd   :  { %2806 = vtanh.f32 %v1500_v5  ;;  %v1879_v13 = vmul.f32 %v1751_v28, %v855_v50  ;;  %v1752_v20 = vadd.f32 1.0, %v2799_v18  ;;  %v1375_v7 = vadd.f32 %v1247_v55, %v4037_v1  ;;  %v4545_v28 = vld [vmem:[#allocation32_spill] sm:$0xff] }
 0x1fe   :  { %v1121_v19 = vmul.f32 %v993_v4, %v4045_v60  ;;  %v1881_v26 = vmul.f32 %v1753_v45, %v857_v48  ;;  %v859_v23 = vmul.f32 0.5, %v3999_v33  ;;  %2808 = vtanh.f32 %v1502_v30 }
 0x1ff   :  { %v992_v62 = vmul.f32 0.044715, %v4059_v11  ;;  %v2801_v42 = vpop.eup %2800  ;;  %v1880_v10 = vmul.f32 %v1752_v20, %v856_v53  ;;  %v1503_v32 = vmul.f32 0.7978846, %v1375_v7  ;;  %v994_v38 = vmul.f32 0.044715, %v4063_v39 }
 0x200   :  { %v1249_v5 = vmul.f32 %v1121_v19, %v4045_v60  ;;  %v1754_v52 = vadd.f32 1.0, %v2801_v42  ;;  %v4074_v55 = vadd.f32 %v4545_v28, %v3100_v56  ;;  %v4078_v33 = vadd.f32 %v3548_v41, %v3102_v57 }
 0x201   :  { %v1120_v50 = vmul.f32 %v992_v62, %v4059_v11  ;;  %v2549_v48 = vpack.c.bf16 %v1880_v10, %v1879_v13  ;;  %2810 = vtanh.f32 %v1503_v32  ;;  %v1122_v45 = vmul.f32 %v994_v38, %v4063_v39 }
 0x202   :  { %v1377_v53 = vadd.f32 %v1249_v5, %v4045_v60  ;;  %v1882_v4 = vmul.f32 %v1754_v52, %v858_v34  ;;  %v861_v18 = vmul.f32 0.5, %v4015_v40  ;;  %v995_v21 = vmul.f32 0.044715, %v4074_v55 }
 0x203   :  { %v1248_v30 = vmul.f32 %v1120_v50, %v4059_v11  ;;  %v2803_v20 = vpop.eup %2802  ;;  %2355 = vst [vmem:[#allocation8 + $0x120] sm:$0xff] %v2549_v48  ;;  %v860_v7 = vmul.f32 0.5, %v4019_v9  ;;  %v1250_v41 = vmul.f32 %v1122_v45, %v4063_v39  ;;  %v997_v13 = vmul.f32 0.044715, %v4078_v33 }
 0x204   :  { %v1505_v19 = vmul.f32 0.7978846, %v1377_v53  ;;  %v2550_v62 = vpack.c.bf16 %v1882_v4, %v1881_v26  ;;  %v1755_v42 = vadd.f32 1.0, %v2803_v20  ;;  %v1123_v34 = vmul.f32 %v995_v21, %v4074_v55 }
 0x205   :  { %v1376_v10 = vadd.f32 %v1248_v30, %v4059_v11  ;;  %v1378_v32 = vadd.f32 %v1250_v41, %v4063_v39  ;;  %v1125_v5 = vmul.f32 %v997_v13, %v4078_v33  ;;  %v4094_v9 = vadd.f32 %v3553_v15, %v3104_v58 }
 0x206   :  { %v2805_v40 = vpop.eup %2804  ;;  %2812 = vtanh.f32 %v1505_v19  ;;  %2356 = vst [vmem:[#allocation8 + $0x128] sm:$0xff] %v2550_v62  ;;  %v862_v26 = vmul.f32 0.5, %v4023_v54  ;;  %v1251_v28 = vmul.f32 %v1123_v34, %v4074_v55  ;;  %v1883_v48 = vmul.f32 %v1755_v42, %v859_v23 }
 0x207   :  { %v2807_v38 = vpop.eup %2806  ;;  %v1757_v52 = vadd.f32 1.0, %v2805_v40  ;;  %v1504_v50 = vmul.f32 0.7978846, %v1376_v10  ;;  %v1506_v45 = vmul.f32 0.7978846, %v1378_v32  ;;  %v1253_v4 = vmul.f32 %v1125_v5, %v4078_v33 }
 0x208   :  { %v1756_v53 = vadd.f32 1.0, %v2807_v38  ;;  %v2809_v30 = vpop.eup %2808  ;;  %v1379_v20 = vadd.f32 %v1251_v28, %v4074_v55  ;;  %v996_v15 = vmul.f32 0.044715, %v4094_v9  ;;  %v4105_v23 = vadd.f32 %v3572_v29, %v3106_v59 }
 0x209   :  { %v1885_v21 = vmul.f32 %v1757_v52, %v861_v18  ;;  %2814 = vtanh.f32 %v1504_v50  ;;  %v1758_v41 = vadd.f32 1.0, %v2809_v30  ;;  %v1381_v54 = vadd.f32 %v1253_v4, %v4078_v33  ;;  %v4546_v30 = vld [vmem:[#allocation33_spill] sm:$0xff] }
 0x20a   :  { %v1884_v19 = vmul.f32 %v1756_v53, %v860_v7  ;;  %2816 = vtanh.f32 %v1506_v45  ;;  %v1507_v13 = vmul.f32 0.7978846, %v1379_v20  ;;  %v1124_v62 = vmul.f32 %v996_v15, %v4094_v9 }
 0x20b   :  { %v4109_v18 = vadd.f32 %v3610_v36, %v3100_v56  ;;  %v2811_v42 = vpop.eup %2810  ;;  %v1886_v34 = vmul.f32 %v1758_v41, %v862_v26  ;;  %v1509_v40 = vmul.f32 0.7978846, %v1381_v54  ;;  %v4113_v7 = vadd.f32 %v3612_v35, %v3102_v57 }
 0x20c   :  { %v2551_v10 = vpack.c.bf16 %v1884_v19, %v1883_v48  ;;  %v863_v32 = vmul.f32 0.5, %v4037_v1  ;;  %v865_v5 = vmul.f32 0.5, %v4045_v60  ;;  %2818 = vtanh.f32 %v1507_v13 }
 0x20d   :  { %v1252_v29 = vmul.f32 %v1124_v62, %v4094_v9  ;;  %v2552_v38 = vpack.c.bf16 %v1886_v34, %v1885_v21  ;;  %v864_v36 = vmul.f32 0.5, %v4059_v11  ;;  %v866_v52 = vmul.f32 0.5, %v4063_v39 }
 0x20e   :  { %2357 = vst [vmem:[#allocation8 + $0x130] sm:$0xff] %v2551_v10  ;;  %v998_v26 = vmul.f32 0.044715, %v4105_v23  ;;  %v1759_v50 = vadd.f32 1.0, %v2811_v42  ;;  %2820 = vtanh.f32 %v1509_v40  ;;  %v999_v28 = vmul.f32 0.044715, %v4109_v18 }
 0x20f   :  { %v1380_v35 = vadd.f32 %v1252_v29, %v4094_v9  ;;  %2358 = vst [vmem:[#allocation8 + $0x138] sm:$0xff] %v2552_v38  ;;  %v867_v60 = vmul.f32 0.5, %v4074_v55  ;;  %v1001_v53 = vmul.f32 0.044715, %v4113_v7  ;;  %v4128_v11 = vadd.f32 %v3616_v6, %v3104_v58 }
 0x210   :  { %v2813_v1 = vpop.eup %2812  ;;  %v1126_v48 = vmul.f32 %v998_v26, %v4105_v23  ;;  %v1127_v4 = vmul.f32 %v999_v28, %v4109_v18  ;;  %v4133_v21 = vadd.f32 %v4546_v30, %v3106_v59  ;;  %v4136_v20 = vmul.f32 0.5, %v4078_v33 }
 0x211   :  { %v1761_v39 = vadd.f32 1.0, %v2813_v1  ;;  %v1508_v45 = vmul.f32 0.7978846, %v1380_v35  ;;  %v1129_v15 = vmul.f32 %v1001_v53, %v4113_v7  ;;  %v1000_v19 = vmul.f32 0.044715, %v4128_v11 }
 0x212   :  { %v1254_v55 = vmul.f32 %v1126_v48, %v4105_v23  ;;  %v1887_v6 = vmul.f32 %v1759_v50, %v863_v32  ;;  %v1255_v54 = vmul.f32 %v1127_v4, %v4109_v18  ;;  %v4144_v13 = vadd.f32 %v3625_v25, %v3100_v56 }
 0x213   :  { %v2815_v41 = vpop.eup %2814  ;;  %2822 = vtanh.f32 %v1508_v45  ;;  %v1257_v10 = vmul.f32 %v1129_v15, %v4113_v7  ;;  %v1128_v34 = vmul.f32 %v1000_v19, %v4128_v11  ;;  %v1889_v40 = vmul.f32 %v1761_v39, %v865_v5 }
 0x214   :  { %v2817_v62 = vpop.eup %2816  ;;  %v1760_v42 = vadd.f32 1.0, %v2815_v41  ;;  %v1382_v33 = vadd.f32 %v1254_v55, %v4105_v23  ;;  %v1383_v38 = vadd.f32 %v1255_v54, %v4109_v18  ;;  %v1002_v32 = vmul.f32 0.044715, %v4133_v21 }
 0x215   :  { %v1762_v29 = vadd.f32 1.0, %v2817_v62  ;;  %v1385_v35 = vadd.f32 %v1257_v10, %v4113_v7  ;;  %v1256_v25 = vmul.f32 %v1128_v34, %v4128_v11  ;;  %v1003_v45 = vmul.f32 0.044715, %v4144_v13 }
 0x216   :  { %v1888_v26 = vmul.f32 %v1760_v42, %v864_v36  ;;  %v1510_v50 = vmul.f32 0.7978846, %v1382_v33  ;;  %v2819_v28 = vpop.eup %2818  ;;  %v1511_v48 = vmul.f32 0.7978846, %v1383_v38  ;;  %v1130_v53 = vmul.f32 %v1002_v32, %v4133_v21 }
 0x217   :  { %v1890_v1 = vmul.f32 %v1762_v29, %v866_v52  ;;  %v868_v5 = vmul.f32 0.5, %v4094_v9  ;;  %v1513_v39 = vmul.f32 0.7978846, %v1385_v35  ;;  %v1763_v36 = vadd.f32 1.0, %v2819_v28 }
 0x218   :  { %v2553_v4 = vpack.c.bf16 %v1888_v26, %v1887_v6  ;;  %2824 = vtanh.f32 %v1510_v50  ;;  %v2821_v30 = vpop.eup %2820  ;;  %v1384_v15 = vadd.f32 %v1256_v25, %v4128_v11  ;;  %v870_v19 = vmul.f32 0.5, %v4105_v23 }
 0x219   :  { %v2554_v55 = vpack.c.bf16 %v1890_v1, %v1889_v40  ;;  %2826 = vtanh.f32 %v1511_v48  ;;  %v1258_v52 = vmul.f32 %v1130_v53, %v4133_v21  ;;  %v1131_v41 = vmul.f32 %v1003_v45, %v4144_v13 }
 0x21a   :  { %2359 = vst [vmem:[#allocation8 + $0x140] sm:$0xff] %v2553_v4  ;;  %2828 = vtanh.f32 %v1513_v39  ;;  %v871_v6 = vmul.f32 0.5, %v4109_v18  ;;  %v1512_v9 = vmul.f32 0.7978846, %v1384_v15  ;;  %v4163_v54 = vadd.f32 %v3635_v63, %v3102_v57 }
 0x21b   :  { %2360 = vst [vmem:[#allocation8 + $0x148] sm:$0xff] %v2554_v55  ;;  %v4167_v62 = vadd.f32 %v3659_v17, %v3104_v58  ;;  %v1765_v42 = vadd.f32 1.0, %v2821_v30  ;;  %v1386_v23 = vadd.f32 %v1258_v52, %v4133_v21  ;;  %v1259_v33 = vmul.f32 %v1131_v41, %v4144_v13 }
 0x21c   :  { %v4173_v10 = vadd.f32 %v3661_v61, %v3106_v59  ;;  %v1891_v18 = vmul.f32 %v1763_v36, %v867_v60  ;;  %2830 = vtanh.f32 %v1512_v9  ;;  %v1005_v40 = vmul.f32 0.044715, %v4163_v54 }
 0x21d   :  { %v2823_v34 = vpop.eup %2822  ;;  %v4178_v63 = vadd.f32 %v3682_v22, %v3100_v56  ;;  %v1514_v29 = vmul.f32 0.7978846, %v1386_v23  ;;  %v1387_v38 = vadd.f32 %v1259_v33, %v4144_v13  ;;  %v1004_v32 = vmul.f32 0.044715, %v4167_v62 }
 0x21e   :  { %v1764_v17 = vadd.f32 1.0, %v2823_v34  ;;  %v873_v26 = vmul.f32 0.5, %v4113_v7  ;;  %v872_v61 = vmul.f32 0.5, %v4128_v11  ;;  %v1133_v50 = vmul.f32 %v1005_v40, %v4163_v54 }
 0x21f   :  { %v1006_v60 = vmul.f32 0.044715, %v4173_v10  ;;  %2832 = vtanh.f32 %v1514_v29  ;;  %v1515_v25 = vmul.f32 0.7978846, %v1387_v38  ;;  %v1132_v22 = vmul.f32 %v1004_v32, %v4167_v62 }
 0x220   :  { %v1892_v35 = vmul.f32 %v1764_v17, %v868_v5  ;;  %v1261_v28 = vmul.f32 %v1133_v50, %v4163_v54  ;;  %v1007_v48 = vmul.f32 0.044715, %v4178_v63  ;;  %v4192_v7 = vadd.f32 %v3684_v24, %v3102_v57 }
 0x221   :  { %v1134_v1 = vmul.f32 %v1006_v60, %v4173_v10  ;;  %v1893_v53 = vmul.f32 %v1765_v42, %v4136_v20  ;;  %2834 = vtanh.f32 %v1515_v25  ;;  %v1260_v4 = vmul.f32 %v1132_v22, %v4167_v62 }
 0x222   :  { %v2825_v11 = vpop.eup %2824  ;;  %v2555_v45 = vpack.c.bf16 %v1892_v35, %v1891_v18  ;;  %v1389_v30 = vadd.f32 %v1261_v28, %v4163_v54  ;;  %v1135_v36 = vmul.f32 %v1007_v48, %v4178_v63  ;;  %v874_v24 = vmul.f32 0.5, %v4133_v21  ;;  %v4547_v48 = vld [vmem:[#allocation12_spill] sm:$0xff] }
 0x223   :  { %v2827_v5 = vpop.eup %2826  ;;  %v1766_v39 = vadd.f32 1.0, %v2825_v11  ;;  %v1262_v55 = vmul.f32 %v1134_v1, %v4173_v10  ;;  %v1388_v41 = vadd.f32 %v1260_v4, %v4167_v62  ;;  %v1009_v20 = vmul.f32 0.044715, %v4192_v7 }
 0x224   :  { %v2829_v15 = vpop.eup %2828  ;;  %2361 = vst [vmem:[#allocation8 + $0x150] sm:$0xff] %v2555_v45  ;;  %v1767_v52 = vadd.f32 1.0, %v2827_v5  ;;  %v1517_v42 = vmul.f32 0.7978846, %v1389_v30  ;;  %v4205_v33 = vadd.f32 %v3688_v46, %v3104_v58  ;;  %v1263_v40 = vmul.f32 %v1135_v36, %v4178_v63 }
 0x225   :  { %v1894_v9 = vmul.f32 %v1766_v39, %v870_v19  ;;  %v1390_v23 = vadd.f32 %v1262_v55, %v4173_v10  ;;  %v1769_v34 = vadd.f32 1.0, %v2829_v15  ;;  %v1516_v18 = vmul.f32 0.7978846, %v1388_v41 }
 0x226   :  { %v1137_v17 = vmul.f32 %v1009_v20, %v4192_v7  ;;  %v2831_v29 = vpop.eup %2830  ;;  %v1895_v38 = vmul.f32 %v1767_v52, %v871_v6  ;;  %2836 = vtanh.f32 %v1517_v42  ;;  %v1391_v19 = vadd.f32 %v1263_v40, %v4178_v63  ;;  %v4548_v52 = vld [vmem:[#allocation34_spill] sm:$0xff] }
 0x227   :  { %v2556_v21 = vpack.c.bf16 %v1894_v9, %v1893_v53  ;;  %v1518_v32 = vmul.f32 0.7978846, %v1390_v23  ;;  %v1768_v50 = vadd.f32 1.0, %v2831_v29  ;;  %2838 = vtanh.f32 %v1516_v18 }
 0x228   :  { %v1265_v60 = vmul.f32 %v1137_v17, %v4192_v7  ;;  %v875_v46 = vmul.f32 0.5, %v4144_v13  ;;  %v1008_v35 = vmul.f32 0.044715, %v4205_v33  ;;  %v4215_v25 = vadd.f32 %v3706_v44, %v3106_v59 }
 0x229   :  { %2362 = vst [vmem:[#allocation8 + $0x158] sm:$0xff] %v2556_v21  ;;  %2840 = vtanh.f32 %v1518_v32  ;;  %v2833_v22 = vpop.eup %2832  ;;  %v1896_v6 = vmul.f32 %v1768_v50, %v872_v61  ;;  %v1519_v28 = vmul.f32 0.7978846, %v1391_v19  ;;  %v4220_v11 = vadd.f32 %v4547_v48, %v3100_v56 }
 0x22a   :  { %v1393_v1 = vadd.f32 %v1265_v60, %v4192_v7  ;;  %v1897_v53 = vmul.f32 %v1769_v34, %v873_v26  ;;  %v1770_v45 = vadd.f32 1.0, %v2833_v22  ;;  %v1136_v13 = vmul.f32 %v1008_v35, %v4205_v33 }
 0x22b   :  { %v1010_v4 = vmul.f32 0.044715, %v4215_v25  ;;  %v2835_v5 = vpop.eup %2834  ;;  %v2557_v39 = vpack.c.bf16 %v1896_v6, %v1895_v38  ;;  %v877_v44 = vmul.f32 0.5, %v4163_v54  ;;  %2842 = vtanh.f32 %v1519_v28 }
 0x22c   :  { %v1521_v30 = vmul.f32 0.7978846, %v1393_v1  ;;  %v1898_v61 = vmul.f32 %v1770_v45, %v874_v24  ;;  %v1771_v55 = vadd.f32 1.0, %v2835_v5  ;;  %v1264_v36 = vmul.f32 %v1136_v13, %v4205_v33 }
 0x22d   :  { %v1138_v15 = vmul.f32 %v1010_v4, %v4215_v25  ;;  %2363 = vst [vmem:[#allocation8 + $0x160] sm:$0xff] %v2557_v39  ;;  %v1011_v26 = vmul.f32 0.044715, %v4220_v11  ;;  %v749_v41 = vadd.f32 %v4548_v52, %v3102_v57  ;;  %v4232_v20 = vadd.f32 %v3741_v31, %v3104_v58 }
 0x22e   :  { %2844 = vtanh.f32 %v1521_v30  ;;  %v2558_v54 = vpack.c.bf16 %v1898_v61, %v1897_v53  ;;  %v876_v9 = vmul.f32 0.5, %v4167_v62  ;;  %v1392_v24 = vadd.f32 %v1264_v36, %v4205_v33 }
 0x22f   :  { %v1266_v42 = vmul.f32 %v1138_v15, %v4215_v25  ;;  %v878_v23 = vmul.f32 0.5, %v4173_v10  ;;  %v879_v34 = vmul.f32 0.5, %v4178_v63  ;;  %v1139_v18 = vmul.f32 %v1011_v26, %v4220_v11 }
 0x230   :  { %v1013_v40 = vmul.f32 0.044715, %v749_v41  ;;  %v2837_v17 = vpop.eup %2836  ;;  %2364 = vst [vmem:[#allocation8 + $0x168] sm:$0xff] %v2558_v54  ;;  %v1899_v29 = vmul.f32 %v1771_v55, %v875_v46  ;;  %v1520_v21 = vmul.f32 0.7978846, %v1392_v24  ;;  %v4245_v10 = vadd.f32 %v3743_v0, %v3106_v59 }
 0x231   :  { %v1394_v31 = vadd.f32 %v1266_v42, %v4215_v25  ;;  %v1012_v38 = vmul.f32 0.044715, %v4232_v20  ;;  %v2839_v62 = vpop.eup %2838  ;;  %v1773_v32 = vadd.f32 1.0, %v2837_v17  ;;  %v1267_v50 = vmul.f32 %v1139_v18, %v4220_v11 }
 0x232   :  { %v1141_v19 = vmul.f32 %v1013_v40, %v749_v41  ;;  %v1772_v60 = vadd.f32 1.0, %v2839_v62  ;;  %2846 = vtanh.f32 %v1520_v21  ;;  %v4252_v45 = vadd.f32 %v3780_v43, %v3100_v56 }
 0x233   :  { %v2841_v63 = vpop.eup %2840  ;;  %v1522_v35 = vmul.f32 0.7978846, %v1394_v31  ;;  %v1140_v46 = vmul.f32 %v1012_v38, %v4232_v20  ;;  %v1901_v22 = vmul.f32 %v1773_v32, %v877_v44  ;;  %v1395_v28 = vadd.f32 %v1267_v50, %v4220_v11 }
 0x234   :  { %v1774_v6 = vadd.f32 1.0, %v2841_v63  ;;  %v1269_v1 = vmul.f32 %v1141_v19, %v749_v41  ;;  %v1900_v48 = vmul.f32 %v1772_v60, %v876_v9  ;;  %v1014_v39 = vmul.f32 0.044715, %v4245_v10 }
 0x235   :  { %2848 = vtanh.f32 %v1522_v35  ;;  %v1268_v53 = vmul.f32 %v1140_v46, %v4232_v20  ;;  %v2843_v0 = vpop.eup %2842  ;;  %v1523_v4 = vmul.f32 0.7978846, %v1395_v28  ;;  %v881_v44 = vmul.f32 0.5, %v4192_v7 }
 0x236   :  { %v1902_v13 = vmul.f32 %v1774_v6, %v878_v23  ;;  %v1397_v5 = vadd.f32 %v1269_v1, %v749_v41  ;;  %v2559_v30 = vpack.c.bf16 %v1900_v48, %v1899_v29  ;;  %v880_v61 = vmul.f32 0.5, %v4205_v33  ;;  %v4549_v33 = vld [vmem:[#allocation13_spill] sm:$0xff]  ;;  %v4550_v23 = vld [vmem:[#allocation14_spill] sm:$0xff]  ;;  %v4552_v6 = vld [vmem:[#allocation16_spill] sm:$0xff] }
 0x237   :  { %v1396_v55 = vadd.f32 %v1268_v53, %v4232_v20  ;;  %2850 = vtanh.f32 %v1523_v4  ;;  %v1142_v43 = vmul.f32 %v1014_v39, %v4245_v10  ;;  %v1775_v52 = vadd.f32 1.0, %v2843_v0 }
 0x238   :  { %v2845_v36 = vpop.eup %2844  ;;  %v2560_v15 = vpack.c.bf16 %v1902_v13, %v1901_v22  ;;  %v1525_v26 = vmul.f32 0.7978846, %v1397_v5  ;;  %2365 = vst [vmem:[#allocation8 + $0x170] sm:$0xff] %v2559_v30  ;;  %v882_v54 = vmul.f32 0.5, %v4215_v25  ;;  %v1015_v24 = vmul.f32 0.044715, %v4252_v45 }
 0x239   :  { %v1524_v9 = vmul.f32 0.7978846, %v1396_v55  ;;  %v1270_v7 = vmul.f32 %v1142_v43, %v4245_v10  ;;  %v4264_v42 = vadd.f32 %v4549_v33, %v3102_v57  ;;  %v4268_v18 = vadd.f32 %v4550_v23, %v3104_v58  ;;  %v4551_v25 = vld [vmem:[#allocation15_spill] sm:$0xff]  ;;  %v4553_v30 = vld [vmem:[#allocation17_spill] sm:$0xff] }
 0x23a   :  { %2366 = vst [vmem:[#allocation8 + $0x178] sm:$0xff] %v2560_v15  ;;  %2852 = vtanh.f32 %v1525_v26  ;;  %v1777_v40 = vadd.f32 1.0, %v2845_v36  ;;  %v1143_v17 = vmul.f32 %v1015_v24, %v4252_v45  ;;  %v4273_v29 = vadd.f32 %v4551_v25, %v3106_v59 }
 0x23b   :  { %2854 = vtanh.f32 %v1524_v9  ;;  %v883_v21 = vmul.f32 0.5, %v4220_v11  ;;  %v885_v31 = vmul.f32 0.5, %v749_v41  ;;  %v1398_v38 = vadd.f32 %v1270_v7, %v4245_v10 }
 0x23c   :  { %v1017_v62 = vmul.f32 0.044715, %v4264_v42  ;;  %v2847_v32 = vpop.eup %2846  ;;  %v1903_v50 = vmul.f32 %v1775_v52, %v879_v34  ;;  %v1271_v19 = vmul.f32 %v1143_v17, %v4252_v45  ;;  %v1016_v63 = vmul.f32 0.044715, %v4268_v18 }
 0x23d   :  { %v1018_v60 = vmul.f32 0.044715, %v4273_v29  ;;  %v1776_v35 = vadd.f32 1.0, %v2847_v32  ;;  %v1526_v46 = vmul.f32 0.7978846, %v1398_v38  ;;  %v4284_v11 = vadd.f32 %v4552_v6, %v3100_v56 }
 0x23e   :  { %v1145_v22 = vmul.f32 %v1017_v62, %v4264_v42  ;;  %v1905_v28 = vmul.f32 %v1777_v40, %v881_v44  ;;  %v1399_v1 = vadd.f32 %v1271_v19, %v4252_v45  ;;  %v1144_v34 = vmul.f32 %v1016_v63, %v4268_v18 }
 0x23f   :  { %v2849_v41 = vpop.eup %2848  ;;  %v1146_v48 = vmul.f32 %v1018_v60, %v4273_v29  ;;  %v1904_v53 = vmul.f32 %v1776_v35, %v880_v61  ;;  %2856 = vtanh.f32 %v1526_v46  ;;  %v4294_v55 = vadd.f32 %v4553_v30, %v3102_v57 }
 0x240   :  { %v1778_v0 = vadd.f32 1.0, %v2849_v41  ;;  %v1273_v13 = vmul.f32 %v1145_v22, %v4264_v42  ;;  %v1527_v4 = vmul.f32 0.7978846, %v1399_v1  ;;  %v1272_v5 = vmul.f32 %v1144_v34, %v4268_v18 }
 0x241   :  { %v1274_v39 = vmul.f32 %v1146_v48, %v4273_v29  ;;  %v2851_v44 = vpop.eup %2850  ;;  %v2561_v36 = vpack.c.bf16 %v1904_v53, %v1903_v50  ;;  %v1019_v61 = vmul.f32 0.044715, %v4284_v11  ;;  %v884_v33 = vmul.f32 0.5, %v4232_v20 }
 0x242   :  { %v1906_v15 = vmul.f32 %v1778_v0, %v882_v54  ;;  %v1401_v26 = vadd.f32 %v1273_v13, %v4264_v42  ;;  %v1779_v43 = vadd.f32 1.0, %v2851_v44  ;;  %2858 = vtanh.f32 %v1527_v4 }
 0x243   :  { %v1400_v52 = vadd.f32 %v1272_v5, %v4268_v18  ;;  %v1402_v9 = vadd.f32 %v1274_v39, %v4273_v29  ;;  %2367 = vst [vmem:[#allocation8 + $0x180] sm:$0xff] %v2561_v36  ;;  %v1147_v40 = vmul.f32 %v1019_v61, %v4284_v11  ;;  %v1021_v19 = vmul.f32 0.044715, %v4294_v55 }
 0x244   :  { %v2853_v24 = vpop.eup %2852  ;;  %v2562_v7 = vpack.c.bf16 %v1906_v15, %v1905_v28  ;;  %v1529_v23 = vmul.f32 0.7978846, %v1401_v26  ;;  %v1907_v54 = vmul.f32 %v1779_v43, %v883_v21  ;;  %v886_v63 = vmul.f32 0.5, %v4245_v10 }
 0x245   :  { %v2855_v17 = vpop.eup %2854  ;;  %v1781_v25 = vadd.f32 1.0, %v2853_v24  ;;  %v1528_v38 = vmul.f32 0.7978846, %v1400_v52  ;;  %v1530_v62 = vmul.f32 0.7978846, %v1402_v9  ;;  %v1275_v50 = vmul.f32 %v1147_v40, %v4284_v11  ;;  %v4555_v24 = vld [vmem:[#allocation19_spill] sm:$0xff] }
 0x246   :  { %2368 = vst [vmem:[#allocation8 + $0x188] sm:$0xff] %v2562_v7  ;;  %v1780_v32 = vadd.f32 1.0, %v2855_v17  ;;  %2860 = vtanh.f32 %v1529_v23  ;;  %v4307_v20 = vadd.f32 %v3828_v3, %v3104_v58  ;;  %v4311_v21 = vadd.f32 %v3842_v8, %v3106_v59 }
 0x247   :  { %2862 = vtanh.f32 %v1528_v38  ;;  %v1403_v35 = vadd.f32 %v1275_v50, %v4284_v11  ;;  %v1149_v46 = vmul.f32 %v1021_v19, %v4294_v55  ;;  %v1909_v22 = vmul.f32 %v1781_v25, %v885_v31 }
 0x248   :  { %v1908_v60 = vmul.f32 %v1780_v32, %v884_v33  ;;  %2864 = vtanh.f32 %v1530_v62  ;;  %v887_v6 = vmul.f32 0.5, %v4252_v45  ;;  %v1020_v10 = vmul.f32 0.044715, %v4307_v20  ;;  %v4554_v45 = vld [vmem:[#allocation18_spill] sm:$0xff] }
 0x249   :  { %v1022_v41 = vmul.f32 0.044715, %v4311_v21  ;;  %v2857_v28 = vpop.eup %2856  ;;  %v1531_v1 = vmul.f32 0.7978846, %v1403_v35  ;;  %v1277_v34 = vmul.f32 %v1149_v46, %v4294_v55  ;;  %v4321_v8 = vadd.f32 %v3864_v49, %v3100_v56  ;;  %v4556_v46 = vld [vmem:[#allocation20_spill] sm:$0xff] }
 0x24a   :  { %v2563_v3 = vpack.c.bf16 %v1908_v60, %v1907_v54  ;;  %v1782_v48 = vadd.f32 1.0, %v2857_v28  ;;  %v1148_v53 = vmul.f32 %v1020_v10, %v4307_v20  ;;  %v4327_v0 = vadd.f32 %v4554_v45, %v3102_v57  ;;  %v4557_v45 = vld [vmem:[#allocation21_spill] sm:$0xff] }
 0x24b   :  { %v1150_v31 = vmul.f32 %v1022_v41, %v4311_v21  ;;  %v889_v13 = vmul.f32 0.5, %v4264_v42  ;;  %2866 = vtanh.f32 %v1531_v1  ;;  %v1405_v4 = vadd.f32 %v1277_v34, %v4294_v55 }
 0x24c   :  { %2369 = vst [vmem:[#allocation8 + $0x190] sm:$0xff] %v2563_v3  ;;  %v1023_v5 = vmul.f32 0.044715, %v4321_v8  ;;  %v2859_v39 = vpop.eup %2858  ;;  %v1910_v49 = vmul.f32 %v1782_v48, %v886_v63  ;;  %v888_v30 = vmul.f32 0.5, %v4268_v18  ;;  %v1276_v44 = vmul.f32 %v1148_v53, %v4307_v20 }
 0x24d   :  { %v1278_v36 = vmul.f32 %v1150_v31, %v4311_v21  ;;  %v1783_v15 = vadd.f32 1.0, %v2859_v39  ;;  %v1533_v26 = vmul.f32 0.7978846, %v1405_v4  ;;  %v1025_v43 = vmul.f32 0.044715, %v4327_v0 }
 0x24e   :  { %v1151_v61 = vmul.f32 %v1023_v5, %v4321_v8  ;;  %v2564_v42 = vpack.c.bf16 %v1910_v49, %v1909_v22  ;;  %v1404_v52 = vadd.f32 %v1276_v44, %v4307_v20  ;;  %v4341_v7 = vadd.f32 %v4555_v24, %v3104_v58  ;;  %v4558_v44 = vld [vmem:[#allocation22_spill] sm:$0xff] }
 0x24f   :  { %v1406_v9 = vadd.f32 %v1278_v36, %v4311_v21  ;;  %v890_v33 = vmul.f32 0.5, %v4273_v29  ;;  %2868 = vtanh.f32 %v1533_v26  ;;  %v1153_v40 = vmul.f32 %v1025_v43, %v4327_v0 }
 0x250   :  { %v2861_v18 = vpop.eup %2860  ;;  %v1279_v23 = vmul.f32 %v1151_v61, %v4321_v8  ;;  %2370 = vst [vmem:[#allocation8 + $0x198] sm:$0xff] %v2564_v42  ;;  %v1911_v54 = vmul.f32 %v1783_v15, %v887_v6  ;;  %v1532_v38 = vmul.f32 0.7978846, %v1404_v52  ;;  %v1024_v60 = vmul.f32 0.044715, %v4341_v7  ;;  %v4559_v61 = vld [vmem:[#allocation23_spill] sm:$0xff] }
 0x251   :  { %v2863_v17 = vpop.eup %2862  ;;  %v1785_v25 = vadd.f32 1.0, %v2861_v18  ;;  %v1534_v62 = vmul.f32 0.7978846, %v1406_v9  ;;  %v1281_v63 = vmul.f32 %v1153_v40, %v4327_v0  ;;  %v4351_v22 = vadd.f32 %v4556_v46, %v3106_v59  ;;  %v4560_v18 = vld [vmem:[#allocation24_spill] sm:$0xff] }
 0x252   :  { %v2865_v32 = vpop.eup %2864  ;;  %v1784_v50 = vadd.f32 1.0, %v2863_v17  ;;  %v1407_v19 = vadd.f32 %v1279_v23, %v4321_v8  ;;  %2870 = vtanh.f32 %v1532_v38  ;;  %v891_v3 = vmul.f32 0.5, %v4284_v11 }
 0x253   :  { %v1913_v29 = vmul.f32 %v1785_v25, %v889_v13  ;;  %v1786_v35 = vadd.f32 1.0, %v2865_v32  ;;  %2872 = vtanh.f32 %v1534_v62  ;;  %v1409_v41 = vadd.f32 %v1281_v63, %v4327_v0 }
 0x254   :  { %v1912_v10 = vmul.f32 %v1784_v50, %v888_v30  ;;  %v1535_v6 = vmul.f32 0.7978846, %v1407_v19  ;;  %v1152_v1 = vmul.f32 %v1024_v60, %v4341_v7  ;;  %v1026_v34 = vmul.f32 0.044715, %v4351_v22 }
 0x255   :  { %v1914_v28 = vmul.f32 %v1786_v35, %v890_v33  ;;  %v2867_v48 = vpop.eup %2866  ;;  %v1537_v31 = vmul.f32 0.7978846, %v1409_v41  ;;  %v4359_v13 = vadd.f32 %v4557_v45, %v3100_v56  ;;  %v893_v5 = vmul.f32 0.5, %v4294_v55 }
 0x256   :  { %v2565_v53 = vpack.c.bf16 %v1912_v10, %v1911_v54  ;;  %2874 = vtanh.f32 %v1535_v6  ;;  %v1280_v39 = vmul.f32 %v1152_v1, %v4341_v7  ;;  %v1154_v49 = vmul.f32 %v1026_v34, %v4351_v22 }
 0x257   :  { %v2566_v4 = vpack.c.bf16 %v1914_v28, %v1913_v29  ;;  %v1787_v11 = vadd.f32 1.0, %v2867_v48  ;;  %2876 = vtanh.f32 %v1537_v31  ;;  %v1027_v30 = vmul.f32 0.044715, %v4359_v13 }
 0x258   :  { %2371 = vst [vmem:[#allocation8 + $0x1a0] sm:$0xff] %v2565_v53  ;;  %v4367_v36 = vadd.f32 %v4558_v44, %v3102_v57  ;;  %v892_v15 = vmul.f32 0.5, %v4307_v20  ;;  %v1408_v26 = vadd.f32 %v1280_v39, %v4341_v7  ;;  %v1282_v55 = vmul.f32 %v1154_v49, %v4351_v22 }
 0x259   :  { %2372 = vst [vmem:[#allocation8 + $0x1a8] sm:$0xff] %v2566_v4  ;;  %v4374_v43 = vadd.f32 %v4559_v61, %v3104_v58  ;;  %v2869_v42 = vpop.eup %2868  ;;  %v894_v52 = vmul.f32 0.5, %v4311_v21  ;;  %v1155_v9 = vmul.f32 %v1027_v30, %v4359_v13  ;;  %v4381_v33 = vadd.f32 %v4560_v18, %v3106_v59 }
 0x25a   :  { %v1029_v24 = vmul.f32 0.044715, %v4367_v36  ;;  %v1789_v20 = vadd.f32 1.0, %v2869_v42  ;;  %v895_v23 = vmul.f32 0.5, %v4321_v8  ;;  %v1536_v40 = vmul.f32 0.7978846, %v1408_v26 }
 0x25b   :  { %v1410_v17 = vadd.f32 %v1282_v55, %v4351_v22  ;;  %v1915_v54 = vmul.f32 %v1787_v11, %v891_v3  ;;  %v1283_v25 = vmul.f32 %v1155_v9, %v4359_v13  ;;  %v1028_v21 = vmul.f32 0.044715, %v4374_v43 }
 0x25c   :  { %v1157_v38 = vmul.f32 %v1029_v24, %v4367_v36  ;;  %v2871_v62 = vpop.eup %2870  ;;  %v1917_v32 = vmul.f32 %v1789_v20, %v893_v5  ;;  %2878 = vtanh.f32 %v1536_v40  ;;  %v1030_v19 = vmul.f32 0.044715, %v4381_v33 }
 0x25d   :  { %v1538_v50 = vmul.f32 0.7978846, %v1410_v17  ;;  %v2873_v63 = vpop.eup %2872  ;;  %v1788_v60 = vadd.f32 1.0, %v2871_v62  ;;  %v1411_v8 = vadd.f32 %v1283_v25, %v4359_v13  ;;  %v1156_v35 = vmul.f32 %v1028_v21, %v4374_v43 }
 0x25e   :  { %v1285_v29 = vmul.f32 %v1157_v38, %v4367_v36  ;;  %v1790_v46 = vadd.f32 1.0, %v2873_v63  ;;  %v1158_v10 = vmul.f32 %v1030_v19, %v4381_v33  ;;  %v4395_v6 = vadd.f32 %v3941_v2, %v3100_v56 }
 0x25f   :  { %2880 = vtanh.f32 %v1538_v50  ;;  %v1916_v28 = vmul.f32 %v1788_v60, %v892_v15  ;;  %v1539_v3 = vmul.f32 0.7978846, %v1411_v8  ;;  %v1284_v34 = vmul.f32 %v1156_v35, %v4374_v43 }
 0x260   :  { %v2875_v41 = vpop.eup %2874  ;;  %v1413_v1 = vadd.f32 %v1285_v29, %v4367_v36  ;;  %v1918_v48 = vmul.f32 %v1790_v46, %v894_v52  ;;  %v897_v53 = vmul.f32 0.5, %v4327_v0  ;;  %v896_v31 = vmul.f32 0.5, %v4341_v7 }
 0x261   :  { %v1286_v45 = vmul.f32 %v1158_v10, %v4381_v33  ;;  %v2877_v4 = vpop.eup %2876  ;;  %v2567_v5 = vpack.c.bf16 %v1916_v28, %v1915_v54  ;;  %2882 = vtanh.f32 %v1539_v3  ;;  %v1412_v2 = vadd.f32 %v1284_v34, %v4374_v43 }
 0x262   :  { %v1541_v39 = vmul.f32 0.7978846, %v1413_v1  ;;  %v2568_v49 = vpack.c.bf16 %v1918_v48, %v1917_v32  ;;  %v1791_v11 = vadd.f32 1.0, %v2875_v41  ;;  %v898_v30 = vmul.f32 0.5, %v4351_v22 }
 0x263   :  { %v1414_v44 = vadd.f32 %v1286_v45, %v4381_v33  ;;  %2373 = vst [vmem:[#allocation8 + $0x1b0] sm:$0xff] %v2567_v5  ;;  %v1540_v15 = vmul.f32 0.7978846, %v1412_v2  ;;  %v1031_v0 = vmul.f32 0.044715, %v4395_v6  ;;  %v4408_v7 = vadd.f32 %v3950_v27, %v3102_v57 }
 0x264   :  { %2884 = vtanh.f32 %v1541_v39  ;;  %2374 = vst [vmem:[#allocation8 + $0x1b8] sm:$0xff] %v2568_v49  ;;  %v1793_v26 = vadd.f32 1.0, %v2877_v4  ;;  %v4412_v61 = vadd.f32 %v3962_v12, %v3104_v58  ;;  %v4416_v22 = vadd.f32 %v3964_v37, %v3106_v59 }
 0x265   :  { %v1542_v55 = vmul.f32 0.7978846, %v1414_v44  ;;  %v899_v42 = vmul.f32 0.5, %v4359_v13  ;;  %2886 = vtanh.f32 %v1540_v15  ;;  %v1159_v52 = vmul.f32 %v1031_v0, %v4395_v6 }
 0x266   :  { %v1033_v9 = vmul.f32 0.044715, %v4408_v7  ;;  %v2879_v27 = vpop.eup %2878  ;;  %v1919_v24 = vmul.f32 %v1791_v11, %v895_v23  ;;  %v901_v18 = vmul.f32 0.5, %v4367_v36  ;;  %v1032_v20 = vmul.f32 0.044715, %v4412_v61 }
 0x267   :  { %2888 = vtanh.f32 %v1542_v55  ;;  %v1792_v12 = vadd.f32 1.0, %v2879_v27  ;;  %v1287_v40 = vmul.f32 %v1159_v52, %v4395_v6  ;;  %v1034_v17 = vmul.f32 0.044715, %v4416_v22 }
 0x268   :  { %v1161_v37 = vmul.f32 %v1033_v9, %v4408_v7  ;;  %v1921_v54 = vmul.f32 %v1793_v26, %v897_v53  ;;  %v900_v25 = vmul.f32 0.5, %v4374_v43  ;;  %v1160_v38 = vmul.f32 %v1032_v20, %v4412_v61 }
 0x269   :  { %v2881_v13 = vpop.eup %2880  ;;  %v4430_v23 = vadd.f32 %v3984_v47, %v3100_v56  ;;  %v1920_v36 = vmul.f32 %v1792_v12, %v896_v31  ;;  %v1415_v62 = vadd.f32 %v1287_v40, %v4395_v6  ;;  %v1162_v19 = vmul.f32 %v1034_v17, %v4416_v22 }
 0x26a   :  { %v1794_v21 = vadd.f32 1.0, %v2881_v13  ;;  %v1289_v32 = vmul.f32 %v1161_v37, %v4408_v7  ;;  %v1288_v50 = vmul.f32 %v1160_v38, %v4412_v61  ;;  %v4439_v43 = vadd.f32 %v3991_v16, %v3102_v57 }
 0x26b   :  { %v1035_v63 = vmul.f32 0.044715, %v4430_v23  ;;  %v2883_v60 = vpop.eup %2882  ;;  %v2569_v8 = vpack.c.bf16 %v1920_v36, %v1919_v24  ;;  %v1543_v47 = vmul.f32 0.7978846, %v1415_v62  ;;  %v1290_v10 = vmul.f32 %v1162_v19, %v4416_v22 }
 0x26c   :  { %v1922_v56 = vmul.f32 %v1794_v21, %v898_v30  ;;  %v1417_v29 = vadd.f32 %v1289_v32, %v4408_v7  ;;  %v1795_v35 = vadd.f32 1.0, %v2883_v60  ;;  %v1416_v46 = vadd.f32 %v1288_v50, %v4412_v61 }
 0x26d   :  { %v1163_v41 = vmul.f32 %v1035_v63, %v4430_v23  ;;  %2375 = vst [vmem:[#allocation8 + $0x1c0] sm:$0xff] %v2569_v8  ;;  %2890 = vtanh.f32 %v1543_v47  ;;  %v4447_v57 = vadd.f32 %v4006_v14, %v3104_v58  ;;  %v902_v34 = vmul.f32 0.5, %v4381_v33 }
 0x26e   :  { %v2885_v28 = vpop.eup %2884  ;;  %v2570_v3 = vpack.c.bf16 %v1922_v56, %v1921_v54  ;;  %v1545_v1 = vmul.f32 0.7978846, %v1417_v29  ;;  %v1544_v48 = vmul.f32 0.7978846, %v1416_v46  ;;  %v1418_v53 = vadd.f32 %v1290_v10, %v4416_v22 }
 0x26f   :  { %v1797_v16 = vadd.f32 1.0, %v2885_v28  ;;  %v2887_v31 = vpop.eup %2886  ;;  %v1923_v45 = vmul.f32 %v1795_v35, %v899_v42  ;;  %v1291_v4 = vmul.f32 %v1163_v41, %v4430_v23  ;;  %v1037_v5 = vmul.f32 0.044715, %v4439_v43 }
 0x270   :  { %2376 = vst [vmem:[#allocation8 + $0x1c8] sm:$0xff] %v2570_v3  ;;  %2892 = vtanh.f32 %v1545_v1  ;;  %v1796_v49 = vadd.f32 1.0, %v2887_v31  ;;  %v1546_v58 = vmul.f32 0.7978846, %v1418_v53  ;;  %v1036_v30 = vmul.f32 0.044715, %v4447_v57 }
 0x271   :  { %v2889_v39 = vpop.eup %2888  ;;  %v1925_v2 = vmul.f32 %v1797_v16, %v901_v18  ;;  %2894 = vtanh.f32 %v1544_v48  ;;  %v1419_v11 = vadd.f32 %v1291_v4, %v4430_v23  ;;  %v1165_v33 = vmul.f32 %v1037_v5, %v4439_v43 }
 0x272   :  { %v1798_v14 = vadd.f32 1.0, %v2889_v39  ;;  %v1924_v44 = vmul.f32 %v1796_v49, %v900_v25  ;;  %2896 = vtanh.f32 %v1546_v58  ;;  %v781_v15 = vadd.f32 %v4009_v51, %v3106_v59 }
 0x273   :  { %v1547_v26 = vmul.f32 0.7978846, %v1419_v11  ;;  %v1293_v55 = vmul.f32 %v1165_v33, %v4439_v43  ;;  %v1164_v42 = vmul.f32 %v1036_v30, %v4447_v57  ;;  %v903_v13 = vmul.f32 0.5, %v4395_v6 }
 0x274   :  { %v1926_v0 = vmul.f32 %v1798_v14, %v902_v34  ;;  %v2571_v52 = vpack.c.bf16 %v1924_v44, %v1923_v45  ;;  %v1038_v9 = vmul.f32 0.044715, %v781_v15  ;;  %v905_v38 = vmul.f32 0.5, %v4408_v7 }
 0x275   :  { %2898 = vtanh.f32 %v1547_v26  ;;  %v1421_v24 = vadd.f32 %v1293_v55, %v4439_v43  ;;  %v1292_v18 = vmul.f32 %v1164_v42, %v4447_v57  ;;  %v904_v32 = vmul.f32 0.5, %v4412_v61 }
 0x276   :  { %v2572_v27 = vpack.c.bf16 %v1926_v0, %v1925_v2  ;;  %2377 = vst [vmem:[#allocation8 + $0x1d0] sm:$0xff] %v2571_v52  ;;  %v1166_v20 = vmul.f32 %v1038_v9, %v781_v15  ;;  %v906_v56 = vmul.f32 0.5, %v4416_v22  ;;  %v907_v61 = vmul.f32 0.5, %v4430_v23 }
 0x277   :  { %v2891_v12 = vpop.eup %2890  ;;  %v1549_v40 = vmul.f32 0.7978846, %v1421_v24  ;;  %v1420_v59 = vadd.f32 %v1292_v18, %v4447_v57  ;;  %v908_v1 = vmul.f32 0.5, %v4447_v57  ;;  %v909_v22 = vmul.f32 0.5, %v4439_v43 }
 0x278   :  { %2378 = vst [vmem:[#allocation8 + $0x1d8] sm:$0xff] %v2572_v27  ;;  %v1799_v51 = vadd.f32 1.0, %v2891_v12  ;;  %v1294_v37 = vmul.f32 %v1166_v20, %v781_v15  ;;  %v910_v31 = vmul.f32 0.5, %v781_v15 }
 0x279   :  { %2900 = vtanh.f32 %v1549_v40  ;;  %v1548_v54 = vmul.f32 0.7978846, %v1420_v59 }
 0x27a   :  { %v2893_v17 = vpop.eup %2892  ;;  %v1422_v21 = vadd.f32 %v1294_v37, %v781_v15  ;;  %v1927_v62 = vmul.f32 %v1799_v51, %v903_v13 }
 0x27b   :  { %v2895_v25 = vpop.eup %2894  ;;  %v1801_v36 = vadd.f32 1.0, %v2893_v17  ;;  %2902 = vtanh.f32 %v1548_v54 }
 0x27c   :  { %v1800_v50 = vadd.f32 1.0, %v2895_v25  ;;  %v2897_v19 = vpop.eup %2896  ;;  %v1550_v63 = vmul.f32 0.7978846, %v1422_v21 }
 0x27d   :  { %v1929_v60 = vmul.f32 %v1801_v36, %v905_v38  ;;  %v1802_v47 = vadd.f32 1.0, %v2897_v19 }
 0x27e   :  { %v1928_v8 = vmul.f32 %v1800_v50, %v904_v32  ;;  %2904 = vtanh.f32 %v1550_v63 }
 0x27f   :  { %v2899_v6 = vpop.eup %2898  ;;  %v1930_v35 = vmul.f32 %v1802_v47, %v906_v56 }
 0x280   :  { %v2573_v29 = vpack.c.bf16 %v1928_v8, %v1927_v62  ;;  %v1803_v46 = vadd.f32 1.0, %v2899_v6 }
 0x281   :  { %v2574_v7 = vpack.c.bf16 %v1930_v35, %v1929_v60 }
 0x282   :  { %2379 = vst [vmem:[#allocation8 + $0x1e0] sm:$0xff] %v2573_v29  ;;  %v1931_v3 = vmul.f32 %v1803_v46, %v907_v61 }
 0x283   :  { %v2901_v10 = vpop.eup %2900  ;;  %2380 = vst [vmem:[#allocation8 + $0x1e8] sm:$0xff] %v2574_v7 }
 0x284   :  { %v1805_v28 = vadd.f32 1.0, %v2901_v10 }
 0x285   :  { %v2903_v41 = vpop.eup %2902 }
 0x286   :  { %v1804_v16 = vadd.f32 1.0, %v2903_v41  ;;  %v1933_v53 = vmul.f32 %v1805_v28, %v909_v22 }
 0x288   :  { %v2905_v34 = vpop.eup %2904  ;;  %v1932_v48 = vmul.f32 %v1804_v16, %v908_v1 }
 0x289   :  { %v1806_v45 = vadd.f32 1.0, %v2905_v34 }
 0x28a   :  { %v2575_v4 = vpack.c.bf16 %v1932_v48, %v1931_v3 }
 0x28b   :  { %v1934_v5 = vmul.f32 %v1806_v45, %v910_v31 }
 0x28c   :  { %2381 = vst [vmem:[#allocation8 + $0x1f0] sm:$0xff] %v2575_v4 }
 0x28d   :  { %v2576_v39 = vpack.c.bf16 %v1934_v5, %v1933_v53 }
 0x28f   :  { %2382 = vst [vmem:[#allocation8 + $0x1f8] sm:$0xff] %v2576_v39 }
 0x290   :  { %2983 = shalt.err (!%p2980_p0)
}
 0x291   :  { %s2984_s29 = scalar_lea.hbm %s4488_s3, 8192 }
 0x292   :  { %p2985_p1 = scmp.ne.s32.totalorder %s4488_s3, %s2984_s29  ;;  %p2988_p2 = scmp.lt.u32.totalorder %s2984_s29, %s4488_s3 }
 0x294   :  { %p2990_p3 = pnand %p2988_p2, %p2985_p1 }
 0x296   :  { %2993 = shalt.err (!%p2990_p3)
}
 0x297   :  { %2394 = dma.vmem_to_hbm [thread:$0]  %s2389_s25, 8192, %s4488_s3, [#allocation4], %s3001_s22, %s3001_s22, %s3002_s23  }
 0x298   :  { %2998 = dma.done.wait [#allocation4], 8192  }
 0x299   :  { %2999 = vsyncadd [#allocation4], 4294959104 }
 0x29a   :  { %2398 = vsyncpa [#allocation3], 1 }
 0x29b   :  { %2399 = vsyncpa [#allocation6], 1 }
 0x29c   :  { %2400 = vsyncpa [#allocation4], 1 }

</bundles_post_ra>
